<compile_context>
chip_gen: v5e
topology: v5e:2x2
jax: 0.10.0
libtpu: 0.0.40
codegen_flags: <defaults>
</compile_context>

<pallas_src>
import functools

import jax
import jax.numpy as jnp
from jax.experimental import pallas as pl
from jax.experimental.pallas import tpu as pltpu

INITRANGE = 0.04

# Static genotype (name, predecessor-state-index) pairs + concat indices,
# mirroring a small DARTS RNN genotype (the PyTorch module takes it as an arg).
GENOTYPE_RNN = (("tanh", 0), ("relu", 1), ("sigmoid", 1), ("identity", 2))
GENOTYPE_CONCAT = (1, 2, 3, 4)


def _activation(name):
    if name == "tanh":
        return jnp.tanh
    if name == "relu":
        return lambda v: jnp.maximum(v, 0.0)
    if name == "sigmoid":
        return jax.nn.sigmoid
    if name == "identity":
        return lambda v: v
    raise NotImplementedError(name)


def _fusion_groups(genotype_rnn):
    """Group consecutive genotype steps that share the same predecessor state.

    Each group becomes a single (B, nhid) @ (nhid, 2*nhid*len(group)) matmul.
    Returns tuples (pred_state_idx, first_step_idx, ((step_idx, act_name), ...)).
    """
    groups = []
    for i, (name, pred) in enumerate(genotype_rnn):
        if groups and groups[-1][0] == pred:
            groups[-1][2].append((i, name))
        else:
            groups.append((pred, i, [(i, name)]))
    return tuple((p, s, tuple(m)) for (p, s, m) in groups)


def darts_cell_kernel(x_ref, h0_ref, w0x_ref, w0h_ref, ws_ref, out_ref, h_scratch,
                      *, nhid, batch, tt, groups):
    g = pl.program_id(0)

    # Initialize the carried hidden state from the provided initial hidden.
    @pl.when(g == 0)
    def _():
        h_scratch[...] = h0_ref[...].astype(jnp.float32)

    # Hoisted input projection for the whole block: one tall MXU dot
    # (tt*B rows instead of B), off the serial recurrence chain.
    xw = jnp.dot(x_ref[...], w0x_ref[...],
                 preferred_element_type=jnp.float32)          # (tt*B, 2*nhid) f32

    # Carry the hidden state in registers across the unrolled block.
    h = h_scratch[...]                                         # (B, nhid) f32

    for step in range(tt):
        r0 = step * batch

        # _compute_init_state: x@W0x (precomputed) + h_prev@W0h.
        ch0 = xw[r0:r0 + batch, :] + jnp.dot(
            h.astype(jnp.bfloat16), w0h_ref[...],
            preferred_element_type=jnp.float32)                # (B, 2*nhid)
        c0 = jax.nn.sigmoid(ch0[:, :nhid])
        hc0 = jnp.tanh(ch0[:, nhid:])
        s0 = h + c0 * (hc0 - h)

        # Genotype steps, fused by shared predecessor (statically unrolled).
        # Weight slices are read from VMEM at each use (not hoisted into vregs).
        states = [s0]
        for (pred, first, members) in groups:
            s_prev = states[pred]
            wg = ws_ref[:, 2 * nhid * first: 2 * nhid * (first + len(members))]
            ch = jnp.dot(s_prev.astype(jnp.bfloat16), wg,
                         preferred_element_type=jnp.float32)
            for k, (_, name) in enumerate(members):
                c = jax.nn.sigmoid(ch[:, 2 * nhid * k: 2 * nhid * k + nhid])
                hh = _activation(name)(ch[:, 2 * nhid * k + nhid: 2 * nhid * (k + 1)])
                states.append(s_prev + c * (hh - s_prev))

        # Mean over the concat states; becomes the next hidden state.
        out = states[GENOTYPE_CONCAT[0]]
        for idx in GENOTYPE_CONCAT[1:]:
            out = out + states[idx]
        h = out * (1.0 / len(GENOTYPE_CONCAT))

        out_ref[pl.ds(r0, batch), :] = h.astype(out_ref.dtype)

    # Single writeback of the carried state per block.
    h_scratch[...] = h


def darts_cell_forward(inputs, hidden, w0, ws, *, tt=None):
    """inputs: (T,B,ninp) f32; hidden: (1,B,nhid); w0: (ninp+nhid,2*nhid); ws: (steps,nhid,2*nhid)."""
    T, B, ninp = inputs.shape
    nhid = hidden.shape[-1]
    steps = ws.shape[0]
    out_dtype = inputs.dtype

    if tt is None:
        # Whole sequence in one grid step when small; otherwise keep the
        # double-buffered bf16-in / f32-out slabs around ~2 MiB per copy.
        per_step = B * (ninp * 2 + nhid * 4)
        tt = max(1, min(T, (2 << 20) // max(per_step, 1)))
    tt = max(1, min(tt, T))
    n_blocks = pl.cdiv(T, tt)
    T_pad = n_blocks * tt
    if T_pad != T:
        inputs = jnp.pad(inputs, ((0, T_pad - T), (0, 0), (0, 0)))

    # Fold time into the row axis: 2D operands everywhere, no in-kernel reshape.
    x2d = inputs.reshape(T_pad * B, ninp).astype(jnp.bfloat16)        # (T_pad*B, ninp)

    # bf16 matmul operands (MXU-native); state math stays f32.
    w0x = w0[:ninp].astype(jnp.bfloat16)                              # (ninp, 2*nhid)
    w0h = w0[ninp:].astype(jnp.bfloat16)                              # (nhid, 2*nhid)
    ws_bf = jnp.transpose(ws, (1, 0, 2)).reshape(
        nhid, steps * 2 * nhid).astype(jnp.bfloat16)                  # (nhid, steps*2*nhid)
    h_init = hidden[0].astype(jnp.float32)                            # (B, nhid)

    groups = _fusion_groups(GENOTYPE_RNN)
    kernel = functools.partial(darts_cell_kernel, nhid=nhid, batch=B, tt=tt,
                               groups=groups)

    def const_spec(shape):
        # Constant across the grid -> single buffer (no double-buffering DMA/VMEM).
        return pl.BlockSpec(shape, lambda g: (0, 0), pipeline_mode=pl.Buffered(1))

    out2d = pl.pallas_call(
        kernel,
        out_shape=jax.ShapeDtypeStruct((T_pad * B, nhid), jnp.float32),
        grid_spec=pltpu.PrefetchScalarGridSpec(
            num_scalar_prefetch=0,
            grid=(n_blocks,),
            in_specs=[
                pl.BlockSpec((tt * B, ninp), lambda g: (g, 0)),        # x slab (bf16)
                const_spec((B, nhid)),                                 # h_init (f32)
                const_spec((ninp, 2 * nhid)),                          # W0x (bf16)
                const_spec((nhid, 2 * nhid)),                          # W0h (bf16)
                const_spec((nhid, steps * 2 * nhid)),                  # fused Ws (bf16)
            ],
            out_specs=pl.BlockSpec((tt * B, nhid), lambda g: (g, 0)),
            scratch_shapes=[pltpu.VMEM((B, nhid), jnp.float32)],
        ),
        compiler_params=pltpu.CompilerParams(
            dimension_semantics=("arbitrary",)),   # sequential recurrence over time
    )(x2d, h_init, w0x, w0h, ws_bf)

    hiddens = out2d.reshape(T_pad, B, nhid)[:T].astype(out_dtype)
    return hiddens, hiddens[-1][None]


def darts_cell_reference(inputs, hidden, w0, ws, *, matmul_dtype=jnp.float32):
    """Pure-JAX reference of the eval-mode PyTorch forward.

    matmul_dtype=jnp.bfloat16 mimics the kernel's bf16 matmul operands.
    """
    T, B, ninp = inputs.shape
    nhid = hidden.shape[-1]

    def mm(a, b):
        return jnp.dot(a.astype(matmul_dtype), b.astype(matmul_dtype),
                       preferred_element_type=jnp.float32)

    h = hidden[0]
    outs = []
    for t in range(T):
        x = inputs[t]
        ch0 = mm(jnp.concatenate([x, h], axis=-1), w0)
        c0 = jax.nn.sigmoid(ch0[:, :nhid])
        h0 = jnp.tanh(ch0[:, nhid:])
        s0 = h + c0 * (h0 - h)
        states = [s0]
        for i, (name, pred) in enumerate(GENOTYPE_RNN):
            s_prev = states[pred]
            ch = mm(s_prev, ws[i])
            c = jax.nn.sigmoid(ch[:, :nhid])
            hh = _activation(name)(ch[:, nhid:])
            states.append(s_prev + c * (hh - s_prev))
        h = jnp.mean(jnp.stack([states[i] for i in GENOTYPE_CONCAT], -1), -1)
        outs.append(h)
    hiddens = jnp.stack(outs)
    return hiddens, hiddens[-1][None]


if __name__ == "__main__":
    T, B, ninp, nhid = 16, 8, 32, 32
    steps = len(GENOTYPE_RNN)

    key = jax.random.PRNGKey(0)
    k_x, k_h, k_w0, k_ws = jax.random.split(key, 4)

    inputs = jax.random.normal(k_x, (T, B, ninp), dtype=jnp.float32)
    hidden = jax.random.normal(k_h, (1, B, nhid), dtype=jnp.float32)
    w0 = jax.random.uniform(k_w0, (ninp + nhid, 2 * nhid),
                            minval=-INITRANGE, maxval=INITRANGE, dtype=jnp.float32)
    ws = jax.random.uniform(k_ws, (steps, nhid, 2 * nhid),
                            minval=-INITRANGE, maxval=INITRANGE, dtype=jnp.float32)

    hiddens, last = darts_cell_forward(inputs, hidden, w0, ws)
    jax.block_until_ready((hiddens, last))

    assert hiddens.shape == (T, B, nhid) and last.shape == (1, B, nhid)

    # Tight check vs. a reference that uses the same bf16 matmul operands.
    ref_bf, ref_bf_last = darts_cell_reference(inputs, hidden, w0, ws,
                                               matmul_dtype=jnp.bfloat16)
    assert jnp.allclose(hiddens, ref_bf, rtol=2e-3, atol=2e-3)
    assert jnp.allclose(last, ref_bf_last, rtol=2e-3, atol=2e-3)

    # Looser check vs. the pure-f32 eval-mode forward (bf16 matmul rounding).
    ref_f32, ref_f32_last = darts_cell_reference(inputs, hidden, w0, ws)
    assert jnp.allclose(hiddens, ref_f32, rtol=3e-2, atol=3e-2)
    assert jnp.allclose(last, ref_f32_last, rtol=3e-2, atol=3e-2)

    print("KERNEL_OK")
</pallas_src>

<mosaic_0001>
module attributes {stable_mosaic.version = 11 : i64} {
  func.func @darts_cell_kernel(%arg0: i32, %arg1: memref<128x32xbf16, #tpu.memory_space<vmem>>, %arg2: memref<8x32xf32, #tpu.memory_space<vmem>>, %arg3: memref<32x64xbf16, #tpu.memory_space<vmem>>, %arg4: memref<32x64xbf16, #tpu.memory_space<vmem>>, %arg5: memref<32x256xbf16, #tpu.memory_space<vmem>>, %arg6: memref<128x32xf32, #tpu.memory_space<vmem>>, %arg7: memref<8x32xf32, #tpu.memory_space<vmem>>) attributes {dimension_semantics = [#tpu.dimension_semantics<arbitrary>], iteration_bounds = array<i64: 1>, scalar_prefetch = 0 : i64, scratch_operands = 1 : i64, tpu.core_type = #tpu.core_type<tc>, window_params = [{transform_indices = @transform_0, window_bounds = array<i64: 128, 32>}, {pipeline_mode = #tpu.pipeline_mode<synchronous>, transform_indices = @transform_1, window_bounds = array<i64: 8, 32>}, {pipeline_mode = #tpu.pipeline_mode<synchronous>, transform_indices = @transform_2, window_bounds = array<i64: 32, 64>}, {pipeline_mode = #tpu.pipeline_mode<synchronous>, transform_indices = @transform_3, window_bounds = array<i64: 32, 64>}, {pipeline_mode = #tpu.pipeline_mode<synchronous>, transform_indices = @transform_4, window_bounds = array<i64: 32, 256>}, {transform_indices = @transform_5, window_bounds = array<i64: 128, 32>}]} {
    %c0_i32 = arith.constant 0 : i32
    %0 = arith.cmpi eq, %arg0, %c0_i32 : i32
    %1 = arith.extui %0 : i1 to i32
    %c0_i32_0 = arith.constant 0 : i32
    %2 = arith.cmpi ne, %1, %c0_i32_0 : i32
    scf.if %2 {
      %c0_344 = arith.constant 0 : index
      %c0_345 = arith.constant 0 : index
      %1272 = vector.load %arg2[%c0_344, %c0_345] : memref<8x32xf32, #tpu.memory_space<vmem>>, vector<8x32xf32>
      %c0_346 = arith.constant 0 : index
      %c0_347 = arith.constant 0 : index
      %1273 = vector.load %arg7[%c0_346, %c0_347] : memref<8x32xf32, #tpu.memory_space<vmem>>, vector<8x32xf32>
      tpu.vector_store %arg7[%c0_346, %c0_347], %1272 {strides = array<i32>} : memref<8x32xf32, #tpu.memory_space<vmem>>, vector<8x32xf32>,
    } else {
    }
    %c0 = arith.constant 0 : index
    %c0_1 = arith.constant 0 : index
    %3 = vector.load %arg1[%c0, %c0_1] : memref<128x32xbf16, #tpu.memory_space<vmem>>, vector<128x32xbf16>
    %c0_2 = arith.constant 0 : index
    %c0_3 = arith.constant 0 : index
    %4 = vector.load %arg3[%c0_2, %c0_3] : memref<32x64xbf16, #tpu.memory_space<vmem>>, vector<32x64xbf16>
    %cst = arith.constant dense<0.000000e+00> : vector<128x64xf32>
    %5 = tpu.matmul %3, %4, %cst {dimension_numbers = #tpu.dot_dimension_numbers<[1], [0], [0], [1], [0, 0, 1, 1], [], []>} : vector<128x32xbf16>, vector<32x64xbf16>, vector<128x64xf32> -> vector<128x64xf32>
    %c0_4 = arith.constant 0 : index
    %c0_5 = arith.constant 0 : index
    %6 = vector.load %arg7[%c0_4, %c0_5] : memref<8x32xf32, #tpu.memory_space<vmem>>, vector<8x32xf32>
    %7 = vector.extract_strided_slice %5 {offsets = [0, 0], sizes = [8, 64], strides = [1, 1]} : vector<128x64xf32> to vector<8x64xf32>
    %8 = arith.truncf %6 : vector<8x32xf32> to vector<8x32xbf16>
    %c0_6 = arith.constant 0 : index
    %c0_7 = arith.constant 0 : index
    %9 = vector.load %arg4[%c0_6, %c0_7] : memref<32x64xbf16, #tpu.memory_space<vmem>>, vector<32x64xbf16>
    %cst_8 = arith.constant dense<0.000000e+00> : vector<8x64xf32>
    %10 = tpu.matmul %8, %9, %cst_8 {dimension_numbers = #tpu.dot_dimension_numbers<[1], [0], [0], [1], [0, 0, 1, 1], [], []>} : vector<8x32xbf16>, vector<32x64xbf16>, vector<8x64xf32> -> vector<8x64xf32>
    %11 = arith.addf %7, %10 : vector<8x64xf32>
    %12 = vector.extract_strided_slice %11 {offsets = [0, 0], sizes = [8, 32], strides = [1, 1]} : vector<8x64xf32> to vector<8x32xf32>
    %13 = arith.negf %12 : vector<8x32xf32>
    %14 = math.exp %13 : vector<8x32xf32>
    %cst_9 = arith.constant 1.000000e+00 : f32
    %15 = vector.broadcast %cst_9 : f32 to vector<8x32xf32>
    %16 = arith.addf %15, %14 : vector<8x32xf32>
    %17 = arith.divf %15, %16 : vector<8x32xf32>
    %18 = vector.extract_strided_slice %11 {offsets = [0, 32], sizes = [8, 32], strides = [1, 1]} : vector<8x64xf32> to vector<8x32xf32>
    %19 = math.tanh %18 : vector<8x32xf32>
    %20 = arith.subf %19, %6 : vector<8x32xf32>
    %21 = arith.mulf %17, %20 : vector<8x32xf32>
    %22 = arith.addf %6, %21 : vector<8x32xf32>
    %c0_10 = arith.constant 0 : index
    %c0_11 = arith.constant 0 : index
    %23 = vector.load %arg5[%c0_10, %c0_11] : memref<32x256xbf16, #tpu.memory_space<vmem>>, vector<32x64xbf16>
    %24 = arith.truncf %22 : vector<8x32xf32> to vector<8x32xbf16>
    %cst_12 = arith.constant dense<0.000000e+00> : vector<8x64xf32>
    %25 = tpu.matmul %24, %23, %cst_12 {dimension_numbers = #tpu.dot_dimension_numbers<[1], [0], [0], [1], [0, 0, 1, 1], [], []>} : vector<8x32xbf16>, vector<32x64xbf16>, vector<8x64xf32> -> vector<8x64xf32>
    %26 = vector.extract_strided_slice %25 {offsets = [0, 0], sizes = [8, 32], strides = [1, 1]} : vector<8x64xf32> to vector<8x32xf32>
    %27 = arith.negf %26 : vector<8x32xf32>
    %28 = math.exp %27 : vector<8x32xf32>
    %cst_13 = arith.constant 1.000000e+00 : f32
    %29 = vector.broadcast %cst_13 : f32 to vector<8x32xf32>
    %30 = arith.addf %29, %28 : vector<8x32xf32>
    %31 = arith.divf %29, %30 : vector<8x32xf32>
    %32 = vector.extract_strided_slice %25 {offsets = [0, 32], sizes = [8, 32], strides = [1, 1]} : vector<8x64xf32> to vector<8x32xf32>
    %33 = math.tanh %32 : vector<8x32xf32>
    %34 = arith.subf %33, %22 : vector<8x32xf32>
    %35 = arith.mulf %31, %34 : vector<8x32xf32>
    %36 = arith.addf %22, %35 : vector<8x32xf32>
    %c0_14 = arith.constant 0 : index
    %c64 = arith.constant 64 : index
    %37 = vector.load %arg5[%c0_14, %c64] : memref<32x256xbf16, #tpu.memory_space<vmem>>, vector<32x128xbf16>
    %38 = arith.truncf %36 : vector<8x32xf32> to vector<8x32xbf16>
    %cst_15 = arith.constant dense<0.000000e+00> : vector<8x128xf32>
    %39 = tpu.matmul %38, %37, %cst_15 {dimension_numbers = #tpu.dot_dimension_numbers<[1], [0], [0], [1], [0, 0, 1, 1], [], []>} : vector<8x32xbf16>, vector<32x128xbf16>, vector<8x128xf32> -> vector<8x128xf32>
    %40 = vector.extract_strided_slice %39 {offsets = [0, 0], sizes = [8, 32], strides = [1, 1]} : vector<8x128xf32> to vector<8x32xf32>
    %41 = arith.negf %40 : vector<8x32xf32>
    %42 = math.exp %41 : vector<8x32xf32>
    %cst_16 = arith.constant 1.000000e+00 : f32
    %43 = vector.broadcast %cst_16 : f32 to vector<8x32xf32>
    %44 = arith.addf %43, %42 : vector<8x32xf32>
    %45 = arith.divf %43, %44 : vector<8x32xf32>
    %46 = vector.extract_strided_slice %39 {offsets = [0, 32], sizes = [8, 32], strides = [1, 1]} : vector<8x128xf32> to vector<8x32xf32>
    %cst_17 = arith.constant 0.000000e+00 : f32
    %47 = vector.broadcast %cst_17 : f32 to vector<8x32xf32>
    %48 = arith.maximumf %46, %47 : vector<8x32xf32>
    %49 = arith.subf %48, %36 : vector<8x32xf32>
    %50 = arith.mulf %45, %49 : vector<8x32xf32>
    %51 = arith.addf %36, %50 : vector<8x32xf32>
    %52 = vector.extract_strided_slice %39 {offsets = [0, 64], sizes = [8, 32], strides = [1, 1]} : vector<8x128xf32> to vector<8x32xf32>
    %53 = arith.negf %52 : vector<8x32xf32>
    %54 = math.exp %53 : vector<8x32xf32>
    %cst_18 = arith.constant 1.000000e+00 : f32
    %55 = vector.broadcast %cst_18 : f32 to vector<8x32xf32>
    %56 = arith.addf %55, %54 : vector<8x32xf32>
    %57 = arith.divf %55, %56 : vector<8x32xf32>
    %58 = vector.extract_strided_slice %39 {offsets = [0, 96], sizes = [8, 32], strides = [1, 1]} : vector<8x128xf32> to vector<8x32xf32>
    %59 = arith.negf %58 : vector<8x32xf32>
    %60 = math.exp %59 : vector<8x32xf32>
    %cst_19 = arith.constant 1.000000e+00 : f32
    %61 = vector.broadcast %cst_19 : f32 to vector<8x32xf32>
    %62 = arith.addf %61, %60 : vector<8x32xf32>
    %63 = arith.divf %61, %62 : vector<8x32xf32>
    %64 = arith.subf %63, %36 : vector<8x32xf32>
    %65 = arith.mulf %57, %64 : vector<8x32xf32>
    %66 = arith.addf %36, %65 : vector<8x32xf32>
    %c0_20 = arith.constant 0 : index
    %c192 = arith.constant 192 : index
    %67 = vector.load %arg5[%c0_20, %c192] : memref<32x256xbf16, #tpu.memory_space<vmem>>, vector<32x64xbf16>
    %68 = arith.truncf %51 : vector<8x32xf32> to vector<8x32xbf16>
    %cst_21 = arith.constant dense<0.000000e+00> : vector<8x64xf32>
    %69 = tpu.matmul %68, %67, %cst_21 {dimension_numbers = #tpu.dot_dimension_numbers<[1], [0], [0], [1], [0, 0, 1, 1], [], []>} : vector<8x32xbf16>, vector<32x64xbf16>, vector<8x64xf32> -> vector<8x64xf32>
    %70 = vector.extract_strided_slice %69 {offsets = [0, 0], sizes = [8, 32], strides = [1, 1]} : vector<8x64xf32> to vector<8x32xf32>
    %71 = arith.negf %70 : vector<8x32xf32>
    %72 = math.exp %71 : vector<8x32xf32>
    %cst_22 = arith.constant 1.000000e+00 : f32
    %73 = vector.broadcast %cst_22 : f32 to vector<8x32xf32>
    %74 = arith.addf %73, %72 : vector<8x32xf32>
    %75 = arith.divf %73, %74 : vector<8x32xf32>
    %76 = vector.extract_strided_slice %69 {offsets = [0, 32], sizes = [8, 32], strides = [1, 1]} : vector<8x64xf32> to vector<8x32xf32>
    %77 = arith.subf %76, %51 : vector<8x32xf32>
    %78 = arith.mulf %75, %77 : vector<8x32xf32>
    %79 = arith.addf %51, %78 : vector<8x32xf32>
    %80 = arith.addf %36, %51 : vector<8x32xf32>
    %81 = arith.addf %80, %66 : vector<8x32xf32>
    %82 = arith.addf %81, %79 : vector<8x32xf32>
    %cst_23 = arith.constant 2.500000e-01 : f32
    %83 = vector.broadcast %cst_23 : f32 to vector<8x32xf32>
    %84 = arith.mulf %82, %83 : vector<8x32xf32>
    %c0_24 = arith.constant 0 : index
    %c0_25 = arith.constant 0 : index
    %85 = vector.load %arg6[%c0_24, %c0_25] : memref<128x32xf32, #tpu.memory_space<vmem>>, vector<8x32xf32>
    tpu.vector_store %arg6[%c0_24, %c0_25], %84 {strides = array<i32>} : memref<128x32xf32, #tpu.memory_space<vmem>>, vector<8x32xf32>,
    %86 = vector.extract_strided_slice %5 {offsets = [8, 0], sizes = [8, 64], strides = [1, 1]} : vector<128x64xf32> to vector<8x64xf32>
    %87 = arith.truncf %84 : vector<8x32xf32> to vector<8x32xbf16>
    %c0_26 = arith.constant 0 : index
    %c0_27 = arith.constant 0 : index
    %88 = vector.load %arg4[%c0_26, %c0_27] : memref<32x64xbf16, #tpu.memory_space<vmem>>, vector<32x64xbf16>
    %cst_28 = arith.constant dense<0.000000e+00> : vector<8x64xf32>
    %89 = tpu.matmul %87, %88, %cst_28 {dimension_numbers = #tpu.dot_dimension_numbers<[1], [0], [0], [1], [0, 0, 1, 1], [], []>} : vector<8x32xbf16>, vector<32x64xbf16>, vector<8x64xf32> -> vector<8x64xf32>
    %90 = arith.addf %86, %89 : vector<8x64xf32>
    %91 = vector.extract_strided_slice %90 {offsets = [0, 0], sizes = [8, 32], strides = [1, 1]} : vector<8x64xf32> to vector<8x32xf32>
    %92 = arith.negf %91 : vector<8x32xf32>
    %93 = math.exp %92 : vector<8x32xf32>
    %cst_29 = arith.constant 1.000000e+00 : f32
    %94 = vector.broadcast %cst_29 : f32 to vector<8x32xf32>
    %95 = arith.addf %94, %93 : vector<8x32xf32>
    %96 = arith.divf %94, %95 : vector<8x32xf32>
    %97 = vector.extract_strided_slice %90 {offsets = [0, 32], sizes = [8, 32], strides = [1, 1]} : vector<8x64xf32> to vector<8x32xf32>
    %98 = math.tanh %97 : vector<8x32xf32>
    %99 = arith.subf %98, %84 : vector<8x32xf32>
    %100 = arith.mulf %96, %99 : vector<8x32xf32>
    %101 = arith.addf %84, %100 : vector<8x32xf32>
    %c0_30 = arith.constant 0 : index
    %c0_31 = arith.constant 0 : index
    %102 = vector.load %arg5[%c0_30, %c0_31] : memref<32x256xbf16, #tpu.memory_space<vmem>>, vector<32x64xbf16>
    %103 = arith.truncf %101 : vector<8x32xf32> to vector<8x32xbf16>
    %cst_32 = arith.constant dense<0.000000e+00> : vector<8x64xf32>
    %104 = tpu.matmul %103, %102, %cst_32 {dimension_numbers = #tpu.dot_dimension_numbers<[1], [0], [0], [1], [0, 0, 1, 1], [], []>} : vector<8x32xbf16>, vector<32x64xbf16>, vector<8x64xf32> -> vector<8x64xf32>
    %105 = vector.extract_strided_slice %104 {offsets = [0, 0], sizes = [8, 32], strides = [1, 1]} : vector<8x64xf32> to vector<8x32xf32>
    %106 = arith.negf %105 : vector<8x32xf32>
    %107 = math.exp %106 : vector<8x32xf32>
    %cst_33 = arith.constant 1.000000e+00 : f32
    %108 = vector.broadcast %cst_33 : f32 to vector<8x32xf32>
    %109 = arith.addf %108, %107 : vector<8x32xf32>
    %110 = arith.divf %108, %109 : vector<8x32xf32>
    %111 = vector.extract_strided_slice %104 {offsets = [0, 32], sizes = [8, 32], strides = [1, 1]} : vector<8x64xf32> to vector<8x32xf32>
    %112 = math.tanh %111 : vector<8x32xf32>
    %113 = arith.subf %112, %101 : vector<8x32xf32>
    %114 = arith.mulf %110, %113 : vector<8x32xf32>
    %115 = arith.addf %101, %114 : vector<8x32xf32>
    %c0_34 = arith.constant 0 : index
    %c64_35 = arith.constant 64 : index
    %116 = vector.load %arg5[%c0_34, %c64_35] : memref<32x256xbf16, #tpu.memory_space<vmem>>, vector<32x128xbf16>
    %117 = arith.truncf %115 : vector<8x32xf32> to vector<8x32xbf16>
    %cst_36 = arith.constant dense<0.000000e+00> : vector<8x128xf32>
    %118 = tpu.matmul %117, %116, %cst_36 {dimension_numbers = #tpu.dot_dimension_numbers<[1], [0], [0], [1], [0, 0, 1, 1], [], []>} : vector<8x32xbf16>, vector<32x128xbf16>, vector<8x128xf32> -> vector<8x128xf32>
    %119 = vector.extract_strided_slice %118 {offsets = [0, 0], sizes = [8, 32], strides = [1, 1]} : vector<8x128xf32> to vector<8x32xf32>
    %120 = arith.negf %119 : vector<8x32xf32>
    %121 = math.exp %120 : vector<8x32xf32>
    %cst_37 = arith.constant 1.000000e+00 : f32
    %122 = vector.broadcast %cst_37 : f32 to vector<8x32xf32>
    %123 = arith.addf %122, %121 : vector<8x32xf32>
    %124 = arith.divf %122, %123 : vector<8x32xf32>
    %125 = vector.extract_strided_slice %118 {offsets = [0, 32], sizes = [8, 32], strides = [1, 1]} : vector<8x128xf32> to vector<8x32xf32>
    %cst_38 = arith.constant 0.000000e+00 : f32
    %126 = vector.broadcast %cst_38 : f32 to vector<8x32xf32>
    %127 = arith.maximumf %125, %126 : vector<8x32xf32>
    %128 = arith.subf %127, %115 : vector<8x32xf32>
    %129 = arith.mulf %124, %128 : vector<8x32xf32>
    %130 = arith.addf %115, %129 : vector<8x32xf32>
    %131 = vector.extract_strided_slice %118 {offsets = [0, 64], sizes = [8, 32], strides = [1, 1]} : vector<8x128xf32> to vector<8x32xf32>
    %132 = arith.negf %131 : vector<8x32xf32>
    %133 = math.exp %132 : vector<8x32xf32>
    %cst_39 = arith.constant 1.000000e+00 : f32
    %134 = vector.broadcast %cst_39 : f32 to vector<8x32xf32>
    %135 = arith.addf %134, %133 : vector<8x32xf32>
    %136 = arith.divf %134, %135 : vector<8x32xf32>
    %137 = vector.extract_strided_slice %118 {offsets = [0, 96], sizes = [8, 32], strides = [1, 1]} : vector<8x128xf32> to vector<8x32xf32>
    %138 = arith.negf %137 : vector<8x32xf32>
    %139 = math.exp %138 : vector<8x32xf32>
    %cst_40 = arith.constant 1.000000e+00 : f32
    %140 = vector.broadcast %cst_40 : f32 to vector<8x32xf32>
    %141 = arith.addf %140, %139 : vector<8x32xf32>
    %142 = arith.divf %140, %141 : vector<8x32xf32>
    %143 = arith.subf %142, %115 : vector<8x32xf32>
    %144 = arith.mulf %136, %143 : vector<8x32xf32>
    %145 = arith.addf %115, %144 : vector<8x32xf32>
    %c0_41 = arith.constant 0 : index
    %c192_42 = arith.constant 192 : index
    %146 = vector.load %arg5[%c0_41, %c192_42] : memref<32x256xbf16, #tpu.memory_space<vmem>>, vector<32x64xbf16>
    %147 = arith.truncf %130 : vector<8x32xf32> to vector<8x32xbf16>
    %cst_43 = arith.constant dense<0.000000e+00> : vector<8x64xf32>
    %148 = tpu.matmul %147, %146, %cst_43 {dimension_numbers = #tpu.dot_dimension_numbers<[1], [0], [0], [1], [0, 0, 1, 1], [], []>} : vector<8x32xbf16>, vector<32x64xbf16>, vector<8x64xf32> -> vector<8x64xf32>
    %149 = vector.extract_strided_slice %148 {offsets = [0, 0], sizes = [8, 32], strides = [1, 1]} : vector<8x64xf32> to vector<8x32xf32>
    %150 = arith.negf %149 : vector<8x32xf32>
    %151 = math.exp %150 : vector<8x32xf32>
    %cst_44 = arith.constant 1.000000e+00 : f32
    %152 = vector.broadcast %cst_44 : f32 to vector<8x32xf32>
    %153 = arith.addf %152, %151 : vector<8x32xf32>
    %154 = arith.divf %152, %153 : vector<8x32xf32>
    %155 = vector.extract_strided_slice %148 {offsets = [0, 32], sizes = [8, 32], strides = [1, 1]} : vector<8x64xf32> to vector<8x32xf32>
    %156 = arith.subf %155, %130 : vector<8x32xf32>
    %157 = arith.mulf %154, %156 : vector<8x32xf32>
    %158 = arith.addf %130, %157 : vector<8x32xf32>
    %159 = arith.addf %115, %130 : vector<8x32xf32>
    %160 = arith.addf %159, %145 : vector<8x32xf32>
    %161 = arith.addf %160, %158 : vector<8x32xf32>
    %cst_45 = arith.constant 2.500000e-01 : f32
    %162 = vector.broadcast %cst_45 : f32 to vector<8x32xf32>
    %163 = arith.mulf %161, %162 : vector<8x32xf32>
    %c8 = arith.constant 8 : index
    %c0_46 = arith.constant 0 : index
    %164 = vector.load %arg6[%c8, %c0_46] : memref<128x32xf32, #tpu.memory_space<vmem>>, vector<8x32xf32>
    tpu.vector_store %arg6[%c8, %c0_46], %163 {strides = array<i32>} : memref<128x32xf32, #tpu.memory_space<vmem>>, vector<8x32xf32>,
    %165 = vector.extract_strided_slice %5 {offsets = [16, 0], sizes = [8, 64], strides = [1, 1]} : vector<128x64xf32> to vector<8x64xf32>
    %166 = arith.truncf %163 : vector<8x32xf32> to vector<8x32xbf16>
    %c0_47 = arith.constant 0 : index
    %c0_48 = arith.constant 0 : index
    %167 = vector.load %arg4[%c0_47, %c0_48] : memref<32x64xbf16, #tpu.memory_space<vmem>>, vector<32x64xbf16>
    %cst_49 = arith.constant dense<0.000000e+00> : vector<8x64xf32>
    %168 = tpu.matmul %166, %167, %cst_49 {dimension_numbers = #tpu.dot_dimension_numbers<[1], [0], [0], [1], [0, 0, 1, 1], [], []>} : vector<8x32xbf16>, vector<32x64xbf16>, vector<8x64xf32> -> vector<8x64xf32>
    %169 = arith.addf %165, %168 : vector<8x64xf32>
    %170 = vector.extract_strided_slice %169 {offsets = [0, 0], sizes = [8, 32], strides = [1, 1]} : vector<8x64xf32> to vector<8x32xf32>
    %171 = arith.negf %170 : vector<8x32xf32>
    %172 = math.exp %171 : vector<8x32xf32>
    %cst_50 = arith.constant 1.000000e+00 : f32
    %173 = vector.broadcast %cst_50 : f32 to vector<8x32xf32>
    %174 = arith.addf %173, %172 : vector<8x32xf32>
    %175 = arith.divf %173, %174 : vector<8x32xf32>
    %176 = vector.extract_strided_slice %169 {offsets = [0, 32], sizes = [8, 32], strides = [1, 1]} : vector<8x64xf32> to vector<8x32xf32>
    %177 = math.tanh %176 : vector<8x32xf32>
    %178 = arith.subf %177, %163 : vector<8x32xf32>
    %179 = arith.mulf %175, %178 : vector<8x32xf32>
    %180 = arith.addf %163, %179 : vector<8x32xf32>
    %c0_51 = arith.constant 0 : index
    %c0_52 = arith.constant 0 : index
    %181 = vector.load %arg5[%c0_51, %c0_52] : memref<32x256xbf16, #tpu.memory_space<vmem>>, vector<32x64xbf16>
    %182 = arith.truncf %180 : vector<8x32xf32> to vector<8x32xbf16>
    %cst_53 = arith.constant dense<0.000000e+00> : vector<8x64xf32>
    %183 = tpu.matmul %182, %181, %cst_53 {dimension_numbers = #tpu.dot_dimension_numbers<[1], [0], [0], [1], [0, 0, 1, 1], [], []>} : vector<8x32xbf16>, vector<32x64xbf16>, vector<8x64xf32> -> vector<8x64xf32>
    %184 = vector.extract_strided_slice %183 {offsets = [0, 0], sizes = [8, 32], strides = [1, 1]} : vector<8x64xf32> to vector<8x32xf32>
    %185 = arith.negf %184 : vector<8x32xf32>
    %186 = math.exp %185 : vector<8x32xf32>
    %cst_54 = arith.constant 1.000000e+00 : f32
    %187 = vector.broadcast %cst_54 : f32 to vector<8x32xf32>
    %188 = arith.addf %187, %186 : vector<8x32xf32>
    %189 = arith.divf %187, %188 : vector<8x32xf32>
    %190 = vector.extract_strided_slice %183 {offsets = [0, 32], sizes = [8, 32], strides = [1, 1]} : vector<8x64xf32> to vector<8x32xf32>
    %191 = math.tanh %190 : vector<8x32xf32>
    %192 = arith.subf %191, %180 : vector<8x32xf32>
    %193 = arith.mulf %189, %192 : vector<8x32xf32>
    %194 = arith.addf %180, %193 : vector<8x32xf32>
    %c0_55 = arith.constant 0 : index
    %c64_56 = arith.constant 64 : index
    %195 = vector.load %arg5[%c0_55, %c64_56] : memref<32x256xbf16, #tpu.memory_space<vmem>>, vector<32x128xbf16>
    %196 = arith.truncf %194 : vector<8x32xf32> to vector<8x32xbf16>
    %cst_57 = arith.constant dense<0.000000e+00> : vector<8x128xf32>
    %197 = tpu.matmul %196, %195, %cst_57 {dimension_numbers = #tpu.dot_dimension_numbers<[1], [0], [0], [1], [0, 0, 1, 1], [], []>} : vector<8x32xbf16>, vector<32x128xbf16>, vector<8x128xf32> -> vector<8x128xf32>
    %198 = vector.extract_strided_slice %197 {offsets = [0, 0], sizes = [8, 32], strides = [1, 1]} : vector<8x128xf32> to vector<8x32xf32>
    %199 = arith.negf %198 : vector<8x32xf32>
    %200 = math.exp %199 : vector<8x32xf32>
    %cst_58 = arith.constant 1.000000e+00 : f32
    %201 = vector.broadcast %cst_58 : f32 to vector<8x32xf32>
    %202 = arith.addf %201, %200 : vector<8x32xf32>
    %203 = arith.divf %201, %202 : vector<8x32xf32>
    %204 = vector.extract_strided_slice %197 {offsets = [0, 32], sizes = [8, 32], strides = [1, 1]} : vector<8x128xf32> to vector<8x32xf32>
    %cst_59 = arith.constant 0.000000e+00 : f32
    %205 = vector.broadcast %cst_59 : f32 to vector<8x32xf32>
    %206 = arith.maximumf %204, %205 : vector<8x32xf32>
    %207 = arith.subf %206, %194 : vector<8x32xf32>
    %208 = arith.mulf %203, %207 : vector<8x32xf32>
    %209 = arith.addf %194, %208 : vector<8x32xf32>
    %210 = vector.extract_strided_slice %197 {offsets = [0, 64], sizes = [8, 32], strides = [1, 1]} : vector<8x128xf32> to vector<8x32xf32>
    %211 = arith.negf %210 : vector<8x32xf32>
    %212 = math.exp %211 : vector<8x32xf32>
    %cst_60 = arith.constant 1.000000e+00 : f32
    %213 = vector.broadcast %cst_60 : f32 to vector<8x32xf32>
    %214 = arith.addf %213, %212 : vector<8x32xf32>
    %215 = arith.divf %213, %214 : vector<8x32xf32>
    %216 = vector.extract_strided_slice %197 {offsets = [0, 96], sizes = [8, 32], strides = [1, 1]} : vector<8x128xf32> to vector<8x32xf32>
    %217 = arith.negf %216 : vector<8x32xf32>
    %218 = math.exp %217 : vector<8x32xf32>
    %cst_61 = arith.constant 1.000000e+00 : f32
    %219 = vector.broadcast %cst_61 : f32 to vector<8x32xf32>
    %220 = arith.addf %219, %218 : vector<8x32xf32>
    %221 = arith.divf %219, %220 : vector<8x32xf32>
    %222 = arith.subf %221, %194 : vector<8x32xf32>
    %223 = arith.mulf %215, %222 : vector<8x32xf32>
    %224 = arith.addf %194, %223 : vector<8x32xf32>
    %c0_62 = arith.constant 0 : index
    %c192_63 = arith.constant 192 : index
    %225 = vector.load %arg5[%c0_62, %c192_63] : memref<32x256xbf16, #tpu.memory_space<vmem>>, vector<32x64xbf16>
    %226 = arith.truncf %209 : vector<8x32xf32> to vector<8x32xbf16>
    %cst_64 = arith.constant dense<0.000000e+00> : vector<8x64xf32>
    %227 = tpu.matmul %226, %225, %cst_64 {dimension_numbers = #tpu.dot_dimension_numbers<[1], [0], [0], [1], [0, 0, 1, 1], [], []>} : vector<8x32xbf16>, vector<32x64xbf16>, vector<8x64xf32> -> vector<8x64xf32>
    %228 = vector.extract_strided_slice %227 {offsets = [0, 0], sizes = [8, 32], strides = [1, 1]} : vector<8x64xf32> to vector<8x32xf32>
    %229 = arith.negf %228 : vector<8x32xf32>
    %230 = math.exp %229 : vector<8x32xf32>
    %cst_65 = arith.constant 1.000000e+00 : f32
    %231 = vector.broadcast %cst_65 : f32 to vector<8x32xf32>
    %232 = arith.addf %231, %230 : vector<8x32xf32>
    %233 = arith.divf %231, %232 : vector<8x32xf32>
    %234 = vector.extract_strided_slice %227 {offsets = [0, 32], sizes = [8, 32], strides = [1, 1]} : vector<8x64xf32> to vector<8x32xf32>
    %235 = arith.subf %234, %209 : vector<8x32xf32>
    %236 = arith.mulf %233, %235 : vector<8x32xf32>
    %237 = arith.addf %209, %236 : vector<8x32xf32>
    %238 = arith.addf %194, %209 : vector<8x32xf32>
    %239 = arith.addf %238, %224 : vector<8x32xf32>
    %240 = arith.addf %239, %237 : vector<8x32xf32>
    %cst_66 = arith.constant 2.500000e-01 : f32
    %241 = vector.broadcast %cst_66 : f32 to vector<8x32xf32>
    %242 = arith.mulf %240, %241 : vector<8x32xf32>
    %c16 = arith.constant 16 : index
    %c0_67 = arith.constant 0 : index
    %243 = vector.load %arg6[%c16, %c0_67] : memref<128x32xf32, #tpu.memory_space<vmem>>, vector<8x32xf32>
    tpu.vector_store %arg6[%c16, %c0_67], %242 {strides = array<i32>} : memref<128x32xf32, #tpu.memory_space<vmem>>, vector<8x32xf32>,
    %244 = vector.extract_strided_slice %5 {offsets = [24, 0], sizes = [8, 64], strides = [1, 1]} : vector<128x64xf32> to vector<8x64xf32>
    %245 = arith.truncf %242 : vector<8x32xf32> to vector<8x32xbf16>
    %c0_68 = arith.constant 0 : index
    %c0_69 = arith.constant 0 : index
    %246 = vector.load %arg4[%c0_68, %c0_69] : memref<32x64xbf16, #tpu.memory_space<vmem>>, vector<32x64xbf16>
    %cst_70 = arith.constant dense<0.000000e+00> : vector<8x64xf32>
    %247 = tpu.matmul %245, %246, %cst_70 {dimension_numbers = #tpu.dot_dimension_numbers<[1], [0], [0], [1], [0, 0, 1, 1], [], []>} : vector<8x32xbf16>, vector<32x64xbf16>, vector<8x64xf32> -> vector<8x64xf32>
    %248 = arith.addf %244, %247 : vector<8x64xf32>
    %249 = vector.extract_strided_slice %248 {offsets = [0, 0], sizes = [8, 32], strides = [1, 1]} : vector<8x64xf32> to vector<8x32xf32>
    %250 = arith.negf %249 : vector<8x32xf32>
    %251 = math.exp %250 : vector<8x32xf32>
    %cst_71 = arith.constant 1.000000e+00 : f32
    %252 = vector.broadcast %cst_71 : f32 to vector<8x32xf32>
    %253 = arith.addf %252, %251 : vector<8x32xf32>
    %254 = arith.divf %252, %253 : vector<8x32xf32>
    %255 = vector.extract_strided_slice %248 {offsets = [0, 32], sizes = [8, 32], strides = [1, 1]} : vector<8x64xf32> to vector<8x32xf32>
    %256 = math.tanh %255 : vector<8x32xf32>
    %257 = arith.subf %256, %242 : vector<8x32xf32>
    %258 = arith.mulf %254, %257 : vector<8x32xf32>
    %259 = arith.addf %242, %258 : vector<8x32xf32>
    %c0_72 = arith.constant 0 : index
    %c0_73 = arith.constant 0 : index
    %260 = vector.load %arg5[%c0_72, %c0_73] : memref<32x256xbf16, #tpu.memory_space<vmem>>, vector<32x64xbf16>
    %261 = arith.truncf %259 : vector<8x32xf32> to vector<8x32xbf16>
    %cst_74 = arith.constant dense<0.000000e+00> : vector<8x64xf32>
    %262 = tpu.matmul %261, %260, %cst_74 {dimension_numbers = #tpu.dot_dimension_numbers<[1], [0], [0], [1], [0, 0, 1, 1], [], []>} : vector<8x32xbf16>, vector<32x64xbf16>, vector<8x64xf32> -> vector<8x64xf32>
    %263 = vector.extract_strided_slice %262 {offsets = [0, 0], sizes = [8, 32], strides = [1, 1]} : vector<8x64xf32> to vector<8x32xf32>
    %264 = arith.negf %263 : vector<8x32xf32>
    %265 = math.exp %264 : vector<8x32xf32>
    %cst_75 = arith.constant 1.000000e+00 : f32
    %266 = vector.broadcast %cst_75 : f32 to vector<8x32xf32>
    %267 = arith.addf %266, %265 : vector<8x32xf32>
    %268 = arith.divf %266, %267 : vector<8x32xf32>
    %269 = vector.extract_strided_slice %262 {offsets = [0, 32], sizes = [8, 32], strides = [1, 1]} : vector<8x64xf32> to vector<8x32xf32>
    %270 = math.tanh %269 : vector<8x32xf32>
    %271 = arith.subf %270, %259 : vector<8x32xf32>
    %272 = arith.mulf %268, %271 : vector<8x32xf32>
    %273 = arith.addf %259, %272 : vector<8x32xf32>
    %c0_76 = arith.constant 0 : index
    %c64_77 = arith.constant 64 : index
    %274 = vector.load %arg5[%c0_76, %c64_77] : memref<32x256xbf16, #tpu.memory_space<vmem>>, vector<32x128xbf16>
    %275 = arith.truncf %273 : vector<8x32xf32> to vector<8x32xbf16>
    %cst_78 = arith.constant dense<0.000000e+00> : vector<8x128xf32>
    %276 = tpu.matmul %275, %274, %cst_78 {dimension_numbers = #tpu.dot_dimension_numbers<[1], [0], [0], [1], [0, 0, 1, 1], [], []>} : vector<8x32xbf16>, vector<32x128xbf16>, vector<8x128xf32> -> vector<8x128xf32>
    %277 = vector.extract_strided_slice %276 {offsets = [0, 0], sizes = [8, 32], strides = [1, 1]} : vector<8x128xf32> to vector<8x32xf32>
    %278 = arith.negf %277 : vector<8x32xf32>
    %279 = math.exp %278 : vector<8x32xf32>
    %cst_79 = arith.constant 1.000000e+00 : f32
    %280 = vector.broadcast %cst_79 : f32 to vector<8x32xf32>
    %281 = arith.addf %280, %279 : vector<8x32xf32>
    %282 = arith.divf %280, %281 : vector<8x32xf32>
    %283 = vector.extract_strided_slice %276 {offsets = [0, 32], sizes = [8, 32], strides = [1, 1]} : vector<8x128xf32> to vector<8x32xf32>
    %cst_80 = arith.constant 0.000000e+00 : f32
    %284 = vector.broadcast %cst_80 : f32 to vector<8x32xf32>
    %285 = arith.maximumf %283, %284 : vector<8x32xf32>
    %286 = arith.subf %285, %273 : vector<8x32xf32>
    %287 = arith.mulf %282, %286 : vector<8x32xf32>
    %288 = arith.addf %273, %287 : vector<8x32xf32>
    %289 = vector.extract_strided_slice %276 {offsets = [0, 64], sizes = [8, 32], strides = [1, 1]} : vector<8x128xf32> to vector<8x32xf32>
    %290 = arith.negf %289 : vector<8x32xf32>
    %291 = math.exp %290 : vector<8x32xf32>
    %cst_81 = arith.constant 1.000000e+00 : f32
    %292 = vector.broadcast %cst_81 : f32 to vector<8x32xf32>
    %293 = arith.addf %292, %291 : vector<8x32xf32>
    %294 = arith.divf %292, %293 : vector<8x32xf32>
    %295 = vector.extract_strided_slice %276 {offsets = [0, 96], sizes = [8, 32], strides = [1, 1]} : vector<8x128xf32> to vector<8x32xf32>
    %296 = arith.negf %295 : vector<8x32xf32>
    %297 = math.exp %296 : vector<8x32xf32>
    %cst_82 = arith.constant 1.000000e+00 : f32
    %298 = vector.broadcast %cst_82 : f32 to vector<8x32xf32>
    %299 = arith.addf %298, %297 : vector<8x32xf32>
    %300 = arith.divf %298, %299 : vector<8x32xf32>
    %301 = arith.subf %300, %273 : vector<8x32xf32>
    %302 = arith.mulf %294, %301 : vector<8x32xf32>
    %303 = arith.addf %273, %302 : vector<8x32xf32>
    %c0_83 = arith.constant 0 : index
    %c192_84 = arith.constant 192 : index
    %304 = vector.load %arg5[%c0_83, %c192_84] : memref<32x256xbf16, #tpu.memory_space<vmem>>, vector<32x64xbf16>
    %305 = arith.truncf %288 : vector<8x32xf32> to vector<8x32xbf16>
    %cst_85 = arith.constant dense<0.000000e+00> : vector<8x64xf32>
    %306 = tpu.matmul %305, %304, %cst_85 {dimension_numbers = #tpu.dot_dimension_numbers<[1], [0], [0], [1], [0, 0, 1, 1], [], []>} : vector<8x32xbf16>, vector<32x64xbf16>, vector<8x64xf32> -> vector<8x64xf32>
    %307 = vector.extract_strided_slice %306 {offsets = [0, 0], sizes = [8, 32], strides = [1, 1]} : vector<8x64xf32> to vector<8x32xf32>
    %308 = arith.negf %307 : vector<8x32xf32>
    %309 = math.exp %308 : vector<8x32xf32>
    %cst_86 = arith.constant 1.000000e+00 : f32
    %310 = vector.broadcast %cst_86 : f32 to vector<8x32xf32>
    %311 = arith.addf %310, %309 : vector<8x32xf32>
    %312 = arith.divf %310, %311 : vector<8x32xf32>
    %313 = vector.extract_strided_slice %306 {offsets = [0, 32], sizes = [8, 32], strides = [1, 1]} : vector<8x64xf32> to vector<8x32xf32>
    %314 = arith.subf %313, %288 : vector<8x32xf32>
    %315 = arith.mulf %312, %314 : vector<8x32xf32>
    %316 = arith.addf %288, %315 : vector<8x32xf32>
    %317 = arith.addf %273, %288 : vector<8x32xf32>
    %318 = arith.addf %317, %303 : vector<8x32xf32>
    %319 = arith.addf %318, %316 : vector<8x32xf32>
    %cst_87 = arith.constant 2.500000e-01 : f32
    %320 = vector.broadcast %cst_87 : f32 to vector<8x32xf32>
    %321 = arith.mulf %319, %320 : vector<8x32xf32>
    %c24 = arith.constant 24 : index
    %c0_88 = arith.constant 0 : index
    %322 = vector.load %arg6[%c24, %c0_88] : memref<128x32xf32, #tpu.memory_space<vmem>>, vector<8x32xf32>
    tpu.vector_store %arg6[%c24, %c0_88], %321 {strides = array<i32>} : memref<128x32xf32, #tpu.memory_space<vmem>>, vector<8x32xf32>,
    %323 = vector.extract_strided_slice %5 {offsets = [32, 0], sizes = [8, 64], strides = [1, 1]} : vector<128x64xf32> to vector<8x64xf32>
    %324 = arith.truncf %321 : vector<8x32xf32> to vector<8x32xbf16>
    %c0_89 = arith.constant 0 : index
    %c0_90 = arith.constant 0 : index
    %325 = vector.load %arg4[%c0_89, %c0_90] : memref<32x64xbf16, #tpu.memory_space<vmem>>, vector<32x64xbf16>
    %cst_91 = arith.constant dense<0.000000e+00> : vector<8x64xf32>
    %326 = tpu.matmul %324, %325, %cst_91 {dimension_numbers = #tpu.dot_dimension_numbers<[1], [0], [0], [1], [0, 0, 1, 1], [], []>} : vector<8x32xbf16>, vector<32x64xbf16>, vector<8x64xf32> -> vector<8x64xf32>
    %327 = arith.addf %323, %326 : vector<8x64xf32>
    %328 = vector.extract_strided_slice %327 {offsets = [0, 0], sizes = [8, 32], strides = [1, 1]} : vector<8x64xf32> to vector<8x32xf32>
    %329 = arith.negf %328 : vector<8x32xf32>
    %330 = math.exp %329 : vector<8x32xf32>
    %cst_92 = arith.constant 1.000000e+00 : f32
    %331 = vector.broadcast %cst_92 : f32 to vector<8x32xf32>
    %332 = arith.addf %331, %330 : vector<8x32xf32>
    %333 = arith.divf %331, %332 : vector<8x32xf32>
    %334 = vector.extract_strided_slice %327 {offsets = [0, 32], sizes = [8, 32], strides = [1, 1]} : vector<8x64xf32> to vector<8x32xf32>
    %335 = math.tanh %334 : vector<8x32xf32>
    %336 = arith.subf %335, %321 : vector<8x32xf32>
    %337 = arith.mulf %333, %336 : vector<8x32xf32>
    %338 = arith.addf %321, %337 : vector<8x32xf32>
    %c0_93 = arith.constant 0 : index
    %c0_94 = arith.constant 0 : index
    %339 = vector.load %arg5[%c0_93, %c0_94] : memref<32x256xbf16, #tpu.memory_space<vmem>>, vector<32x64xbf16>
    %340 = arith.truncf %338 : vector<8x32xf32> to vector<8x32xbf16>
    %cst_95 = arith.constant dense<0.000000e+00> : vector<8x64xf32>
    %341 = tpu.matmul %340, %339, %cst_95 {dimension_numbers = #tpu.dot_dimension_numbers<[1], [0], [0], [1], [0, 0, 1, 1], [], []>} : vector<8x32xbf16>, vector<32x64xbf16>, vector<8x64xf32> -> vector<8x64xf32>
    %342 = vector.extract_strided_slice %341 {offsets = [0, 0], sizes = [8, 32], strides = [1, 1]} : vector<8x64xf32> to vector<8x32xf32>
    %343 = arith.negf %342 : vector<8x32xf32>
    %344 = math.exp %343 : vector<8x32xf32>
    %cst_96 = arith.constant 1.000000e+00 : f32
    %345 = vector.broadcast %cst_96 : f32 to vector<8x32xf32>
    %346 = arith.addf %345, %344 : vector<8x32xf32>
    %347 = arith.divf %345, %346 : vector<8x32xf32>
    %348 = vector.extract_strided_slice %341 {offsets = [0, 32], sizes = [8, 32], strides = [1, 1]} : vector<8x64xf32> to vector<8x32xf32>
    %349 = math.tanh %348 : vector<8x32xf32>
    %350 = arith.subf %349, %338 : vector<8x32xf32>
    %351 = arith.mulf %347, %350 : vector<8x32xf32>
    %352 = arith.addf %338, %351 : vector<8x32xf32>
    %c0_97 = arith.constant 0 : index
    %c64_98 = arith.constant 64 : index
    %353 = vector.load %arg5[%c0_97, %c64_98] : memref<32x256xbf16, #tpu.memory_space<vmem>>, vector<32x128xbf16>
    %354 = arith.truncf %352 : vector<8x32xf32> to vector<8x32xbf16>
    %cst_99 = arith.constant dense<0.000000e+00> : vector<8x128xf32>
    %355 = tpu.matmul %354, %353, %cst_99 {dimension_numbers = #tpu.dot_dimension_numbers<[1], [0], [0], [1], [0, 0, 1, 1], [], []>} : vector<8x32xbf16>, vector<32x128xbf16>, vector<8x128xf32> -> vector<8x128xf32>
    %356 = vector.extract_strided_slice %355 {offsets = [0, 0], sizes = [8, 32], strides = [1, 1]} : vector<8x128xf32> to vector<8x32xf32>
    %357 = arith.negf %356 : vector<8x32xf32>
    %358 = math.exp %357 : vector<8x32xf32>
    %cst_100 = arith.constant 1.000000e+00 : f32
    %359 = vector.broadcast %cst_100 : f32 to vector<8x32xf32>
    %360 = arith.addf %359, %358 : vector<8x32xf32>
    %361 = arith.divf %359, %360 : vector<8x32xf32>
    %362 = vector.extract_strided_slice %355 {offsets = [0, 32], sizes = [8, 32], strides = [1, 1]} : vector<8x128xf32> to vector<8x32xf32>
    %cst_101 = arith.constant 0.000000e+00 : f32
    %363 = vector.broadcast %cst_101 : f32 to vector<8x32xf32>
    %364 = arith.maximumf %362, %363 : vector<8x32xf32>
    %365 = arith.subf %364, %352 : vector<8x32xf32>
    %366 = arith.mulf %361, %365 : vector<8x32xf32>
    %367 = arith.addf %352, %366 : vector<8x32xf32>
    %368 = vector.extract_strided_slice %355 {offsets = [0, 64], sizes = [8, 32], strides = [1, 1]} : vector<8x128xf32> to vector<8x32xf32>
    %369 = arith.negf %368 : vector<8x32xf32>
    %370 = math.exp %369 : vector<8x32xf32>
    %cst_102 = arith.constant 1.000000e+00 : f32
    %371 = vector.broadcast %cst_102 : f32 to vector<8x32xf32>
    %372 = arith.addf %371, %370 : vector<8x32xf32>
    %373 = arith.divf %371, %372 : vector<8x32xf32>
    %374 = vector.extract_strided_slice %355 {offsets = [0, 96], sizes = [8, 32], strides = [1, 1]} : vector<8x128xf32> to vector<8x32xf32>
    %375 = arith.negf %374 : vector<8x32xf32>
    %376 = math.exp %375 : vector<8x32xf32>
    %cst_103 = arith.constant 1.000000e+00 : f32
    %377 = vector.broadcast %cst_103 : f32 to vector<8x32xf32>
    %378 = arith.addf %377, %376 : vector<8x32xf32>
    %379 = arith.divf %377, %378 : vector<8x32xf32>
    %380 = arith.subf %379, %352 : vector<8x32xf32>
    %381 = arith.mulf %373, %380 : vector<8x32xf32>
    %382 = arith.addf %352, %381 : vector<8x32xf32>
    %c0_104 = arith.constant 0 : index
    %c192_105 = arith.constant 192 : index
    %383 = vector.load %arg5[%c0_104, %c192_105] : memref<32x256xbf16, #tpu.memory_space<vmem>>, vector<32x64xbf16>
    %384 = arith.truncf %367 : vector<8x32xf32> to vector<8x32xbf16>
    %cst_106 = arith.constant dense<0.000000e+00> : vector<8x64xf32>
    %385 = tpu.matmul %384, %383, %cst_106 {dimension_numbers = #tpu.dot_dimension_numbers<[1], [0], [0], [1], [0, 0, 1, 1], [], []>} : vector<8x32xbf16>, vector<32x64xbf16>, vector<8x64xf32> -> vector<8x64xf32>
    %386 = vector.extract_strided_slice %385 {offsets = [0, 0], sizes = [8, 32], strides = [1, 1]} : vector<8x64xf32> to vector<8x32xf32>
    %387 = arith.negf %386 : vector<8x32xf32>
    %388 = math.exp %387 : vector<8x32xf32>
    %cst_107 = arith.constant 1.000000e+00 : f32
    %389 = vector.broadcast %cst_107 : f32 to vector<8x32xf32>
    %390 = arith.addf %389, %388 : vector<8x32xf32>
    %391 = arith.divf %389, %390 : vector<8x32xf32>
    %392 = vector.extract_strided_slice %385 {offsets = [0, 32], sizes = [8, 32], strides = [1, 1]} : vector<8x64xf32> to vector<8x32xf32>
    %393 = arith.subf %392, %367 : vector<8x32xf32>
    %394 = arith.mulf %391, %393 : vector<8x32xf32>
    %395 = arith.addf %367, %394 : vector<8x32xf32>
    %396 = arith.addf %352, %367 : vector<8x32xf32>
    %397 = arith.addf %396, %382 : vector<8x32xf32>
    %398 = arith.addf %397, %395 : vector<8x32xf32>
    %cst_108 = arith.constant 2.500000e-01 : f32
    %399 = vector.broadcast %cst_108 : f32 to vector<8x32xf32>
    %400 = arith.mulf %398, %399 : vector<8x32xf32>
    %c32 = arith.constant 32 : index
    %c0_109 = arith.constant 0 : index
    %401 = vector.load %arg6[%c32, %c0_109] : memref<128x32xf32, #tpu.memory_space<vmem>>, vector<8x32xf32>
    tpu.vector_store %arg6[%c32, %c0_109], %400 {strides = array<i32>} : memref<128x32xf32, #tpu.memory_space<vmem>>, vector<8x32xf32>,
    %402 = vector.extract_strided_slice %5 {offsets = [40, 0], sizes = [8, 64], strides = [1, 1]} : vector<128x64xf32> to vector<8x64xf32>
    %403 = arith.truncf %400 : vector<8x32xf32> to vector<8x32xbf16>
    %c0_110 = arith.constant 0 : index
    %c0_111 = arith.constant 0 : index
    %404 = vector.load %arg4[%c0_110, %c0_111] : memref<32x64xbf16, #tpu.memory_space<vmem>>, vector<32x64xbf16>
    %cst_112 = arith.constant dense<0.000000e+00> : vector<8x64xf32>
    %405 = tpu.matmul %403, %404, %cst_112 {dimension_numbers = #tpu.dot_dimension_numbers<[1], [0], [0], [1], [0, 0, 1, 1], [], []>} : vector<8x32xbf16>, vector<32x64xbf16>, vector<8x64xf32> -> vector<8x64xf32>
    %406 = arith.addf %402, %405 : vector<8x64xf32>
    %407 = vector.extract_strided_slice %406 {offsets = [0, 0], sizes = [8, 32], strides = [1, 1]} : vector<8x64xf32> to vector<8x32xf32>
    %408 = arith.negf %407 : vector<8x32xf32>
    %409 = math.exp %408 : vector<8x32xf32>
    %cst_113 = arith.constant 1.000000e+00 : f32
    %410 = vector.broadcast %cst_113 : f32 to vector<8x32xf32>
    %411 = arith.addf %410, %409 : vector<8x32xf32>
    %412 = arith.divf %410, %411 : vector<8x32xf32>
    %413 = vector.extract_strided_slice %406 {offsets = [0, 32], sizes = [8, 32], strides = [1, 1]} : vector<8x64xf32> to vector<8x32xf32>
    %414 = math.tanh %413 : vector<8x32xf32>
    %415 = arith.subf %414, %400 : vector<8x32xf32>
    %416 = arith.mulf %412, %415 : vector<8x32xf32>
    %417 = arith.addf %400, %416 : vector<8x32xf32>
    %c0_114 = arith.constant 0 : index
    %c0_115 = arith.constant 0 : index
    %418 = vector.load %arg5[%c0_114, %c0_115] : memref<32x256xbf16, #tpu.memory_space<vmem>>, vector<32x64xbf16>
    %419 = arith.truncf %417 : vector<8x32xf32> to vector<8x32xbf16>
    %cst_116 = arith.constant dense<0.000000e+00> : vector<8x64xf32>
    %420 = tpu.matmul %419, %418, %cst_116 {dimension_numbers = #tpu.dot_dimension_numbers<[1], [0], [0], [1], [0, 0, 1, 1], [], []>} : vector<8x32xbf16>, vector<32x64xbf16>, vector<8x64xf32> -> vector<8x64xf32>
    %421 = vector.extract_strided_slice %420 {offsets = [0, 0], sizes = [8, 32], strides = [1, 1]} : vector<8x64xf32> to vector<8x32xf32>
    %422 = arith.negf %421 : vector<8x32xf32>
    %423 = math.exp %422 : vector<8x32xf32>
    %cst_117 = arith.constant 1.000000e+00 : f32
    %424 = vector.broadcast %cst_117 : f32 to vector<8x32xf32>
    %425 = arith.addf %424, %423 : vector<8x32xf32>
    %426 = arith.divf %424, %425 : vector<8x32xf32>
    %427 = vector.extract_strided_slice %420 {offsets = [0, 32], sizes = [8, 32], strides = [1, 1]} : vector<8x64xf32> to vector<8x32xf32>
    %428 = math.tanh %427 : vector<8x32xf32>
    %429 = arith.subf %428, %417 : vector<8x32xf32>
    %430 = arith.mulf %426, %429 : vector<8x32xf32>
    %431 = arith.addf %417, %430 : vector<8x32xf32>
    %c0_118 = arith.constant 0 : index
    %c64_119 = arith.constant 64 : index
    %432 = vector.load %arg5[%c0_118, %c64_119] : memref<32x256xbf16, #tpu.memory_space<vmem>>, vector<32x128xbf16>
    %433 = arith.truncf %431 : vector<8x32xf32> to vector<8x32xbf16>
    %cst_120 = arith.constant dense<0.000000e+00> : vector<8x128xf32>
    %434 = tpu.matmul %433, %432, %cst_120 {dimension_numbers = #tpu.dot_dimension_numbers<[1], [0], [0], [1], [0, 0, 1, 1], [], []>} : vector<8x32xbf16>, vector<32x128xbf16>, vector<8x128xf32> -> vector<8x128xf32>
    %435 = vector.extract_strided_slice %434 {offsets = [0, 0], sizes = [8, 32], strides = [1, 1]} : vector<8x128xf32> to vector<8x32xf32>
    %436 = arith.negf %435 : vector<8x32xf32>
    %437 = math.exp %436 : vector<8x32xf32>
    %cst_121 = arith.constant 1.000000e+00 : f32
    %438 = vector.broadcast %cst_121 : f32 to vector<8x32xf32>
    %439 = arith.addf %438, %437 : vector<8x32xf32>
    %440 = arith.divf %438, %439 : vector<8x32xf32>
    %441 = vector.extract_strided_slice %434 {offsets = [0, 32], sizes = [8, 32], strides = [1, 1]} : vector<8x128xf32> to vector<8x32xf32>
    %cst_122 = arith.constant 0.000000e+00 : f32
    %442 = vector.broadcast %cst_122 : f32 to vector<8x32xf32>
    %443 = arith.maximumf %441, %442 : vector<8x32xf32>
    %444 = arith.subf %443, %431 : vector<8x32xf32>
    %445 = arith.mulf %440, %444 : vector<8x32xf32>
    %446 = arith.addf %431, %445 : vector<8x32xf32>
    %447 = vector.extract_strided_slice %434 {offsets = [0, 64], sizes = [8, 32], strides = [1, 1]} : vector<8x128xf32> to vector<8x32xf32>
    %448 = arith.negf %447 : vector<8x32xf32>
    %449 = math.exp %448 : vector<8x32xf32>
    %cst_123 = arith.constant 1.000000e+00 : f32
    %450 = vector.broadcast %cst_123 : f32 to vector<8x32xf32>
    %451 = arith.addf %450, %449 : vector<8x32xf32>
    %452 = arith.divf %450, %451 : vector<8x32xf32>
    %453 = vector.extract_strided_slice %434 {offsets = [0, 96], sizes = [8, 32], strides = [1, 1]} : vector<8x128xf32> to vector<8x32xf32>
    %454 = arith.negf %453 : vector<8x32xf32>
    %455 = math.exp %454 : vector<8x32xf32>
    %cst_124 = arith.constant 1.000000e+00 : f32
    %456 = vector.broadcast %cst_124 : f32 to vector<8x32xf32>
    %457 = arith.addf %456, %455 : vector<8x32xf32>
    %458 = arith.divf %456, %457 : vector<8x32xf32>
    %459 = arith.subf %458, %431 : vector<8x32xf32>
    %460 = arith.mulf %452, %459 : vector<8x32xf32>
    %461 = arith.addf %431, %460 : vector<8x32xf32>
    %c0_125 = arith.constant 0 : index
    %c192_126 = arith.constant 192 : index
    %462 = vector.load %arg5[%c0_125, %c192_126] : memref<32x256xbf16, #tpu.memory_space<vmem>>, vector<32x64xbf16>
    %463 = arith.truncf %446 : vector<8x32xf32> to vector<8x32xbf16>
    %cst_127 = arith.constant dense<0.000000e+00> : vector<8x64xf32>
    %464 = tpu.matmul %463, %462, %cst_127 {dimension_numbers = #tpu.dot_dimension_numbers<[1], [0], [0], [1], [0, 0, 1, 1], [], []>} : vector<8x32xbf16>, vector<32x64xbf16>, vector<8x64xf32> -> vector<8x64xf32>
    %465 = vector.extract_strided_slice %464 {offsets = [0, 0], sizes = [8, 32], strides = [1, 1]} : vector<8x64xf32> to vector<8x32xf32>
    %466 = arith.negf %465 : vector<8x32xf32>
    %467 = math.exp %466 : vector<8x32xf32>
    %cst_128 = arith.constant 1.000000e+00 : f32
    %468 = vector.broadcast %cst_128 : f32 to vector<8x32xf32>
    %469 = arith.addf %468, %467 : vector<8x32xf32>
    %470 = arith.divf %468, %469 : vector<8x32xf32>
    %471 = vector.extract_strided_slice %464 {offsets = [0, 32], sizes = [8, 32], strides = [1, 1]} : vector<8x64xf32> to vector<8x32xf32>
    %472 = arith.subf %471, %446 : vector<8x32xf32>
    %473 = arith.mulf %470, %472 : vector<8x32xf32>
    %474 = arith.addf %446, %473 : vector<8x32xf32>
    %475 = arith.addf %431, %446 : vector<8x32xf32>
    %476 = arith.addf %475, %461 : vector<8x32xf32>
    %477 = arith.addf %476, %474 : vector<8x32xf32>
    %cst_129 = arith.constant 2.500000e-01 : f32
    %478 = vector.broadcast %cst_129 : f32 to vector<8x32xf32>
    %479 = arith.mulf %477, %478 : vector<8x32xf32>
    %c40 = arith.constant 40 : index
    %c0_130 = arith.constant 0 : index
    %480 = vector.load %arg6[%c40, %c0_130] : memref<128x32xf32, #tpu.memory_space<vmem>>, vector<8x32xf32>
    tpu.vector_store %arg6[%c40, %c0_130], %479 {strides = array<i32>} : memref<128x32xf32, #tpu.memory_space<vmem>>, vector<8x32xf32>,
    %481 = vector.extract_strided_slice %5 {offsets = [48, 0], sizes = [8, 64], strides = [1, 1]} : vector<128x64xf32> to vector<8x64xf32>
    %482 = arith.truncf %479 : vector<8x32xf32> to vector<8x32xbf16>
    %c0_131 = arith.constant 0 : index
    %c0_132 = arith.constant 0 : index
    %483 = vector.load %arg4[%c0_131, %c0_132] : memref<32x64xbf16, #tpu.memory_space<vmem>>, vector<32x64xbf16>
    %cst_133 = arith.constant dense<0.000000e+00> : vector<8x64xf32>
    %484 = tpu.matmul %482, %483, %cst_133 {dimension_numbers = #tpu.dot_dimension_numbers<[1], [0], [0], [1], [0, 0, 1, 1], [], []>} : vector<8x32xbf16>, vector<32x64xbf16>, vector<8x64xf32> -> vector<8x64xf32>
    %485 = arith.addf %481, %484 : vector<8x64xf32>
    %486 = vector.extract_strided_slice %485 {offsets = [0, 0], sizes = [8, 32], strides = [1, 1]} : vector<8x64xf32> to vector<8x32xf32>
    %487 = arith.negf %486 : vector<8x32xf32>
    %488 = math.exp %487 : vector<8x32xf32>
    %cst_134 = arith.constant 1.000000e+00 : f32
    %489 = vector.broadcast %cst_134 : f32 to vector<8x32xf32>
    %490 = arith.addf %489, %488 : vector<8x32xf32>
    %491 = arith.divf %489, %490 : vector<8x32xf32>
    %492 = vector.extract_strided_slice %485 {offsets = [0, 32], sizes = [8, 32], strides = [1, 1]} : vector<8x64xf32> to vector<8x32xf32>
    %493 = math.tanh %492 : vector<8x32xf32>
    %494 = arith.subf %493, %479 : vector<8x32xf32>
    %495 = arith.mulf %491, %494 : vector<8x32xf32>
    %496 = arith.addf %479, %495 : vector<8x32xf32>
    %c0_135 = arith.constant 0 : index
    %c0_136 = arith.constant 0 : index
    %497 = vector.load %arg5[%c0_135, %c0_136] : memref<32x256xbf16, #tpu.memory_space<vmem>>, vector<32x64xbf16>
    %498 = arith.truncf %496 : vector<8x32xf32> to vector<8x32xbf16>
    %cst_137 = arith.constant dense<0.000000e+00> : vector<8x64xf32>
    %499 = tpu.matmul %498, %497, %cst_137 {dimension_numbers = #tpu.dot_dimension_numbers<[1], [0], [0], [1], [0, 0, 1, 1], [], []>} : vector<8x32xbf16>, vector<32x64xbf16>, vector<8x64xf32> -> vector<8x64xf32>
    %500 = vector.extract_strided_slice %499 {offsets = [0, 0], sizes = [8, 32], strides = [1, 1]} : vector<8x64xf32> to vector<8x32xf32>
    %501 = arith.negf %500 : vector<8x32xf32>
    %502 = math.exp %501 : vector<8x32xf32>
    %cst_138 = arith.constant 1.000000e+00 : f32
    %503 = vector.broadcast %cst_138 : f32 to vector<8x32xf32>
    %504 = arith.addf %503, %502 : vector<8x32xf32>
    %505 = arith.divf %503, %504 : vector<8x32xf32>
    %506 = vector.extract_strided_slice %499 {offsets = [0, 32], sizes = [8, 32], strides = [1, 1]} : vector<8x64xf32> to vector<8x32xf32>
    %507 = math.tanh %506 : vector<8x32xf32>
    %508 = arith.subf %507, %496 : vector<8x32xf32>
    %509 = arith.mulf %505, %508 : vector<8x32xf32>
    %510 = arith.addf %496, %509 : vector<8x32xf32>
    %c0_139 = arith.constant 0 : index
    %c64_140 = arith.constant 64 : index
    %511 = vector.load %arg5[%c0_139, %c64_140] : memref<32x256xbf16, #tpu.memory_space<vmem>>, vector<32x128xbf16>
    %512 = arith.truncf %510 : vector<8x32xf32> to vector<8x32xbf16>
    %cst_141 = arith.constant dense<0.000000e+00> : vector<8x128xf32>
    %513 = tpu.matmul %512, %511, %cst_141 {dimension_numbers = #tpu.dot_dimension_numbers<[1], [0], [0], [1], [0, 0, 1, 1], [], []>} : vector<8x32xbf16>, vector<32x128xbf16>, vector<8x128xf32> -> vector<8x128xf32>
    %514 = vector.extract_strided_slice %513 {offsets = [0, 0], sizes = [8, 32], strides = [1, 1]} : vector<8x128xf32> to vector<8x32xf32>
    %515 = arith.negf %514 : vector<8x32xf32>
    %516 = math.exp %515 : vector<8x32xf32>
    %cst_142 = arith.constant 1.000000e+00 : f32
    %517 = vector.broadcast %cst_142 : f32 to vector<8x32xf32>
    %518 = arith.addf %517, %516 : vector<8x32xf32>
    %519 = arith.divf %517, %518 : vector<8x32xf32>
    %520 = vector.extract_strided_slice %513 {offsets = [0, 32], sizes = [8, 32], strides = [1, 1]} : vector<8x128xf32> to vector<8x32xf32>
    %cst_143 = arith.constant 0.000000e+00 : f32
    %521 = vector.broadcast %cst_143 : f32 to vector<8x32xf32>
    %522 = arith.maximumf %520, %521 : vector<8x32xf32>
    %523 = arith.subf %522, %510 : vector<8x32xf32>
    %524 = arith.mulf %519, %523 : vector<8x32xf32>
    %525 = arith.addf %510, %524 : vector<8x32xf32>
    %526 = vector.extract_strided_slice %513 {offsets = [0, 64], sizes = [8, 32], strides = [1, 1]} : vector<8x128xf32> to vector<8x32xf32>
    %527 = arith.negf %526 : vector<8x32xf32>
    %528 = math.exp %527 : vector<8x32xf32>
    %cst_144 = arith.constant 1.000000e+00 : f32
    %529 = vector.broadcast %cst_144 : f32 to vector<8x32xf32>
    %530 = arith.addf %529, %528 : vector<8x32xf32>
    %531 = arith.divf %529, %530 : vector<8x32xf32>
    %532 = vector.extract_strided_slice %513 {offsets = [0, 96], sizes = [8, 32], strides = [1, 1]} : vector<8x128xf32> to vector<8x32xf32>
    %533 = arith.negf %532 : vector<8x32xf32>
    %534 = math.exp %533 : vector<8x32xf32>
    %cst_145 = arith.constant 1.000000e+00 : f32
    %535 = vector.broadcast %cst_145 : f32 to vector<8x32xf32>
    %536 = arith.addf %535, %534 : vector<8x32xf32>
    %537 = arith.divf %535, %536 : vector<8x32xf32>
    %538 = arith.subf %537, %510 : vector<8x32xf32>
    %539 = arith.mulf %531, %538 : vector<8x32xf32>
    %540 = arith.addf %510, %539 : vector<8x32xf32>
    %c0_146 = arith.constant 0 : index
    %c192_147 = arith.constant 192 : index
    %541 = vector.load %arg5[%c0_146, %c192_147] : memref<32x256xbf16, #tpu.memory_space<vmem>>, vector<32x64xbf16>
    %542 = arith.truncf %525 : vector<8x32xf32> to vector<8x32xbf16>
    %cst_148 = arith.constant dense<0.000000e+00> : vector<8x64xf32>
    %543 = tpu.matmul %542, %541, %cst_148 {dimension_numbers = #tpu.dot_dimension_numbers<[1], [0], [0], [1], [0, 0, 1, 1], [], []>} : vector<8x32xbf16>, vector<32x64xbf16>, vector<8x64xf32> -> vector<8x64xf32>
    %544 = vector.extract_strided_slice %543 {offsets = [0, 0], sizes = [8, 32], strides = [1, 1]} : vector<8x64xf32> to vector<8x32xf32>
    %545 = arith.negf %544 : vector<8x32xf32>
    %546 = math.exp %545 : vector<8x32xf32>
    %cst_149 = arith.constant 1.000000e+00 : f32
    %547 = vector.broadcast %cst_149 : f32 to vector<8x32xf32>
    %548 = arith.addf %547, %546 : vector<8x32xf32>
    %549 = arith.divf %547, %548 : vector<8x32xf32>
    %550 = vector.extract_strided_slice %543 {offsets = [0, 32], sizes = [8, 32], strides = [1, 1]} : vector<8x64xf32> to vector<8x32xf32>
    %551 = arith.subf %550, %525 : vector<8x32xf32>
    %552 = arith.mulf %549, %551 : vector<8x32xf32>
    %553 = arith.addf %525, %552 : vector<8x32xf32>
    %554 = arith.addf %510, %525 : vector<8x32xf32>
    %555 = arith.addf %554, %540 : vector<8x32xf32>
    %556 = arith.addf %555, %553 : vector<8x32xf32>
    %cst_150 = arith.constant 2.500000e-01 : f32
    %557 = vector.broadcast %cst_150 : f32 to vector<8x32xf32>
    %558 = arith.mulf %556, %557 : vector<8x32xf32>
    %c48 = arith.constant 48 : index
    %c0_151 = arith.constant 0 : index
    %559 = vector.load %arg6[%c48, %c0_151] : memref<128x32xf32, #tpu.memory_space<vmem>>, vector<8x32xf32>
    tpu.vector_store %arg6[%c48, %c0_151], %558 {strides = array<i32>} : memref<128x32xf32, #tpu.memory_space<vmem>>, vector<8x32xf32>,
    %560 = vector.extract_strided_slice %5 {offsets = [56, 0], sizes = [8, 64], strides = [1, 1]} : vector<128x64xf32> to vector<8x64xf32>
    %561 = arith.truncf %558 : vector<8x32xf32> to vector<8x32xbf16>
    %c0_152 = arith.constant 0 : index
    %c0_153 = arith.constant 0 : index
    %562 = vector.load %arg4[%c0_152, %c0_153] : memref<32x64xbf16, #tpu.memory_space<vmem>>, vector<32x64xbf16>
    %cst_154 = arith.constant dense<0.000000e+00> : vector<8x64xf32>
    %563 = tpu.matmul %561, %562, %cst_154 {dimension_numbers = #tpu.dot_dimension_numbers<[1], [0], [0], [1], [0, 0, 1, 1], [], []>} : vector<8x32xbf16>, vector<32x64xbf16>, vector<8x64xf32> -> vector<8x64xf32>
    %564 = arith.addf %560, %563 : vector<8x64xf32>
    %565 = vector.extract_strided_slice %564 {offsets = [0, 0], sizes = [8, 32], strides = [1, 1]} : vector<8x64xf32> to vector<8x32xf32>
    %566 = arith.negf %565 : vector<8x32xf32>
    %567 = math.exp %566 : vector<8x32xf32>
    %cst_155 = arith.constant 1.000000e+00 : f32
    %568 = vector.broadcast %cst_155 : f32 to vector<8x32xf32>
    %569 = arith.addf %568, %567 : vector<8x32xf32>
    %570 = arith.divf %568, %569 : vector<8x32xf32>
    %571 = vector.extract_strided_slice %564 {offsets = [0, 32], sizes = [8, 32], strides = [1, 1]} : vector<8x64xf32> to vector<8x32xf32>
    %572 = math.tanh %571 : vector<8x32xf32>
    %573 = arith.subf %572, %558 : vector<8x32xf32>
    %574 = arith.mulf %570, %573 : vector<8x32xf32>
    %575 = arith.addf %558, %574 : vector<8x32xf32>
    %c0_156 = arith.constant 0 : index
    %c0_157 = arith.constant 0 : index
    %576 = vector.load %arg5[%c0_156, %c0_157] : memref<32x256xbf16, #tpu.memory_space<vmem>>, vector<32x64xbf16>
    %577 = arith.truncf %575 : vector<8x32xf32> to vector<8x32xbf16>
    %cst_158 = arith.constant dense<0.000000e+00> : vector<8x64xf32>
    %578 = tpu.matmul %577, %576, %cst_158 {dimension_numbers = #tpu.dot_dimension_numbers<[1], [0], [0], [1], [0, 0, 1, 1], [], []>} : vector<8x32xbf16>, vector<32x64xbf16>, vector<8x64xf32> -> vector<8x64xf32>
    %579 = vector.extract_strided_slice %578 {offsets = [0, 0], sizes = [8, 32], strides = [1, 1]} : vector<8x64xf32> to vector<8x32xf32>
    %580 = arith.negf %579 : vector<8x32xf32>
    %581 = math.exp %580 : vector<8x32xf32>
    %cst_159 = arith.constant 1.000000e+00 : f32
    %582 = vector.broadcast %cst_159 : f32 to vector<8x32xf32>
    %583 = arith.addf %582, %581 : vector<8x32xf32>
    %584 = arith.divf %582, %583 : vector<8x32xf32>
    %585 = vector.extract_strided_slice %578 {offsets = [0, 32], sizes = [8, 32], strides = [1, 1]} : vector<8x64xf32> to vector<8x32xf32>
    %586 = math.tanh %585 : vector<8x32xf32>
    %587 = arith.subf %586, %575 : vector<8x32xf32>
    %588 = arith.mulf %584, %587 : vector<8x32xf32>
    %589 = arith.addf %575, %588 : vector<8x32xf32>
    %c0_160 = arith.constant 0 : index
    %c64_161 = arith.constant 64 : index
    %590 = vector.load %arg5[%c0_160, %c64_161] : memref<32x256xbf16, #tpu.memory_space<vmem>>, vector<32x128xbf16>
    %591 = arith.truncf %589 : vector<8x32xf32> to vector<8x32xbf16>
    %cst_162 = arith.constant dense<0.000000e+00> : vector<8x128xf32>
    %592 = tpu.matmul %591, %590, %cst_162 {dimension_numbers = #tpu.dot_dimension_numbers<[1], [0], [0], [1], [0, 0, 1, 1], [], []>} : vector<8x32xbf16>, vector<32x128xbf16>, vector<8x128xf32> -> vector<8x128xf32>
    %593 = vector.extract_strided_slice %592 {offsets = [0, 0], sizes = [8, 32], strides = [1, 1]} : vector<8x128xf32> to vector<8x32xf32>
    %594 = arith.negf %593 : vector<8x32xf32>
    %595 = math.exp %594 : vector<8x32xf32>
    %cst_163 = arith.constant 1.000000e+00 : f32
    %596 = vector.broadcast %cst_163 : f32 to vector<8x32xf32>
    %597 = arith.addf %596, %595 : vector<8x32xf32>
    %598 = arith.divf %596, %597 : vector<8x32xf32>
    %599 = vector.extract_strided_slice %592 {offsets = [0, 32], sizes = [8, 32], strides = [1, 1]} : vector<8x128xf32> to vector<8x32xf32>
    %cst_164 = arith.constant 0.000000e+00 : f32
    %600 = vector.broadcast %cst_164 : f32 to vector<8x32xf32>
    %601 = arith.maximumf %599, %600 : vector<8x32xf32>
    %602 = arith.subf %601, %589 : vector<8x32xf32>
    %603 = arith.mulf %598, %602 : vector<8x32xf32>
    %604 = arith.addf %589, %603 : vector<8x32xf32>
    %605 = vector.extract_strided_slice %592 {offsets = [0, 64], sizes = [8, 32], strides = [1, 1]} : vector<8x128xf32> to vector<8x32xf32>
    %606 = arith.negf %605 : vector<8x32xf32>
    %607 = math.exp %606 : vector<8x32xf32>
    %cst_165 = arith.constant 1.000000e+00 : f32
    %608 = vector.broadcast %cst_165 : f32 to vector<8x32xf32>
    %609 = arith.addf %608, %607 : vector<8x32xf32>
    %610 = arith.divf %608, %609 : vector<8x32xf32>
    %611 = vector.extract_strided_slice %592 {offsets = [0, 96], sizes = [8, 32], strides = [1, 1]} : vector<8x128xf32> to vector<8x32xf32>
    %612 = arith.negf %611 : vector<8x32xf32>
    %613 = math.exp %612 : vector<8x32xf32>
    %cst_166 = arith.constant 1.000000e+00 : f32
    %614 = vector.broadcast %cst_166 : f32 to vector<8x32xf32>
    %615 = arith.addf %614, %613 : vector<8x32xf32>
    %616 = arith.divf %614, %615 : vector<8x32xf32>
    %617 = arith.subf %616, %589 : vector<8x32xf32>
    %618 = arith.mulf %610, %617 : vector<8x32xf32>
    %619 = arith.addf %589, %618 : vector<8x32xf32>
    %c0_167 = arith.constant 0 : index
    %c192_168 = arith.constant 192 : index
    %620 = vector.load %arg5[%c0_167, %c192_168] : memref<32x256xbf16, #tpu.memory_space<vmem>>, vector<32x64xbf16>
    %621 = arith.truncf %604 : vector<8x32xf32> to vector<8x32xbf16>
    %cst_169 = arith.constant dense<0.000000e+00> : vector<8x64xf32>
    %622 = tpu.matmul %621, %620, %cst_169 {dimension_numbers = #tpu.dot_dimension_numbers<[1], [0], [0], [1], [0, 0, 1, 1], [], []>} : vector<8x32xbf16>, vector<32x64xbf16>, vector<8x64xf32> -> vector<8x64xf32>
    %623 = vector.extract_strided_slice %622 {offsets = [0, 0], sizes = [8, 32], strides = [1, 1]} : vector<8x64xf32> to vector<8x32xf32>
    %624 = arith.negf %623 : vector<8x32xf32>
    %625 = math.exp %624 : vector<8x32xf32>
    %cst_170 = arith.constant 1.000000e+00 : f32
    %626 = vector.broadcast %cst_170 : f32 to vector<8x32xf32>
    %627 = arith.addf %626, %625 : vector<8x32xf32>
    %628 = arith.divf %626, %627 : vector<8x32xf32>
    %629 = vector.extract_strided_slice %622 {offsets = [0, 32], sizes = [8, 32], strides = [1, 1]} : vector<8x64xf32> to vector<8x32xf32>
    %630 = arith.subf %629, %604 : vector<8x32xf32>
    %631 = arith.mulf %628, %630 : vector<8x32xf32>
    %632 = arith.addf %604, %631 : vector<8x32xf32>
    %633 = arith.addf %589, %604 : vector<8x32xf32>
    %634 = arith.addf %633, %619 : vector<8x32xf32>
    %635 = arith.addf %634, %632 : vector<8x32xf32>
    %cst_171 = arith.constant 2.500000e-01 : f32
    %636 = vector.broadcast %cst_171 : f32 to vector<8x32xf32>
    %637 = arith.mulf %635, %636 : vector<8x32xf32>
    %c56 = arith.constant 56 : index
    %c0_172 = arith.constant 0 : index
    %638 = vector.load %arg6[%c56, %c0_172] : memref<128x32xf32, #tpu.memory_space<vmem>>, vector<8x32xf32>
    tpu.vector_store %arg6[%c56, %c0_172], %637 {strides = array<i32>} : memref<128x32xf32, #tpu.memory_space<vmem>>, vector<8x32xf32>,
    %639 = vector.extract_strided_slice %5 {offsets = [64, 0], sizes = [8, 64], strides = [1, 1]} : vector<128x64xf32> to vector<8x64xf32>
    %640 = arith.truncf %637 : vector<8x32xf32> to vector<8x32xbf16>
    %c0_173 = arith.constant 0 : index
    %c0_174 = arith.constant 0 : index
    %641 = vector.load %arg4[%c0_173, %c0_174] : memref<32x64xbf16, #tpu.memory_space<vmem>>, vector<32x64xbf16>
    %cst_175 = arith.constant dense<0.000000e+00> : vector<8x64xf32>
    %642 = tpu.matmul %640, %641, %cst_175 {dimension_numbers = #tpu.dot_dimension_numbers<[1], [0], [0], [1], [0, 0, 1, 1], [], []>} : vector<8x32xbf16>, vector<32x64xbf16>, vector<8x64xf32> -> vector<8x64xf32>
    %643 = arith.addf %639, %642 : vector<8x64xf32>
    %644 = vector.extract_strided_slice %643 {offsets = [0, 0], sizes = [8, 32], strides = [1, 1]} : vector<8x64xf32> to vector<8x32xf32>
    %645 = arith.negf %644 : vector<8x32xf32>
    %646 = math.exp %645 : vector<8x32xf32>
    %cst_176 = arith.constant 1.000000e+00 : f32
    %647 = vector.broadcast %cst_176 : f32 to vector<8x32xf32>
    %648 = arith.addf %647, %646 : vector<8x32xf32>
    %649 = arith.divf %647, %648 : vector<8x32xf32>
    %650 = vector.extract_strided_slice %643 {offsets = [0, 32], sizes = [8, 32], strides = [1, 1]} : vector<8x64xf32> to vector<8x32xf32>
    %651 = math.tanh %650 : vector<8x32xf32>
    %652 = arith.subf %651, %637 : vector<8x32xf32>
    %653 = arith.mulf %649, %652 : vector<8x32xf32>
    %654 = arith.addf %637, %653 : vector<8x32xf32>
    %c0_177 = arith.constant 0 : index
    %c0_178 = arith.constant 0 : index
    %655 = vector.load %arg5[%c0_177, %c0_178] : memref<32x256xbf16, #tpu.memory_space<vmem>>, vector<32x64xbf16>
    %656 = arith.truncf %654 : vector<8x32xf32> to vector<8x32xbf16>
    %cst_179 = arith.constant dense<0.000000e+00> : vector<8x64xf32>
    %657 = tpu.matmul %656, %655, %cst_179 {dimension_numbers = #tpu.dot_dimension_numbers<[1], [0], [0], [1], [0, 0, 1, 1], [], []>} : vector<8x32xbf16>, vector<32x64xbf16>, vector<8x64xf32> -> vector<8x64xf32>
    %658 = vector.extract_strided_slice %657 {offsets = [0, 0], sizes = [8, 32], strides = [1, 1]} : vector<8x64xf32> to vector<8x32xf32>
    %659 = arith.negf %658 : vector<8x32xf32>
    %660 = math.exp %659 : vector<8x32xf32>
    %cst_180 = arith.constant 1.000000e+00 : f32
    %661 = vector.broadcast %cst_180 : f32 to vector<8x32xf32>
    %662 = arith.addf %661, %660 : vector<8x32xf32>
    %663 = arith.divf %661, %662 : vector<8x32xf32>
    %664 = vector.extract_strided_slice %657 {offsets = [0, 32], sizes = [8, 32], strides = [1, 1]} : vector<8x64xf32> to vector<8x32xf32>
    %665 = math.tanh %664 : vector<8x32xf32>
    %666 = arith.subf %665, %654 : vector<8x32xf32>
    %667 = arith.mulf %663, %666 : vector<8x32xf32>
    %668 = arith.addf %654, %667 : vector<8x32xf32>
    %c0_181 = arith.constant 0 : index
    %c64_182 = arith.constant 64 : index
    %669 = vector.load %arg5[%c0_181, %c64_182] : memref<32x256xbf16, #tpu.memory_space<vmem>>, vector<32x128xbf16>
    %670 = arith.truncf %668 : vector<8x32xf32> to vector<8x32xbf16>
    %cst_183 = arith.constant dense<0.000000e+00> : vector<8x128xf32>
    %671 = tpu.matmul %670, %669, %cst_183 {dimension_numbers = #tpu.dot_dimension_numbers<[1], [0], [0], [1], [0, 0, 1, 1], [], []>} : vector<8x32xbf16>, vector<32x128xbf16>, vector<8x128xf32> -> vector<8x128xf32>
    %672 = vector.extract_strided_slice %671 {offsets = [0, 0], sizes = [8, 32], strides = [1, 1]} : vector<8x128xf32> to vector<8x32xf32>
    %673 = arith.negf %672 : vector<8x32xf32>
    %674 = math.exp %673 : vector<8x32xf32>
    %cst_184 = arith.constant 1.000000e+00 : f32
    %675 = vector.broadcast %cst_184 : f32 to vector<8x32xf32>
    %676 = arith.addf %675, %674 : vector<8x32xf32>
    %677 = arith.divf %675, %676 : vector<8x32xf32>
    %678 = vector.extract_strided_slice %671 {offsets = [0, 32], sizes = [8, 32], strides = [1, 1]} : vector<8x128xf32> to vector<8x32xf32>
    %cst_185 = arith.constant 0.000000e+00 : f32
    %679 = vector.broadcast %cst_185 : f32 to vector<8x32xf32>
    %680 = arith.maximumf %678, %679 : vector<8x32xf32>
    %681 = arith.subf %680, %668 : vector<8x32xf32>
    %682 = arith.mulf %677, %681 : vector<8x32xf32>
    %683 = arith.addf %668, %682 : vector<8x32xf32>
    %684 = vector.extract_strided_slice %671 {offsets = [0, 64], sizes = [8, 32], strides = [1, 1]} : vector<8x128xf32> to vector<8x32xf32>
    %685 = arith.negf %684 : vector<8x32xf32>
    %686 = math.exp %685 : vector<8x32xf32>
    %cst_186 = arith.constant 1.000000e+00 : f32
    %687 = vector.broadcast %cst_186 : f32 to vector<8x32xf32>
    %688 = arith.addf %687, %686 : vector<8x32xf32>
    %689 = arith.divf %687, %688 : vector<8x32xf32>
    %690 = vector.extract_strided_slice %671 {offsets = [0, 96], sizes = [8, 32], strides = [1, 1]} : vector<8x128xf32> to vector<8x32xf32>
    %691 = arith.negf %690 : vector<8x32xf32>
    %692 = math.exp %691 : vector<8x32xf32>
    %cst_187 = arith.constant 1.000000e+00 : f32
    %693 = vector.broadcast %cst_187 : f32 to vector<8x32xf32>
    %694 = arith.addf %693, %692 : vector<8x32xf32>
    %695 = arith.divf %693, %694 : vector<8x32xf32>
    %696 = arith.subf %695, %668 : vector<8x32xf32>
    %697 = arith.mulf %689, %696 : vector<8x32xf32>
    %698 = arith.addf %668, %697 : vector<8x32xf32>
    %c0_188 = arith.constant 0 : index
    %c192_189 = arith.constant 192 : index
    %699 = vector.load %arg5[%c0_188, %c192_189] : memref<32x256xbf16, #tpu.memory_space<vmem>>, vector<32x64xbf16>
    %700 = arith.truncf %683 : vector<8x32xf32> to vector<8x32xbf16>
    %cst_190 = arith.constant dense<0.000000e+00> : vector<8x64xf32>
    %701 = tpu.matmul %700, %699, %cst_190 {dimension_numbers = #tpu.dot_dimension_numbers<[1], [0], [0], [1], [0, 0, 1, 1], [], []>} : vector<8x32xbf16>, vector<32x64xbf16>, vector<8x64xf32> -> vector<8x64xf32>
    %702 = vector.extract_strided_slice %701 {offsets = [0, 0], sizes = [8, 32], strides = [1, 1]} : vector<8x64xf32> to vector<8x32xf32>
    %703 = arith.negf %702 : vector<8x32xf32>
    %704 = math.exp %703 : vector<8x32xf32>
    %cst_191 = arith.constant 1.000000e+00 : f32
    %705 = vector.broadcast %cst_191 : f32 to vector<8x32xf32>
    %706 = arith.addf %705, %704 : vector<8x32xf32>
    %707 = arith.divf %705, %706 : vector<8x32xf32>
    %708 = vector.extract_strided_slice %701 {offsets = [0, 32], sizes = [8, 32], strides = [1, 1]} : vector<8x64xf32> to vector<8x32xf32>
    %709 = arith.subf %708, %683 : vector<8x32xf32>
    %710 = arith.mulf %707, %709 : vector<8x32xf32>
    %711 = arith.addf %683, %710 : vector<8x32xf32>
    %712 = arith.addf %668, %683 : vector<8x32xf32>
    %713 = arith.addf %712, %698 : vector<8x32xf32>
    %714 = arith.addf %713, %711 : vector<8x32xf32>
    %cst_192 = arith.constant 2.500000e-01 : f32
    %715 = vector.broadcast %cst_192 : f32 to vector<8x32xf32>
    %716 = arith.mulf %714, %715 : vector<8x32xf32>
    %c64_193 = arith.constant 64 : index
    %c0_194 = arith.constant 0 : index
    %717 = vector.load %arg6[%c64_193, %c0_194] : memref<128x32xf32, #tpu.memory_space<vmem>>, vector<8x32xf32>
    tpu.vector_store %arg6[%c64_193, %c0_194], %716 {strides = array<i32>} : memref<128x32xf32, #tpu.memory_space<vmem>>, vector<8x32xf32>,
    %718 = vector.extract_strided_slice %5 {offsets = [72, 0], sizes = [8, 64], strides = [1, 1]} : vector<128x64xf32> to vector<8x64xf32>
    %719 = arith.truncf %716 : vector<8x32xf32> to vector<8x32xbf16>
    %c0_195 = arith.constant 0 : index
    %c0_196 = arith.constant 0 : index
    %720 = vector.load %arg4[%c0_195, %c0_196] : memref<32x64xbf16, #tpu.memory_space<vmem>>, vector<32x64xbf16>
    %cst_197 = arith.constant dense<0.000000e+00> : vector<8x64xf32>
    %721 = tpu.matmul %719, %720, %cst_197 {dimension_numbers = #tpu.dot_dimension_numbers<[1], [0], [0], [1], [0, 0, 1, 1], [], []>} : vector<8x32xbf16>, vector<32x64xbf16>, vector<8x64xf32> -> vector<8x64xf32>
    %722 = arith.addf %718, %721 : vector<8x64xf32>
    %723 = vector.extract_strided_slice %722 {offsets = [0, 0], sizes = [8, 32], strides = [1, 1]} : vector<8x64xf32> to vector<8x32xf32>
    %724 = arith.negf %723 : vector<8x32xf32>
    %725 = math.exp %724 : vector<8x32xf32>
    %cst_198 = arith.constant 1.000000e+00 : f32
    %726 = vector.broadcast %cst_198 : f32 to vector<8x32xf32>
    %727 = arith.addf %726, %725 : vector<8x32xf32>
    %728 = arith.divf %726, %727 : vector<8x32xf32>
    %729 = vector.extract_strided_slice %722 {offsets = [0, 32], sizes = [8, 32], strides = [1, 1]} : vector<8x64xf32> to vector<8x32xf32>
    %730 = math.tanh %729 : vector<8x32xf32>
    %731 = arith.subf %730, %716 : vector<8x32xf32>
    %732 = arith.mulf %728, %731 : vector<8x32xf32>
    %733 = arith.addf %716, %732 : vector<8x32xf32>
    %c0_199 = arith.constant 0 : index
    %c0_200 = arith.constant 0 : index
    %734 = vector.load %arg5[%c0_199, %c0_200] : memref<32x256xbf16, #tpu.memory_space<vmem>>, vector<32x64xbf16>
    %735 = arith.truncf %733 : vector<8x32xf32> to vector<8x32xbf16>
    %cst_201 = arith.constant dense<0.000000e+00> : vector<8x64xf32>
    %736 = tpu.matmul %735, %734, %cst_201 {dimension_numbers = #tpu.dot_dimension_numbers<[1], [0], [0], [1], [0, 0, 1, 1], [], []>} : vector<8x32xbf16>, vector<32x64xbf16>, vector<8x64xf32> -> vector<8x64xf32>
    %737 = vector.extract_strided_slice %736 {offsets = [0, 0], sizes = [8, 32], strides = [1, 1]} : vector<8x64xf32> to vector<8x32xf32>
    %738 = arith.negf %737 : vector<8x32xf32>
    %739 = math.exp %738 : vector<8x32xf32>
    %cst_202 = arith.constant 1.000000e+00 : f32
    %740 = vector.broadcast %cst_202 : f32 to vector<8x32xf32>
    %741 = arith.addf %740, %739 : vector<8x32xf32>
    %742 = arith.divf %740, %741 : vector<8x32xf32>
    %743 = vector.extract_strided_slice %736 {offsets = [0, 32], sizes = [8, 32], strides = [1, 1]} : vector<8x64xf32> to vector<8x32xf32>
    %744 = math.tanh %743 : vector<8x32xf32>
    %745 = arith.subf %744, %733 : vector<8x32xf32>
    %746 = arith.mulf %742, %745 : vector<8x32xf32>
    %747 = arith.addf %733, %746 : vector<8x32xf32>
    %c0_203 = arith.constant 0 : index
    %c64_204 = arith.constant 64 : index
    %748 = vector.load %arg5[%c0_203, %c64_204] : memref<32x256xbf16, #tpu.memory_space<vmem>>, vector<32x128xbf16>
    %749 = arith.truncf %747 : vector<8x32xf32> to vector<8x32xbf16>
    %cst_205 = arith.constant dense<0.000000e+00> : vector<8x128xf32>
    %750 = tpu.matmul %749, %748, %cst_205 {dimension_numbers = #tpu.dot_dimension_numbers<[1], [0], [0], [1], [0, 0, 1, 1], [], []>} : vector<8x32xbf16>, vector<32x128xbf16>, vector<8x128xf32> -> vector<8x128xf32>
    %751 = vector.extract_strided_slice %750 {offsets = [0, 0], sizes = [8, 32], strides = [1, 1]} : vector<8x128xf32> to vector<8x32xf32>
    %752 = arith.negf %751 : vector<8x32xf32>
    %753 = math.exp %752 : vector<8x32xf32>
    %cst_206 = arith.constant 1.000000e+00 : f32
    %754 = vector.broadcast %cst_206 : f32 to vector<8x32xf32>
    %755 = arith.addf %754, %753 : vector<8x32xf32>
    %756 = arith.divf %754, %755 : vector<8x32xf32>
    %757 = vector.extract_strided_slice %750 {offsets = [0, 32], sizes = [8, 32], strides = [1, 1]} : vector<8x128xf32> to vector<8x32xf32>
    %cst_207 = arith.constant 0.000000e+00 : f32
    %758 = vector.broadcast %cst_207 : f32 to vector<8x32xf32>
    %759 = arith.maximumf %757, %758 : vector<8x32xf32>
    %760 = arith.subf %759, %747 : vector<8x32xf32>
    %761 = arith.mulf %756, %760 : vector<8x32xf32>
    %762 = arith.addf %747, %761 : vector<8x32xf32>
    %763 = vector.extract_strided_slice %750 {offsets = [0, 64], sizes = [8, 32], strides = [1, 1]} : vector<8x128xf32> to vector<8x32xf32>
    %764 = arith.negf %763 : vector<8x32xf32>
    %765 = math.exp %764 : vector<8x32xf32>
    %cst_208 = arith.constant 1.000000e+00 : f32
    %766 = vector.broadcast %cst_208 : f32 to vector<8x32xf32>
    %767 = arith.addf %766, %765 : vector<8x32xf32>
    %768 = arith.divf %766, %767 : vector<8x32xf32>
    %769 = vector.extract_strided_slice %750 {offsets = [0, 96], sizes = [8, 32], strides = [1, 1]} : vector<8x128xf32> to vector<8x32xf32>
    %770 = arith.negf %769 : vector<8x32xf32>
    %771 = math.exp %770 : vector<8x32xf32>
    %cst_209 = arith.constant 1.000000e+00 : f32
    %772 = vector.broadcast %cst_209 : f32 to vector<8x32xf32>
    %773 = arith.addf %772, %771 : vector<8x32xf32>
    %774 = arith.divf %772, %773 : vector<8x32xf32>
    %775 = arith.subf %774, %747 : vector<8x32xf32>
    %776 = arith.mulf %768, %775 : vector<8x32xf32>
    %777 = arith.addf %747, %776 : vector<8x32xf32>
    %c0_210 = arith.constant 0 : index
    %c192_211 = arith.constant 192 : index
    %778 = vector.load %arg5[%c0_210, %c192_211] : memref<32x256xbf16, #tpu.memory_space<vmem>>, vector<32x64xbf16>
    %779 = arith.truncf %762 : vector<8x32xf32> to vector<8x32xbf16>
    %cst_212 = arith.constant dense<0.000000e+00> : vector<8x64xf32>
    %780 = tpu.matmul %779, %778, %cst_212 {dimension_numbers = #tpu.dot_dimension_numbers<[1], [0], [0], [1], [0, 0, 1, 1], [], []>} : vector<8x32xbf16>, vector<32x64xbf16>, vector<8x64xf32> -> vector<8x64xf32>
    %781 = vector.extract_strided_slice %780 {offsets = [0, 0], sizes = [8, 32], strides = [1, 1]} : vector<8x64xf32> to vector<8x32xf32>
    %782 = arith.negf %781 : vector<8x32xf32>
    %783 = math.exp %782 : vector<8x32xf32>
    %cst_213 = arith.constant 1.000000e+00 : f32
    %784 = vector.broadcast %cst_213 : f32 to vector<8x32xf32>
    %785 = arith.addf %784, %783 : vector<8x32xf32>
    %786 = arith.divf %784, %785 : vector<8x32xf32>
    %787 = vector.extract_strided_slice %780 {offsets = [0, 32], sizes = [8, 32], strides = [1, 1]} : vector<8x64xf32> to vector<8x32xf32>
    %788 = arith.subf %787, %762 : vector<8x32xf32>
    %789 = arith.mulf %786, %788 : vector<8x32xf32>
    %790 = arith.addf %762, %789 : vector<8x32xf32>
    %791 = arith.addf %747, %762 : vector<8x32xf32>
    %792 = arith.addf %791, %777 : vector<8x32xf32>
    %793 = arith.addf %792, %790 : vector<8x32xf32>
    %cst_214 = arith.constant 2.500000e-01 : f32
    %794 = vector.broadcast %cst_214 : f32 to vector<8x32xf32>
    %795 = arith.mulf %793, %794 : vector<8x32xf32>
    %c72 = arith.constant 72 : index
    %c0_215 = arith.constant 0 : index
    %796 = vector.load %arg6[%c72, %c0_215] : memref<128x32xf32, #tpu.memory_space<vmem>>, vector<8x32xf32>
    tpu.vector_store %arg6[%c72, %c0_215], %795 {strides = array<i32>} : memref<128x32xf32, #tpu.memory_space<vmem>>, vector<8x32xf32>,
    %797 = vector.extract_strided_slice %5 {offsets = [80, 0], sizes = [8, 64], strides = [1, 1]} : vector<128x64xf32> to vector<8x64xf32>
    %798 = arith.truncf %795 : vector<8x32xf32> to vector<8x32xbf16>
    %c0_216 = arith.constant 0 : index
    %c0_217 = arith.constant 0 : index
    %799 = vector.load %arg4[%c0_216, %c0_217] : memref<32x64xbf16, #tpu.memory_space<vmem>>, vector<32x64xbf16>
    %cst_218 = arith.constant dense<0.000000e+00> : vector<8x64xf32>
    %800 = tpu.matmul %798, %799, %cst_218 {dimension_numbers = #tpu.dot_dimension_numbers<[1], [0], [0], [1], [0, 0, 1, 1], [], []>} : vector<8x32xbf16>, vector<32x64xbf16>, vector<8x64xf32> -> vector<8x64xf32>
    %801 = arith.addf %797, %800 : vector<8x64xf32>
    %802 = vector.extract_strided_slice %801 {offsets = [0, 0], sizes = [8, 32], strides = [1, 1]} : vector<8x64xf32> to vector<8x32xf32>
    %803 = arith.negf %802 : vector<8x32xf32>
    %804 = math.exp %803 : vector<8x32xf32>
    %cst_219 = arith.constant 1.000000e+00 : f32
    %805 = vector.broadcast %cst_219 : f32 to vector<8x32xf32>
    %806 = arith.addf %805, %804 : vector<8x32xf32>
    %807 = arith.divf %805, %806 : vector<8x32xf32>
    %808 = vector.extract_strided_slice %801 {offsets = [0, 32], sizes = [8, 32], strides = [1, 1]} : vector<8x64xf32> to vector<8x32xf32>
    %809 = math.tanh %808 : vector<8x32xf32>
    %810 = arith.subf %809, %795 : vector<8x32xf32>
    %811 = arith.mulf %807, %810 : vector<8x32xf32>
    %812 = arith.addf %795, %811 : vector<8x32xf32>
    %c0_220 = arith.constant 0 : index
    %c0_221 = arith.constant 0 : index
    %813 = vector.load %arg5[%c0_220, %c0_221] : memref<32x256xbf16, #tpu.memory_space<vmem>>, vector<32x64xbf16>
    %814 = arith.truncf %812 : vector<8x32xf32> to vector<8x32xbf16>
    %cst_222 = arith.constant dense<0.000000e+00> : vector<8x64xf32>
    %815 = tpu.matmul %814, %813, %cst_222 {dimension_numbers = #tpu.dot_dimension_numbers<[1], [0], [0], [1], [0, 0, 1, 1], [], []>} : vector<8x32xbf16>, vector<32x64xbf16>, vector<8x64xf32> -> vector<8x64xf32>
    %816 = vector.extract_strided_slice %815 {offsets = [0, 0], sizes = [8, 32], strides = [1, 1]} : vector<8x64xf32> to vector<8x32xf32>
    %817 = arith.negf %816 : vector<8x32xf32>
    %818 = math.exp %817 : vector<8x32xf32>
    %cst_223 = arith.constant 1.000000e+00 : f32
    %819 = vector.broadcast %cst_223 : f32 to vector<8x32xf32>
    %820 = arith.addf %819, %818 : vector<8x32xf32>
    %821 = arith.divf %819, %820 : vector<8x32xf32>
    %822 = vector.extract_strided_slice %815 {offsets = [0, 32], sizes = [8, 32], strides = [1, 1]} : vector<8x64xf32> to vector<8x32xf32>
    %823 = math.tanh %822 : vector<8x32xf32>
    %824 = arith.subf %823, %812 : vector<8x32xf32>
    %825 = arith.mulf %821, %824 : vector<8x32xf32>
    %826 = arith.addf %812, %825 : vector<8x32xf32>
    %c0_224 = arith.constant 0 : index
    %c64_225 = arith.constant 64 : index
    %827 = vector.load %arg5[%c0_224, %c64_225] : memref<32x256xbf16, #tpu.memory_space<vmem>>, vector<32x128xbf16>
    %828 = arith.truncf %826 : vector<8x32xf32> to vector<8x32xbf16>
    %cst_226 = arith.constant dense<0.000000e+00> : vector<8x128xf32>
    %829 = tpu.matmul %828, %827, %cst_226 {dimension_numbers = #tpu.dot_dimension_numbers<[1], [0], [0], [1], [0, 0, 1, 1], [], []>} : vector<8x32xbf16>, vector<32x128xbf16>, vector<8x128xf32> -> vector<8x128xf32>
    %830 = vector.extract_strided_slice %829 {offsets = [0, 0], sizes = [8, 32], strides = [1, 1]} : vector<8x128xf32> to vector<8x32xf32>
    %831 = arith.negf %830 : vector<8x32xf32>
    %832 = math.exp %831 : vector<8x32xf32>
    %cst_227 = arith.constant 1.000000e+00 : f32
    %833 = vector.broadcast %cst_227 : f32 to vector<8x32xf32>
    %834 = arith.addf %833, %832 : vector<8x32xf32>
    %835 = arith.divf %833, %834 : vector<8x32xf32>
    %836 = vector.extract_strided_slice %829 {offsets = [0, 32], sizes = [8, 32], strides = [1, 1]} : vector<8x128xf32> to vector<8x32xf32>
    %cst_228 = arith.constant 0.000000e+00 : f32
    %837 = vector.broadcast %cst_228 : f32 to vector<8x32xf32>
    %838 = arith.maximumf %836, %837 : vector<8x32xf32>
    %839 = arith.subf %838, %826 : vector<8x32xf32>
    %840 = arith.mulf %835, %839 : vector<8x32xf32>
    %841 = arith.addf %826, %840 : vector<8x32xf32>
    %842 = vector.extract_strided_slice %829 {offsets = [0, 64], sizes = [8, 32], strides = [1, 1]} : vector<8x128xf32> to vector<8x32xf32>
    %843 = arith.negf %842 : vector<8x32xf32>
    %844 = math.exp %843 : vector<8x32xf32>
    %cst_229 = arith.constant 1.000000e+00 : f32
    %845 = vector.broadcast %cst_229 : f32 to vector<8x32xf32>
    %846 = arith.addf %845, %844 : vector<8x32xf32>
    %847 = arith.divf %845, %846 : vector<8x32xf32>
    %848 = vector.extract_strided_slice %829 {offsets = [0, 96], sizes = [8, 32], strides = [1, 1]} : vector<8x128xf32> to vector<8x32xf32>
    %849 = arith.negf %848 : vector<8x32xf32>
    %850 = math.exp %849 : vector<8x32xf32>
    %cst_230 = arith.constant 1.000000e+00 : f32
    %851 = vector.broadcast %cst_230 : f32 to vector<8x32xf32>
    %852 = arith.addf %851, %850 : vector<8x32xf32>
    %853 = arith.divf %851, %852 : vector<8x32xf32>
    %854 = arith.subf %853, %826 : vector<8x32xf32>
    %855 = arith.mulf %847, %854 : vector<8x32xf32>
    %856 = arith.addf %826, %855 : vector<8x32xf32>
    %c0_231 = arith.constant 0 : index
    %c192_232 = arith.constant 192 : index
    %857 = vector.load %arg5[%c0_231, %c192_232] : memref<32x256xbf16, #tpu.memory_space<vmem>>, vector<32x64xbf16>
    %858 = arith.truncf %841 : vector<8x32xf32> to vector<8x32xbf16>
    %cst_233 = arith.constant dense<0.000000e+00> : vector<8x64xf32>
    %859 = tpu.matmul %858, %857, %cst_233 {dimension_numbers = #tpu.dot_dimension_numbers<[1], [0], [0], [1], [0, 0, 1, 1], [], []>} : vector<8x32xbf16>, vector<32x64xbf16>, vector<8x64xf32> -> vector<8x64xf32>
    %860 = vector.extract_strided_slice %859 {offsets = [0, 0], sizes = [8, 32], strides = [1, 1]} : vector<8x64xf32> to vector<8x32xf32>
    %861 = arith.negf %860 : vector<8x32xf32>
    %862 = math.exp %861 : vector<8x32xf32>
    %cst_234 = arith.constant 1.000000e+00 : f32
    %863 = vector.broadcast %cst_234 : f32 to vector<8x32xf32>
    %864 = arith.addf %863, %862 : vector<8x32xf32>
    %865 = arith.divf %863, %864 : vector<8x32xf32>
    %866 = vector.extract_strided_slice %859 {offsets = [0, 32], sizes = [8, 32], strides = [1, 1]} : vector<8x64xf32> to vector<8x32xf32>
    %867 = arith.subf %866, %841 : vector<8x32xf32>
    %868 = arith.mulf %865, %867 : vector<8x32xf32>
    %869 = arith.addf %841, %868 : vector<8x32xf32>
    %870 = arith.addf %826, %841 : vector<8x32xf32>
    %871 = arith.addf %870, %856 : vector<8x32xf32>
    %872 = arith.addf %871, %869 : vector<8x32xf32>
    %cst_235 = arith.constant 2.500000e-01 : f32
    %873 = vector.broadcast %cst_235 : f32 to vector<8x32xf32>
    %874 = arith.mulf %872, %873 : vector<8x32xf32>
    %c80 = arith.constant 80 : index
    %c0_236 = arith.constant 0 : index
    %875 = vector.load %arg6[%c80, %c0_236] : memref<128x32xf32, #tpu.memory_space<vmem>>, vector<8x32xf32>
    tpu.vector_store %arg6[%c80, %c0_236], %874 {strides = array<i32>} : memref<128x32xf32, #tpu.memory_space<vmem>>, vector<8x32xf32>,
    %876 = vector.extract_strided_slice %5 {offsets = [88, 0], sizes = [8, 64], strides = [1, 1]} : vector<128x64xf32> to vector<8x64xf32>
    %877 = arith.truncf %874 : vector<8x32xf32> to vector<8x32xbf16>
    %c0_237 = arith.constant 0 : index
    %c0_238 = arith.constant 0 : index
    %878 = vector.load %arg4[%c0_237, %c0_238] : memref<32x64xbf16, #tpu.memory_space<vmem>>, vector<32x64xbf16>
    %cst_239 = arith.constant dense<0.000000e+00> : vector<8x64xf32>
    %879 = tpu.matmul %877, %878, %cst_239 {dimension_numbers = #tpu.dot_dimension_numbers<[1], [0], [0], [1], [0, 0, 1, 1], [], []>} : vector<8x32xbf16>, vector<32x64xbf16>, vector<8x64xf32> -> vector<8x64xf32>
    %880 = arith.addf %876, %879 : vector<8x64xf32>
    %881 = vector.extract_strided_slice %880 {offsets = [0, 0], sizes = [8, 32], strides = [1, 1]} : vector<8x64xf32> to vector<8x32xf32>
    %882 = arith.negf %881 : vector<8x32xf32>
    %883 = math.exp %882 : vector<8x32xf32>
    %cst_240 = arith.constant 1.000000e+00 : f32
    %884 = vector.broadcast %cst_240 : f32 to vector<8x32xf32>
    %885 = arith.addf %884, %883 : vector<8x32xf32>
    %886 = arith.divf %884, %885 : vector<8x32xf32>
    %887 = vector.extract_strided_slice %880 {offsets = [0, 32], sizes = [8, 32], strides = [1, 1]} : vector<8x64xf32> to vector<8x32xf32>
    %888 = math.tanh %887 : vector<8x32xf32>
    %889 = arith.subf %888, %874 : vector<8x32xf32>
    %890 = arith.mulf %886, %889 : vector<8x32xf32>
    %891 = arith.addf %874, %890 : vector<8x32xf32>
    %c0_241 = arith.constant 0 : index
    %c0_242 = arith.constant 0 : index
    %892 = vector.load %arg5[%c0_241, %c0_242] : memref<32x256xbf16, #tpu.memory_space<vmem>>, vector<32x64xbf16>
    %893 = arith.truncf %891 : vector<8x32xf32> to vector<8x32xbf16>
    %cst_243 = arith.constant dense<0.000000e+00> : vector<8x64xf32>
    %894 = tpu.matmul %893, %892, %cst_243 {dimension_numbers = #tpu.dot_dimension_numbers<[1], [0], [0], [1], [0, 0, 1, 1], [], []>} : vector<8x32xbf16>, vector<32x64xbf16>, vector<8x64xf32> -> vector<8x64xf32>
    %895 = vector.extract_strided_slice %894 {offsets = [0, 0], sizes = [8, 32], strides = [1, 1]} : vector<8x64xf32> to vector<8x32xf32>
    %896 = arith.negf %895 : vector<8x32xf32>
    %897 = math.exp %896 : vector<8x32xf32>
    %cst_244 = arith.constant 1.000000e+00 : f32
    %898 = vector.broadcast %cst_244 : f32 to vector<8x32xf32>
    %899 = arith.addf %898, %897 : vector<8x32xf32>
    %900 = arith.divf %898, %899 : vector<8x32xf32>
    %901 = vector.extract_strided_slice %894 {offsets = [0, 32], sizes = [8, 32], strides = [1, 1]} : vector<8x64xf32> to vector<8x32xf32>
    %902 = math.tanh %901 : vector<8x32xf32>
    %903 = arith.subf %902, %891 : vector<8x32xf32>
    %904 = arith.mulf %900, %903 : vector<8x32xf32>
    %905 = arith.addf %891, %904 : vector<8x32xf32>
    %c0_245 = arith.constant 0 : index
    %c64_246 = arith.constant 64 : index
    %906 = vector.load %arg5[%c0_245, %c64_246] : memref<32x256xbf16, #tpu.memory_space<vmem>>, vector<32x128xbf16>
    %907 = arith.truncf %905 : vector<8x32xf32> to vector<8x32xbf16>
    %cst_247 = arith.constant dense<0.000000e+00> : vector<8x128xf32>
    %908 = tpu.matmul %907, %906, %cst_247 {dimension_numbers = #tpu.dot_dimension_numbers<[1], [0], [0], [1], [0, 0, 1, 1], [], []>} : vector<8x32xbf16>, vector<32x128xbf16>, vector<8x128xf32> -> vector<8x128xf32>
    %909 = vector.extract_strided_slice %908 {offsets = [0, 0], sizes = [8, 32], strides = [1, 1]} : vector<8x128xf32> to vector<8x32xf32>
    %910 = arith.negf %909 : vector<8x32xf32>
    %911 = math.exp %910 : vector<8x32xf32>
    %cst_248 = arith.constant 1.000000e+00 : f32
    %912 = vector.broadcast %cst_248 : f32 to vector<8x32xf32>
    %913 = arith.addf %912, %911 : vector<8x32xf32>
    %914 = arith.divf %912, %913 : vector<8x32xf32>
    %915 = vector.extract_strided_slice %908 {offsets = [0, 32], sizes = [8, 32], strides = [1, 1]} : vector<8x128xf32> to vector<8x32xf32>
    %cst_249 = arith.constant 0.000000e+00 : f32
    %916 = vector.broadcast %cst_249 : f32 to vector<8x32xf32>
    %917 = arith.maximumf %915, %916 : vector<8x32xf32>
    %918 = arith.subf %917, %905 : vector<8x32xf32>
    %919 = arith.mulf %914, %918 : vector<8x32xf32>
    %920 = arith.addf %905, %919 : vector<8x32xf32>
    %921 = vector.extract_strided_slice %908 {offsets = [0, 64], sizes = [8, 32], strides = [1, 1]} : vector<8x128xf32> to vector<8x32xf32>
    %922 = arith.negf %921 : vector<8x32xf32>
    %923 = math.exp %922 : vector<8x32xf32>
    %cst_250 = arith.constant 1.000000e+00 : f32
    %924 = vector.broadcast %cst_250 : f32 to vector<8x32xf32>
    %925 = arith.addf %924, %923 : vector<8x32xf32>
    %926 = arith.divf %924, %925 : vector<8x32xf32>
    %927 = vector.extract_strided_slice %908 {offsets = [0, 96], sizes = [8, 32], strides = [1, 1]} : vector<8x128xf32> to vector<8x32xf32>
    %928 = arith.negf %927 : vector<8x32xf32>
    %929 = math.exp %928 : vector<8x32xf32>
    %cst_251 = arith.constant 1.000000e+00 : f32
    %930 = vector.broadcast %cst_251 : f32 to vector<8x32xf32>
    %931 = arith.addf %930, %929 : vector<8x32xf32>
    %932 = arith.divf %930, %931 : vector<8x32xf32>
    %933 = arith.subf %932, %905 : vector<8x32xf32>
    %934 = arith.mulf %926, %933 : vector<8x32xf32>
    %935 = arith.addf %905, %934 : vector<8x32xf32>
    %c0_252 = arith.constant 0 : index
    %c192_253 = arith.constant 192 : index
    %936 = vector.load %arg5[%c0_252, %c192_253] : memref<32x256xbf16, #tpu.memory_space<vmem>>, vector<32x64xbf16>
    %937 = arith.truncf %920 : vector<8x32xf32> to vector<8x32xbf16>
    %cst_254 = arith.constant dense<0.000000e+00> : vector<8x64xf32>
    %938 = tpu.matmul %937, %936, %cst_254 {dimension_numbers = #tpu.dot_dimension_numbers<[1], [0], [0], [1], [0, 0, 1, 1], [], []>} : vector<8x32xbf16>, vector<32x64xbf16>, vector<8x64xf32> -> vector<8x64xf32>
    %939 = vector.extract_strided_slice %938 {offsets = [0, 0], sizes = [8, 32], strides = [1, 1]} : vector<8x64xf32> to vector<8x32xf32>
    %940 = arith.negf %939 : vector<8x32xf32>
    %941 = math.exp %940 : vector<8x32xf32>
    %cst_255 = arith.constant 1.000000e+00 : f32
    %942 = vector.broadcast %cst_255 : f32 to vector<8x32xf32>
    %943 = arith.addf %942, %941 : vector<8x32xf32>
    %944 = arith.divf %942, %943 : vector<8x32xf32>
    %945 = vector.extract_strided_slice %938 {offsets = [0, 32], sizes = [8, 32], strides = [1, 1]} : vector<8x64xf32> to vector<8x32xf32>
    %946 = arith.subf %945, %920 : vector<8x32xf32>
    %947 = arith.mulf %944, %946 : vector<8x32xf32>
    %948 = arith.addf %920, %947 : vector<8x32xf32>
    %949 = arith.addf %905, %920 : vector<8x32xf32>
    %950 = arith.addf %949, %935 : vector<8x32xf32>
    %951 = arith.addf %950, %948 : vector<8x32xf32>
    %cst_256 = arith.constant 2.500000e-01 : f32
    %952 = vector.broadcast %cst_256 : f32 to vector<8x32xf32>
    %953 = arith.mulf %951, %952 : vector<8x32xf32>
    %c88 = arith.constant 88 : index
    %c0_257 = arith.constant 0 : index
    %954 = vector.load %arg6[%c88, %c0_257] : memref<128x32xf32, #tpu.memory_space<vmem>>, vector<8x32xf32>
    tpu.vector_store %arg6[%c88, %c0_257], %953 {strides = array<i32>} : memref<128x32xf32, #tpu.memory_space<vmem>>, vector<8x32xf32>,
    %955 = vector.extract_strided_slice %5 {offsets = [96, 0], sizes = [8, 64], strides = [1, 1]} : vector<128x64xf32> to vector<8x64xf32>
    %956 = arith.truncf %953 : vector<8x32xf32> to vector<8x32xbf16>
    %c0_258 = arith.constant 0 : index
    %c0_259 = arith.constant 0 : index
    %957 = vector.load %arg4[%c0_258, %c0_259] : memref<32x64xbf16, #tpu.memory_space<vmem>>, vector<32x64xbf16>
    %cst_260 = arith.constant dense<0.000000e+00> : vector<8x64xf32>
    %958 = tpu.matmul %956, %957, %cst_260 {dimension_numbers = #tpu.dot_dimension_numbers<[1], [0], [0], [1], [0, 0, 1, 1], [], []>} : vector<8x32xbf16>, vector<32x64xbf16>, vector<8x64xf32> -> vector<8x64xf32>
    %959 = arith.addf %955, %958 : vector<8x64xf32>
    %960 = vector.extract_strided_slice %959 {offsets = [0, 0], sizes = [8, 32], strides = [1, 1]} : vector<8x64xf32> to vector<8x32xf32>
    %961 = arith.negf %960 : vector<8x32xf32>
    %962 = math.exp %961 : vector<8x32xf32>
    %cst_261 = arith.constant 1.000000e+00 : f32
    %963 = vector.broadcast %cst_261 : f32 to vector<8x32xf32>
    %964 = arith.addf %963, %962 : vector<8x32xf32>
    %965 = arith.divf %963, %964 : vector<8x32xf32>
    %966 = vector.extract_strided_slice %959 {offsets = [0, 32], sizes = [8, 32], strides = [1, 1]} : vector<8x64xf32> to vector<8x32xf32>
    %967 = math.tanh %966 : vector<8x32xf32>
    %968 = arith.subf %967, %953 : vector<8x32xf32>
    %969 = arith.mulf %965, %968 : vector<8x32xf32>
    %970 = arith.addf %953, %969 : vector<8x32xf32>
    %c0_262 = arith.constant 0 : index
    %c0_263 = arith.constant 0 : index
    %971 = vector.load %arg5[%c0_262, %c0_263] : memref<32x256xbf16, #tpu.memory_space<vmem>>, vector<32x64xbf16>
    %972 = arith.truncf %970 : vector<8x32xf32> to vector<8x32xbf16>
    %cst_264 = arith.constant dense<0.000000e+00> : vector<8x64xf32>
    %973 = tpu.matmul %972, %971, %cst_264 {dimension_numbers = #tpu.dot_dimension_numbers<[1], [0], [0], [1], [0, 0, 1, 1], [], []>} : vector<8x32xbf16>, vector<32x64xbf16>, vector<8x64xf32> -> vector<8x64xf32>
    %974 = vector.extract_strided_slice %973 {offsets = [0, 0], sizes = [8, 32], strides = [1, 1]} : vector<8x64xf32> to vector<8x32xf32>
    %975 = arith.negf %974 : vector<8x32xf32>
    %976 = math.exp %975 : vector<8x32xf32>
    %cst_265 = arith.constant 1.000000e+00 : f32
    %977 = vector.broadcast %cst_265 : f32 to vector<8x32xf32>
    %978 = arith.addf %977, %976 : vector<8x32xf32>
    %979 = arith.divf %977, %978 : vector<8x32xf32>
    %980 = vector.extract_strided_slice %973 {offsets = [0, 32], sizes = [8, 32], strides = [1, 1]} : vector<8x64xf32> to vector<8x32xf32>
    %981 = math.tanh %980 : vector<8x32xf32>
    %982 = arith.subf %981, %970 : vector<8x32xf32>
    %983 = arith.mulf %979, %982 : vector<8x32xf32>
    %984 = arith.addf %970, %983 : vector<8x32xf32>
    %c0_266 = arith.constant 0 : index
    %c64_267 = arith.constant 64 : index
    %985 = vector.load %arg5[%c0_266, %c64_267] : memref<32x256xbf16, #tpu.memory_space<vmem>>, vector<32x128xbf16>
    %986 = arith.truncf %984 : vector<8x32xf32> to vector<8x32xbf16>
    %cst_268 = arith.constant dense<0.000000e+00> : vector<8x128xf32>
    %987 = tpu.matmul %986, %985, %cst_268 {dimension_numbers = #tpu.dot_dimension_numbers<[1], [0], [0], [1], [0, 0, 1, 1], [], []>} : vector<8x32xbf16>, vector<32x128xbf16>, vector<8x128xf32> -> vector<8x128xf32>
    %988 = vector.extract_strided_slice %987 {offsets = [0, 0], sizes = [8, 32], strides = [1, 1]} : vector<8x128xf32> to vector<8x32xf32>
    %989 = arith.negf %988 : vector<8x32xf32>
    %990 = math.exp %989 : vector<8x32xf32>
    %cst_269 = arith.constant 1.000000e+00 : f32
    %991 = vector.broadcast %cst_269 : f32 to vector<8x32xf32>
    %992 = arith.addf %991, %990 : vector<8x32xf32>
    %993 = arith.divf %991, %992 : vector<8x32xf32>
    %994 = vector.extract_strided_slice %987 {offsets = [0, 32], sizes = [8, 32], strides = [1, 1]} : vector<8x128xf32> to vector<8x32xf32>
    %cst_270 = arith.constant 0.000000e+00 : f32
    %995 = vector.broadcast %cst_270 : f32 to vector<8x32xf32>
    %996 = arith.maximumf %994, %995 : vector<8x32xf32>
    %997 = arith.subf %996, %984 : vector<8x32xf32>
    %998 = arith.mulf %993, %997 : vector<8x32xf32>
    %999 = arith.addf %984, %998 : vector<8x32xf32>
    %1000 = vector.extract_strided_slice %987 {offsets = [0, 64], sizes = [8, 32], strides = [1, 1]} : vector<8x128xf32> to vector<8x32xf32>
    %1001 = arith.negf %1000 : vector<8x32xf32>
    %1002 = math.exp %1001 : vector<8x32xf32>
    %cst_271 = arith.constant 1.000000e+00 : f32
    %1003 = vector.broadcast %cst_271 : f32 to vector<8x32xf32>
    %1004 = arith.addf %1003, %1002 : vector<8x32xf32>
    %1005 = arith.divf %1003, %1004 : vector<8x32xf32>
    %1006 = vector.extract_strided_slice %987 {offsets = [0, 96], sizes = [8, 32], strides = [1, 1]} : vector<8x128xf32> to vector<8x32xf32>
    %1007 = arith.negf %1006 : vector<8x32xf32>
    %1008 = math.exp %1007 : vector<8x32xf32>
    %cst_272 = arith.constant 1.000000e+00 : f32
    %1009 = vector.broadcast %cst_272 : f32 to vector<8x32xf32>
    %1010 = arith.addf %1009, %1008 : vector<8x32xf32>
    %1011 = arith.divf %1009, %1010 : vector<8x32xf32>
    %1012 = arith.subf %1011, %984 : vector<8x32xf32>
    %1013 = arith.mulf %1005, %1012 : vector<8x32xf32>
    %1014 = arith.addf %984, %1013 : vector<8x32xf32>
    %c0_273 = arith.constant 0 : index
    %c192_274 = arith.constant 192 : index
    %1015 = vector.load %arg5[%c0_273, %c192_274] : memref<32x256xbf16, #tpu.memory_space<vmem>>, vector<32x64xbf16>
    %1016 = arith.truncf %999 : vector<8x32xf32> to vector<8x32xbf16>
    %cst_275 = arith.constant dense<0.000000e+00> : vector<8x64xf32>
    %1017 = tpu.matmul %1016, %1015, %cst_275 {dimension_numbers = #tpu.dot_dimension_numbers<[1], [0], [0], [1], [0, 0, 1, 1], [], []>} : vector<8x32xbf16>, vector<32x64xbf16>, vector<8x64xf32> -> vector<8x64xf32>
    %1018 = vector.extract_strided_slice %1017 {offsets = [0, 0], sizes = [8, 32], strides = [1, 1]} : vector<8x64xf32> to vector<8x32xf32>
    %1019 = arith.negf %1018 : vector<8x32xf32>
    %1020 = math.exp %1019 : vector<8x32xf32>
    %cst_276 = arith.constant 1.000000e+00 : f32
    %1021 = vector.broadcast %cst_276 : f32 to vector<8x32xf32>
    %1022 = arith.addf %1021, %1020 : vector<8x32xf32>
    %1023 = arith.divf %1021, %1022 : vector<8x32xf32>
    %1024 = vector.extract_strided_slice %1017 {offsets = [0, 32], sizes = [8, 32], strides = [1, 1]} : vector<8x64xf32> to vector<8x32xf32>
    %1025 = arith.subf %1024, %999 : vector<8x32xf32>
    %1026 = arith.mulf %1023, %1025 : vector<8x32xf32>
    %1027 = arith.addf %999, %1026 : vector<8x32xf32>
    %1028 = arith.addf %984, %999 : vector<8x32xf32>
    %1029 = arith.addf %1028, %1014 : vector<8x32xf32>
    %1030 = arith.addf %1029, %1027 : vector<8x32xf32>
    %cst_277 = arith.constant 2.500000e-01 : f32
    %1031 = vector.broadcast %cst_277 : f32 to vector<8x32xf32>
    %1032 = arith.mulf %1030, %1031 : vector<8x32xf32>
    %c96 = arith.constant 96 : index
    %c0_278 = arith.constant 0 : index
    %1033 = vector.load %arg6[%c96, %c0_278] : memref<128x32xf32, #tpu.memory_space<vmem>>, vector<8x32xf32>
    tpu.vector_store %arg6[%c96, %c0_278], %1032 {strides = array<i32>} : memref<128x32xf32, #tpu.memory_space<vmem>>, vector<8x32xf32>,
    %1034 = vector.extract_strided_slice %5 {offsets = [104, 0], sizes = [8, 64], strides = [1, 1]} : vector<128x64xf32> to vector<8x64xf32>
    %1035 = arith.truncf %1032 : vector<8x32xf32> to vector<8x32xbf16>
    %c0_279 = arith.constant 0 : index
    %c0_280 = arith.constant 0 : index
    %1036 = vector.load %arg4[%c0_279, %c0_280] : memref<32x64xbf16, #tpu.memory_space<vmem>>, vector<32x64xbf16>
    %cst_281 = arith.constant dense<0.000000e+00> : vector<8x64xf32>
    %1037 = tpu.matmul %1035, %1036, %cst_281 {dimension_numbers = #tpu.dot_dimension_numbers<[1], [0], [0], [1], [0, 0, 1, 1], [], []>} : vector<8x32xbf16>, vector<32x64xbf16>, vector<8x64xf32> -> vector<8x64xf32>
    %1038 = arith.addf %1034, %1037 : vector<8x64xf32>
    %1039 = vector.extract_strided_slice %1038 {offsets = [0, 0], sizes = [8, 32], strides = [1, 1]} : vector<8x64xf32> to vector<8x32xf32>
    %1040 = arith.negf %1039 : vector<8x32xf32>
    %1041 = math.exp %1040 : vector<8x32xf32>
    %cst_282 = arith.constant 1.000000e+00 : f32
    %1042 = vector.broadcast %cst_282 : f32 to vector<8x32xf32>
    %1043 = arith.addf %1042, %1041 : vector<8x32xf32>
    %1044 = arith.divf %1042, %1043 : vector<8x32xf32>
    %1045 = vector.extract_strided_slice %1038 {offsets = [0, 32], sizes = [8, 32], strides = [1, 1]} : vector<8x64xf32> to vector<8x32xf32>
    %1046 = math.tanh %1045 : vector<8x32xf32>
    %1047 = arith.subf %1046, %1032 : vector<8x32xf32>
    %1048 = arith.mulf %1044, %1047 : vector<8x32xf32>
    %1049 = arith.addf %1032, %1048 : vector<8x32xf32>
    %c0_283 = arith.constant 0 : index
    %c0_284 = arith.constant 0 : index
    %1050 = vector.load %arg5[%c0_283, %c0_284] : memref<32x256xbf16, #tpu.memory_space<vmem>>, vector<32x64xbf16>
    %1051 = arith.truncf %1049 : vector<8x32xf32> to vector<8x32xbf16>
    %cst_285 = arith.constant dense<0.000000e+00> : vector<8x64xf32>
    %1052 = tpu.matmul %1051, %1050, %cst_285 {dimension_numbers = #tpu.dot_dimension_numbers<[1], [0], [0], [1], [0, 0, 1, 1], [], []>} : vector<8x32xbf16>, vector<32x64xbf16>, vector<8x64xf32> -> vector<8x64xf32>
    %1053 = vector.extract_strided_slice %1052 {offsets = [0, 0], sizes = [8, 32], strides = [1, 1]} : vector<8x64xf32> to vector<8x32xf32>
    %1054 = arith.negf %1053 : vector<8x32xf32>
    %1055 = math.exp %1054 : vector<8x32xf32>
    %cst_286 = arith.constant 1.000000e+00 : f32
    %1056 = vector.broadcast %cst_286 : f32 to vector<8x32xf32>
    %1057 = arith.addf %1056, %1055 : vector<8x32xf32>
    %1058 = arith.divf %1056, %1057 : vector<8x32xf32>
    %1059 = vector.extract_strided_slice %1052 {offsets = [0, 32], sizes = [8, 32], strides = [1, 1]} : vector<8x64xf32> to vector<8x32xf32>
    %1060 = math.tanh %1059 : vector<8x32xf32>
    %1061 = arith.subf %1060, %1049 : vector<8x32xf32>
    %1062 = arith.mulf %1058, %1061 : vector<8x32xf32>
    %1063 = arith.addf %1049, %1062 : vector<8x32xf32>
    %c0_287 = arith.constant 0 : index
    %c64_288 = arith.constant 64 : index
    %1064 = vector.load %arg5[%c0_287, %c64_288] : memref<32x256xbf16, #tpu.memory_space<vmem>>, vector<32x128xbf16>
    %1065 = arith.truncf %1063 : vector<8x32xf32> to vector<8x32xbf16>
    %cst_289 = arith.constant dense<0.000000e+00> : vector<8x128xf32>
    %1066 = tpu.matmul %1065, %1064, %cst_289 {dimension_numbers = #tpu.dot_dimension_numbers<[1], [0], [0], [1], [0, 0, 1, 1], [], []>} : vector<8x32xbf16>, vector<32x128xbf16>, vector<8x128xf32> -> vector<8x128xf32>
    %1067 = vector.extract_strided_slice %1066 {offsets = [0, 0], sizes = [8, 32], strides = [1, 1]} : vector<8x128xf32> to vector<8x32xf32>
    %1068 = arith.negf %1067 : vector<8x32xf32>
    %1069 = math.exp %1068 : vector<8x32xf32>
    %cst_290 = arith.constant 1.000000e+00 : f32
    %1070 = vector.broadcast %cst_290 : f32 to vector<8x32xf32>
    %1071 = arith.addf %1070, %1069 : vector<8x32xf32>
    %1072 = arith.divf %1070, %1071 : vector<8x32xf32>
    %1073 = vector.extract_strided_slice %1066 {offsets = [0, 32], sizes = [8, 32], strides = [1, 1]} : vector<8x128xf32> to vector<8x32xf32>
    %cst_291 = arith.constant 0.000000e+00 : f32
    %1074 = vector.broadcast %cst_291 : f32 to vector<8x32xf32>
    %1075 = arith.maximumf %1073, %1074 : vector<8x32xf32>
    %1076 = arith.subf %1075, %1063 : vector<8x32xf32>
    %1077 = arith.mulf %1072, %1076 : vector<8x32xf32>
    %1078 = arith.addf %1063, %1077 : vector<8x32xf32>
    %1079 = vector.extract_strided_slice %1066 {offsets = [0, 64], sizes = [8, 32], strides = [1, 1]} : vector<8x128xf32> to vector<8x32xf32>
    %1080 = arith.negf %1079 : vector<8x32xf32>
    %1081 = math.exp %1080 : vector<8x32xf32>
    %cst_292 = arith.constant 1.000000e+00 : f32
    %1082 = vector.broadcast %cst_292 : f32 to vector<8x32xf32>
    %1083 = arith.addf %1082, %1081 : vector<8x32xf32>
    %1084 = arith.divf %1082, %1083 : vector<8x32xf32>
    %1085 = vector.extract_strided_slice %1066 {offsets = [0, 96], sizes = [8, 32], strides = [1, 1]} : vector<8x128xf32> to vector<8x32xf32>
    %1086 = arith.negf %1085 : vector<8x32xf32>
    %1087 = math.exp %1086 : vector<8x32xf32>
    %cst_293 = arith.constant 1.000000e+00 : f32
    %1088 = vector.broadcast %cst_293 : f32 to vector<8x32xf32>
    %1089 = arith.addf %1088, %1087 : vector<8x32xf32>
    %1090 = arith.divf %1088, %1089 : vector<8x32xf32>
    %1091 = arith.subf %1090, %1063 : vector<8x32xf32>
    %1092 = arith.mulf %1084, %1091 : vector<8x32xf32>
    %1093 = arith.addf %1063, %1092 : vector<8x32xf32>
    %c0_294 = arith.constant 0 : index
    %c192_295 = arith.constant 192 : index
    %1094 = vector.load %arg5[%c0_294, %c192_295] : memref<32x256xbf16, #tpu.memory_space<vmem>>, vector<32x64xbf16>
    %1095 = arith.truncf %1078 : vector<8x32xf32> to vector<8x32xbf16>
    %cst_296 = arith.constant dense<0.000000e+00> : vector<8x64xf32>
    %1096 = tpu.matmul %1095, %1094, %cst_296 {dimension_numbers = #tpu.dot_dimension_numbers<[1], [0], [0], [1], [0, 0, 1, 1], [], []>} : vector<8x32xbf16>, vector<32x64xbf16>, vector<8x64xf32> -> vector<8x64xf32>
    %1097 = vector.extract_strided_slice %1096 {offsets = [0, 0], sizes = [8, 32], strides = [1, 1]} : vector<8x64xf32> to vector<8x32xf32>
    %1098 = arith.negf %1097 : vector<8x32xf32>
    %1099 = math.exp %1098 : vector<8x32xf32>
    %cst_297 = arith.constant 1.000000e+00 : f32
    %1100 = vector.broadcast %cst_297 : f32 to vector<8x32xf32>
    %1101 = arith.addf %1100, %1099 : vector<8x32xf32>
    %1102 = arith.divf %1100, %1101 : vector<8x32xf32>
    %1103 = vector.extract_strided_slice %1096 {offsets = [0, 32], sizes = [8, 32], strides = [1, 1]} : vector<8x64xf32> to vector<8x32xf32>
    %1104 = arith.subf %1103, %1078 : vector<8x32xf32>
    %1105 = arith.mulf %1102, %1104 : vector<8x32xf32>
    %1106 = arith.addf %1078, %1105 : vector<8x32xf32>
    %1107 = arith.addf %1063, %1078 : vector<8x32xf32>
    %1108 = arith.addf %1107, %1093 : vector<8x32xf32>
    %1109 = arith.addf %1108, %1106 : vector<8x32xf32>
    %cst_298 = arith.constant 2.500000e-01 : f32
    %1110 = vector.broadcast %cst_298 : f32 to vector<8x32xf32>
    %1111 = arith.mulf %1109, %1110 : vector<8x32xf32>
    %c104 = arith.constant 104 : index
    %c0_299 = arith.constant 0 : index
    %1112 = vector.load %arg6[%c104, %c0_299] : memref<128x32xf32, #tpu.memory_space<vmem>>, vector<8x32xf32>
    tpu.vector_store %arg6[%c104, %c0_299], %1111 {strides = array<i32>} : memref<128x32xf32, #tpu.memory_space<vmem>>, vector<8x32xf32>,
    %1113 = vector.extract_strided_slice %5 {offsets = [112, 0], sizes = [8, 64], strides = [1, 1]} : vector<128x64xf32> to vector<8x64xf32>
    %1114 = arith.truncf %1111 : vector<8x32xf32> to vector<8x32xbf16>
    %c0_300 = arith.constant 0 : index
    %c0_301 = arith.constant 0 : index
    %1115 = vector.load %arg4[%c0_300, %c0_301] : memref<32x64xbf16, #tpu.memory_space<vmem>>, vector<32x64xbf16>
    %cst_302 = arith.constant dense<0.000000e+00> : vector<8x64xf32>
    %1116 = tpu.matmul %1114, %1115, %cst_302 {dimension_numbers = #tpu.dot_dimension_numbers<[1], [0], [0], [1], [0, 0, 1, 1], [], []>} : vector<8x32xbf16>, vector<32x64xbf16>, vector<8x64xf32> -> vector<8x64xf32>
    %1117 = arith.addf %1113, %1116 : vector<8x64xf32>
    %1118 = vector.extract_strided_slice %1117 {offsets = [0, 0], sizes = [8, 32], strides = [1, 1]} : vector<8x64xf32> to vector<8x32xf32>
    %1119 = arith.negf %1118 : vector<8x32xf32>
    %1120 = math.exp %1119 : vector<8x32xf32>
    %cst_303 = arith.constant 1.000000e+00 : f32
    %1121 = vector.broadcast %cst_303 : f32 to vector<8x32xf32>
    %1122 = arith.addf %1121, %1120 : vector<8x32xf32>
    %1123 = arith.divf %1121, %1122 : vector<8x32xf32>
    %1124 = vector.extract_strided_slice %1117 {offsets = [0, 32], sizes = [8, 32], strides = [1, 1]} : vector<8x64xf32> to vector<8x32xf32>
    %1125 = math.tanh %1124 : vector<8x32xf32>
    %1126 = arith.subf %1125, %1111 : vector<8x32xf32>
    %1127 = arith.mulf %1123, %1126 : vector<8x32xf32>
    %1128 = arith.addf %1111, %1127 : vector<8x32xf32>
    %c0_304 = arith.constant 0 : index
    %c0_305 = arith.constant 0 : index
    %1129 = vector.load %arg5[%c0_304, %c0_305] : memref<32x256xbf16, #tpu.memory_space<vmem>>, vector<32x64xbf16>
    %1130 = arith.truncf %1128 : vector<8x32xf32> to vector<8x32xbf16>
    %cst_306 = arith.constant dense<0.000000e+00> : vector<8x64xf32>
    %1131 = tpu.matmul %1130, %1129, %cst_306 {dimension_numbers = #tpu.dot_dimension_numbers<[1], [0], [0], [1], [0, 0, 1, 1], [], []>} : vector<8x32xbf16>, vector<32x64xbf16>, vector<8x64xf32> -> vector<8x64xf32>
    %1132 = vector.extract_strided_slice %1131 {offsets = [0, 0], sizes = [8, 32], strides = [1, 1]} : vector<8x64xf32> to vector<8x32xf32>
    %1133 = arith.negf %1132 : vector<8x32xf32>
    %1134 = math.exp %1133 : vector<8x32xf32>
    %cst_307 = arith.constant 1.000000e+00 : f32
    %1135 = vector.broadcast %cst_307 : f32 to vector<8x32xf32>
    %1136 = arith.addf %1135, %1134 : vector<8x32xf32>
    %1137 = arith.divf %1135, %1136 : vector<8x32xf32>
    %1138 = vector.extract_strided_slice %1131 {offsets = [0, 32], sizes = [8, 32], strides = [1, 1]} : vector<8x64xf32> to vector<8x32xf32>
    %1139 = math.tanh %1138 : vector<8x32xf32>
    %1140 = arith.subf %1139, %1128 : vector<8x32xf32>
    %1141 = arith.mulf %1137, %1140 : vector<8x32xf32>
    %1142 = arith.addf %1128, %1141 : vector<8x32xf32>
    %c0_308 = arith.constant 0 : index
    %c64_309 = arith.constant 64 : index
    %1143 = vector.load %arg5[%c0_308, %c64_309] : memref<32x256xbf16, #tpu.memory_space<vmem>>, vector<32x128xbf16>
    %1144 = arith.truncf %1142 : vector<8x32xf32> to vector<8x32xbf16>
    %cst_310 = arith.constant dense<0.000000e+00> : vector<8x128xf32>
    %1145 = tpu.matmul %1144, %1143, %cst_310 {dimension_numbers = #tpu.dot_dimension_numbers<[1], [0], [0], [1], [0, 0, 1, 1], [], []>} : vector<8x32xbf16>, vector<32x128xbf16>, vector<8x128xf32> -> vector<8x128xf32>
    %1146 = vector.extract_strided_slice %1145 {offsets = [0, 0], sizes = [8, 32], strides = [1, 1]} : vector<8x128xf32> to vector<8x32xf32>
    %1147 = arith.negf %1146 : vector<8x32xf32>
    %1148 = math.exp %1147 : vector<8x32xf32>
    %cst_311 = arith.constant 1.000000e+00 : f32
    %1149 = vector.broadcast %cst_311 : f32 to vector<8x32xf32>
    %1150 = arith.addf %1149, %1148 : vector<8x32xf32>
    %1151 = arith.divf %1149, %1150 : vector<8x32xf32>
    %1152 = vector.extract_strided_slice %1145 {offsets = [0, 32], sizes = [8, 32], strides = [1, 1]} : vector<8x128xf32> to vector<8x32xf32>
    %cst_312 = arith.constant 0.000000e+00 : f32
    %1153 = vector.broadcast %cst_312 : f32 to vector<8x32xf32>
    %1154 = arith.maximumf %1152, %1153 : vector<8x32xf32>
    %1155 = arith.subf %1154, %1142 : vector<8x32xf32>
    %1156 = arith.mulf %1151, %1155 : vector<8x32xf32>
    %1157 = arith.addf %1142, %1156 : vector<8x32xf32>
    %1158 = vector.extract_strided_slice %1145 {offsets = [0, 64], sizes = [8, 32], strides = [1, 1]} : vector<8x128xf32> to vector<8x32xf32>
    %1159 = arith.negf %1158 : vector<8x32xf32>
    %1160 = math.exp %1159 : vector<8x32xf32>
    %cst_313 = arith.constant 1.000000e+00 : f32
    %1161 = vector.broadcast %cst_313 : f32 to vector<8x32xf32>
    %1162 = arith.addf %1161, %1160 : vector<8x32xf32>
    %1163 = arith.divf %1161, %1162 : vector<8x32xf32>
    %1164 = vector.extract_strided_slice %1145 {offsets = [0, 96], sizes = [8, 32], strides = [1, 1]} : vector<8x128xf32> to vector<8x32xf32>
    %1165 = arith.negf %1164 : vector<8x32xf32>
    %1166 = math.exp %1165 : vector<8x32xf32>
    %cst_314 = arith.constant 1.000000e+00 : f32
    %1167 = vector.broadcast %cst_314 : f32 to vector<8x32xf32>
    %1168 = arith.addf %1167, %1166 : vector<8x32xf32>
    %1169 = arith.divf %1167, %1168 : vector<8x32xf32>
    %1170 = arith.subf %1169, %1142 : vector<8x32xf32>
    %1171 = arith.mulf %1163, %1170 : vector<8x32xf32>
    %1172 = arith.addf %1142, %1171 : vector<8x32xf32>
    %c0_315 = arith.constant 0 : index
    %c192_316 = arith.constant 192 : index
    %1173 = vector.load %arg5[%c0_315, %c192_316] : memref<32x256xbf16, #tpu.memory_space<vmem>>, vector<32x64xbf16>
    %1174 = arith.truncf %1157 : vector<8x32xf32> to vector<8x32xbf16>
    %cst_317 = arith.constant dense<0.000000e+00> : vector<8x64xf32>
    %1175 = tpu.matmul %1174, %1173, %cst_317 {dimension_numbers = #tpu.dot_dimension_numbers<[1], [0], [0], [1], [0, 0, 1, 1], [], []>} : vector<8x32xbf16>, vector<32x64xbf16>, vector<8x64xf32> -> vector<8x64xf32>
    %1176 = vector.extract_strided_slice %1175 {offsets = [0, 0], sizes = [8, 32], strides = [1, 1]} : vector<8x64xf32> to vector<8x32xf32>
    %1177 = arith.negf %1176 : vector<8x32xf32>
    %1178 = math.exp %1177 : vector<8x32xf32>
    %cst_318 = arith.constant 1.000000e+00 : f32
    %1179 = vector.broadcast %cst_318 : f32 to vector<8x32xf32>
    %1180 = arith.addf %1179, %1178 : vector<8x32xf32>
    %1181 = arith.divf %1179, %1180 : vector<8x32xf32>
    %1182 = vector.extract_strided_slice %1175 {offsets = [0, 32], sizes = [8, 32], strides = [1, 1]} : vector<8x64xf32> to vector<8x32xf32>
    %1183 = arith.subf %1182, %1157 : vector<8x32xf32>
    %1184 = arith.mulf %1181, %1183 : vector<8x32xf32>
    %1185 = arith.addf %1157, %1184 : vector<8x32xf32>
    %1186 = arith.addf %1142, %1157 : vector<8x32xf32>
    %1187 = arith.addf %1186, %1172 : vector<8x32xf32>
    %1188 = arith.addf %1187, %1185 : vector<8x32xf32>
    %cst_319 = arith.constant 2.500000e-01 : f32
    %1189 = vector.broadcast %cst_319 : f32 to vector<8x32xf32>
    %1190 = arith.mulf %1188, %1189 : vector<8x32xf32>
    %c112 = arith.constant 112 : index
    %c0_320 = arith.constant 0 : index
    %1191 = vector.load %arg6[%c112, %c0_320] : memref<128x32xf32, #tpu.memory_space<vmem>>, vector<8x32xf32>
    tpu.vector_store %arg6[%c112, %c0_320], %1190 {strides = array<i32>} : memref<128x32xf32, #tpu.memory_space<vmem>>, vector<8x32xf32>,
    %1192 = vector.extract_strided_slice %5 {offsets = [120, 0], sizes = [8, 64], strides = [1, 1]} : vector<128x64xf32> to vector<8x64xf32>
    %1193 = arith.truncf %1190 : vector<8x32xf32> to vector<8x32xbf16>
    %c0_321 = arith.constant 0 : index
    %c0_322 = arith.constant 0 : index
    %1194 = vector.load %arg4[%c0_321, %c0_322] : memref<32x64xbf16, #tpu.memory_space<vmem>>, vector<32x64xbf16>
    %cst_323 = arith.constant dense<0.000000e+00> : vector<8x64xf32>
    %1195 = tpu.matmul %1193, %1194, %cst_323 {dimension_numbers = #tpu.dot_dimension_numbers<[1], [0], [0], [1], [0, 0, 1, 1], [], []>} : vector<8x32xbf16>, vector<32x64xbf16>, vector<8x64xf32> -> vector<8x64xf32>
    %1196 = arith.addf %1192, %1195 : vector<8x64xf32>
    %1197 = vector.extract_strided_slice %1196 {offsets = [0, 0], sizes = [8, 32], strides = [1, 1]} : vector<8x64xf32> to vector<8x32xf32>
    %1198 = arith.negf %1197 : vector<8x32xf32>
    %1199 = math.exp %1198 : vector<8x32xf32>
    %cst_324 = arith.constant 1.000000e+00 : f32
    %1200 = vector.broadcast %cst_324 : f32 to vector<8x32xf32>
    %1201 = arith.addf %1200, %1199 : vector<8x32xf32>
    %1202 = arith.divf %1200, %1201 : vector<8x32xf32>
    %1203 = vector.extract_strided_slice %1196 {offsets = [0, 32], sizes = [8, 32], strides = [1, 1]} : vector<8x64xf32> to vector<8x32xf32>
    %1204 = math.tanh %1203 : vector<8x32xf32>
    %1205 = arith.subf %1204, %1190 : vector<8x32xf32>
    %1206 = arith.mulf %1202, %1205 : vector<8x32xf32>
    %1207 = arith.addf %1190, %1206 : vector<8x32xf32>
    %c0_325 = arith.constant 0 : index
    %c0_326 = arith.constant 0 : index
    %1208 = vector.load %arg5[%c0_325, %c0_326] : memref<32x256xbf16, #tpu.memory_space<vmem>>, vector<32x64xbf16>
    %1209 = arith.truncf %1207 : vector<8x32xf32> to vector<8x32xbf16>
    %cst_327 = arith.constant dense<0.000000e+00> : vector<8x64xf32>
    %1210 = tpu.matmul %1209, %1208, %cst_327 {dimension_numbers = #tpu.dot_dimension_numbers<[1], [0], [0], [1], [0, 0, 1, 1], [], []>} : vector<8x32xbf16>, vector<32x64xbf16>, vector<8x64xf32> -> vector<8x64xf32>
    %1211 = vector.extract_strided_slice %1210 {offsets = [0, 0], sizes = [8, 32], strides = [1, 1]} : vector<8x64xf32> to vector<8x32xf32>
    %1212 = arith.negf %1211 : vector<8x32xf32>
    %1213 = math.exp %1212 : vector<8x32xf32>
    %cst_328 = arith.constant 1.000000e+00 : f32
    %1214 = vector.broadcast %cst_328 : f32 to vector<8x32xf32>
    %1215 = arith.addf %1214, %1213 : vector<8x32xf32>
    %1216 = arith.divf %1214, %1215 : vector<8x32xf32>
    %1217 = vector.extract_strided_slice %1210 {offsets = [0, 32], sizes = [8, 32], strides = [1, 1]} : vector<8x64xf32> to vector<8x32xf32>
    %1218 = math.tanh %1217 : vector<8x32xf32>
    %1219 = arith.subf %1218, %1207 : vector<8x32xf32>
    %1220 = arith.mulf %1216, %1219 : vector<8x32xf32>
    %1221 = arith.addf %1207, %1220 : vector<8x32xf32>
    %c0_329 = arith.constant 0 : index
    %c64_330 = arith.constant 64 : index
    %1222 = vector.load %arg5[%c0_329, %c64_330] : memref<32x256xbf16, #tpu.memory_space<vmem>>, vector<32x128xbf16>
    %1223 = arith.truncf %1221 : vector<8x32xf32> to vector<8x32xbf16>
    %cst_331 = arith.constant dense<0.000000e+00> : vector<8x128xf32>
    %1224 = tpu.matmul %1223, %1222, %cst_331 {dimension_numbers = #tpu.dot_dimension_numbers<[1], [0], [0], [1], [0, 0, 1, 1], [], []>} : vector<8x32xbf16>, vector<32x128xbf16>, vector<8x128xf32> -> vector<8x128xf32>
    %1225 = vector.extract_strided_slice %1224 {offsets = [0, 0], sizes = [8, 32], strides = [1, 1]} : vector<8x128xf32> to vector<8x32xf32>
    %1226 = arith.negf %1225 : vector<8x32xf32>
    %1227 = math.exp %1226 : vector<8x32xf32>
    %cst_332 = arith.constant 1.000000e+00 : f32
    %1228 = vector.broadcast %cst_332 : f32 to vector<8x32xf32>
    %1229 = arith.addf %1228, %1227 : vector<8x32xf32>
    %1230 = arith.divf %1228, %1229 : vector<8x32xf32>
    %1231 = vector.extract_strided_slice %1224 {offsets = [0, 32], sizes = [8, 32], strides = [1, 1]} : vector<8x128xf32> to vector<8x32xf32>
    %cst_333 = arith.constant 0.000000e+00 : f32
    %1232 = vector.broadcast %cst_333 : f32 to vector<8x32xf32>
    %1233 = arith.maximumf %1231, %1232 : vector<8x32xf32>
    %1234 = arith.subf %1233, %1221 : vector<8x32xf32>
    %1235 = arith.mulf %1230, %1234 : vector<8x32xf32>
    %1236 = arith.addf %1221, %1235 : vector<8x32xf32>
    %1237 = vector.extract_strided_slice %1224 {offsets = [0, 64], sizes = [8, 32], strides = [1, 1]} : vector<8x128xf32> to vector<8x32xf32>
    %1238 = arith.negf %1237 : vector<8x32xf32>
    %1239 = math.exp %1238 : vector<8x32xf32>
    %cst_334 = arith.constant 1.000000e+00 : f32
    %1240 = vector.broadcast %cst_334 : f32 to vector<8x32xf32>
    %1241 = arith.addf %1240, %1239 : vector<8x32xf32>
    %1242 = arith.divf %1240, %1241 : vector<8x32xf32>
    %1243 = vector.extract_strided_slice %1224 {offsets = [0, 96], sizes = [8, 32], strides = [1, 1]} : vector<8x128xf32> to vector<8x32xf32>
    %1244 = arith.negf %1243 : vector<8x32xf32>
    %1245 = math.exp %1244 : vector<8x32xf32>
    %cst_335 = arith.constant 1.000000e+00 : f32
    %1246 = vector.broadcast %cst_335 : f32 to vector<8x32xf32>
    %1247 = arith.addf %1246, %1245 : vector<8x32xf32>
    %1248 = arith.divf %1246, %1247 : vector<8x32xf32>
    %1249 = arith.subf %1248, %1221 : vector<8x32xf32>
    %1250 = arith.mulf %1242, %1249 : vector<8x32xf32>
    %1251 = arith.addf %1221, %1250 : vector<8x32xf32>
    %c0_336 = arith.constant 0 : index
    %c192_337 = arith.constant 192 : index
    %1252 = vector.load %arg5[%c0_336, %c192_337] : memref<32x256xbf16, #tpu.memory_space<vmem>>, vector<32x64xbf16>
    %1253 = arith.truncf %1236 : vector<8x32xf32> to vector<8x32xbf16>
    %cst_338 = arith.constant dense<0.000000e+00> : vector<8x64xf32>
    %1254 = tpu.matmul %1253, %1252, %cst_338 {dimension_numbers = #tpu.dot_dimension_numbers<[1], [0], [0], [1], [0, 0, 1, 1], [], []>} : vector<8x32xbf16>, vector<32x64xbf16>, vector<8x64xf32> -> vector<8x64xf32>
    %1255 = vector.extract_strided_slice %1254 {offsets = [0, 0], sizes = [8, 32], strides = [1, 1]} : vector<8x64xf32> to vector<8x32xf32>
    %1256 = arith.negf %1255 : vector<8x32xf32>
    %1257 = math.exp %1256 : vector<8x32xf32>
    %cst_339 = arith.constant 1.000000e+00 : f32
    %1258 = vector.broadcast %cst_339 : f32 to vector<8x32xf32>
    %1259 = arith.addf %1258, %1257 : vector<8x32xf32>
    %1260 = arith.divf %1258, %1259 : vector<8x32xf32>
    %1261 = vector.extract_strided_slice %1254 {offsets = [0, 32], sizes = [8, 32], strides = [1, 1]} : vector<8x64xf32> to vector<8x32xf32>
    %1262 = arith.subf %1261, %1236 : vector<8x32xf32>
    %1263 = arith.mulf %1260, %1262 : vector<8x32xf32>
    %1264 = arith.addf %1236, %1263 : vector<8x32xf32>
    %1265 = arith.addf %1221, %1236 : vector<8x32xf32>
    %1266 = arith.addf %1265, %1251 : vector<8x32xf32>
    %1267 = arith.addf %1266, %1264 : vector<8x32xf32>
    %cst_340 = arith.constant 2.500000e-01 : f32
    %1268 = vector.broadcast %cst_340 : f32 to vector<8x32xf32>
    %1269 = arith.mulf %1267, %1268 : vector<8x32xf32>
    %c120 = arith.constant 120 : index
    %c0_341 = arith.constant 0 : index
    %1270 = vector.load %arg6[%c120, %c0_341] : memref<128x32xf32, #tpu.memory_space<vmem>>, vector<8x32xf32>
    tpu.vector_store %arg6[%c120, %c0_341], %1269 {strides = array<i32>} : memref<128x32xf32, #tpu.memory_space<vmem>>, vector<8x32xf32>,
    %c0_342 = arith.constant 0 : index
    %c0_343 = arith.constant 0 : index
    %1271 = vector.load %arg7[%c0_342, %c0_343] : memref<8x32xf32, #tpu.memory_space<vmem>>, vector<8x32xf32>
    tpu.vector_store %arg7[%c0_342, %c0_343], %1269 {strides = array<i32>} : memref<8x32xf32, #tpu.memory_space<vmem>>, vector<8x32xf32>,
    return
  }
  func.func @transform_0(%arg0: i32) -> (i32, i32) {
    %c0_i32 = arith.constant 0 : i32
    %c0_i32_0 = arith.constant 0 : i32
    return %arg0, %c0_i32 : i32, i32
  }
  func.func @transform_1(%arg0: i32) -> (i32, i32) {
    %c0_i32 = arith.constant 0 : i32
    %c0_i32_0 = arith.constant 0 : i32
    %c0_i32_1 = arith.constant 0 : i32
    return %c0_i32, %c0_i32_0 : i32, i32
  }
  func.func @transform_2(%arg0: i32) -> (i32, i32) {
    %c0_i32 = arith.constant 0 : i32
    %c0_i32_0 = arith.constant 0 : i32
    %c0_i32_1 = arith.constant 0 : i32
    return %c0_i32, %c0_i32_0 : i32, i32
  }
  func.func @transform_3(%arg0: i32) -> (i32, i32) {
    %c0_i32 = arith.constant 0 : i32
    %c0_i32_0 = arith.constant 0 : i32
    %c0_i32_1 = arith.constant 0 : i32
    return %c0_i32, %c0_i32_0 : i32, i32
  }
  func.func @transform_4(%arg0: i32) -> (i32, i32) {
    %c0_i32 = arith.constant 0 : i32
    %c0_i32_0 = arith.constant 0 : i32
    %c0_i32_1 = arith.constant 0 : i32
    return %c0_i32, %c0_i32_0 : i32, i32
  }
  func.func @transform_5(%arg0: i32) -> (i32, i32) {
    %c0_i32 = arith.constant 0 : i32
    %c0_i32_0 = arith.constant 0 : i32
    return %arg0, %c0_i32 : i32, i32
  }
}

</mosaic_0001>

<bundles_post_ra>
// kernel: tpu_custom_call.1
= control target key start
LH: loop header
LB: loop body
LE: loop exit
PB: predicated region body
PF: predicated region fallthrough
CT: control target
= control target key end

     0   :  { %vm26_vm0 = vcmask 261120   ;;  %s6211_s8 = smov 96   ;;  %s6212_s17 = smov 64   ;;  %vm333_vm5 = vcmask 523264   ;;  %s7753_s2 = inlined_call_operand.vmem [shape: bf16[32,64], index: 2, kind: input, shape index: {}]   ;;  %s7754_s3 = inlined_call_operand.vmem [shape: bf16[32,64], index: 3, kind: input, shape index: {}]   ;;  %s7755_s1 = inlined_call_operand.vmem [shape: f32[8,32], index: 1, kind: input, shape index: {}]   ;;  %s7756_s0 = inlined_call_operand.vmem [shape: bf16[128,32], index: 0, kind: input, shape index: {}]   ;;  %s7757_s4 = inlined_call_operand.vmem [shape: bf16[32,256], index: 4, kind: input, shape index: {}]   ;;  %s7758_s5 = inlined_call_operand.vmem [shape: f32[128,32], index: 5, kind: output, shape index: {}]  }
   0x1   :  { %v5726_v0 = vld [vmem:[%s7753_s2 + $0x8] sm:$0xff]  ;;  %v25_v2 = vld [vmem:[%s7755_s1] sm:$0xff]  ;;  %s6210_s1 = smov 32   ;;  %v4965_v8 = vld [vmem:[%s7757_s4 + $0x10] sm:$0xf] }
   0x2   :  { %v5728_v1 = vld [vmem:[%s7754_s3 + $0x8] sm:$0xff]  ;;  %131 = vmatpush.bf16.msra.mxu0 %v5726_v0  ;;  %v5725_v3 = vld [vmem:[%s7753_s2] sm:$0xff]  ;;  %27 = vst.msk [vmem:[#allocation2] sm:$0xff] %vm26_vm0, %v25_v2  ;;  %v5730_v9 = vld [vmem:[%s7757_s4 + $0x14] sm:$0xf0] }
   0x3   :  { %201 = vmatpush.bf16.msra.mxu1 %v5728_v1  ;;  %v5727_v4 = vld [vmem:[%s7754_s3] sm:$0xff]  ;;  %v4966_v10 = vor.u32 %v5730_v9, %v4965_v8  ;;  %v5729_v22 = vld [vmem:[%s7757_s4 + $0x4] sm:$0xf0]  ;;  %v4979_v38 = vld [vmem:[%s7757_s4 + $0x10] sm:$0xf] }
   0x4   :  { %v5717_v5 = vld [vmem:[%s7756_s0] sm:$0xff]  ;;  %v5734_v39 = vld [vmem:[%s7757_s4 + $0x14] sm:$0xf0]  ;;  %v5732_v42 = vld [vmem:[%s7757_s4 + $0x4] sm:$0xf0] }
   0x5   :  { %266 = vmatpush.bf16.msra.mxu2 %v4966_v10  ;;  %v4961_v21 = vld [vmem:[%s7757_s4] sm:$0xf]  ;;  %v4980_v40 = vor.u32 %v5734_v39, %v4979_v38  ;;  %v5731_v43 = vld [vmem:[%s7757_s4 + $0x4] sm:$0xf]  ;;  %v4973_v45 = vld [vmem:[%s7757_s4 + $0x8] sm:$0xf0] }
   0x6   :  { %132 = vmatpush.bf16.msra.mxu0 %v5725_v3  ;;  %v4962_v23 = vor.u32 %v5729_v22, %v4961_v21  ;;  %v4971_v41 = vld [vmem:[%s7757_s4] sm:$0xf]  ;;  %v4976_v46 = vor.u32 %v5731_v43, %v4973_v45  ;;  %v5733_v47 = vld [vmem:[%s7757_s4 + $0x14] sm:$0xf]  ;;  %v4981_v48 = vld [vmem:[%s7757_s4 + $0x18] sm:$0xf0] }
   0x7   :  { %202 = vmatpush.bf16.msra.mxu1 %v5727_v4  ;;  %v4972_v44 = vor.u32 %v5732_v42, %v4971_v41  ;;  %v4984_v49 = vor.u32 %v5733_v47, %v4981_v48  ;;  %v4993_v55 = vld [vmem:[%s7757_s4 + $0x14] sm:$0xf]  ;;  %v5736_v56 = vld [vmem:[%s7757_s4 + $0x18] sm:$0xf0]  ;;  %v5738_v48 = vld [vmem:[%s7754_s3 + $0x8] sm:$0xff] }
   0x8   :  { %v4994_v57 = vor.u32 %v5736_v56, %v4993_v55  ;;  %v5737_v56 = vld [vmem:[%s7754_s3] sm:$0xff] }
   0x9   :  { %4941 = vmatmul.msk.bf16.vlgmr.msra.gmra.mxu0 %vm26_vm0, %v5717_v5  ;;  %v174_v6 = vld [vmem:[#allocation2] sm:$0xff]  ;;  %267 = vmatpush.bf16.msra.mxu2 %v4962_v23 }
   0xa   :  { %v175_v7 = vpack.c.bf16 %v174_v6, %v174_v6  ;;  %230 = vrot.lane.b32.xlu0 %v174_v6, %s6210_s1  ;;  %331 = vrot.lane.b32.xlu2 %v4984_v49, %s6212_s17 }
   0xc   :  { %4957 = vmatmul.msk.bf16.vlgmr.msra.gmra.mxu1 %vm26_vm0, %v175_v7 }
   0xd   :  { %497 = vmatpush.bf16.msrb.mxu2 %v5738_v48 }
  0x11   :  { %498 = vmatpush.bf16.msrb.mxu2 %v5737_v56 }
  0x64   :  { %v332_v60 = vpop.permute.xlu2 %331 }
  0x7c   :  { %v231_v14 = vpop.permute.xlu0 %230 }
  0x86   :  { %v134_v11 = vpop.f32.mrf.mxu0 }
  0x89   :  { %v204_v12 = vpop.f32.mrf.mxu1 }
  0x8a   :  { %v208_v13 = vadd.f32 %v204_v12, %v134_v11 }
  0x8c   :  { %5890 = vtanh.f32 %v208_v13  ;;  %v4958_v18 = vmul.f32 -1.442695, %v208_v13 }
  0x8e   :  { %5892 = vpow2.f32 %v4958_v18  ;;  %v4989_v18 = vld [vmem:[%s7757_s4 + $0x4] sm:$0xf] }
  0x91   :  { %v206_v15 = vpop.f32.mrf.mxu1 }
  0x92   :  { %v5891_v16 = vpop.eup %5890 }
  0x93   :  { %v233_v17 = vsub.f32 %v5891_v16, %v231_v14 }
  0x94   :  { %v5893_v19 = vpop.eup %5892 }
  0x95   :  { %235 = vrot.lane.b32.xlu0 %v233_v17, %s6211_s8  ;;  %v212_v20 = vadd.f32 1.0, %v5893_v19  ;;  %v5735_v19 = vld [vmem:[%s7757_s4 + $0x8] sm:$0xf0] }
  0x97   :  { %5894 = vrcp.f32 %v212_v20  ;;  %v224_v29 = vand.u32 2147483648, %v212_v20  ;;  %vm218_vm2 = vweird.f32 %v212_v20  ;;  %v222_v30 = vand.u32 2147483647, %v212_v20 }
  0x99   :  { %v225_v32 = vor.u32 1.1754944e-38, %v224_v29  ;;  %vm223_vm4 = vcmp.eq.f32.partialorder %v222_v30, 8.507059e+37 }
  0x9d   :  { %v5895_v24 = vpop.eup %5894  ;;  %325 = vrot.lane.b32.xlu0 %v4972_v44, %s6212_s17 }
  0x9e   :  { %v214_v25 = vmul.f32 %v5895_v24, %v212_v20  ;;  %vm219_vm1 = vweird.f32 %v5895_v24  ;;  %v4990_v20 = vor.u32 %v5735_v19, %v4989_v18  ;;  %v136_v19 = vpop.f32.mrf.mxu0 }
  0x9f   :  { %vm220_vm3 = vmor %vm218_vm2, %vm219_vm1 }
  0xa0   :  { %v215_v26 = vsub.f32 1.0, %v214_v25 }
  0xa2   :  { %v216_v27 = vmul.f32 %v5895_v24, %v215_v26 }
  0xa4   :  { %v217_v28 = vadd.f32 %v5895_v24, %v216_v27 }
  0xa5   :  { %416 = vrot.lane.b32.xlu0 %v4994_v57, %s6212_s17 }
  0xa6   :  { %v221_v31 = vsel %vm220_vm3, %v5895_v24, %v217_v28 }
  0xa7   :  { %v226_v34 = vsel %vm223_vm4, %v225_v32, %v221_v31 }
 0x107   :  { %v236_v33 = vpop.permute.xlu0 %235 }
 0x108   :  { %v238_v35 = vmul.f32 %v236_v33, %v226_v34 }
 0x10a   :  { %v239_v36 = vadd.f32 %v238_v35, %v174_v6 }
 0x10c   :  { %294 = vrot.lane.b32.xlu1 %v239_v36, %s6210_s1  ;;  %v244_v37 = vpack.c.bf16 %v239_v36, %v239_v36 }
 0x10e   :  { %4967 = vmatmul.msk.bf16.vlgmr.msra.gmra.mxu2 %vm26_vm0, %v244_v37 }
 0x10f   :  { %v326_v0 = vpop.permute.xlu0 %325 }
 0x114   :  { %329 = vrot.lane.b32.xlu1 %v4980_v40, %s6212_s17 }
 0x117   :  { %v417_v17 = vpop.permute.xlu0 %416 }
 0x118   :  { %429 = vmatpush.bf16.msrb.mxu1 %v417_v17  ;;  %v5739_v17 = vld [vmem:[%s7757_s4 + $0x4] sm:$0xf0] }
 0x11c   :  { %327 = vrot.lane.b32.xlu1 %v4976_v46, %s6212_s17 }
 0x17e   :  { %v295_v52 = vpop.permute.xlu1 %294 }
 0x186   :  { %v330_v59 = vpop.permute.xlu1 %329 }
 0x187   :  { %v335_v61 = vsel %vm333_vm5, %v330_v59, %v332_v60 }
 0x188   :  { %347 = vmatpush.bf16.msra.mxu3 %v335_v61 }
 0x18e   :  { %v328_v1 = vpop.permute.xlu1 %327 }
 0x18f   :  { %v334_v2 = vsel %vm333_vm5, %v326_v0, %v328_v1 }
 0x190   :  { %348 = vmatpush.bf16.msra.mxu3 %v334_v2 }
 0x191   :  { %v269_v50 = vpop.f32.mrf.mxu2 }
 0x192   :  { %5896 = vtanh.f32 %v269_v50  ;;  %v4968_v58 = vmul.f32 -1.442695, %v269_v50 }
 0x194   :  { %5898 = vpow2.f32 %v4968_v58 }
 0x198   :  { %v5897_v51 = vpop.eup %5896 }
 0x199   :  { %v271_v53 = vpop.f32.mrf.mxu2  ;;  %v297_v54 = vsub.f32 %v5897_v51, %v295_v52 }
 0x19a   :  { %v5899_v62 = vpop.eup %5898 }
 0x19b   :  { %299 = vrot.lane.b32.xlu2 %v297_v54, %s6211_s8  ;;  %v276_v63 = vadd.f32 1.0, %v5899_v62 }
 0x19d   :  { %5900 = vrcp.f32 %v276_v63  ;;  %v288_v8 = vand.u32 2147483648, %v276_v63  ;;  %vm282_vm7 = vweird.f32 %v276_v63  ;;  %v286_v9 = vand.u32 2147483647, %v276_v63 }
 0x19f   :  { %v289_v11 = vor.u32 1.1754944e-38, %v288_v8  ;;  %vm287_vm9 = vcmp.eq.f32.partialorder %v286_v9, 8.507059e+37 }
 0x1a3   :  { %v5901_v3 = vpop.eup %5900 }
 0x1a4   :  { %v278_v4 = vmul.f32 %v5901_v3, %v276_v63  ;;  %vm283_vm6 = vweird.f32 %v5901_v3 }
 0x1a5   :  { %vm284_vm8 = vmor %vm282_vm7, %vm283_vm6 }
 0x1a6   :  { %v279_v5 = vsub.f32 1.0, %v278_v4 }
 0x1a8   :  { %v280_v6 = vmul.f32 %v5901_v3, %v279_v5 }
 0x1aa   :  { %v281_v7 = vadd.f32 %v5901_v3, %v280_v6 }
 0x1ac   :  { %v285_v10 = vsel %vm284_vm8, %v5901_v3, %v281_v7 }
 0x1ad   :  { %v290_v13 = vsel %vm287_vm9, %v289_v11, %v285_v10 }
 0x1f5   :  { %v300_v12 = vpop.permute.xlu2 %299 }
 0x1f6   :  { %v302_v14 = vmul.f32 %v300_v12, %v290_v13  ;;  %v5013_v13 = vld [vmem:[%s7757_s4 + $0x10] sm:$0xf] }
 0x1f8   :  { %v6318_v15 = vadd.f32 %v302_v14, %v239_v36  ;;  %v5740_v14 = vld [vmem:[%s7757_s4 + $0x14] sm:$0xf0] }
 0x1fa   :  { %385 = vrot.lane.b32.xlu0 %v6318_v15, %s6211_s8  ;;  %375 = vrot.lane.b32.xlu2 %v6318_v15, %s6210_s1  ;;  %v308_v16 = vpack.c.bf16 %v6318_v15, %v6318_v15 }
 0x1fc   :  { %4985 = vmatmul.msk.bf16.vlgmr.msra.gmra.mxu3 %vm26_vm0, %v308_v16  ;;  %v5014_v16 = vor.u32 %v5740_v14, %v5013_v13 }
 0x1fe   :  { %562 = vmatpush.bf16.msrb.mxu3 %v5014_v16 }
 0x202   :  { %414 = vrot.lane.b32.xlu2 %v4990_v20, %s6212_s17 }
 0x254   :  { %v376_v24 = vpop.permute.xlu2 %375 }
 0x25c   :  { %v415_v41 = vpop.permute.xlu2 %414 }
 0x25d   :  { %430 = vmatpush.bf16.msrb.mxu1 %v415_v41 }
 0x26c   :  { %v386_v38 = vpop.permute.xlu0 %385 }
 0x27f   :  { %v350_v21 = vpop.f32.mrf.mxu3 }
 0x280   :  { %v4986_v22 = vmul.f32 -1.442695, %v350_v21  ;;  %v373_v23 = vmax.f32 %v350_v21, 0.0 }
 0x282   :  { %5902 = vpow2.f32 %v4986_v22  ;;  %v378_v25 = vsub.f32 %v373_v23, %v376_v24 }
 0x284   :  { %380 = vrot.lane.b32.xlu1 %v378_v25, %s6211_s8 }
 0x287   :  { %v352_v26 = vpop.f32.mrf.mxu3 }
 0x288   :  { %v5903_v27 = vpop.eup %5902 }
 0x289   :  { %v357_v28 = vadd.f32 1.0, %v5903_v27 }
 0x28b   :  { %5904 = vrcp.f32 %v357_v28  ;;  %v369_v32 = vand.u32 2147483648, %v357_v28  ;;  %v367_v34 = vand.u32 2147483647, %v357_v28  ;;  %vm363_vm11 = vweird.f32 %v357_v28 }
 0x28d   :  { %v370_v36 = vor.u32 1.1754944e-38, %v369_v32  ;;  %vm368_vm13 = vcmp.eq.f32.partialorder %v367_v34, 8.507059e+37 }
 0x291   :  { %v5905_v29 = vpop.eup %5904 }
 0x292   :  { %v359_v30 = vmul.f32 %v5905_v29, %v357_v28  ;;  %vm364_vm10 = vweird.f32 %v5905_v29 }
 0x293   :  { %vm365_vm12 = vmor %vm363_vm11, %vm364_vm10 }
 0x294   :  { %v360_v31 = vsub.f32 1.0, %v359_v30 }
 0x296   :  { %v361_v33 = vmul.f32 %v5905_v29, %v360_v31 }
 0x298   :  { %v362_v35 = vadd.f32 %v5905_v29, %v361_v33 }
 0x29a   :  { %v366_v37 = vsel %vm365_vm12, %v5905_v29, %v362_v35 }
 0x29b   :  { %v371_v39 = vsel %vm368_vm13, %v370_v36, %v366_v37 }
 0x29c   :  { %v388_v40 = vsub.f32 %v371_v39, %v386_v38 }
 0x29e   :  { %390 = vrot.lane.b32.xlu1 %v388_v40, %s6211_s8 }
 0x2f6   :  { %v381_v42 = vpop.permute.xlu1 %380 }
 0x2f7   :  { %v383_v43 = vmul.f32 %v381_v42, %v371_v39 }
 0x2f9   :  { %v384_v44 = vadd.f32 %v383_v43, %v6318_v15  ;;  %v5743_v43 = vld [vmem:[%s7757_s4 + $0x14] sm:$0xf] }
 0x2fb   :  { %456 = vrot.lane.b32.xlu2 %v384_v44, %s6210_s1  ;;  %v403_v45 = vpack.c.bf16 %v384_v44, %v384_v44  ;;  %v466_v6 = vadd.f32 %v384_v44, %v6318_v15 }
 0x2fd   :  { %4995 = vmatmul.msk.bf16.vlgmr.msrb.gmra.mxu1 %vm26_vm0, %v403_v45 }
 0x310   :  { %v391_v46 = vpop.permute.xlu1 %390 }
 0x311   :  { %v393_v47 = vmul.f32 %v391_v46, %v371_v39  ;;  %v5741_v46 = vld [vmem:[%s7757_s4 + $0x4] sm:$0xf] }
 0x313   :  { %395 = vrot.lane.b32.xlu0 %v393_v47, %s6212_s17  ;;  %v5021_v47 = vld [vmem:[%s7757_s4 + $0x8] sm:$0xf0] }
 0x314   :  { %v5024_v48 = vor.u32 %v5741_v46, %v5021_v47 }
 0x355   :  { %v457_v49 = vpop.permute.xlu2 %456 }
 0x37a   :  { %v432_v50 = vpop.f32.mrf.mxu1 }
 0x37b   :  { %v459_v51 = vsub.f32 %v432_v50, %v457_v49  ;;  %v4996_v53 = vmul.f32 -1.442695, %v432_v50  ;;  %v5027_v49 = vld [vmem:[%s7757_s4 + $0x10] sm:$0xf]  ;;  %v5744_v50 = vld [vmem:[%s7757_s4 + $0x14] sm:$0xf0] }
 0x37d   :  { %461 = vrot.lane.b32.xlu1 %v459_v51, %s6211_s8  ;;  %5906 = vpow2.f32 %v4996_v53  ;;  %v5028_v51 = vor.u32 %v5744_v50, %v5027_v49  ;;  %v5742_v53 = vld [vmem:[%s7757_s4 + $0x4] sm:$0xf0] }
 0x382   :  { %v434_v52 = vpop.f32.mrf.mxu1 }
 0x383   :  { %v5907_v54 = vpop.eup %5906  ;;  %v5019_v52 = vld [vmem:[%s7757_s4] sm:$0xf] }
 0x384   :  { %v439_v55 = vadd.f32 1.0, %v5907_v54  ;;  %v5020_v54 = vor.u32 %v5742_v53, %v5019_v52  ;;  %v5748_v53 = vld [vmem:[%s7754_s3 + $0x8] sm:$0xff] }
 0x385   :  { %v396_v0 = vpop.permute.xlu0 %395 }
 0x386   :  { %5908 = vrcp.f32 %v439_v55  ;;  %v451_v62 = vand.u32 2147483648, %v439_v55  ;;  %vm445_vm15 = vweird.f32 %v439_v55  ;;  %v449_v63 = vand.u32 2147483647, %v439_v55 }
 0x387   :  { %v398_v3 = vadd.f32 %v396_v0, %v6318_v15  ;;  %v5009_v15 = vld [vmem:[%s7757_s4] sm:$0xf] }
 0x388   :  { %v452_v2 = vor.u32 1.1754944e-38, %v451_v62  ;;  %vm450_vm2 = vcmp.eq.f32.partialorder %v449_v63, 8.507059e+37  ;;  %v5010_v18 = vor.u32 %v5739_v17, %v5009_v15 }
 0x389   :  { %v467_v8 = vadd.f32 %v466_v6, %v398_v3 }
 0x38a   :  { %563 = vmatpush.bf16.msrb.mxu3 %v5010_v18 }
 0x38c   :  { %v5909_v57 = vpop.eup %5908 }
 0x38d   :  { %v441_v58 = vmul.f32 %v5909_v57, %v439_v55  ;;  %vm446_vm14 = vweird.f32 %v5909_v57 }
 0x38e   :  { %vm447_vm1 = vmor %vm445_vm15, %vm446_vm14  ;;  %792 = vmatpush.bf16.msra.mxu3 %v5748_v53  ;;  %v5752_v53 = vld [vmem:[%s7757_s4 + $0x4] sm:$0xf0] }
 0x38f   :  { %v442_v59 = vsub.f32 1.0, %v441_v58 }
 0x391   :  { %v443_v60 = vmul.f32 %v5909_v57, %v442_v59 }
 0x393   :  { %v444_v61 = vadd.f32 %v5909_v57, %v443_v60  ;;  %v5041_v60 = vld [vmem:[%s7757_s4 + $0x14] sm:$0xf] }
 0x395   :  { %v448_v1 = vsel %vm447_vm1, %v5909_v57, %v444_v61  ;;  %v5746_v61 = vld [vmem:[%s7757_s4 + $0x18] sm:$0xf0] }
 0x396   :  { %v453_v5 = vsel %vm450_vm2, %v452_v2, %v448_v1  ;;  %v5042_v62 = vor.u32 %v5746_v61, %v5041_v60  ;;  %v5747_v61 = vld [vmem:[%s7754_s3] sm:$0xff] }
 0x397   :  { %793 = vmatpush.bf16.msra.mxu3 %v5747_v61 }
 0x3ef   :  { %v462_v4 = vpop.permute.xlu1 %461 }
 0x3f0   :  { %v464_v7 = vmul.f32 %v462_v4, %v453_v5 }
 0x3f2   :  { %v465_v9 = vadd.f32 %v464_v7, %v384_v44  ;;  %v5029_v44 = vld [vmem:[%s7757_s4 + $0x18] sm:$0xf0] }
 0x3f3   :  { %v5032_v45 = vor.u32 %v5743_v43, %v5029_v44 }
 0x3f4   :  { %v468_v10 = vadd.f32 %v467_v8, %v465_v9 }
 0x3f6   :  { %v469_v11 = vmul.f32 0.25, %v468_v10 }
 0x3f8   :  { %470 = vst.msk [vmem:[%s7758_s5] sm:$0xff] %vm26_vm0, %v469_v11  ;;  %526 = vrot.lane.b32.xlu2 %v469_v11, %s6210_s1  ;;  %v471_v12 = vpack.c.bf16 %v469_v11, %v469_v11 }
 0x3fa   :  { %5005 = vmatmul.msk.bf16.vlgmr.msrb.gmra.mxu2 %vm26_vm0, %v471_v12 }
 0x400   :  { %625 = vrot.lane.b32.xlu2 %v5028_v51, %s6212_s17 }
 0x408   :  { %621 = vrot.lane.b32.xlu2 %v5020_v54, %s6212_s17 }
 0x410   :  { %711 = vrot.lane.b32.xlu2 %v5042_v62, %s6212_s17  ;;  %v5718_v62 = vld [vmem:[%s7756_s0 + $0x8] sm:$0xff] }
 0x411   :  { %4942 = vmatmul.msk.bf16.gmra.mxu0 %vm26_vm0, %v5718_v62 }
 0x452   :  { %v527_v24 = vpop.permute.xlu2 %526 }
 0x45a   :  { %v626_v0 = vpop.permute.xlu2 %625 }
 0x462   :  { %v622_v5 = vpop.permute.xlu2 %621 }
 0x47d   :  { %v500_v20 = vpop.f32.mrf.mxu2 }
 0x47e   :  { %v504_v21 = vadd.f32 %v500_v20, %v136_v19 }
 0x480   :  { %5910 = vtanh.f32 %v504_v21  ;;  %v5006_v26 = vmul.f32 -1.442695, %v504_v21 }
 0x482   :  { %5912 = vpow2.f32 %v5006_v26 }
 0x485   :  { %v502_v22 = vpop.f32.mrf.mxu2 }
 0x486   :  { %v5911_v23 = vpop.eup %5910  ;;  %v712_v22 = vpop.permute.xlu2 %711 }
 0x487   :  { %v529_v25 = vsub.f32 %v5911_v23, %v527_v24  ;;  %724 = vmatpush.bf16.msra.mxu2 %v712_v22  ;;  %v5037_v23 = vld [vmem:[%s7757_s4 + $0x4] sm:$0xf]  ;;  %v5745_v24 = vld [vmem:[%s7757_s4 + $0x8] sm:$0xf0] }
 0x488   :  { %v5913_v27 = vpop.eup %5912 }
 0x489   :  { %531 = vrot.lane.b32.xlu0 %v529_v25, %s6211_s8  ;;  %v508_v28 = vadd.f32 1.0, %v5913_v27  ;;  %v5038_v25 = vor.u32 %v5745_v24, %v5037_v23  ;;  %v5749_v23 = vld [vmem:[%s7757_s4 + $0x4] sm:$0xf0] }
 0x48b   :  { %5914 = vrcp.f32 %v508_v28  ;;  %v520_v34 = vand.u32 2147483648, %v508_v28  ;;  %vm514_vm4 = vweird.f32 %v508_v28  ;;  %v518_v35 = vand.u32 2147483647, %v508_v28 }
 0x48d   :  { %v521_v37 = vor.u32 1.1754944e-38, %v520_v34  ;;  %vm519_vm7 = vcmp.eq.f32.partialorder %v518_v35, 8.507059e+37 }
 0x491   :  { %v5915_v29 = vpop.eup %5914  ;;  %627 = vrot.lane.b32.xlu0 %v5032_v45, %s6212_s17 }
 0x492   :  { %v510_v30 = vmul.f32 %v5915_v29, %v508_v28  ;;  %vm515_vm3 = vweird.f32 %v5915_v29 }
 0x493   :  { %vm516_vm6 = vmor %vm514_vm4, %vm515_vm3 }
 0x494   :  { %v511_v31 = vsub.f32 1.0, %v510_v30 }
 0x496   :  { %v512_v32 = vmul.f32 %v5915_v29, %v511_v31 }
 0x498   :  { %v513_v33 = vadd.f32 %v5915_v29, %v512_v32 }
 0x499   :  { %623 = vrot.lane.b32.xlu0 %v5024_v48, %s6212_s17 }
 0x49a   :  { %v517_v36 = vsel %vm516_vm6, %v5915_v29, %v513_v33 }
 0x49b   :  { %v522_v39 = vsel %vm519_vm7, %v521_v37, %v517_v36 }
 0x4fb   :  { %v532_v38 = vpop.permute.xlu0 %531 }
 0x4fc   :  { %v534_v40 = vmul.f32 %v532_v38, %v522_v39 }
 0x4fe   :  { %v535_v41 = vadd.f32 %v534_v40, %v469_v11 }
 0x500   :  { %590 = vrot.lane.b32.xlu1 %v535_v41, %s6210_s1  ;;  %v540_v42 = vpack.c.bf16 %v535_v41, %v535_v41 }
 0x502   :  { %5015 = vmatmul.msk.bf16.vlgmr.msrb.gmra.mxu3 %vm26_vm0, %v540_v42 }
 0x503   :  { %v628_v63 = vpop.permute.xlu0 %627 }
 0x504   :  { %v630_v1 = vsel %vm333_vm5, %v626_v0, %v628_v63 }
 0x505   :  { %642 = vmatpush.bf16.msra.mxu1 %v630_v1 }
 0x50b   :  { %v624_v6 = vpop.permute.xlu0 %623 }
 0x50c   :  { %v629_v7 = vsel %vm333_vm5, %v622_v5, %v624_v6 }
 0x50d   :  { %643 = vmatpush.bf16.msra.mxu1 %v629_v7 }
 0x572   :  { %v591_v57 = vpop.permute.xlu1 %590 }
 0x585   :  { %v565_v55 = vpop.f32.mrf.mxu3 }
 0x586   :  { %5916 = vtanh.f32 %v565_v55  ;;  %v5016_v2 = vmul.f32 -1.442695, %v565_v55 }
 0x588   :  { %5918 = vpow2.f32 %v5016_v2 }
 0x58c   :  { %v5917_v56 = vpop.eup %5916 }
 0x58d   :  { %v567_v58 = vpop.f32.mrf.mxu3  ;;  %v593_v59 = vsub.f32 %v5917_v56, %v591_v57 }
 0x58e   :  { %v5919_v3 = vpop.eup %5918 }
 0x58f   :  { %595 = vrot.lane.b32.xlu1 %v593_v59, %s6211_s8  ;;  %v572_v4 = vadd.f32 1.0, %v5919_v3 }
 0x591   :  { %5920 = vrcp.f32 %v572_v4  ;;  %v584_v13 = vand.u32 2147483648, %v572_v4  ;;  %vm578_vm9 = vweird.f32 %v572_v4  ;;  %v582_v14 = vand.u32 2147483647, %v572_v4 }
 0x593   :  { %v585_v16 = vor.u32 1.1754944e-38, %v584_v13  ;;  %vm583_vm11 = vcmp.eq.f32.partialorder %v582_v14, 8.507059e+37 }
 0x597   :  { %v5921_v8 = vpop.eup %5920 }
 0x598   :  { %v574_v9 = vmul.f32 %v5921_v8, %v572_v4  ;;  %vm579_vm8 = vweird.f32 %v5921_v8 }
 0x599   :  { %vm580_vm10 = vmor %vm578_vm9, %vm579_vm8 }
 0x59a   :  { %v575_v10 = vsub.f32 1.0, %v574_v9 }
 0x59c   :  { %v576_v11 = vmul.f32 %v5921_v8, %v575_v10 }
 0x59e   :  { %v577_v12 = vadd.f32 %v5921_v8, %v576_v11 }
 0x5a0   :  { %v581_v15 = vsel %vm580_vm10, %v5921_v8, %v577_v12 }
 0x5a1   :  { %v586_v18 = vsel %vm583_vm11, %v585_v16, %v581_v15 }
 0x601   :  { %v596_v17 = vpop.permute.xlu1 %595 }
 0x602   :  { %v598_v19 = vmul.f32 %v596_v17, %v586_v18 }
 0x604   :  { %v6408_v20 = vadd.f32 %v598_v19, %v535_v41  ;;  %v5061_v19 = vld [vmem:[%s7757_s4 + $0x10] sm:$0xf] }
 0x606   :  { %680 = vrot.lane.b32.xlu2 %v6408_v20, %s6211_s8  ;;  %670 = vrot.lane.b32.xlu1 %v6408_v20, %s6210_s1  ;;  %v604_v21 = vpack.c.bf16 %v6408_v20, %v6408_v20 }
 0x608   :  { %5033 = vmatmul.msk.bf16.vlgmr.msra.gmra.mxu1 %vm26_vm0, %v604_v21  ;;  %v5057_v21 = vld [vmem:[%s7757_s4] sm:$0xf] }
 0x609   :  { %v5058_v24 = vor.u32 %v5749_v23, %v5057_v21 }
 0x60e   :  { %709 = vrot.lane.b32.xlu1 %v5038_v25, %s6212_s17  ;;  %v139_v25 = vpop.f32.mrf.mxu0 }
 0x660   :  { %v681_v43 = vpop.permute.xlu2 %680 }
 0x678   :  { %v671_v29 = vpop.permute.xlu1 %670 }
 0x680   :  { %v710_v46 = vpop.permute.xlu1 %709 }
 0x681   :  { %725 = vmatpush.bf16.msra.mxu2 %v710_v46 }
 0x685   :  { %v645_v26 = vpop.f32.mrf.mxu1 }
 0x686   :  { %v5034_v27 = vmul.f32 -1.442695, %v645_v26  ;;  %v668_v28 = vmax.f32 %v645_v26, 0.0 }
 0x688   :  { %5922 = vpow2.f32 %v5034_v27  ;;  %v673_v30 = vsub.f32 %v668_v28, %v671_v29 }
 0x68a   :  { %675 = vrot.lane.b32.xlu0 %v673_v30, %s6211_s8 }
 0x68d   :  { %v647_v31 = vpop.f32.mrf.mxu1 }
 0x68e   :  { %v5923_v32 = vpop.eup %5922 }
 0x68f   :  { %v652_v33 = vadd.f32 1.0, %v5923_v32 }
 0x691   :  { %5924 = vrcp.f32 %v652_v33  ;;  %v664_v37 = vand.u32 2147483648, %v652_v33  ;;  %v662_v39 = vand.u32 2147483647, %v652_v33  ;;  %vm658_vm13 = vweird.f32 %v652_v33 }
 0x693   :  { %v665_v41 = vor.u32 1.1754944e-38, %v664_v37  ;;  %vm663_vm15 = vcmp.eq.f32.partialorder %v662_v39, 8.507059e+37 }
 0x697   :  { %v5925_v34 = vpop.eup %5924 }
 0x698   :  { %v654_v35 = vmul.f32 %v5925_v34, %v652_v33  ;;  %vm659_vm12 = vweird.f32 %v5925_v34 }
 0x699   :  { %vm660_vm14 = vmor %vm658_vm13, %vm659_vm12 }
 0x69a   :  { %v655_v36 = vsub.f32 1.0, %v654_v35 }
 0x69c   :  { %v656_v38 = vmul.f32 %v5925_v34, %v655_v36 }
 0x69e   :  { %v657_v40 = vadd.f32 %v5925_v34, %v656_v38 }
 0x6a0   :  { %v661_v42 = vsel %vm660_vm14, %v5925_v34, %v657_v40 }
 0x6a1   :  { %v666_v44 = vsel %vm663_vm15, %v665_v41, %v661_v42 }
 0x6a2   :  { %v683_v45 = vsub.f32 %v666_v44, %v681_v43 }
 0x6a4   :  { %685 = vrot.lane.b32.xlu0 %v683_v45, %s6211_s8 }
 0x6fc   :  { %v676_v47 = vpop.permute.xlu0 %675 }
 0x6fd   :  { %v678_v48 = vmul.f32 %v676_v47, %v666_v44 }
 0x6ff   :  { %v679_v49 = vadd.f32 %v678_v48, %v6408_v20 }
 0x701   :  { %v698_v50 = vpack.c.bf16 %v679_v49, %v679_v49  ;;  %751 = vrot.lane.b32.xlu1 %v679_v49, %s6210_s1  ;;  %v761_v12 = vadd.f32 %v679_v49, %v6408_v20 }
 0x703   :  { %5043 = vmatmul.msk.bf16.vlgmr.msra.gmra.mxu2 %vm26_vm0, %v698_v50  ;;  %v5754_v50 = vld [vmem:[%s7757_s4 + $0x14] sm:$0xf0] }
 0x716   :  { %v686_v51 = vpop.permute.xlu0 %685 }
 0x717   :  { %v688_v52 = vmul.f32 %v686_v51, %v666_v44 }
 0x719   :  { %690 = vrot.lane.b32.xlu2 %v688_v52, %s6212_s17  ;;  %v5067_v52 = vld [vmem:[%s7757_s4] sm:$0xf] }
 0x773   :  { %v752_v54 = vpop.permute.xlu1 %751  ;;  %v691_v6 = vpop.permute.xlu2 %690 }
 0x774   :  { %v693_v9 = vadd.f32 %v691_v6, %v6408_v20  ;;  %v5750_v20 = vld [vmem:[%s7757_s4 + $0x14] sm:$0xf0] }
 0x775   :  { %v5062_v22 = vor.u32 %v5750_v20, %v5061_v19 }
 0x776   :  { %v762_v14 = vadd.f32 %v761_v12, %v693_v9 }
 0x777   :  { %857 = vmatpush.bf16.msrb.mxu1 %v5062_v22 }
 0x77b   :  { %858 = vmatpush.bf16.msrb.mxu1 %v5058_v24 }
 0x786   :  { %v727_v55 = vpop.f32.mrf.mxu2 }
 0x787   :  { %v754_v56 = vsub.f32 %v727_v55, %v752_v54  ;;  %v5044_v58 = vmul.f32 -1.442695, %v727_v55  ;;  %v5068_v54 = vor.u32 %v5752_v53, %v5067_v52  ;;  %v5753_v55 = vld [vmem:[%s7757_s4 + $0x14] sm:$0xf] }
 0x789   :  { %756 = vrot.lane.b32.xlu0 %v754_v56, %s6211_s8  ;;  %5926 = vpow2.f32 %v5044_v58  ;;  %v5077_v56 = vld [vmem:[%s7757_s4 + $0x18] sm:$0xf0]  ;;  %v5751_v58 = vld [vmem:[%s7757_s4 + $0x4] sm:$0xf] }
 0x78e   :  { %v729_v57 = vpop.f32.mrf.mxu2 }
 0x78f   :  { %v5927_v59 = vpop.eup %5926  ;;  %v5080_v57 = vor.u32 %v5753_v55, %v5077_v56 }
 0x790   :  { %v734_v60 = vadd.f32 1.0, %v5927_v59  ;;  %v5069_v59 = vld [vmem:[%s7757_s4 + $0x8] sm:$0xf0] }
 0x792   :  { %5928 = vrcp.f32 %v734_v60  ;;  %v746_v4 = vand.u32 2147483648, %v734_v60  ;;  %vm740_vm2 = vweird.f32 %v734_v60  ;;  %v744_v5 = vand.u32 2147483647, %v734_v60 }
 0x794   :  { %v747_v8 = vor.u32 1.1754944e-38, %v746_v4  ;;  %vm745_vm4 = vcmp.eq.f32.partialorder %v744_v5, 8.507059e+37 }
 0x798   :  { %v5929_v63 = vpop.eup %5928 }
 0x799   :  { %v736_v0 = vmul.f32 %v5929_v63, %v734_v60  ;;  %vm741_vm1 = vweird.f32 %v5929_v63  ;;  %v5072_v60 = vor.u32 %v5751_v58, %v5069_v59  ;;  %v5758_v59 = vld [vmem:[%s7754_s3 + $0x8] sm:$0xff] }
 0x79a   :  { %vm742_vm3 = vmor %vm740_vm2, %vm741_vm1  ;;  %1087 = vmatpush.bf16.msra.mxu1 %v5758_v59 }
 0x79b   :  { %v737_v1 = vsub.f32 1.0, %v736_v0 }
 0x79d   :  { %v738_v2 = vmul.f32 %v5929_v63, %v737_v1 }
 0x79f   :  { %v739_v3 = vadd.f32 %v5929_v63, %v738_v2  ;;  %v5089_v2 = vld [vmem:[%s7757_s4 + $0x14] sm:$0xf] }
 0x7a1   :  { %v743_v7 = vsel %vm742_vm3, %v5929_v63, %v739_v3  ;;  %v5756_v3 = vld [vmem:[%s7757_s4 + $0x18] sm:$0xf0] }
 0x7a2   :  { %v748_v11 = vsel %vm745_vm4, %v747_v8, %v743_v7  ;;  %v5090_v4 = vor.u32 %v5756_v3, %v5089_v2  ;;  %v5757_v3 = vld [vmem:[%s7754_s3] sm:$0xff] }
 0x7a3   :  { %1088 = vmatpush.bf16.msra.mxu1 %v5757_v3 }
 0x7fb   :  { %v757_v10 = vpop.permute.xlu0 %756 }
 0x7fc   :  { %v759_v13 = vmul.f32 %v757_v10, %v748_v11 }
 0x7fe   :  { %v760_v15 = vadd.f32 %v759_v13, %v679_v49  ;;  %v5075_v49 = vld [vmem:[%s7757_s4 + $0x10] sm:$0xf] }
 0x7ff   :  { %v5076_v51 = vor.u32 %v5754_v50, %v5075_v49 }
 0x800   :  { %v763_v16 = vadd.f32 %v762_v14, %v760_v15 }
 0x802   :  { %v764_v17 = vmul.f32 0.25, %v763_v16 }
 0x804   :  { %765 = vst.msk [vmem:[%s7758_s5 + $0x8] sm:$0xff] %vm26_vm0, %v764_v17  ;;  %821 = vrot.lane.b32.xlu1 %v764_v17, %s6210_s1  ;;  %v766_v18 = vpack.c.bf16 %v764_v17, %v764_v17 }
 0x806   :  { %5053 = vmatmul.msk.bf16.vlgmr.msra.gmra.mxu3 %vm26_vm0, %v766_v18 }
 0x80c   :  { %920 = vrot.lane.b32.xlu1 %v5076_v51, %s6212_s17 }
 0x814   :  { %916 = vrot.lane.b32.xlu1 %v5068_v54, %s6212_s17 }
 0x81c   :  { %1006 = vrot.lane.b32.xlu1 %v5090_v4, %s6212_s17 }
 0x876   :  { %v822_v30 = vpop.permute.xlu1 %821 }
 0x87e   :  { %v921_v5 = vpop.permute.xlu1 %920 }
 0x886   :  { %v917_v12 = vpop.permute.xlu1 %916 }
 0x889   :  { %v795_v26 = vpop.f32.mrf.mxu3 }
 0x88a   :  { %v799_v27 = vadd.f32 %v795_v26, %v139_v25 }
 0x88c   :  { %5930 = vtanh.f32 %v799_v27  ;;  %v5054_v32 = vmul.f32 -1.442695, %v799_v27 }
 0x88e   :  { %5932 = vpow2.f32 %v5054_v32 }
 0x891   :  { %v797_v28 = vpop.f32.mrf.mxu3 }
 0x892   :  { %v5931_v29 = vpop.eup %5930  ;;  %v5085_v28 = vld [vmem:[%s7757_s4 + $0x4] sm:$0xf] }
 0x893   :  { %v824_v31 = vsub.f32 %v5931_v29, %v822_v30  ;;  %v5755_v29 = vld [vmem:[%s7757_s4 + $0x8] sm:$0xf0] }
 0x894   :  { %v5933_v33 = vpop.eup %5932  ;;  %v5086_v30 = vor.u32 %v5755_v29, %v5085_v28  ;;  %v5759_v28 = vld [vmem:[%s7757_s4 + $0x4] sm:$0xf0] }
 0x895   :  { %826 = vrot.lane.b32.xlu2 %v824_v31, %s6211_s8  ;;  %v803_v34 = vadd.f32 1.0, %v5933_v33  ;;  %v1007_v31 = vpop.permute.xlu1 %1006 }
 0x896   :  { %1019 = vmatpush.bf16.msrb.mxu3 %v1007_v31 }
 0x897   :  { %5934 = vrcp.f32 %v803_v34  ;;  %v815_v40 = vand.u32 2147483648, %v803_v34  ;;  %vm809_vm7 = vweird.f32 %v803_v34  ;;  %v813_v41 = vand.u32 2147483647, %v803_v34 }
 0x899   :  { %v816_v43 = vor.u32 1.1754944e-38, %v815_v40  ;;  %vm814_vm9 = vcmp.eq.f32.partialorder %v813_v41, 8.507059e+37 }
 0x89d   :  { %v5935_v35 = vpop.eup %5934  ;;  %922 = vrot.lane.b32.xlu2 %v5080_v57, %s6212_s17 }
 0x89e   :  { %v805_v36 = vmul.f32 %v5935_v35, %v803_v34  ;;  %vm810_vm6 = vweird.f32 %v5935_v35 }
 0x89f   :  { %vm811_vm8 = vmor %vm809_vm7, %vm810_vm6 }
 0x8a0   :  { %v806_v37 = vsub.f32 1.0, %v805_v36 }
 0x8a2   :  { %v807_v38 = vmul.f32 %v5935_v35, %v806_v37 }
 0x8a4   :  { %v808_v39 = vadd.f32 %v5935_v35, %v807_v38 }
 0x8a5   :  { %918 = vrot.lane.b32.xlu2 %v5072_v60, %s6212_s17 }
 0x8a6   :  { %v812_v42 = vsel %vm811_vm8, %v5935_v35, %v808_v39 }
 0x8a7   :  { %v817_v45 = vsel %vm814_vm9, %v816_v43, %v812_v42 }
 0x8ef   :  { %v827_v44 = vpop.permute.xlu2 %826 }
 0x8f0   :  { %v829_v46 = vmul.f32 %v827_v44, %v817_v45 }
 0x8f2   :  { %v830_v47 = vadd.f32 %v829_v46, %v764_v17 }
 0x8f4   :  { %v835_v48 = vpack.c.bf16 %v830_v47, %v830_v47  ;;  %885 = vrot.lane.b32.xlu0 %v830_v47, %s6210_s1 }
 0x8f6   :  { %5063 = vmatmul.msk.bf16.vlgmr.msrb.gmra.mxu1 %vm26_vm0, %v835_v48 }
 0x8f7   :  { %v923_v6 = vpop.permute.xlu2 %922 }
 0x8f8   :  { %v925_v7 = vsel %vm333_vm5, %v921_v5, %v923_v6 }
 0x8f9   :  { %937 = vmatpush.bf16.msrb.mxu2 %v925_v7 }
 0x8ff   :  { %v919_v11 = vpop.permute.xlu2 %918 }
 0x900   :  { %v924_v13 = vsel %vm333_vm5, %v917_v12, %v919_v11 }
 0x901   :  { %938 = vmatpush.bf16.msrb.mxu2 %v924_v13 }
 0x966   :  { %v886_v63 = vpop.permute.xlu0 %885 }
 0x973   :  { %v860_v61 = vpop.f32.mrf.mxu1 }
 0x974   :  { %5936 = vtanh.f32 %v860_v61  ;;  %v5064_v8 = vmul.f32 -1.442695, %v860_v61 }
 0x976   :  { %5938 = vpow2.f32 %v5064_v8 }
 0x97a   :  { %v5937_v62 = vpop.eup %5936 }
 0x97b   :  { %v862_v0 = vpop.f32.mrf.mxu1  ;;  %v888_v1 = vsub.f32 %v5937_v62, %v886_v63 }
 0x97c   :  { %v5939_v9 = vpop.eup %5938 }
 0x97d   :  { %890 = vrot.lane.b32.xlu0 %v888_v1, %s6211_s8  ;;  %v867_v10 = vadd.f32 1.0, %v5939_v9 }
 0x97f   :  { %5940 = vrcp.f32 %v867_v10  ;;  %v879_v19 = vand.u32 2147483648, %v867_v10  ;;  %vm873_vm11 = vweird.f32 %v867_v10  ;;  %v877_v20 = vand.u32 2147483647, %v867_v10 }
 0x981   :  { %v880_v22 = vor.u32 1.1754944e-38, %v879_v19  ;;  %vm878_vm13 = vcmp.eq.f32.partialorder %v877_v20, 8.507059e+37 }
 0x985   :  { %v5941_v14 = vpop.eup %5940 }
 0x986   :  { %v869_v15 = vmul.f32 %v5941_v14, %v867_v10  ;;  %vm874_vm10 = vweird.f32 %v5941_v14 }
 0x987   :  { %vm875_vm12 = vmor %vm873_vm11, %vm874_vm10 }
 0x988   :  { %v870_v16 = vsub.f32 1.0, %v869_v15 }
 0x98a   :  { %v871_v17 = vmul.f32 %v5941_v14, %v870_v16 }
 0x98c   :  { %v872_v18 = vadd.f32 %v5941_v14, %v871_v17 }
 0x98e   :  { %v876_v21 = vsel %vm875_vm12, %v5941_v14, %v872_v18 }
 0x98f   :  { %v881_v24 = vsel %vm878_vm13, %v880_v22, %v876_v21 }
 0x9ef   :  { %v891_v23 = vpop.permute.xlu0 %890 }
 0x9f0   :  { %v893_v25 = vmul.f32 %v891_v23, %v881_v24  ;;  %v5109_v24 = vld [vmem:[%s7757_s4 + $0x10] sm:$0xf] }
 0x9f2   :  { %v6502_v26 = vadd.f32 %v893_v25, %v830_v47  ;;  %v5760_v25 = vld [vmem:[%s7757_s4 + $0x14] sm:$0xf0] }
 0x9f4   :  { %975 = vrot.lane.b32.xlu1 %v6502_v26, %s6211_s8  ;;  %965 = vrot.lane.b32.xlu0 %v6502_v26, %s6210_s1  ;;  %v899_v27 = vpack.c.bf16 %v6502_v26, %v6502_v26 }
 0x9f6   :  { %5081 = vmatmul.msk.bf16.vlgmr.msrb.gmra.mxu2 %vm26_vm0, %v899_v27  ;;  %v5110_v27 = vor.u32 %v5760_v25, %v5109_v24 }
 0x9f8   :  { %1152 = vmatpush.bf16.msra.mxu2 %v5110_v27 }
 0x9fc   :  { %1004 = vrot.lane.b32.xlu0 %v5086_v30, %s6212_s17  ;;  %v141_v30 = vpop.f32.mrf.mxu0 }
 0xa66   :  { %v966_v32 = vpop.permute.xlu0 %965  ;;  %v976_v50 = vpop.permute.xlu1 %975 }
 0xa6e   :  { %v1005_v33 = vpop.permute.xlu0 %1004 }
 0xa6f   :  { %1020 = vmatpush.bf16.msrb.mxu3 %v1005_v33 }
 0xa79   :  { %v940_v34 = vpop.f32.mrf.mxu2 }
 0xa7a   :  { %v5082_v35 = vmul.f32 -1.442695, %v940_v34  ;;  %v963_v36 = vmax.f32 %v940_v34, 0.0 }
 0xa7c   :  { %5942 = vpow2.f32 %v5082_v35  ;;  %v968_v37 = vsub.f32 %v963_v36, %v966_v32 }
 0xa7e   :  { %970 = vrot.lane.b32.xlu2 %v968_v37, %s6211_s8 }
 0xa81   :  { %v942_v38 = vpop.f32.mrf.mxu2 }
 0xa82   :  { %v5943_v39 = vpop.eup %5942 }
 0xa83   :  { %v947_v40 = vadd.f32 1.0, %v5943_v39 }
 0xa85   :  { %5944 = vrcp.f32 %v947_v40  ;;  %v959_v44 = vand.u32 2147483648, %v947_v40  ;;  %v957_v46 = vand.u32 2147483647, %v947_v40  ;;  %vm953_vm15 = vweird.f32 %v947_v40 }
 0xa87   :  { %v960_v48 = vor.u32 1.1754944e-38, %v959_v44  ;;  %vm958_vm2 = vcmp.eq.f32.partialorder %v957_v46, 8.507059e+37 }
 0xa8b   :  { %v5945_v41 = vpop.eup %5944 }
 0xa8c   :  { %v949_v42 = vmul.f32 %v5945_v41, %v947_v40  ;;  %vm954_vm14 = vweird.f32 %v5945_v41 }
 0xa8d   :  { %vm955_vm1 = vmor %vm953_vm15, %vm954_vm14 }
 0xa8e   :  { %v950_v43 = vsub.f32 1.0, %v949_v42 }
 0xa90   :  { %v951_v45 = vmul.f32 %v5945_v41, %v950_v43 }
 0xa92   :  { %v952_v47 = vadd.f32 %v5945_v41, %v951_v45 }
 0xa94   :  { %v956_v49 = vsel %vm955_vm1, %v5945_v41, %v952_v47 }
 0xa95   :  { %v961_v51 = vsel %vm958_vm2, %v960_v48, %v956_v49 }
 0xa96   :  { %v978_v52 = vsub.f32 %v961_v51, %v976_v50 }
 0xa98   :  { %980 = vrot.lane.b32.xlu2 %v978_v52, %s6211_s8 }
 0xad8   :  { %v971_v53 = vpop.permute.xlu2 %970 }
 0xad9   :  { %v973_v54 = vmul.f32 %v971_v53, %v961_v51 }
 0xadb   :  { %v974_v55 = vadd.f32 %v973_v54, %v6502_v26  ;;  %v5123_v54 = vld [vmem:[%s7757_s4 + $0x10] sm:$0xf] }
 0xadd   :  { %v993_v56 = vpack.c.bf16 %v974_v55, %v974_v55  ;;  %1046 = vrot.lane.b32.xlu0 %v974_v55, %s6210_s1  ;;  %v1056_v17 = vadd.f32 %v974_v55, %v6502_v26 }
 0xadf   :  { %5091 = vmatmul.msk.bf16.vlgmr.msrb.gmra.mxu3 %vm26_vm0, %v993_v56  ;;  %v5763_v56 = vld [vmem:[%s7757_s4 + $0x14] sm:$0xf] }
 0xaf2   :  { %v981_v57 = vpop.permute.xlu2 %980 }
 0xaf3   :  { %v983_v58 = vmul.f32 %v981_v57, %v961_v51 }
 0xaf5   :  { %985 = vrot.lane.b32.xlu1 %v983_v58, %s6212_s17  ;;  %v5125_v58 = vld [vmem:[%s7757_s4 + $0x18] sm:$0xf0] }
 0xaf6   :  { %v5128_v59 = vor.u32 %v5763_v56, %v5125_v58 }
 0xb4f   :  { %v1047_v60 = vpop.permute.xlu0 %1046 }
 0xb62   :  { %v1022_v61 = vpop.f32.mrf.mxu3 }
 0xb63   :  { %v1049_v62 = vsub.f32 %v1022_v61, %v1047_v60  ;;  %v5092_v0 = vmul.f32 -1.442695, %v1022_v61  ;;  %v5115_v60 = vld [vmem:[%s7757_s4] sm:$0xf]  ;;  %v5762_v61 = vld [vmem:[%s7757_s4 + $0x4] sm:$0xf0] }
 0xb65   :  { %1051 = vrot.lane.b32.xlu2 %v1049_v62, %s6211_s8  ;;  %5946 = vpow2.f32 %v5092_v0  ;;  %v5761_v62 = vld [vmem:[%s7757_s4 + $0x4] sm:$0xf]  ;;  %v5116_v0 = vor.u32 %v5762_v61, %v5115_v60 }
 0xb67   :  { %v986_v11 = vpop.permute.xlu1 %985 }
 0xb68   :  { %v988_v14 = vadd.f32 %v986_v11, %v6502_v26  ;;  %v5105_v26 = vld [vmem:[%s7757_s4] sm:$0xf] }
 0xb69   :  { %v5106_v29 = vor.u32 %v5759_v28, %v5105_v26 }
 0xb6a   :  { %v1024_v63 = vpop.f32.mrf.mxu3  ;;  %v1057_v19 = vadd.f32 %v1056_v17, %v988_v14 }
 0xb6b   :  { %v5947_v1 = vpop.eup %5946  ;;  %1153 = vmatpush.bf16.msra.mxu2 %v5106_v29  ;;  %v5117_v63 = vld [vmem:[%s7757_s4 + $0x8] sm:$0xf0] }
 0xb6c   :  { %v1029_v2 = vadd.f32 1.0, %v5947_v1  ;;  %v5120_v1 = vor.u32 %v5761_v62, %v5117_v63 }
 0xb6e   :  { %5948 = vrcp.f32 %v1029_v2  ;;  %v1041_v9 = vand.u32 2147483648, %v1029_v2  ;;  %vm1035_vm4 = vweird.f32 %v1029_v2  ;;  %v1039_v10 = vand.u32 2147483647, %v1029_v2 }
 0xb70   :  { %v1042_v13 = vor.u32 1.1754944e-38, %v1041_v9  ;;  %vm1040_vm7 = vcmp.eq.f32.partialorder %v1039_v10, 8.507059e+37 }
 0xb74   :  { %v5949_v4 = vpop.eup %5948 }
 0xb75   :  { %v1031_v5 = vmul.f32 %v5949_v4, %v1029_v2  ;;  %vm1036_vm3 = vweird.f32 %v5949_v4 }
 0xb76   :  { %vm1037_vm6 = vmor %vm1035_vm4, %vm1036_vm3 }
 0xb77   :  { %v1032_v6 = vsub.f32 1.0, %v1031_v5 }
 0xb79   :  { %v1033_v7 = vmul.f32 %v5949_v4, %v1032_v6 }
 0xb7b   :  { %v1034_v8 = vadd.f32 %v5949_v4, %v1033_v7  ;;  %v5137_v7 = vld [vmem:[%s7757_s4 + $0x14] sm:$0xf] }
 0xb7d   :  { %v1038_v12 = vsel %vm1037_vm6, %v5949_v4, %v1034_v8  ;;  %v5766_v8 = vld [vmem:[%s7757_s4 + $0x18] sm:$0xf0] }
 0xb7e   :  { %v1043_v16 = vsel %vm1040_vm7, %v1042_v13, %v1038_v12  ;;  %v5138_v9 = vor.u32 %v5766_v8, %v5137_v7  ;;  %v5767_v8 = vld [vmem:[%s7754_s3] sm:$0xff] }
 0xbbf   :  { %v1052_v15 = vpop.permute.xlu2 %1051 }
 0xbc0   :  { %v1054_v18 = vmul.f32 %v1052_v15, %v1043_v16 }
 0xbc2   :  { %v1055_v20 = vadd.f32 %v1054_v18, %v974_v55  ;;  %v5764_v55 = vld [vmem:[%s7757_s4 + $0x14] sm:$0xf0] }
 0xbc3   :  { %v5124_v57 = vor.u32 %v5764_v55, %v5123_v54 }
 0xbc4   :  { %v1058_v21 = vadd.f32 %v1057_v19, %v1055_v20 }
 0xbc6   :  { %v1059_v22 = vmul.f32 0.25, %v1058_v21 }
 0xbc8   :  { %1060 = vst.msk [vmem:[%s7758_s5 + $0x10] sm:$0xff] %vm26_vm0, %v1059_v22  ;;  %1116 = vrot.lane.b32.xlu0 %v1059_v22, %s6210_s1  ;;  %v1061_v23 = vpack.c.bf16 %v1059_v22, %v1059_v22 }
 0xbca   :  { %5101 = vmatmul.msk.bf16.vlgmr.msra.gmra.mxu1 %vm26_vm0, %v1061_v23 }
 0xbd0   :  { %1215 = vrot.lane.b32.xlu0 %v5124_v57, %s6212_s17 }
 0xbd8   :  { %1211 = vrot.lane.b32.xlu0 %v5116_v0, %s6212_s17  ;;  %v5768_v0 = vld [vmem:[%s7754_s3 + $0x8] sm:$0xff] }
 0xbd9   :  { %1382 = vmatpush.bf16.msrb.mxu2 %v5768_v0  ;;  %v5165_v0 = vld [vmem:[%s7757_s4 + $0x8] sm:$0xf0] }
 0xbdd   :  { %1383 = vmatpush.bf16.msrb.mxu2 %v5767_v8 }
 0xbe0   :  { %1301 = vrot.lane.b32.xlu0 %v5138_v9, %s6212_s17  ;;  %v5719_v9 = vld [vmem:[%s7756_s0 + $0x10] sm:$0xff] }
 0xbe1   :  { %4943 = vmatmul.msk.bf16.gmra.mxu0 %vm26_vm0, %v5719_v9 }
 0xc3a   :  { %v1117_v35 = vpop.permute.xlu0 %1116 }
 0xc42   :  { %v1216_v10 = vpop.permute.xlu0 %1215 }
 0xc47   :  { %v1090_v31 = vpop.f32.mrf.mxu1 }
 0xc48   :  { %v1094_v32 = vadd.f32 %v1090_v31, %v141_v30 }
 0xc4a   :  { %5950 = vtanh.f32 %v1094_v32  ;;  %v5102_v37 = vmul.f32 -1.442695, %v1094_v32  ;;  %v1212_v13 = vpop.permute.xlu0 %1211 }
 0xc4c   :  { %5952 = vpow2.f32 %v5102_v37 }
 0xc4f   :  { %v1092_v33 = vpop.f32.mrf.mxu1 }
 0xc50   :  { %v5951_v34 = vpop.eup %5950 }
 0xc51   :  { %v1119_v36 = vsub.f32 %v5951_v34, %v1117_v35  ;;  %v5133_v34 = vld [vmem:[%s7757_s4 + $0x4] sm:$0xf]  ;;  %v5765_v35 = vld [vmem:[%s7757_s4 + $0x8] sm:$0xf0] }
 0xc52   :  { %v5953_v38 = vpop.eup %5952  ;;  %v1302_v33 = vpop.permute.xlu0 %1301 }
 0xc53   :  { %1121 = vrot.lane.b32.xlu1 %v1119_v36, %s6211_s8  ;;  %v1098_v39 = vadd.f32 1.0, %v5953_v38  ;;  %1314 = vmatpush.bf16.msrb.mxu1 %v1302_v33  ;;  %v5134_v36 = vor.u32 %v5765_v35, %v5133_v34  ;;  %v5769_v34 = vld [vmem:[%s7757_s4 + $0x4] sm:$0xf0] }
 0xc55   :  { %5954 = vrcp.f32 %v1098_v39  ;;  %v1110_v45 = vand.u32 2147483648, %v1098_v39  ;;  %vm1104_vm9 = vweird.f32 %v1098_v39  ;;  %v1108_v46 = vand.u32 2147483647, %v1098_v39 }
 0xc57   :  { %v1111_v48 = vor.u32 1.1754944e-38, %v1110_v45  ;;  %vm1109_vm11 = vcmp.eq.f32.partialorder %v1108_v46, 8.507059e+37 }
 0xc5b   :  { %v5955_v40 = vpop.eup %5954  ;;  %1217 = vrot.lane.b32.xlu1 %v5128_v59, %s6212_s17 }
 0xc5c   :  { %v1100_v41 = vmul.f32 %v5955_v40, %v1098_v39  ;;  %vm1105_vm8 = vweird.f32 %v5955_v40 }
 0xc5d   :  { %vm1106_vm10 = vmor %vm1104_vm9, %vm1105_vm8 }
 0xc5e   :  { %v1101_v42 = vsub.f32 1.0, %v1100_v41 }
 0xc60   :  { %v1102_v43 = vmul.f32 %v5955_v40, %v1101_v42 }
 0xc62   :  { %v1103_v44 = vadd.f32 %v5955_v40, %v1102_v43 }
 0xc63   :  { %1213 = vrot.lane.b32.xlu1 %v5120_v1, %s6212_s17 }
 0xc64   :  { %v1107_v47 = vsel %vm1106_vm10, %v5955_v40, %v1103_v44 }
 0xc65   :  { %v1112_v50 = vsel %vm1109_vm11, %v1111_v48, %v1107_v47 }
 0xcc5   :  { %v1122_v49 = vpop.permute.xlu1 %1121 }
 0xcc6   :  { %v1124_v51 = vmul.f32 %v1122_v49, %v1112_v50 }
 0xcc8   :  { %v1125_v52 = vadd.f32 %v1124_v51, %v1059_v22 }
 0xcca   :  { %v1130_v53 = vpack.c.bf16 %v1125_v52, %v1125_v52  ;;  %1180 = vrot.lane.b32.xlu2 %v1125_v52, %s6210_s1 }
 0xccc   :  { %5111 = vmatmul.msk.bf16.vlgmr.msra.gmra.mxu2 %vm26_vm0, %v1130_v53 }
 0xccd   :  { %v1218_v11 = vpop.permute.xlu1 %1217 }
 0xcce   :  { %v1220_v12 = vsel %vm333_vm5, %v1216_v10, %v1218_v11 }
 0xccf   :  { %1232 = vmatpush.bf16.msra.mxu3 %v1220_v12 }
 0xcd5   :  { %v1214_v14 = vpop.permute.xlu1 %1213 }
 0xcd6   :  { %v1219_v15 = vsel %vm333_vm5, %v1212_v13, %v1214_v14 }
 0xcd7   :  { %1233 = vmatpush.bf16.msra.mxu3 %v1219_v15 }
 0xd24   :  { %v1181_v4 = vpop.permute.xlu2 %1180 }
 0xd4f   :  { %v1155_v2 = vpop.f32.mrf.mxu2 }
 0xd50   :  { %5956 = vtanh.f32 %v1155_v2  ;;  %v5112_v16 = vmul.f32 -1.442695, %v1155_v2 }
 0xd52   :  { %5958 = vpow2.f32 %v5112_v16 }
 0xd56   :  { %v5957_v3 = vpop.eup %5956 }
 0xd57   :  { %v1157_v5 = vpop.f32.mrf.mxu2  ;;  %v1183_v6 = vsub.f32 %v5957_v3, %v1181_v4 }
 0xd58   :  { %v5959_v17 = vpop.eup %5958 }
 0xd59   :  { %1185 = vrot.lane.b32.xlu2 %v1183_v6, %s6211_s8  ;;  %v1162_v18 = vadd.f32 1.0, %v5959_v17 }
 0xd5b   :  { %5960 = vrcp.f32 %v1162_v18  ;;  %v1174_v24 = vand.u32 2147483648, %v1162_v18  ;;  %vm1168_vm13 = vweird.f32 %v1162_v18  ;;  %v1172_v25 = vand.u32 2147483647, %v1162_v18 }
 0xd5d   :  { %v1175_v27 = vor.u32 1.1754944e-38, %v1174_v24  ;;  %vm1173_vm15 = vcmp.eq.f32.partialorder %v1172_v25, 8.507059e+37 }
 0xd61   :  { %v5961_v19 = vpop.eup %5960 }
 0xd62   :  { %v1164_v20 = vmul.f32 %v5961_v19, %v1162_v18  ;;  %vm1169_vm12 = vweird.f32 %v5961_v19 }
 0xd63   :  { %vm1170_vm14 = vmor %vm1168_vm13, %vm1169_vm12 }
 0xd64   :  { %v1165_v21 = vsub.f32 1.0, %v1164_v20 }
 0xd66   :  { %v1166_v22 = vmul.f32 %v5961_v19, %v1165_v21 }
 0xd68   :  { %v1167_v23 = vadd.f32 %v5961_v19, %v1166_v22 }
 0xd6a   :  { %v1171_v26 = vsel %vm1170_vm14, %v5961_v19, %v1167_v23 }
 0xd6b   :  { %v1176_v29 = vsel %vm1173_vm15, %v1175_v27, %v1171_v26 }
 0xdb3   :  { %v1186_v28 = vpop.permute.xlu2 %1185 }
 0xdb4   :  { %v1188_v30 = vmul.f32 %v1186_v28, %v1176_v29 }
 0xdb6   :  { %v6592_v31 = vadd.f32 %v1188_v30, %v1125_v52  ;;  %v5157_v30 = vld [vmem:[%s7757_s4 + $0x10] sm:$0xf] }
 0xdb8   :  { %1270 = vrot.lane.b32.xlu0 %v6592_v31, %s6211_s8  ;;  %1260 = vrot.lane.b32.xlu2 %v6592_v31, %s6210_s1  ;;  %v1194_v32 = vpack.c.bf16 %v6592_v31, %v6592_v31 }
 0xdba   :  { %5129 = vmatmul.msk.bf16.vlgmr.msra.gmra.mxu3 %vm26_vm0, %v1194_v32  ;;  %v5153_v32 = vld [vmem:[%s7757_s4] sm:$0xf] }
 0xdbb   :  { %v5154_v35 = vor.u32 %v5769_v34, %v5153_v32 }
 0xdc0   :  { %1299 = vrot.lane.b32.xlu2 %v5134_v36, %s6212_s17  ;;  %v144_v36 = vpop.f32.mrf.mxu0 }
 0xe12   :  { %v1261_v40 = vpop.permute.xlu2 %1260 }
 0xe1a   :  { %v1300_v57 = vpop.permute.xlu2 %1299 }
 0xe1b   :  { %1315 = vmatpush.bf16.msrb.mxu1 %v1300_v57 }
 0xe2a   :  { %v1271_v54 = vpop.permute.xlu0 %1270 }
 0xe3d   :  { %v1235_v37 = vpop.f32.mrf.mxu3 }
 0xe3e   :  { %v5130_v38 = vmul.f32 -1.442695, %v1235_v37  ;;  %v1258_v39 = vmax.f32 %v1235_v37, 0.0 }
 0xe40   :  { %5962 = vpow2.f32 %v5130_v38  ;;  %v1263_v41 = vsub.f32 %v1258_v39, %v1261_v40 }
 0xe42   :  { %1265 = vrot.lane.b32.xlu1 %v1263_v41, %s6211_s8 }
 0xe45   :  { %v1237_v42 = vpop.f32.mrf.mxu3 }
 0xe46   :  { %v5963_v43 = vpop.eup %5962 }
 0xe47   :  { %v1242_v44 = vadd.f32 1.0, %v5963_v43 }
 0xe49   :  { %5964 = vrcp.f32 %v1242_v44  ;;  %v1254_v48 = vand.u32 2147483648, %v1242_v44  ;;  %v1252_v50 = vand.u32 2147483647, %v1242_v44  ;;  %vm1248_vm2 = vweird.f32 %v1242_v44 }
 0xe4b   :  { %v1255_v52 = vor.u32 1.1754944e-38, %v1254_v48  ;;  %vm1253_vm4 = vcmp.eq.f32.partialorder %v1252_v50, 8.507059e+37 }
 0xe4f   :  { %v5965_v45 = vpop.eup %5964 }
 0xe50   :  { %v1244_v46 = vmul.f32 %v5965_v45, %v1242_v44  ;;  %vm1249_vm1 = vweird.f32 %v5965_v45 }
 0xe51   :  { %vm1250_vm3 = vmor %vm1248_vm2, %vm1249_vm1 }
 0xe52   :  { %v1245_v47 = vsub.f32 1.0, %v1244_v46 }
 0xe54   :  { %v1246_v49 = vmul.f32 %v5965_v45, %v1245_v47 }
 0xe56   :  { %v1247_v51 = vadd.f32 %v5965_v45, %v1246_v49 }
 0xe58   :  { %v1251_v53 = vsel %vm1250_vm3, %v5965_v45, %v1247_v51 }
 0xe59   :  { %v1256_v55 = vsel %vm1253_vm4, %v1255_v52, %v1251_v53 }
 0xe5a   :  { %v1273_v56 = vsub.f32 %v1256_v55, %v1271_v54 }
 0xe5c   :  { %1275 = vrot.lane.b32.xlu1 %v1273_v56, %s6211_s8 }
 0xeb4   :  { %v1266_v58 = vpop.permute.xlu1 %1265 }
 0xeb5   :  { %v1268_v59 = vmul.f32 %v1266_v58, %v1256_v55 }
 0xeb7   :  { %v1269_v60 = vadd.f32 %v1268_v59, %v6592_v31 }
 0xeb9   :  { %v1288_v61 = vpack.c.bf16 %v1269_v60, %v1269_v60  ;;  %1341 = vrot.lane.b32.xlu2 %v1269_v60, %s6210_s1  ;;  %v1351_v23 = vadd.f32 %v1269_v60, %v6592_v31 }
 0xebb   :  { %5139 = vmatmul.msk.bf16.vlgmr.msrb.gmra.mxu1 %vm26_vm0, %v1288_v61  ;;  %v5173_v61 = vld [vmem:[%s7757_s4 + $0x18] sm:$0xf0] }
 0xece   :  { %v1276_v62 = vpop.permute.xlu1 %1275 }
 0xecf   :  { %v1278_v63 = vmul.f32 %v1276_v62, %v1256_v55 }
 0xed1   :  { %1280 = vrot.lane.b32.xlu0 %v1278_v63, %s6212_s17  ;;  %v5771_v63 = vld [vmem:[%s7757_s4 + $0x4] sm:$0xf] }
 0xf13   :  { %v1342_v1 = vpop.permute.xlu2 %1341 }
 0xf38   :  { %v1317_v2 = vpop.f32.mrf.mxu1 }
 0xf39   :  { %v1344_v3 = vsub.f32 %v1317_v2, %v1342_v1  ;;  %v5140_v5 = vmul.f32 -1.442695, %v1317_v2  ;;  %v5168_v1 = vor.u32 %v5771_v63, %v5165_v0  ;;  %v5171_v2 = vld [vmem:[%s7757_s4 + $0x10] sm:$0xf] }
 0xf3b   :  { %1346 = vrot.lane.b32.xlu1 %v1344_v3, %s6211_s8  ;;  %5966 = vpow2.f32 %v5140_v5  ;;  %v5774_v3 = vld [vmem:[%s7757_s4 + $0x14] sm:$0xf0]  ;;  %v5163_v5 = vld [vmem:[%s7757_s4] sm:$0xf] }
 0xf40   :  { %v1319_v4 = vpop.f32.mrf.mxu1 }
 0xf41   :  { %v5967_v6 = vpop.eup %5966  ;;  %v5172_v4 = vor.u32 %v5774_v3, %v5171_v2 }
 0xf42   :  { %v1324_v7 = vadd.f32 1.0, %v5967_v6  ;;  %v5772_v6 = vld [vmem:[%s7757_s4 + $0x4] sm:$0xf0] }
 0xf43   :  { %v1281_v17 = vpop.permute.xlu0 %1280 }
 0xf44   :  { %5968 = vrcp.f32 %v1324_v7  ;;  %v1336_v15 = vand.u32 2147483648, %v1324_v7  ;;  %vm1330_vm7 = vweird.f32 %v1324_v7  ;;  %v1334_v16 = vand.u32 2147483647, %v1324_v7 }
 0xf45   :  { %v1283_v20 = vadd.f32 %v1281_v17, %v6592_v31  ;;  %v5770_v31 = vld [vmem:[%s7757_s4 + $0x14] sm:$0xf0] }
 0xf46   :  { %v1337_v19 = vor.u32 1.1754944e-38, %v1336_v15  ;;  %vm1335_vm9 = vcmp.eq.f32.partialorder %v1334_v16, 8.507059e+37  ;;  %v5158_v33 = vor.u32 %v5770_v31, %v5157_v30 }
 0xf47   :  { %v1352_v25 = vadd.f32 %v1351_v23, %v1283_v20 }
 0xf48   :  { %1447 = vmatpush.bf16.msrb.mxu3 %v5158_v33 }
 0xf4a   :  { %v5969_v10 = vpop.eup %5968 }
 0xf4b   :  { %v1326_v11 = vmul.f32 %v5969_v10, %v1324_v7  ;;  %vm1331_vm6 = vweird.f32 %v5969_v10  ;;  %v5164_v7 = vor.u32 %v5772_v6, %v5163_v5  ;;  %v5778_v6 = vld [vmem:[%s7754_s3 + $0x8] sm:$0xff] }
 0xf4c   :  { %vm1332_vm8 = vmor %vm1330_vm7, %vm1331_vm6  ;;  %1448 = vmatpush.bf16.msrb.mxu3 %v5154_v35 }
 0xf4d   :  { %v1327_v12 = vsub.f32 1.0, %v1326_v11 }
 0xf4f   :  { %v1328_v13 = vmul.f32 %v5969_v10, %v1327_v12 }
 0xf50   :  { %1677 = vmatpush.bf16.msra.mxu3 %v5778_v6 }
 0xf51   :  { %v1329_v14 = vadd.f32 %v5969_v10, %v1328_v13  ;;  %v5185_v13 = vld [vmem:[%s7757_s4 + $0x14] sm:$0xf] }
 0xf53   :  { %v1333_v18 = vsel %vm1332_vm8, %v5969_v10, %v1329_v14  ;;  %v5776_v14 = vld [vmem:[%s7757_s4 + $0x18] sm:$0xf0] }
 0xf54   :  { %v1338_v22 = vsel %vm1335_vm9, %v1337_v19, %v1333_v18  ;;  %v5186_v15 = vor.u32 %v5776_v14, %v5185_v13  ;;  %v5777_v14 = vld [vmem:[%s7754_s3] sm:$0xff] }
 0xf55   :  { %1678 = vmatpush.bf16.msra.mxu3 %v5777_v14 }
 0xfad   :  { %v1347_v21 = vpop.permute.xlu1 %1346 }
 0xfae   :  { %v1349_v24 = vmul.f32 %v1347_v21, %v1338_v22 }
 0xfb0   :  { %v1350_v26 = vadd.f32 %v1349_v24, %v1269_v60  ;;  %v5773_v60 = vld [vmem:[%s7757_s4 + $0x14] sm:$0xf] }
 0xfb1   :  { %v5176_v62 = vor.u32 %v5773_v60, %v5173_v61 }
 0xfb2   :  { %v1353_v27 = vadd.f32 %v1352_v25, %v1350_v26 }
 0xfb4   :  { %v1354_v28 = vmul.f32 0.25, %v1353_v27 }
 0xfb6   :  { %1355 = vst.msk [vmem:[%s7758_s5 + $0x18] sm:$0xff] %vm26_vm0, %v1354_v28  ;;  %1411 = vrot.lane.b32.xlu2 %v1354_v28, %s6210_s1  ;;  %v1356_v29 = vpack.c.bf16 %v1354_v28, %v1354_v28 }
 0xfb8   :  { %5149 = vmatmul.msk.bf16.vlgmr.msrb.gmra.mxu2 %vm26_vm0, %v1356_v29 }
 0xfbe   :  { %1510 = vrot.lane.b32.xlu2 %v5172_v4, %s6212_s17 }
 0xfc6   :  { %1506 = vrot.lane.b32.xlu2 %v5164_v7, %s6212_s17 }
 0xfce   :  { %1596 = vrot.lane.b32.xlu2 %v5186_v15, %s6212_s17 }
0x1010   :  { %v1412_v41 = vpop.permute.xlu2 %1411 }
0x1018   :  { %v1511_v17 = vpop.permute.xlu2 %1510 }
0x1020   :  { %v1507_v22 = vpop.permute.xlu2 %1506 }
0x103b   :  { %v1385_v37 = vpop.f32.mrf.mxu2 }
0x103c   :  { %v1389_v38 = vadd.f32 %v1385_v37, %v144_v36 }
0x103e   :  { %5970 = vtanh.f32 %v1389_v38  ;;  %v5150_v43 = vmul.f32 -1.442695, %v1389_v38 }
0x1040   :  { %5972 = vpow2.f32 %v5150_v43 }
0x1043   :  { %v1387_v39 = vpop.f32.mrf.mxu2 }
0x1044   :  { %v5971_v40 = vpop.eup %5970  ;;  %v1597_v39 = vpop.permute.xlu2 %1596 }
0x1045   :  { %v1414_v42 = vsub.f32 %v5971_v40, %v1412_v41  ;;  %1609 = vmatpush.bf16.msra.mxu2 %v1597_v39  ;;  %v5181_v40 = vld [vmem:[%s7757_s4 + $0x4] sm:$0xf]  ;;  %v5775_v41 = vld [vmem:[%s7757_s4 + $0x8] sm:$0xf0]  ;;  %v5779_v39 = vld [vmem:[%s7757_s4 + $0x4] sm:$0xf0] }
0x1046   :  { %v5973_v44 = vpop.eup %5972 }
0x1047   :  { %1416 = vrot.lane.b32.xlu0 %v1414_v42, %s6211_s8  ;;  %v1393_v45 = vadd.f32 1.0, %v5973_v44  ;;  %v5182_v42 = vor.u32 %v5775_v41, %v5181_v40  ;;  %v146_v41 = vpop.f32.mrf.mxu0 }
0x1049   :  { %5974 = vrcp.f32 %v1393_v45  ;;  %v1405_v51 = vand.u32 2147483648, %v1393_v45  ;;  %vm1399_vm11 = vweird.f32 %v1393_v45  ;;  %v1403_v52 = vand.u32 2147483647, %v1393_v45 }
0x104b   :  { %v1406_v54 = vor.u32 1.1754944e-38, %v1405_v51  ;;  %vm1404_vm13 = vcmp.eq.f32.partialorder %v1403_v52, 8.507059e+37 }
0x104f   :  { %v5975_v46 = vpop.eup %5974  ;;  %1512 = vrot.lane.b32.xlu0 %v5176_v62, %s6212_s17 }
0x1050   :  { %v1395_v47 = vmul.f32 %v5975_v46, %v1393_v45  ;;  %vm1400_vm10 = vweird.f32 %v5975_v46 }
0x1051   :  { %vm1401_vm12 = vmor %vm1399_vm11, %vm1400_vm10 }
0x1052   :  { %v1396_v48 = vsub.f32 1.0, %v1395_v47 }
0x1054   :  { %v1397_v49 = vmul.f32 %v5975_v46, %v1396_v48 }
0x1056   :  { %v1398_v50 = vadd.f32 %v5975_v46, %v1397_v49 }
0x1057   :  { %1508 = vrot.lane.b32.xlu0 %v5168_v1, %s6212_s17 }
0x1058   :  { %v1402_v53 = vsel %vm1401_vm12, %v5975_v46, %v1398_v50 }
0x1059   :  { %v1407_v56 = vsel %vm1404_vm13, %v1406_v54, %v1402_v53 }
0x10b9   :  { %v1417_v55 = vpop.permute.xlu0 %1416 }
0x10ba   :  { %v1419_v57 = vmul.f32 %v1417_v55, %v1407_v56 }
0x10bc   :  { %v1420_v58 = vadd.f32 %v1419_v57, %v1354_v28 }
0x10be   :  { %v1425_v59 = vpack.c.bf16 %v1420_v58, %v1420_v58  ;;  %1475 = vrot.lane.b32.xlu1 %v1420_v58, %s6210_s1 }
0x10c0   :  { %5159 = vmatmul.msk.bf16.vlgmr.msrb.gmra.mxu3 %vm26_vm0, %v1425_v59 }
0x10c1   :  { %v1513_v16 = vpop.permute.xlu0 %1512 }
0x10c2   :  { %v1515_v18 = vsel %vm333_vm5, %v1511_v17, %v1513_v16 }
0x10c3   :  { %1527 = vmatpush.bf16.msra.mxu1 %v1515_v18 }
0x10c9   :  { %v1509_v23 = vpop.permute.xlu0 %1508 }
0x10ca   :  { %v1514_v24 = vsel %vm333_vm5, %v1507_v22, %v1509_v23 }
0x10cb   :  { %1528 = vmatpush.bf16.msra.mxu1 %v1514_v24 }
0x1130   :  { %v1476_v10 = vpop.permute.xlu1 %1475 }
0x1143   :  { %v1450_v8 = vpop.f32.mrf.mxu3 }
0x1144   :  { %5976 = vtanh.f32 %v1450_v8  ;;  %v5160_v19 = vmul.f32 -1.442695, %v1450_v8 }
0x1146   :  { %5978 = vpow2.f32 %v5160_v19 }
0x114a   :  { %v5977_v9 = vpop.eup %5976 }
0x114b   :  { %v1452_v11 = vpop.f32.mrf.mxu3  ;;  %v1478_v12 = vsub.f32 %v5977_v9, %v1476_v10 }
0x114c   :  { %v5979_v20 = vpop.eup %5978 }
0x114d   :  { %1480 = vrot.lane.b32.xlu1 %v1478_v12, %s6211_s8  ;;  %v1457_v21 = vadd.f32 1.0, %v5979_v20 }
0x114f   :  { %5980 = vrcp.f32 %v1457_v21  ;;  %v1469_v30 = vand.u32 2147483648, %v1457_v21  ;;  %vm1463_vm15 = vweird.f32 %v1457_v21  ;;  %v1467_v31 = vand.u32 2147483647, %v1457_v21 }
0x1151   :  { %v1470_v33 = vor.u32 1.1754944e-38, %v1469_v30  ;;  %vm1468_vm2 = vcmp.eq.f32.partialorder %v1467_v31, 8.507059e+37 }
0x1155   :  { %v5981_v25 = vpop.eup %5980 }
0x1156   :  { %v1459_v26 = vmul.f32 %v5981_v25, %v1457_v21  ;;  %vm1464_vm14 = vweird.f32 %v5981_v25 }
0x1157   :  { %vm1465_vm1 = vmor %vm1463_vm15, %vm1464_vm14 }
0x1158   :  { %v1460_v27 = vsub.f32 1.0, %v1459_v26 }
0x115a   :  { %v1461_v28 = vmul.f32 %v5981_v25, %v1460_v27 }
0x115c   :  { %v1462_v29 = vadd.f32 %v5981_v25, %v1461_v28 }
0x115e   :  { %v1466_v32 = vsel %vm1465_vm1, %v5981_v25, %v1462_v29 }
0x115f   :  { %v1471_v35 = vsel %vm1468_vm2, %v1470_v33, %v1466_v32 }
0x11bf   :  { %v1481_v34 = vpop.permute.xlu1 %1480 }
0x11c0   :  { %v1483_v36 = vmul.f32 %v1481_v34, %v1471_v35  ;;  %v5205_v35 = vld [vmem:[%s7757_s4 + $0x10] sm:$0xf] }
0x11c2   :  { %v6686_v37 = vadd.f32 %v1483_v36, %v1420_v58  ;;  %v5780_v36 = vld [vmem:[%s7757_s4 + $0x14] sm:$0xf0] }
0x11c4   :  { %1565 = vrot.lane.b32.xlu2 %v6686_v37, %s6211_s8  ;;  %1555 = vrot.lane.b32.xlu1 %v6686_v37, %s6210_s1  ;;  %v1489_v38 = vpack.c.bf16 %v6686_v37, %v6686_v37 }
0x11c6   :  { %5177 = vmatmul.msk.bf16.vlgmr.msra.gmra.mxu1 %vm26_vm0, %v1489_v38  ;;  %v5206_v38 = vor.u32 %v5780_v36, %v5205_v35 }
0x11c8   :  { %1742 = vmatpush.bf16.msrb.mxu1 %v5206_v38 }
0x11cc   :  { %1594 = vrot.lane.b32.xlu1 %v5182_v42, %s6212_s17 }
0x121e   :  { %v1566_v60 = vpop.permute.xlu2 %1565 }
0x1236   :  { %v1556_v46 = vpop.permute.xlu1 %1555 }
0x123e   :  { %v1595_v63 = vpop.permute.xlu1 %1594 }
0x123f   :  { %1610 = vmatpush.bf16.msra.mxu2 %v1595_v63 }
0x1243   :  { %v1530_v43 = vpop.f32.mrf.mxu1 }
0x1244   :  { %v5178_v44 = vmul.f32 -1.442695, %v1530_v43  ;;  %v1553_v45 = vmax.f32 %v1530_v43, 0.0 }
0x1246   :  { %5982 = vpow2.f32 %v5178_v44  ;;  %v1558_v47 = vsub.f32 %v1553_v45, %v1556_v46 }
0x1248   :  { %1560 = vrot.lane.b32.xlu0 %v1558_v47, %s6211_s8 }
0x124b   :  { %v1532_v48 = vpop.f32.mrf.mxu1 }
0x124c   :  { %v5983_v49 = vpop.eup %5982 }
0x124d   :  { %v1537_v50 = vadd.f32 1.0, %v5983_v49 }
0x124f   :  { %5984 = vrcp.f32 %v1537_v50  ;;  %v1549_v54 = vand.u32 2147483648, %v1537_v50  ;;  %v1547_v56 = vand.u32 2147483647, %v1537_v50  ;;  %vm1543_vm4 = vweird.f32 %v1537_v50 }
0x1251   :  { %v1550_v58 = vor.u32 1.1754944e-38, %v1549_v54  ;;  %vm1548_vm7 = vcmp.eq.f32.partialorder %v1547_v56, 8.507059e+37 }
0x1255   :  { %v5985_v51 = vpop.eup %5984 }
0x1256   :  { %v1539_v52 = vmul.f32 %v5985_v51, %v1537_v50  ;;  %vm1544_vm3 = vweird.f32 %v5985_v51 }
0x1257   :  { %vm1545_vm6 = vmor %vm1543_vm4, %vm1544_vm3 }
0x1258   :  { %v1540_v53 = vsub.f32 1.0, %v1539_v52 }
0x125a   :  { %v1541_v55 = vmul.f32 %v5985_v51, %v1540_v53 }
0x125c   :  { %v1542_v57 = vadd.f32 %v5985_v51, %v1541_v55 }
0x125e   :  { %v1546_v59 = vsel %vm1545_vm6, %v5985_v51, %v1542_v57 }
0x125f   :  { %v1551_v61 = vsel %vm1548_vm7, %v1550_v58, %v1546_v59 }
0x1260   :  { %v1568_v62 = vsub.f32 %v1551_v61, %v1566_v60 }
0x1262   :  { %1570 = vrot.lane.b32.xlu0 %v1568_v62, %s6211_s8 }
0x12ba   :  { %v1561_v0 = vpop.permute.xlu0 %1560 }
0x12bb   :  { %v1563_v1 = vmul.f32 %v1561_v0, %v1551_v61 }
0x12bd   :  { %v1564_v2 = vadd.f32 %v1563_v1, %v6686_v37  ;;  %v5219_v1 = vld [vmem:[%s7757_s4 + $0x10] sm:$0xf] }
0x12bf   :  { %v1583_v3 = vpack.c.bf16 %v1564_v2, %v1564_v2  ;;  %1636 = vrot.lane.b32.xlu1 %v1564_v2, %s6210_s1  ;;  %v1646_v28 = vadd.f32 %v1564_v2, %v6686_v37 }
0x12c1   :  { %5187 = vmatmul.msk.bf16.vlgmr.msra.gmra.mxu2 %vm26_vm0, %v1583_v3 }
0x12d4   :  { %v1571_v4 = vpop.permute.xlu0 %1570 }
0x12d5   :  { %v1573_v5 = vmul.f32 %v1571_v4, %v1551_v61  ;;  %v5211_v4 = vld [vmem:[%s7757_s4] sm:$0xf] }
0x12d7   :  { %1575 = vrot.lane.b32.xlu2 %v1573_v5, %s6212_s17  ;;  %v5782_v5 = vld [vmem:[%s7757_s4 + $0x4] sm:$0xf0] }
0x12d8   :  { %v5212_v6 = vor.u32 %v5782_v5, %v5211_v4  ;;  %v5788_v5 = vld [vmem:[%s7754_s3 + $0x8] sm:$0xff] }
0x12d9   :  { %1972 = vmatpush.bf16.msrb.mxu0 %v5788_v5 }
0x1331   :  { %v1637_v7 = vpop.permute.xlu1 %1636  ;;  %v1576_v22 = vpop.permute.xlu2 %1575 }
0x1332   :  { %v1578_v25 = vadd.f32 %v1576_v22, %v6686_v37  ;;  %v5201_v37 = vld [vmem:[%s7757_s4] sm:$0xf] }
0x1333   :  { %v5202_v40 = vor.u32 %v5779_v39, %v5201_v37 }
0x1334   :  { %v1647_v30 = vadd.f32 %v1646_v28, %v1578_v25 }
0x1335   :  { %1743 = vmatpush.bf16.msrb.mxu1 %v5202_v40 }
0x1344   :  { %v1612_v8 = vpop.f32.mrf.mxu2 }
0x1345   :  { %v1639_v9 = vsub.f32 %v1612_v8, %v1637_v7  ;;  %v5188_v11 = vmul.f32 -1.442695, %v1612_v8  ;;  %v5783_v7 = vld [vmem:[%s7757_s4 + $0x14] sm:$0xf]  ;;  %v5221_v8 = vld [vmem:[%s7757_s4 + $0x18] sm:$0xf0] }
0x1347   :  { %1641 = vrot.lane.b32.xlu0 %v1639_v9, %s6211_s8  ;;  %5986 = vpow2.f32 %v5188_v11  ;;  %v5224_v9 = vor.u32 %v5783_v7, %v5221_v8  ;;  %v5213_v11 = vld [vmem:[%s7757_s4 + $0x8] sm:$0xf0] }
0x134c   :  { %v1614_v10 = vpop.f32.mrf.mxu2 }
0x134d   :  { %v5987_v12 = vpop.eup %5986  ;;  %v5781_v10 = vld [vmem:[%s7757_s4 + $0x4] sm:$0xf] }
0x134e   :  { %v1619_v13 = vadd.f32 1.0, %v5987_v12  ;;  %v5216_v12 = vor.u32 %v5781_v10, %v5213_v11 }
0x1350   :  { %5988 = vrcp.f32 %v1619_v13  ;;  %v1631_v20 = vand.u32 2147483648, %v1619_v13  ;;  %vm1625_vm9 = vweird.f32 %v1619_v13  ;;  %v1629_v21 = vand.u32 2147483647, %v1619_v13 }
0x1352   :  { %v1632_v24 = vor.u32 1.1754944e-38, %v1631_v20  ;;  %vm1630_vm11 = vcmp.eq.f32.partialorder %v1629_v21, 8.507059e+37 }
0x1356   :  { %v5989_v15 = vpop.eup %5988 }
0x1357   :  { %v1621_v16 = vmul.f32 %v5989_v15, %v1619_v13  ;;  %vm1626_vm8 = vweird.f32 %v5989_v15 }
0x1358   :  { %vm1627_vm10 = vmor %vm1625_vm9, %vm1626_vm8 }
0x1359   :  { %v1622_v17 = vsub.f32 1.0, %v1621_v16 }
0x135b   :  { %v1623_v18 = vmul.f32 %v5989_v15, %v1622_v17 }
0x135d   :  { %v1624_v19 = vadd.f32 %v5989_v15, %v1623_v18  ;;  %v5233_v18 = vld [vmem:[%s7757_s4 + $0x14] sm:$0xf] }
0x135f   :  { %v1628_v23 = vsel %vm1627_vm10, %v5989_v15, %v1624_v19  ;;  %v5786_v19 = vld [vmem:[%s7757_s4 + $0x18] sm:$0xf0] }
0x1360   :  { %v1633_v27 = vsel %vm1630_vm11, %v1632_v24, %v1628_v23  ;;  %v5234_v20 = vor.u32 %v5786_v19, %v5233_v18  ;;  %v5722_v19 = vld [vmem:[%s7756_s0 + $0x28] sm:$0xff] }
0x13b9   :  { %v1642_v26 = vpop.permute.xlu0 %1641 }
0x13ba   :  { %v1644_v29 = vmul.f32 %v1642_v26, %v1633_v27 }
0x13bc   :  { %v1645_v31 = vadd.f32 %v1644_v29, %v1564_v2  ;;  %v5784_v2 = vld [vmem:[%s7757_s4 + $0x14] sm:$0xf0] }
0x13bd   :  { %v5220_v3 = vor.u32 %v5784_v2, %v5219_v1 }
0x13be   :  { %v1648_v32 = vadd.f32 %v1647_v30, %v1645_v31 }
0x13c0   :  { %v1649_v33 = vmul.f32 0.25, %v1648_v32 }
0x13c2   :  { %1650 = vst.msk [vmem:[%s7758_s5 + $0x20] sm:$0xff] %vm26_vm0, %v1649_v33  ;;  %1706 = vrot.lane.b32.xlu1 %v1649_v33, %s6210_s1  ;;  %v1651_v34 = vpack.c.bf16 %v1649_v33, %v1649_v33 }
0x13c4   :  { %5197 = vmatmul.msk.bf16.vlgmr.msra.gmra.mxu3 %vm26_vm0, %v1651_v34 }
0x13ca   :  { %1805 = vrot.lane.b32.xlu1 %v5220_v3, %s6212_s17 }
0x13d2   :  { %1801 = vrot.lane.b32.xlu1 %v5212_v6, %s6212_s17 }
0x13da   :  { %1891 = vrot.lane.b32.xlu1 %v5234_v20, %s6212_s17  ;;  %v5723_v20 = vld [vmem:[%s7756_s0 + $0x30] sm:$0xff] }
0x1434   :  { %v1707_v46 = vpop.permute.xlu1 %1706 }
0x143c   :  { %v1806_v21 = vpop.permute.xlu1 %1805 }
0x1444   :  { %v1802_v28 = vpop.permute.xlu1 %1801 }
0x1447   :  { %v1680_v42 = vpop.f32.mrf.mxu3 }
0x1448   :  { %v1684_v43 = vadd.f32 %v1680_v42, %v146_v41 }
0x144a   :  { %5990 = vtanh.f32 %v1684_v43  ;;  %v5198_v48 = vmul.f32 -1.442695, %v1684_v43 }
0x144c   :  { %5992 = vpow2.f32 %v5198_v48 }
0x144f   :  { %v1682_v44 = vpop.f32.mrf.mxu3 }
0x1450   :  { %v5991_v45 = vpop.eup %5990  ;;  %v5229_v44 = vld [vmem:[%s7757_s4 + $0x4] sm:$0xf] }
0x1451   :  { %v1709_v47 = vsub.f32 %v5991_v45, %v1707_v46  ;;  %v5785_v45 = vld [vmem:[%s7757_s4 + $0x8] sm:$0xf0] }
0x1452   :  { %v5993_v49 = vpop.eup %5992  ;;  %v5230_v46 = vor.u32 %v5785_v45, %v5229_v44 }
0x1453   :  { %1711 = vrot.lane.b32.xlu2 %v1709_v47, %s6211_s8  ;;  %v1688_v50 = vadd.f32 1.0, %v5993_v49  ;;  %v1892_v47 = vpop.permute.xlu1 %1891 }
0x1454   :  { %1904 = vmatpush.bf16.msrb.mxu3 %v1892_v47 }
0x1455   :  { %5994 = vrcp.f32 %v1688_v50  ;;  %v1700_v56 = vand.u32 2147483648, %v1688_v50  ;;  %vm1694_vm13 = vweird.f32 %v1688_v50  ;;  %v1698_v57 = vand.u32 2147483647, %v1688_v50 }
0x1457   :  { %v1701_v59 = vor.u32 1.1754944e-38, %v1700_v56  ;;  %vm1699_vm15 = vcmp.eq.f32.partialorder %v1698_v57, 8.507059e+37 }
0x145b   :  { %v5995_v51 = vpop.eup %5994  ;;  %1807 = vrot.lane.b32.xlu2 %v5224_v9, %s6212_s17 }
0x145c   :  { %v1690_v52 = vmul.f32 %v5995_v51, %v1688_v50  ;;  %vm1695_vm12 = vweird.f32 %v5995_v51 }
0x145d   :  { %vm1696_vm14 = vmor %vm1694_vm13, %vm1695_vm12 }
0x145e   :  { %v1691_v53 = vsub.f32 1.0, %v1690_v52 }
0x1460   :  { %v1692_v54 = vmul.f32 %v5995_v51, %v1691_v53 }
0x1462   :  { %v1693_v55 = vadd.f32 %v5995_v51, %v1692_v54 }
0x1463   :  { %1803 = vrot.lane.b32.xlu2 %v5216_v12, %s6212_s17  ;;  %v5720_v12 = vld [vmem:[%s7756_s0 + $0x18] sm:$0xff] }
0x1464   :  { %v1697_v58 = vsel %vm1696_vm14, %v5995_v51, %v1693_v55  ;;  %4944 = vmatmul.msk.bf16.gmra.mxu0 %vm26_vm0, %v5720_v12 }
0x1465   :  { %v1702_v61 = vsel %vm1699_vm15, %v1701_v59, %v1697_v58 }
0x14ad   :  { %v1712_v60 = vpop.permute.xlu2 %1711 }
0x14ae   :  { %v1714_v62 = vmul.f32 %v1712_v60, %v1702_v61 }
0x14b0   :  { %v1715_v63 = vadd.f32 %v1714_v62, %v1649_v33 }
0x14b2   :  { %v1720_v0 = vpack.c.bf16 %v1715_v63, %v1715_v63  ;;  %1770 = vrot.lane.b32.xlu0 %v1715_v63, %s6210_s1 }
0x14b4   :  { %5207 = vmatmul.msk.bf16.vlgmr.msrb.gmra.mxu1 %vm26_vm0, %v1720_v0 }
0x14b5   :  { %v1808_v22 = vpop.permute.xlu2 %1807 }
0x14b6   :  { %v1810_v23 = vsel %vm333_vm5, %v1806_v21, %v1808_v22  ;;  %v5724_v21 = vld [vmem:[%s7756_s0 + $0x38] sm:$0xff] }
0x14b7   :  { %1822 = vmatpush.bf16.msrb.mxu2 %v1810_v23 }
0x14bd   :  { %v1804_v27 = vpop.permute.xlu2 %1803 }
0x14be   :  { %v1809_v29 = vsel %vm333_vm5, %v1802_v28, %v1804_v27 }
0x14bf   :  { %1823 = vmatpush.bf16.msrb.mxu2 %v1809_v29 }
0x1524   :  { %v1771_v15 = vpop.permute.xlu0 %1770 }
0x1531   :  { %v1745_v13 = vpop.f32.mrf.mxu1 }
0x1532   :  { %5996 = vtanh.f32 %v1745_v13  ;;  %v5208_v24 = vmul.f32 -1.442695, %v1745_v13  ;;  %v5787_v13 = vld [vmem:[%s7754_s3] sm:$0xff] }
0x1533   :  { %1973 = vmatpush.bf16.msrb.mxu0 %v5787_v13 }
0x1534   :  { %5998 = vpow2.f32 %v5208_v24 }
0x1538   :  { %v5997_v14 = vpop.eup %5996 }
0x1539   :  { %v1747_v16 = vpop.f32.mrf.mxu1  ;;  %v1773_v17 = vsub.f32 %v5997_v14, %v1771_v15  ;;  %v5721_v14 = vld [vmem:[%s7756_s0 + $0x20] sm:$0xff] }
0x153a   :  { %v5999_v25 = vpop.eup %5998  ;;  %4945 = vmatmul.msk.bf16.gmra.mxu0 %vm26_vm0, %v5721_v14 }
0x153b   :  { %1775 = vrot.lane.b32.xlu0 %v1773_v17, %s6211_s8  ;;  %v1752_v26 = vadd.f32 1.0, %v5999_v25 }
0x153d   :  { %6000 = vrcp.f32 %v1752_v26  ;;  %v1764_v35 = vand.u32 2147483648, %v1752_v26  ;;  %vm1758_vm2 = vweird.f32 %v1752_v26  ;;  %v1762_v36 = vand.u32 2147483647, %v1752_v26 }
0x153f   :  { %v1765_v38 = vor.u32 1.1754944e-38, %v1764_v35  ;;  %vm1763_vm4 = vcmp.eq.f32.partialorder %v1762_v36, 8.507059e+37 }
0x1543   :  { %v6001_v30 = vpop.eup %6000 }
0x1544   :  { %v1754_v31 = vmul.f32 %v6001_v30, %v1752_v26  ;;  %vm1759_vm1 = vweird.f32 %v6001_v30 }
0x1545   :  { %vm1760_vm3 = vmor %vm1758_vm2, %vm1759_vm1 }
0x1546   :  { %v1755_v32 = vsub.f32 1.0, %v1754_v31 }
0x1548   :  { %v1756_v33 = vmul.f32 %v6001_v30, %v1755_v32 }
0x154a   :  { %v1757_v34 = vadd.f32 %v6001_v30, %v1756_v33  ;;  %4946 = vmatmul.msk.bf16.gmra.mxu0 %vm26_vm0, %v5722_v19 }
0x154c   :  { %v1761_v37 = vsel %vm1760_vm3, %v6001_v30, %v1757_v34 }
0x154d   :  { %v1766_v40 = vsel %vm1763_vm4, %v1765_v38, %v1761_v37 }
0x155a   :  { %4947 = vmatmul.msk.bf16.gmra.mxu0 %vm26_vm0, %v5723_v20  ;;  %v5267_v20 = vld [vmem:[%s7757_s4 + $0x10] sm:$0xf] }
0x156a   :  { %4948 = vmatmul.msk.bf16.gmra.mxu0 %vm26_vm0, %v5724_v21  ;;  %v5794_v21 = vld [vmem:[%s7757_s4 + $0x14] sm:$0xf0] }
0x15ad   :  { %v1776_v39 = vpop.permute.xlu0 %1775 }
0x15ae   :  { %v1778_v41 = vmul.f32 %v1776_v39, %v1766_v40 }
0x15b0   :  { %v6776_v42 = vadd.f32 %v1778_v41, %v1715_v63 }
0x15b2   :  { %1860 = vrot.lane.b32.xlu1 %v6776_v42, %s6211_s8  ;;  %1850 = vrot.lane.b32.xlu0 %v6776_v42, %s6210_s1  ;;  %v1784_v43 = vpack.c.bf16 %v6776_v42, %v6776_v42 }
0x15b4   :  { %5225 = vmatmul.msk.bf16.vlgmr.msrb.gmra.mxu2 %vm26_vm0, %v1784_v43 }
0x15ba   :  { %1889 = vrot.lane.b32.xlu0 %v5230_v46, %s6212_s17  ;;  %v149_v46 = vpop.f32.mrf.mxu0 }
0x15c2   :  { %v6833_v47 = vpop.f32.mrf.mxu0 }
0x1624   :  { %v1851_v48 = vpop.permute.xlu0 %1850  ;;  %v1861_v2 = vpop.permute.xlu1 %1860 }
0x162c   :  { %v1890_v49 = vpop.permute.xlu0 %1889 }
0x162d   :  { %1905 = vmatpush.bf16.msrb.mxu3 %v1890_v49 }
0x1637   :  { %v1825_v50 = vpop.f32.mrf.mxu2 }
0x1638   :  { %v5226_v51 = vmul.f32 -1.442695, %v1825_v50  ;;  %v1848_v52 = vmax.f32 %v1825_v50, 0.0 }
0x163a   :  { %6002 = vpow2.f32 %v5226_v51  ;;  %v1853_v53 = vsub.f32 %v1848_v52, %v1851_v48  ;;  %v6835_v48 = vpop.f32.mrf.mxu0 }
0x163c   :  { %1855 = vrot.lane.b32.xlu2 %v1853_v53, %s6211_s8 }
0x163f   :  { %v1827_v54 = vpop.f32.mrf.mxu2 }
0x1640   :  { %v6003_v55 = vpop.eup %6002  ;;  %v5253_v54 = vld [vmem:[%s7757_s4 + $0x10] sm:$0xf] }
0x1641   :  { %v1832_v56 = vadd.f32 1.0, %v6003_v55  ;;  %v5790_v55 = vld [vmem:[%s7757_s4 + $0x14] sm:$0xf0] }
0x1643   :  { %6004 = vrcp.f32 %v1832_v56  ;;  %v1844_v60 = vand.u32 2147483648, %v1832_v56  ;;  %v1842_v62 = vand.u32 2147483647, %v1832_v56  ;;  %vm1838_vm7 = vweird.f32 %v1832_v56 }
0x1645   :  { %v1845_v0 = vor.u32 1.1754944e-38, %v1844_v60  ;;  %vm1843_vm9 = vcmp.eq.f32.partialorder %v1842_v62, 8.507059e+37 }
0x1649   :  { %v6005_v57 = vpop.eup %6004 }
0x164a   :  { %v1834_v58 = vmul.f32 %v6005_v57, %v1832_v56  ;;  %vm1839_vm6 = vweird.f32 %v6005_v57  ;;  %v5249_v56 = vld [vmem:[%s7757_s4] sm:$0xf] }
0x164b   :  { %vm1840_vm8 = vmor %vm1838_vm7, %vm1839_vm6 }
0x164c   :  { %v1835_v59 = vsub.f32 1.0, %v1834_v58  ;;  %v5789_v58 = vld [vmem:[%s7757_s4 + $0x4] sm:$0xf0] }
0x164e   :  { %v1836_v61 = vmul.f32 %v6005_v57, %v1835_v59  ;;  %v5250_v59 = vor.u32 %v5789_v58, %v5249_v56 }
0x1650   :  { %v1837_v63 = vadd.f32 %v6005_v57, %v1836_v61 }
0x1652   :  { %v1841_v1 = vsel %vm1840_vm8, %v6005_v57, %v1837_v63  ;;  %v5254_v57 = vor.u32 %v5790_v55, %v5253_v54 }
0x1653   :  { %v1846_v3 = vsel %vm1843_vm9, %v1845_v0, %v1841_v1 }
0x1654   :  { %v1863_v4 = vsub.f32 %v1846_v3, %v1861_v2  ;;  %2037 = vmatpush.bf16.msra.mxu1 %v5254_v57 }
0x1656   :  { %1865 = vrot.lane.b32.xlu2 %v1863_v4, %s6211_s8 }
0x1658   :  { %2038 = vmatpush.bf16.msra.mxu1 %v5250_v59 }
0x1696   :  { %v1856_v6 = vpop.permute.xlu2 %1855 }
0x1697   :  { %v1858_v7 = vmul.f32 %v1856_v6, %v1846_v3 }
0x1699   :  { %v1859_v8 = vadd.f32 %v1858_v7, %v6776_v42 }
0x169b   :  { %v1878_v9 = vpack.c.bf16 %v1859_v8, %v1859_v8  ;;  %1931 = vrot.lane.b32.xlu0 %v1859_v8, %s6210_s1  ;;  %v1941_v38 = vadd.f32 %v1859_v8, %v6776_v42 }
0x169d   :  { %5235 = vmatmul.msk.bf16.vlgmr.msrb.gmra.mxu3 %vm26_vm0, %v1878_v9 }
0x16b0   :  { %v1866_v10 = vpop.permute.xlu2 %1865 }
0x16b1   :  { %v1868_v11 = vmul.f32 %v1866_v10, %v1846_v3 }
0x16b3   :  { %1870 = vrot.lane.b32.xlu1 %v1868_v11, %s6212_s17 }
0x170d   :  { %v1932_v15 = vpop.permute.xlu0 %1931 }
0x1720   :  { %v1907_v16 = vpop.f32.mrf.mxu3 }
0x1721   :  { %v1934_v17 = vsub.f32 %v1907_v16, %v1932_v15  ;;  %v5236_v22 = vmul.f32 -1.442695, %v1907_v16 }
0x1723   :  { %1936 = vrot.lane.b32.xlu2 %v1934_v17, %s6211_s8  ;;  %6006 = vpow2.f32 %v5236_v22  ;;  %v5793_v22 = vld [vmem:[%s7757_s4 + $0x14] sm:$0xf] }
0x1725   :  { %v1871_v32 = vpop.permute.xlu1 %1870 }
0x1726   :  { %v1873_v35 = vadd.f32 %v1871_v32, %v6776_v42  ;;  %v6837_v42 = vpop.f32.mrf.mxu0 }
0x1728   :  { %v1909_v18 = vpop.f32.mrf.mxu3  ;;  %v1942_v40 = vadd.f32 %v1941_v38, %v1873_v35  ;;  %v5796_v38 = vld [vmem:[%s7757_s4 + $0x18] sm:$0xf0] }
0x1729   :  { %v6007_v23 = vpop.eup %6006 }
0x172a   :  { %v1914_v24 = vadd.f32 1.0, %v6007_v23  ;;  %v5268_v23 = vor.u32 %v5794_v21, %v5267_v20 }
0x172c   :  { %6008 = vrcp.f32 %v1914_v24  ;;  %v1926_v30 = vand.u32 2147483648, %v1914_v24  ;;  %vm1920_vm11 = vweird.f32 %v1914_v24  ;;  %v1924_v31 = vand.u32 2147483647, %v1914_v24 }
0x172e   :  { %v1927_v34 = vor.u32 1.1754944e-38, %v1926_v30  ;;  %vm1925_vm13 = vcmp.eq.f32.partialorder %v1924_v31, 8.507059e+37  ;;  %v6839_v49 = vpop.f32.mrf.mxu0 }
0x1732   :  { %v6009_v25 = vpop.eup %6008 }
0x1733   :  { %v1916_v26 = vmul.f32 %v6009_v25, %v1914_v24  ;;  %vm1921_vm10 = vweird.f32 %v6009_v25  ;;  %v5269_v24 = vld [vmem:[%s7757_s4 + $0x18] sm:$0xf0] }
0x1734   :  { %vm1922_vm12 = vmor %vm1920_vm11, %vm1921_vm10 }
0x1735   :  { %v1917_v27 = vsub.f32 1.0, %v1916_v26  ;;  %v5259_v26 = vld [vmem:[%s7757_s4] sm:$0xf] }
0x1736   :  { %v6841_v50 = vpop.f32.mrf.mxu0 }
0x1737   :  { %v1918_v28 = vmul.f32 %v6009_v25, %v1917_v27  ;;  %v5792_v27 = vld [vmem:[%s7757_s4 + $0x4] sm:$0xf0] }
0x1738   :  { %v5260_v30 = vor.u32 %v5792_v27, %v5259_v26 }
0x1739   :  { %v1919_v29 = vadd.f32 %v6009_v25, %v1918_v28  ;;  %v5791_v28 = vld [vmem:[%s7757_s4 + $0x4] sm:$0xf] }
0x173b   :  { %v1923_v33 = vsel %vm1922_vm12, %v6009_v25, %v1919_v29  ;;  %v5272_v25 = vor.u32 %v5793_v22, %v5269_v24  ;;  %v5261_v29 = vld [vmem:[%s7757_s4 + $0x8] sm:$0xf0] }
0x173c   :  { %v1928_v37 = vsel %vm1925_vm13, %v1927_v34, %v1923_v33  ;;  %v5264_v31 = vor.u32 %v5791_v28, %v5261_v29 }
0x173e   :  { %v6843_v51 = vpop.f32.mrf.mxu0 }
0x1746   :  { %v6845_v52 = vpop.f32.mrf.mxu0 }
0x174e   :  { %v6847_v53 = vpop.f32.mrf.mxu0 }
0x1756   :  { %v6861_v60 = vpop.f32.mrf.mxu0 }
0x177d   :  { %v1937_v36 = vpop.permute.xlu2 %1936 }
0x177e   :  { %v1939_v39 = vmul.f32 %v1937_v36, %v1928_v37  ;;  %v5281_v37 = vld [vmem:[%s7757_s4 + $0x14] sm:$0xf] }
0x1780   :  { %v1940_v41 = vadd.f32 %v1939_v39, %v1859_v8  ;;  %v5282_v39 = vor.u32 %v5796_v38, %v5281_v37 }
0x1782   :  { %v1943_v43 = vadd.f32 %v1942_v40, %v1940_v41 }
0x1784   :  { %v1944_v44 = vmul.f32 0.25, %v1943_v43 }
0x1786   :  { %1945 = vst.msk [vmem:[%s7758_s5 + $0x28] sm:$0xff] %vm26_vm0, %v1944_v44  ;;  %2001 = vrot.lane.b32.xlu0 %v1944_v44, %s6210_s1  ;;  %v1946_v45 = vpack.c.bf16 %v1944_v44, %v1944_v44 }
0x1788   :  { %5245 = vmatmul.msk.bf16.vlgmr.msrb.gmra.mxu0 %vm26_vm0, %v1946_v45 }
0x178e   :  { %2100 = vrot.lane.b32.xlu0 %v5268_v23, %s6212_s17 }
0x1796   :  { %2096 = vrot.lane.b32.xlu0 %v5260_v30, %s6212_s17 }
0x179e   :  { %2186 = vrot.lane.b32.xlu0 %v5282_v39, %s6212_s17  ;;  %v5798_v39 = vld [vmem:[%s7754_s3 + $0x8] sm:$0xff] }
0x179f   :  { %2267 = vmatpush.bf16.msra.mxu0 %v5798_v39 }
0x17f8   :  { %v2002_v1 = vpop.permute.xlu0 %2001 }
0x1800   :  { %v2101_v40 = vpop.permute.xlu0 %2100 }
0x1805   :  { %v1975_v61 = vpop.f32.mrf.mxu0 }
0x1806   :  { %v1979_v62 = vadd.f32 %v1975_v61, %v149_v46 }
0x1808   :  { %6010 = vtanh.f32 %v1979_v62  ;;  %v5246_v3 = vmul.f32 -1.442695, %v1979_v62  ;;  %v2097_v45 = vpop.permute.xlu0 %2096 }
0x180a   :  { %6012 = vpow2.f32 %v5246_v3 }
0x180d   :  { %v1977_v63 = vpop.f32.mrf.mxu0 }
0x180e   :  { %v6011_v0 = vpop.eup %6010 }
0x180f   :  { %v2004_v2 = vsub.f32 %v6011_v0, %v2002_v1 }
0x1810   :  { %v6013_v4 = vpop.eup %6012 }
0x1811   :  { %2006 = vrot.lane.b32.xlu1 %v2004_v2, %s6211_s8  ;;  %v1983_v5 = vadd.f32 1.0, %v6013_v4 }
0x1813   :  { %6014 = vrcp.f32 %v1983_v5  ;;  %v1995_v11 = vand.u32 2147483648, %v1983_v5  ;;  %vm1989_vm15 = vweird.f32 %v1983_v5  ;;  %v1993_v12 = vand.u32 2147483647, %v1983_v5 }
0x1815   :  { %v1996_v14 = vor.u32 1.1754944e-38, %v1995_v11  ;;  %vm1994_vm2 = vcmp.eq.f32.partialorder %v1993_v12, 8.507059e+37 }
0x1819   :  { %v6015_v6 = vpop.eup %6014  ;;  %2102 = vrot.lane.b32.xlu1 %v5272_v25, %s6212_s17 }
0x181a   :  { %v1985_v7 = vmul.f32 %v6015_v6, %v1983_v5  ;;  %vm1990_vm14 = vweird.f32 %v6015_v6 }
0x181b   :  { %vm1991_vm1 = vmor %vm1989_vm15, %vm1990_vm14 }
0x181c   :  { %v1986_v8 = vsub.f32 1.0, %v1985_v7 }
0x181e   :  { %v1987_v9 = vmul.f32 %v6015_v6, %v1986_v8  ;;  %v2187_v8 = vpop.permute.xlu0 %2186 }
0x181f   :  { %2199 = vmatpush.bf16.msra.mxu3 %v2187_v8 }
0x1820   :  { %v1988_v10 = vadd.f32 %v6015_v6, %v1987_v9  ;;  %v5277_v9 = vld [vmem:[%s7757_s4 + $0x4] sm:$0xf] }
0x1821   :  { %2098 = vrot.lane.b32.xlu1 %v5264_v31, %s6212_s17 }
0x1822   :  { %v1992_v13 = vsel %vm1991_vm1, %v6015_v6, %v1988_v10  ;;  %v5795_v10 = vld [vmem:[%s7757_s4 + $0x8] sm:$0xf0] }
0x1823   :  { %v1997_v16 = vsel %vm1994_vm2, %v1996_v14, %v1992_v13  ;;  %v5278_v11 = vor.u32 %v5795_v10, %v5277_v9 }
0x1883   :  { %v2007_v15 = vpop.permute.xlu1 %2006 }
0x1884   :  { %v2009_v17 = vmul.f32 %v2007_v15, %v1997_v16 }
0x1886   :  { %v2010_v18 = vadd.f32 %v2009_v17, %v1944_v44 }
0x1888   :  { %v2015_v19 = vpack.c.bf16 %v2010_v18, %v2010_v18  ;;  %2065 = vrot.lane.b32.xlu2 %v2010_v18, %s6210_s1 }
0x188a   :  { %5255 = vmatmul.msk.bf16.vlgmr.msra.gmra.mxu1 %vm26_vm0, %v2015_v19 }
0x188b   :  { %v2103_v41 = vpop.permute.xlu1 %2102 }
0x188c   :  { %v2105_v43 = vsel %vm333_vm5, %v2101_v40, %v2103_v41 }
0x188d   :  { %2117 = vmatpush.bf16.msra.mxu2 %v2105_v43 }
0x1893   :  { %v2099_v46 = vpop.permute.xlu1 %2098 }
0x1894   :  { %v2104_v54 = vsel %vm333_vm5, %v2097_v45, %v2099_v46 }
0x1895   :  { %2118 = vmatpush.bf16.msra.mxu2 %v2104_v54 }
0x18e2   :  { %v2066_v34 = vpop.permute.xlu2 %2065 }
0x1907   :  { %v2040_v32 = vpop.f32.mrf.mxu1 }
0x1908   :  { %6016 = vtanh.f32 %v2040_v32  ;;  %v5256_v44 = vmul.f32 -1.442695, %v2040_v32 }
0x190a   :  { %6018 = vpow2.f32 %v5256_v44 }
0x190e   :  { %v6017_v33 = vpop.eup %6016 }
0x190f   :  { %v2042_v35 = vpop.f32.mrf.mxu1  ;;  %v2068_v36 = vsub.f32 %v6017_v33, %v2066_v34 }
0x1910   :  { %v6019_v55 = vpop.eup %6018 }
0x1911   :  { %2070 = vrot.lane.b32.xlu2 %v2068_v36, %s6211_s8  ;;  %v2047_v56 = vadd.f32 1.0, %v6019_v55  ;;  %v5797_v55 = vld [vmem:[%s7754_s3] sm:$0xff] }
0x1912   :  { %2268 = vmatpush.bf16.msra.mxu0 %v5797_v55  ;;  %v5315_v55 = vld [vmem:[%s7757_s4 + $0x10] sm:$0xf] }
0x1913   :  { %6020 = vrcp.f32 %v2047_v56  ;;  %v2059_v63 = vand.u32 2147483648, %v2047_v56  ;;  %vm2053_vm4 = vweird.f32 %v2047_v56  ;;  %v2057_v0 = vand.u32 2147483647, %v2047_v56 }
0x1915   :  { %v2060_v2 = vor.u32 1.1754944e-38, %v2059_v63  ;;  %vm2058_vm7 = vcmp.eq.f32.partialorder %v2057_v0, 8.507059e+37 }
0x1919   :  { %v6021_v57 = vpop.eup %6020 }
0x191a   :  { %v2049_v58 = vmul.f32 %v6021_v57, %v2047_v56  ;;  %vm2054_vm3 = vweird.f32 %v6021_v57 }
0x191b   :  { %vm2055_vm6 = vmor %vm2053_vm4, %vm2054_vm3 }
0x191c   :  { %v2050_v59 = vsub.f32 1.0, %v2049_v58 }
0x191e   :  { %v2051_v61 = vmul.f32 %v6021_v57, %v2050_v59 }
0x1920   :  { %v2052_v62 = vadd.f32 %v6021_v57, %v2051_v61 }
0x1922   :  { %v2056_v1 = vsel %vm2055_vm6, %v6021_v57, %v2052_v62 }
0x1923   :  { %v2061_v4 = vsel %vm2058_vm7, %v2060_v2, %v2056_v1 }
0x196b   :  { %v2071_v3 = vpop.permute.xlu2 %2070 }
0x196c   :  { %v2073_v5 = vmul.f32 %v2071_v3, %v2061_v4 }
0x196e   :  { %v6904_v6 = vadd.f32 %v2073_v5, %v2010_v18 }
0x1970   :  { %2155 = vrot.lane.b32.xlu0 %v6904_v6, %s6211_s8  ;;  %2145 = vrot.lane.b32.xlu2 %v6904_v6, %s6210_s1  ;;  %v2079_v7 = vpack.c.bf16 %v6904_v6, %v6904_v6 }
0x1972   :  { %5273 = vmatmul.msk.bf16.vlgmr.msra.gmra.mxu2 %vm26_vm0, %v2079_v7 }
0x1978   :  { %2184 = vrot.lane.b32.xlu2 %v5278_v11, %s6212_s17 }
0x19ca   :  { %v2146_v15 = vpop.permute.xlu2 %2145 }
0x19d2   :  { %v2185_v32 = vpop.permute.xlu2 %2184 }
0x19d3   :  { %2200 = vmatpush.bf16.msra.mxu3 %v2185_v32 }
0x19e2   :  { %v2156_v29 = vpop.permute.xlu0 %2155 }
0x19f5   :  { %v2120_v12 = vpop.f32.mrf.mxu2 }
0x19f6   :  { %v5274_v13 = vmul.f32 -1.442695, %v2120_v12  ;;  %v2143_v14 = vmax.f32 %v2120_v12, 0.0 }
0x19f8   :  { %6022 = vpow2.f32 %v5274_v13  ;;  %v2148_v16 = vsub.f32 %v2143_v14, %v2146_v15  ;;  %v5301_v14 = vld [vmem:[%s7757_s4 + $0x10] sm:$0xf]  ;;  %v5297_v15 = vld [vmem:[%s7757_s4] sm:$0xf] }
0x19fa   :  { %2150 = vrot.lane.b32.xlu1 %v2148_v16, %s6211_s8 }
0x19fd   :  { %v2122_v17 = vpop.f32.mrf.mxu2 }
0x19fe   :  { %v6023_v18 = vpop.eup %6022  ;;  %v5799_v17 = vld [vmem:[%s7757_s4 + $0x4] sm:$0xf0] }
0x19ff   :  { %v2127_v19 = vadd.f32 1.0, %v6023_v18  ;;  %v5298_v18 = vor.u32 %v5799_v17, %v5297_v15 }
0x1a01   :  { %6024 = vrcp.f32 %v2127_v19  ;;  %v2139_v23 = vand.u32 2147483648, %v2127_v19  ;;  %v2137_v25 = vand.u32 2147483647, %v2127_v19  ;;  %vm2133_vm9 = vweird.f32 %v2127_v19 }
0x1a03   :  { %v2140_v27 = vor.u32 1.1754944e-38, %v2139_v23  ;;  %vm2138_vm11 = vcmp.eq.f32.partialorder %v2137_v25, 8.507059e+37 }
0x1a07   :  { %v6025_v20 = vpop.eup %6024 }
0x1a08   :  { %v2129_v21 = vmul.f32 %v6025_v20, %v2127_v19  ;;  %vm2134_vm8 = vweird.f32 %v6025_v20 }
0x1a09   :  { %vm2135_vm10 = vmor %vm2133_vm9, %vm2134_vm8 }
0x1a0a   :  { %v2130_v22 = vsub.f32 1.0, %v2129_v21 }
0x1a0c   :  { %v2131_v24 = vmul.f32 %v6025_v20, %v2130_v22 }
0x1a0e   :  { %v2132_v26 = vadd.f32 %v6025_v20, %v2131_v24 }
0x1a10   :  { %v2136_v28 = vsel %vm2135_vm10, %v6025_v20, %v2132_v26 }
0x1a11   :  { %v2141_v30 = vsel %vm2138_vm11, %v2140_v27, %v2136_v28 }
0x1a12   :  { %v2158_v31 = vsub.f32 %v2141_v30, %v2156_v29 }
0x1a14   :  { %2160 = vrot.lane.b32.xlu1 %v2158_v31, %s6211_s8 }
0x1a6c   :  { %v2151_v33 = vpop.permute.xlu1 %2150 }
0x1a6d   :  { %v2153_v34 = vmul.f32 %v2151_v33, %v2141_v30 }
0x1a6f   :  { %v2154_v35 = vadd.f32 %v2153_v34, %v6904_v6 }
0x1a71   :  { %v2173_v36 = vpack.c.bf16 %v2154_v35, %v2154_v35  ;;  %2226 = vrot.lane.b32.xlu2 %v2154_v35, %s6210_s1  ;;  %v2236_v7 = vadd.f32 %v2154_v35, %v6904_v6 }
0x1a73   :  { %5283 = vmatmul.msk.bf16.vlgmr.msra.gmra.mxu3 %vm26_vm0, %v2173_v36 }
0x1a86   :  { %v2161_v37 = vpop.permute.xlu1 %2160 }
0x1a87   :  { %v2163_v38 = vmul.f32 %v2161_v37, %v2141_v30 }
0x1a89   :  { %2165 = vrot.lane.b32.xlu0 %v2163_v38, %s6212_s17 }
0x1acb   :  { %v2227_v40 = vpop.permute.xlu2 %2226 }
0x1af6   :  { %v2202_v41 = vpop.f32.mrf.mxu3 }
0x1af7   :  { %v2229_v43 = vsub.f32 %v2202_v41, %v2227_v40  ;;  %v5284_v45 = vmul.f32 -1.442695, %v2202_v41  ;;  %v5803_v41 = vld [vmem:[%s7757_s4 + $0x14] sm:$0xf] }
0x1af9   :  { %2231 = vrot.lane.b32.xlu1 %v2229_v43, %s6211_s8  ;;  %6026 = vpow2.f32 %v5284_v45  ;;  %v5317_v43 = vld [vmem:[%s7757_s4 + $0x18] sm:$0xf0]  ;;  %v5801_v45 = vld [vmem:[%s7757_s4 + $0x4] sm:$0xf] }
0x1afb   :  { %v2166_v0 = vpop.permute.xlu0 %2165 }
0x1afc   :  { %v2168_v3 = vadd.f32 %v2166_v0, %v6904_v6  ;;  %v5800_v6 = vld [vmem:[%s7757_s4 + $0x14] sm:$0xf0] }
0x1afd   :  { %v5302_v16 = vor.u32 %v5800_v6, %v5301_v14 }
0x1afe   :  { %v2204_v44 = vpop.f32.mrf.mxu3  ;;  %v2237_v9 = vadd.f32 %v2236_v7, %v2168_v3  ;;  %v5329_v3 = vld [vmem:[%s7757_s4 + $0x14] sm:$0xf] }
0x1aff   :  { %v6027_v46 = vpop.eup %6026  ;;  %2332 = vmatpush.bf16.msrb.mxu1 %v5302_v16  ;;  %v5320_v44 = vor.u32 %v5803_v41, %v5317_v43 }
0x1b00   :  { %v2209_v54 = vadd.f32 1.0, %v6027_v46  ;;  %v5309_v46 = vld [vmem:[%s7757_s4 + $0x8] sm:$0xf0] }
0x1b02   :  { %6028 = vrcp.f32 %v2209_v54  ;;  %v2221_v62 = vand.u32 2147483648, %v2209_v54  ;;  %vm2215_vm13 = vweird.f32 %v2209_v54  ;;  %v2219_v63 = vand.u32 2147483647, %v2209_v54 }
0x1b03   :  { %2333 = vmatpush.bf16.msrb.mxu1 %v5298_v18 }
0x1b04   :  { %v2222_v2 = vor.u32 1.1754944e-38, %v2221_v62  ;;  %vm2220_vm15 = vcmp.eq.f32.partialorder %v2219_v63, 8.507059e+37 }
0x1b08   :  { %v6029_v56 = vpop.eup %6028 }
0x1b09   :  { %v2211_v57 = vmul.f32 %v6029_v56, %v2209_v54  ;;  %vm2216_vm12 = vweird.f32 %v6029_v56  ;;  %v5312_v54 = vor.u32 %v5801_v45, %v5309_v46 }
0x1b0a   :  { %vm2217_vm14 = vmor %vm2215_vm13, %vm2216_vm12 }
0x1b0b   :  { %v2212_v58 = vsub.f32 1.0, %v2211_v57 }
0x1b0d   :  { %v2213_v59 = vmul.f32 %v6029_v56, %v2212_v58  ;;  %v5307_v58 = vld [vmem:[%s7757_s4] sm:$0xf] }
0x1b0f   :  { %v2214_v61 = vadd.f32 %v6029_v56, %v2213_v59  ;;  %v5802_v59 = vld [vmem:[%s7757_s4 + $0x4] sm:$0xf0] }
0x1b11   :  { %v2218_v1 = vsel %vm2217_vm14, %v6029_v56, %v2214_v61  ;;  %v5804_v56 = vld [vmem:[%s7757_s4 + $0x14] sm:$0xf0]  ;;  %v5308_v61 = vor.u32 %v5802_v59, %v5307_v58 }
0x1b12   :  { %v2223_v5 = vsel %vm2220_vm15, %v2222_v2, %v2218_v1  ;;  %v5316_v57 = vor.u32 %v5804_v56, %v5315_v55 }
0x1b6b   :  { %v2232_v4 = vpop.permute.xlu1 %2231 }
0x1b6c   :  { %v2234_v8 = vmul.f32 %v2232_v4, %v2223_v5  ;;  %v5806_v4 = vld [vmem:[%s7757_s4 + $0x18] sm:$0xf0] }
0x1b6d   :  { %v5330_v5 = vor.u32 %v5806_v4, %v5329_v3  ;;  %v5808_v4 = vld [vmem:[%s7754_s3 + $0x8] sm:$0xff] }
0x1b6e   :  { %v2235_v10 = vadd.f32 %v2234_v8, %v2154_v35  ;;  %2562 = vmatpush.bf16.msrb.mxu0 %v5808_v4 }
0x1b70   :  { %v2238_v11 = vadd.f32 %v2237_v9, %v2235_v10 }
0x1b72   :  { %v2239_v12 = vmul.f32 0.25, %v2238_v11 }
0x1b74   :  { %2240 = vst.msk [vmem:[%s7758_s5 + $0x30] sm:$0xff] %vm26_vm0, %v2239_v12  ;;  %2296 = vrot.lane.b32.xlu2 %v2239_v12, %s6210_s1  ;;  %v2241_v13 = vpack.c.bf16 %v2239_v12, %v2239_v12 }
0x1b76   :  { %5293 = vmatmul.msk.bf16.vlgmr.msra.gmra.mxu0 %vm26_vm0, %v2241_v13 }
0x1b7c   :  { %2395 = vrot.lane.b32.xlu2 %v5316_v57, %s6212_s17 }
0x1b84   :  { %2391 = vrot.lane.b32.xlu2 %v5308_v61, %s6212_s17 }
0x1b8c   :  { %2481 = vrot.lane.b32.xlu2 %v5330_v5, %s6212_s17 }
0x1bce   :  { %v2297_v23 = vpop.permute.xlu2 %2296 }
0x1bd6   :  { %v2396_v8 = vpop.permute.xlu2 %2395 }
0x1bde   :  { %v2392_v13 = vpop.permute.xlu2 %2391 }
0x1bf3   :  { %v2270_v19 = vpop.f32.mrf.mxu0 }
0x1bf4   :  { %v2274_v20 = vadd.f32 %v2270_v19, %v6833_v47 }
0x1bf6   :  { %6030 = vtanh.f32 %v2274_v20  ;;  %v5294_v25 = vmul.f32 -1.442695, %v2274_v20 }
0x1bf8   :  { %6032 = vpow2.f32 %v5294_v25 }
0x1bfb   :  { %v2272_v21 = vpop.f32.mrf.mxu0 }
0x1bfc   :  { %v6031_v22 = vpop.eup %6030 }
0x1bfd   :  { %v2299_v24 = vsub.f32 %v6031_v22, %v2297_v23 }
0x1bfe   :  { %v6033_v26 = vpop.eup %6032 }
0x1bff   :  { %2301 = vrot.lane.b32.xlu0 %v2299_v24, %s6211_s8  ;;  %v2278_v27 = vadd.f32 1.0, %v6033_v26 }
0x1c01   :  { %6034 = vrcp.f32 %v2278_v27  ;;  %v2290_v33 = vand.u32 2147483648, %v2278_v27  ;;  %vm2284_vm2 = vweird.f32 %v2278_v27  ;;  %v2288_v47 = vand.u32 2147483647, %v2278_v27 }
0x1c03   :  { %v2291_v35 = vor.u32 1.1754944e-38, %v2290_v33  ;;  %vm2289_vm4 = vcmp.eq.f32.partialorder %v2288_v47, 8.507059e+37 }
0x1c07   :  { %v6035_v28 = vpop.eup %6034  ;;  %2397 = vrot.lane.b32.xlu0 %v5320_v44, %s6212_s17 }
0x1c08   :  { %v2280_v29 = vmul.f32 %v6035_v28, %v2278_v27  ;;  %vm2285_vm1 = vweird.f32 %v6035_v28 }
0x1c09   :  { %vm2286_vm3 = vmor %vm2284_vm2, %vm2285_vm1 }
0x1c0a   :  { %v2281_v30 = vsub.f32 1.0, %v2280_v29  ;;  %v2482_v29 = vpop.permute.xlu2 %2481 }
0x1c0b   :  { %2494 = vmatpush.bf16.msrb.mxu3 %v2482_v29 }
0x1c0c   :  { %v2282_v31 = vmul.f32 %v6035_v28, %v2281_v30  ;;  %v5325_v30 = vld [vmem:[%s7757_s4 + $0x4] sm:$0xf] }
0x1c0e   :  { %v2283_v32 = vadd.f32 %v6035_v28, %v2282_v31  ;;  %v5805_v31 = vld [vmem:[%s7757_s4 + $0x8] sm:$0xf0] }
0x1c0f   :  { %2393 = vrot.lane.b32.xlu0 %v5312_v54, %s6212_s17 }
0x1c10   :  { %v2287_v34 = vsel %vm2286_vm3, %v6035_v28, %v2283_v32  ;;  %v5326_v32 = vor.u32 %v5805_v31, %v5325_v30 }
0x1c11   :  { %v2292_v37 = vsel %vm2289_vm4, %v2291_v35, %v2287_v34 }
0x1c71   :  { %v2302_v36 = vpop.permute.xlu0 %2301 }
0x1c72   :  { %v2304_v38 = vmul.f32 %v2302_v36, %v2292_v37 }
0x1c74   :  { %v2305_v39 = vadd.f32 %v2304_v38, %v2239_v12 }
0x1c76   :  { %v2310_v40 = vpack.c.bf16 %v2305_v39, %v2305_v39  ;;  %2360 = vrot.lane.b32.xlu1 %v2305_v39, %s6210_s1 }
0x1c78   :  { %5303 = vmatmul.msk.bf16.vlgmr.msrb.gmra.mxu1 %vm26_vm0, %v2310_v40 }
0x1c79   :  { %v2398_v7 = vpop.permute.xlu0 %2397 }
0x1c7a   :  { %v2400_v9 = vsel %vm333_vm5, %v2396_v8, %v2398_v7 }
0x1c7b   :  { %2412 = vmatpush.bf16.msrb.mxu2 %v2400_v9 }
0x1c81   :  { %v2394_v14 = vpop.permute.xlu0 %2393 }
0x1c82   :  { %v2399_v6 = vsel %vm333_vm5, %v2392_v13, %v2394_v14  ;;  %v5807_v13 = vld [vmem:[%s7754_s3] sm:$0xff] }
0x1c83   :  { %2413 = vmatpush.bf16.msrb.mxu2 %v2399_v6  ;;  %2563 = vmatpush.bf16.msrb.mxu0 %v5807_v13  ;;  %v5365_v13 = vld [vmem:[%s7757_s4 + $0x18] sm:$0xf0] }
0x1ce8   :  { %v2361_v0 = vpop.permute.xlu1 %2360 }
0x1cf5   :  { %v2335_v62 = vpop.f32.mrf.mxu1 }
0x1cf6   :  { %6036 = vtanh.f32 %v2335_v62  ;;  %v5304_v10 = vmul.f32 -1.442695, %v2335_v62 }
0x1cf8   :  { %6038 = vpow2.f32 %v5304_v10 }
0x1cfc   :  { %v6037_v63 = vpop.eup %6036 }
0x1cfd   :  { %v2337_v1 = vpop.f32.mrf.mxu1  ;;  %v2363_v2 = vsub.f32 %v6037_v63, %v2361_v0 }
0x1cfe   :  { %v6039_v11 = vpop.eup %6038 }
0x1cff   :  { %2365 = vrot.lane.b32.xlu1 %v2363_v2, %s6211_s8  ;;  %v2342_v12 = vadd.f32 1.0, %v6039_v11 }
0x1d01   :  { %6040 = vrcp.f32 %v2342_v12  ;;  %v2354_v20 = vand.u32 2147483648, %v2342_v12  ;;  %vm2348_vm7 = vweird.f32 %v2342_v12  ;;  %v2352_v21 = vand.u32 2147483647, %v2342_v12 }
0x1d03   :  { %v2355_v23 = vor.u32 1.1754944e-38, %v2354_v20  ;;  %vm2353_vm9 = vcmp.eq.f32.partialorder %v2352_v21, 8.507059e+37 }
0x1d07   :  { %v6041_v15 = vpop.eup %6040 }
0x1d08   :  { %v2344_v16 = vmul.f32 %v6041_v15, %v2342_v12  ;;  %vm2349_vm6 = vweird.f32 %v6041_v15 }
0x1d09   :  { %vm2350_vm8 = vmor %vm2348_vm7, %vm2349_vm6 }
0x1d0a   :  { %v2345_v17 = vsub.f32 1.0, %v2344_v16 }
0x1d0c   :  { %v2346_v18 = vmul.f32 %v6041_v15, %v2345_v17 }
0x1d0e   :  { %v2347_v19 = vadd.f32 %v6041_v15, %v2346_v18 }
0x1d10   :  { %v2351_v22 = vsel %vm2350_vm8, %v6041_v15, %v2347_v19 }
0x1d11   :  { %v2356_v25 = vsel %vm2353_vm9, %v2355_v23, %v2351_v22 }
0x1d71   :  { %v2366_v24 = vpop.permute.xlu1 %2365 }
0x1d72   :  { %v2368_v26 = vmul.f32 %v2366_v24, %v2356_v25 }
0x1d74   :  { %v6995_v27 = vadd.f32 %v2368_v26, %v2305_v39 }
0x1d76   :  { %2450 = vrot.lane.b32.xlu2 %v6995_v27, %s6211_s8  ;;  %2440 = vrot.lane.b32.xlu1 %v6995_v27, %s6210_s1  ;;  %v2374_v28 = vpack.c.bf16 %v6995_v27, %v6995_v27 }
0x1d78   :  { %5321 = vmatmul.msk.bf16.vlgmr.msrb.gmra.mxu2 %vm26_vm0, %v2374_v28 }
0x1d7e   :  { %2479 = vrot.lane.b32.xlu1 %v5326_v32, %s6212_s17 }
0x1dd0   :  { %v2451_v57 = vpop.permute.xlu2 %2450 }
0x1de8   :  { %v2441_v35 = vpop.permute.xlu1 %2440 }
0x1df0   :  { %v2480_v61 = vpop.permute.xlu1 %2479 }
0x1df1   :  { %2495 = vmatpush.bf16.msrb.mxu3 %v2480_v61 }
0x1dfb   :  { %v2415_v33 = vpop.f32.mrf.mxu2 }
0x1dfc   :  { %v5322_v47 = vmul.f32 -1.442695, %v2415_v33  ;;  %v2438_v34 = vmax.f32 %v2415_v33, 0.0 }
0x1dfe   :  { %6042 = vpow2.f32 %v5322_v47  ;;  %v2443_v36 = vsub.f32 %v2438_v34, %v2441_v35  ;;  %v5349_v47 = vld [vmem:[%s7757_s4 + $0x10] sm:$0xf]  ;;  %v5345_v34 = vld [vmem:[%s7757_s4] sm:$0xf] }
0x1e00   :  { %2445 = vrot.lane.b32.xlu0 %v2443_v36, %s6211_s8  ;;  %v5809_v36 = vld [vmem:[%s7757_s4 + $0x4] sm:$0xf0] }
0x1e03   :  { %v2417_v37 = vpop.f32.mrf.mxu2 }
0x1e04   :  { %v6043_v38 = vpop.eup %6042  ;;  %v5346_v37 = vor.u32 %v5809_v36, %v5345_v34 }
0x1e05   :  { %v2422_v39 = vadd.f32 1.0, %v6043_v38 }
0x1e07   :  { %6044 = vrcp.f32 %v2422_v39  ;;  %v2434_v44 = vand.u32 2147483648, %v2422_v39  ;;  %v2432_v46 = vand.u32 2147483647, %v2422_v39  ;;  %vm2428_vm11 = vweird.f32 %v2422_v39 }
0x1e09   :  { %v2435_v55 = vor.u32 1.1754944e-38, %v2434_v44  ;;  %vm2433_vm13 = vcmp.eq.f32.partialorder %v2432_v46, 8.507059e+37 }
0x1e0d   :  { %v6045_v40 = vpop.eup %6044 }
0x1e0e   :  { %v2424_v41 = vmul.f32 %v6045_v40, %v2422_v39  ;;  %vm2429_vm10 = vweird.f32 %v6045_v40 }
0x1e0f   :  { %vm2430_vm12 = vmor %vm2428_vm11, %vm2429_vm10 }
0x1e10   :  { %v2425_v43 = vsub.f32 1.0, %v2424_v41 }
0x1e12   :  { %v2426_v45 = vmul.f32 %v6045_v40, %v2425_v43 }
0x1e14   :  { %v2427_v54 = vadd.f32 %v6045_v40, %v2426_v45 }
0x1e16   :  { %v2431_v56 = vsel %vm2430_vm12, %v6045_v40, %v2427_v54 }
0x1e17   :  { %v2436_v58 = vsel %vm2433_vm13, %v2435_v55, %v2431_v56 }
0x1e18   :  { %v2453_v59 = vsub.f32 %v2436_v58, %v2451_v57 }
0x1e1a   :  { %2455 = vrot.lane.b32.xlu0 %v2453_v59, %s6211_s8 }
0x1e72   :  { %v2446_v62 = vpop.permute.xlu0 %2445 }
0x1e73   :  { %v2448_v63 = vmul.f32 %v2446_v62, %v2436_v58 }
0x1e75   :  { %v2449_v0 = vadd.f32 %v2448_v63, %v6995_v27 }
0x1e77   :  { %v2468_v1 = vpack.c.bf16 %v2449_v0, %v2449_v0  ;;  %2521 = vrot.lane.b32.xlu1 %v2449_v0, %s6210_s1  ;;  %v2531_v26 = vadd.f32 %v2449_v0, %v6995_v27 }
0x1e79   :  { %5331 = vmatmul.msk.bf16.vlgmr.msrb.gmra.mxu3 %vm26_vm0, %v2468_v1 }
0x1e8c   :  { %v2456_v2 = vpop.permute.xlu0 %2455 }
0x1e8d   :  { %v2458_v3 = vmul.f32 %v2456_v2, %v2436_v58 }
0x1e8f   :  { %2460 = vrot.lane.b32.xlu2 %v2458_v3, %s6212_s17 }
0x1ee9   :  { %v2522_v5 = vpop.permute.xlu1 %2521  ;;  %v2461_v20 = vpop.permute.xlu2 %2460 }
0x1eea   :  { %v2463_v23 = vadd.f32 %v2461_v20, %v6995_v27  ;;  %v5810_v27 = vld [vmem:[%s7757_s4 + $0x14] sm:$0xf0] }
0x1eeb   :  { %v5350_v35 = vor.u32 %v5810_v27, %v5349_v47 }
0x1eec   :  { %v2532_v29 = vadd.f32 %v2531_v26, %v2463_v23  ;;  %v5816_v23 = vld [vmem:[%s7757_s4 + $0x18] sm:$0xf0] }
0x1eed   :  { %2627 = vmatpush.bf16.msra.mxu1 %v5350_v35 }
0x1ef1   :  { %2628 = vmatpush.bf16.msra.mxu1 %v5346_v37 }
0x1efc   :  { %v2497_v7 = vpop.f32.mrf.mxu3 }
0x1efd   :  { %v2524_v8 = vsub.f32 %v2497_v7, %v2522_v5  ;;  %v5332_v10 = vmul.f32 -1.442695, %v2497_v7  ;;  %v5363_v5 = vld [vmem:[%s7757_s4 + $0x10] sm:$0xf]  ;;  %v5814_v7 = vld [vmem:[%s7757_s4 + $0x14] sm:$0xf0] }
0x1eff   :  { %2526 = vrot.lane.b32.xlu0 %v2524_v8, %s6211_s8  ;;  %6046 = vpow2.f32 %v5332_v10  ;;  %v5364_v8 = vor.u32 %v5814_v7, %v5363_v5  ;;  %v5812_v10 = vld [vmem:[%s7757_s4 + $0x4] sm:$0xf0] }
0x1f04   :  { %v2499_v9 = vpop.f32.mrf.mxu3 }
0x1f05   :  { %v6047_v11 = vpop.eup %6046  ;;  %v5355_v9 = vld [vmem:[%s7757_s4] sm:$0xf] }
0x1f06   :  { %v2504_v12 = vadd.f32 1.0, %v6047_v11  ;;  %v5356_v11 = vor.u32 %v5812_v10, %v5355_v9 }
0x1f08   :  { %6048 = vrcp.f32 %v2504_v12  ;;  %v2516_v18 = vand.u32 2147483648, %v2504_v12  ;;  %vm2510_vm15 = vweird.f32 %v2504_v12  ;;  %v2514_v19 = vand.u32 2147483647, %v2504_v12 }
0x1f0a   :  { %v2517_v22 = vor.u32 1.1754944e-38, %v2516_v18  ;;  %vm2515_vm2 = vcmp.eq.f32.partialorder %v2514_v19, 8.507059e+37 }
0x1f0e   :  { %v6049_v14 = vpop.eup %6048 }
0x1f0f   :  { %v2506_v6 = vmul.f32 %v6049_v14, %v2504_v12  ;;  %vm2511_vm14 = vweird.f32 %v6049_v14  ;;  %v5813_v12 = vld [vmem:[%s7757_s4 + $0x14] sm:$0xf] }
0x1f10   :  { %vm2512_vm1 = vmor %vm2510_vm15, %vm2511_vm14 }
0x1f11   :  { %v2507_v15 = vsub.f32 1.0, %v2506_v6  ;;  %v5811_v6 = vld [vmem:[%s7757_s4 + $0x4] sm:$0xf] }
0x1f13   :  { %v2508_v16 = vmul.f32 %v6049_v14, %v2507_v15  ;;  %v5357_v15 = vld [vmem:[%s7757_s4 + $0x8] sm:$0xf0] }
0x1f15   :  { %v2509_v17 = vadd.f32 %v6049_v14, %v2508_v16  ;;  %v5360_v16 = vor.u32 %v5811_v6, %v5357_v15 }
0x1f17   :  { %v2513_v21 = vsel %vm2512_vm1, %v6049_v14, %v2509_v17  ;;  %v5368_v14 = vor.u32 %v5813_v12, %v5365_v13 }
0x1f18   :  { %v2518_v25 = vsel %vm2515_vm2, %v2517_v22, %v2513_v21  ;;  %v5377_v22 = vld [vmem:[%s7757_s4 + $0x14] sm:$0xf] }
0x1f71   :  { %v2527_v24 = vpop.permute.xlu0 %2526 }
0x1f72   :  { %v2529_v28 = vmul.f32 %v2527_v24, %v2518_v25  ;;  %v5378_v24 = vor.u32 %v5816_v23, %v5377_v22  ;;  %v5818_v22 = vld [vmem:[%s7754_s3 + $0x8] sm:$0xff] }
0x1f73   :  { %2857 = vmatpush.bf16.msra.mxu0 %v5818_v22  ;;  %v5411_v22 = vld [vmem:[%s7757_s4 + $0x10] sm:$0xf] }
0x1f74   :  { %v2530_v30 = vadd.f32 %v2529_v28, %v2449_v0 }
0x1f76   :  { %v2533_v31 = vadd.f32 %v2532_v29, %v2530_v30 }
0x1f78   :  { %v2534_v32 = vmul.f32 0.25, %v2533_v31 }
0x1f7a   :  { %2535 = vst.msk [vmem:[%s7758_s5 + $0x38] sm:$0xff] %vm26_vm0, %v2534_v32  ;;  %2591 = vrot.lane.b32.xlu1 %v2534_v32, %s6210_s1  ;;  %v2536_v33 = vpack.c.bf16 %v2534_v32, %v2534_v32 }
0x1f7c   :  { %5341 = vmatmul.msk.bf16.vlgmr.msrb.gmra.mxu0 %vm26_vm0, %v2536_v33 }
0x1f82   :  { %2690 = vrot.lane.b32.xlu1 %v5364_v8, %s6212_s17 }
0x1f8a   :  { %2686 = vrot.lane.b32.xlu1 %v5356_v11, %s6212_s17 }
0x1f92   :  { %2776 = vrot.lane.b32.xlu1 %v5378_v24, %s6212_s17 }
0x1fec   :  { %v2592_v43 = vpop.permute.xlu1 %2591 }
0x1ff4   :  { %v2691_v25 = vpop.permute.xlu1 %2690 }
0x1ff9   :  { %v2565_v38 = vpop.f32.mrf.mxu0 }
0x1ffa   :  { %v2569_v39 = vadd.f32 %v2565_v38, %v6835_v48 }
0x1ffc   :  { %6050 = vtanh.f32 %v2569_v39  ;;  %v5342_v45 = vmul.f32 -1.442695, %v2569_v39  ;;  %v2687_v33 = vpop.permute.xlu1 %2686 }
0x1ffe   :  { %6052 = vpow2.f32 %v5342_v45 }
0x2001   :  { %v2567_v40 = vpop.f32.mrf.mxu0 }
0x2002   :  { %v6051_v41 = vpop.eup %6050 }
0x2003   :  { %v2594_v44 = vsub.f32 %v6051_v41, %v2592_v43 }
0x2004   :  { %v6053_v46 = vpop.eup %6052 }
0x2005   :  { %2596 = vrot.lane.b32.xlu2 %v2594_v44, %s6211_s8  ;;  %v2573_v54 = vadd.f32 1.0, %v6053_v46 }
0x2007   :  { %6054 = vrcp.f32 %v2573_v54  ;;  %v2585_v61 = vand.u32 2147483648, %v2573_v54  ;;  %vm2579_vm4 = vweird.f32 %v2573_v54  ;;  %v2583_v48 = vand.u32 2147483647, %v2573_v54 }
0x2009   :  { %v2586_v63 = vor.u32 1.1754944e-38, %v2585_v61  ;;  %vm2584_vm7 = vcmp.eq.f32.partialorder %v2583_v48, 8.507059e+37 }
0x200d   :  { %v6055_v55 = vpop.eup %6054  ;;  %2692 = vrot.lane.b32.xlu2 %v5368_v14, %s6212_s17 }
0x200e   :  { %v2575_v56 = vmul.f32 %v6055_v55, %v2573_v54  ;;  %vm2580_vm3 = vweird.f32 %v6055_v55 }
0x200f   :  { %vm2581_vm6 = vmor %vm2579_vm4, %vm2580_vm3 }
0x2010   :  { %v2576_v57 = vsub.f32 1.0, %v2575_v56  ;;  %v5815_v56 = vld [vmem:[%s7757_s4 + $0x8] sm:$0xf0] }
0x2012   :  { %v2577_v58 = vmul.f32 %v6055_v55, %v2576_v57 }
0x2014   :  { %v2578_v59 = vadd.f32 %v6055_v55, %v2577_v58  ;;  %v2777_v58 = vpop.permute.xlu1 %2776 }
0x2015   :  { %2688 = vrot.lane.b32.xlu2 %v5360_v16, %s6212_s17  ;;  %2789 = vmatpush.bf16.msra.mxu3 %v2777_v58 }
0x2016   :  { %v2582_v62 = vsel %vm2581_vm6, %v6055_v55, %v2578_v59  ;;  %v5373_v55 = vld [vmem:[%s7757_s4 + $0x4] sm:$0xf] }
0x2017   :  { %v2587_v1 = vsel %vm2584_vm7, %v2586_v63, %v2582_v62  ;;  %v5374_v57 = vor.u32 %v5815_v56, %v5373_v55 }
0x205f   :  { %v2597_v0 = vpop.permute.xlu2 %2596 }
0x2060   :  { %v2599_v2 = vmul.f32 %v2597_v0, %v2587_v1 }
0x2062   :  { %v2600_v3 = vadd.f32 %v2599_v2, %v2534_v32 }
0x2064   :  { %v2605_v4 = vpack.c.bf16 %v2600_v3, %v2600_v3  ;;  %2655 = vrot.lane.b32.xlu0 %v2600_v3, %s6210_s1 }
0x2066   :  { %5351 = vmatmul.msk.bf16.vlgmr.msra.gmra.mxu1 %vm26_vm0, %v2605_v4 }
0x2067   :  { %v2693_v26 = vpop.permute.xlu2 %2692 }
0x2068   :  { %v2695_v28 = vsel %vm333_vm5, %v2691_v25, %v2693_v26 }
0x2069   :  { %2707 = vmatpush.bf16.msra.mxu2 %v2695_v28 }
0x206f   :  { %v2689_v32 = vpop.permute.xlu2 %2688 }
0x2070   :  { %v2694_v47 = vsel %vm333_vm5, %v2687_v33, %v2689_v32 }
0x2071   :  { %2708 = vmatpush.bf16.msra.mxu2 %v2694_v47 }
0x20d6   :  { %v2656_v19 = vpop.permute.xlu0 %2655 }
0x20e3   :  { %v2630_v17 = vpop.f32.mrf.mxu1 }
0x20e4   :  { %6056 = vtanh.f32 %v2630_v17  ;;  %v5352_v29 = vmul.f32 -1.442695, %v2630_v17 }
0x20e6   :  { %6058 = vpow2.f32 %v5352_v29 }
0x20ea   :  { %v6057_v18 = vpop.eup %6056 }
0x20eb   :  { %v2632_v20 = vpop.f32.mrf.mxu1  ;;  %v2658_v21 = vsub.f32 %v6057_v18, %v2656_v19 }
0x20ec   :  { %v6059_v30 = vpop.eup %6058 }
0x20ed   :  { %2660 = vrot.lane.b32.xlu0 %v2658_v21, %s6211_s8  ;;  %v2637_v31 = vadd.f32 1.0, %v6059_v30 }
0x20ef   :  { %6060 = vrcp.f32 %v2637_v31  ;;  %v2649_v38 = vand.u32 2147483648, %v2637_v31  ;;  %vm2643_vm9 = vweird.f32 %v2637_v31  ;;  %v2647_v39 = vand.u32 2147483647, %v2637_v31 }
0x20f1   :  { %v2650_v41 = vor.u32 1.1754944e-38, %v2649_v38  ;;  %vm2648_vm11 = vcmp.eq.f32.partialorder %v2647_v39, 8.507059e+37 }
0x20f5   :  { %v6061_v27 = vpop.eup %6060 }
0x20f6   :  { %v2639_v34 = vmul.f32 %v6061_v27, %v2637_v31  ;;  %vm2644_vm8 = vweird.f32 %v6061_v27  ;;  %v5817_v31 = vld [vmem:[%s7754_s3] sm:$0xff] }
0x20f7   :  { %vm2645_vm10 = vmor %vm2643_vm9, %vm2644_vm8  ;;  %2858 = vmatpush.bf16.msra.mxu0 %v5817_v31  ;;  %v5821_v31 = vld [vmem:[%s7757_s4 + $0x4] sm:$0xf] }
0x20f8   :  { %v2640_v35 = vsub.f32 1.0, %v2639_v34 }
0x20fa   :  { %v2641_v36 = vmul.f32 %v6061_v27, %v2640_v35 }
0x20fc   :  { %v2642_v37 = vadd.f32 %v6061_v27, %v2641_v36 }
0x20fe   :  { %v2646_v40 = vsel %vm2645_vm10, %v6061_v27, %v2642_v37 }
0x20ff   :  { %v2651_v44 = vsel %vm2648_vm11, %v2650_v41, %v2646_v40 }
0x215f   :  { %v2661_v43 = vpop.permute.xlu0 %2660 }
0x2160   :  { %v2663_v45 = vmul.f32 %v2661_v43, %v2651_v44 }
0x2162   :  { %v7086_v46 = vadd.f32 %v2663_v45, %v2600_v3 }
0x2164   :  { %2745 = vrot.lane.b32.xlu1 %v7086_v46, %s6211_s8  ;;  %2735 = vrot.lane.b32.xlu0 %v7086_v46, %s6210_s1  ;;  %v2669_v54 = vpack.c.bf16 %v7086_v46, %v7086_v46 }
0x2166   :  { %5369 = vmatmul.msk.bf16.vlgmr.msra.gmra.mxu2 %vm26_vm0, %v2669_v54 }
0x216c   :  { %2774 = vrot.lane.b32.xlu0 %v5374_v57, %s6212_s17 }
0x21d6   :  { %v2736_v59 = vpop.permute.xlu0 %2735  ;;  %v2746_v14 = vpop.permute.xlu1 %2745 }
0x21de   :  { %v2775_v61 = vpop.permute.xlu0 %2774 }
0x21df   :  { %2790 = vmatpush.bf16.msra.mxu3 %v2775_v61  ;;  %v5393_v61 = vld [vmem:[%s7757_s4] sm:$0xf] }
0x21e9   :  { %v2710_v48 = vpop.f32.mrf.mxu2 }
0x21ea   :  { %v5370_v62 = vmul.f32 -1.442695, %v2710_v48  ;;  %v2733_v63 = vmax.f32 %v2710_v48, 0.0 }
0x21ec   :  { %6062 = vpow2.f32 %v5370_v62  ;;  %v2738_v0 = vsub.f32 %v2733_v63, %v2736_v59  ;;  %v5397_v59 = vld [vmem:[%s7757_s4 + $0x10] sm:$0xf]  ;;  %v5819_v62 = vld [vmem:[%s7757_s4 + $0x4] sm:$0xf0] }
0x21ed   :  { %v5394_v63 = vor.u32 %v5819_v62, %v5393_v61 }
0x21ee   :  { %2740 = vrot.lane.b32.xlu2 %v2738_v0, %s6211_s8 }
0x21f1   :  { %v2712_v1 = vpop.f32.mrf.mxu2 }
0x21f2   :  { %v6063_v2 = vpop.eup %6062 }
0x21f3   :  { %v2717_v3 = vadd.f32 1.0, %v6063_v2 }
0x21f5   :  { %6064 = vrcp.f32 %v2717_v3  ;;  %v2729_v8 = vand.u32 2147483648, %v2717_v3  ;;  %v2727_v10 = vand.u32 2147483647, %v2717_v3  ;;  %vm2723_vm13 = vweird.f32 %v2717_v3 }
0x21f7   :  { %v2730_v12 = vor.u32 1.1754944e-38, %v2729_v8  ;;  %vm2728_vm15 = vcmp.eq.f32.partialorder %v2727_v10, 8.507059e+37 }
0x21fb   :  { %v6065_v4 = vpop.eup %6064 }
0x21fc   :  { %v2719_v5 = vmul.f32 %v6065_v4, %v2717_v3  ;;  %vm2724_vm12 = vweird.f32 %v6065_v4 }
0x21fd   :  { %vm2725_vm14 = vmor %vm2723_vm13, %vm2724_vm12 }
0x21fe   :  { %v2720_v7 = vsub.f32 1.0, %v2719_v5 }
0x2200   :  { %v2721_v9 = vmul.f32 %v6065_v4, %v2720_v7 }
0x2202   :  { %v2722_v11 = vadd.f32 %v6065_v4, %v2721_v9 }
0x2204   :  { %v2726_v13 = vsel %vm2725_vm14, %v6065_v4, %v2722_v11 }
0x2205   :  { %v2731_v6 = vsel %vm2728_vm15, %v2730_v12, %v2726_v13 }
0x2206   :  { %v2748_v15 = vsub.f32 %v2731_v6, %v2746_v14 }
0x2208   :  { %2750 = vrot.lane.b32.xlu2 %v2748_v15, %s6211_s8 }
0x2248   :  { %v2741_v16 = vpop.permute.xlu2 %2740 }
0x2249   :  { %v2743_v17 = vmul.f32 %v2741_v16, %v2731_v6 }
0x224b   :  { %v2744_v18 = vadd.f32 %v2743_v17, %v7086_v46 }
0x224d   :  { %v2763_v19 = vpack.c.bf16 %v2744_v18, %v2744_v18  ;;  %2816 = vrot.lane.b32.xlu0 %v2744_v18, %s6210_s1  ;;  %v2826_v44 = vadd.f32 %v2744_v18, %v7086_v46 }
0x224f   :  { %5379 = vmatmul.msk.bf16.vlgmr.msra.gmra.mxu3 %vm26_vm0, %v2763_v19 }
0x2262   :  { %v2751_v20 = vpop.permute.xlu2 %2750 }
0x2263   :  { %v2753_v21 = vmul.f32 %v2751_v20, %v2731_v6 }
0x2265   :  { %2755 = vrot.lane.b32.xlu1 %v2753_v21, %s6212_s17 }
0x22bf   :  { %v2817_v23 = vpop.permute.xlu0 %2816 }
0x22d2   :  { %v2792_v24 = vpop.f32.mrf.mxu3 }
0x22d3   :  { %v2819_v25 = vsub.f32 %v2792_v24, %v2817_v23  ;;  %v5380_v28 = vmul.f32 -1.442695, %v2792_v24  ;;  %v5824_v23 = vld [vmem:[%s7757_s4 + $0x14] sm:$0xf0]  ;;  %v5823_v24 = vld [vmem:[%s7757_s4 + $0x14] sm:$0xf] }
0x22d5   :  { %2821 = vrot.lane.b32.xlu2 %v2819_v25, %s6211_s8  ;;  %6066 = vpow2.f32 %v5380_v28  ;;  %v5412_v25 = vor.u32 %v5824_v23, %v5411_v22 }
0x22d7   :  { %v2756_v37 = vpop.permute.xlu1 %2755 }
0x22d8   :  { %v2758_v40 = vadd.f32 %v2756_v37, %v7086_v46  ;;  %v5820_v46 = vld [vmem:[%s7757_s4 + $0x14] sm:$0xf0] }
0x22d9   :  { %v5398_v48 = vor.u32 %v5820_v46, %v5397_v59 }
0x22da   :  { %v2794_v26 = vpop.f32.mrf.mxu3  ;;  %v2827_v54 = vadd.f32 %v2826_v44, %v2758_v40 }
0x22db   :  { %v6067_v29 = vpop.eup %6066  ;;  %2922 = vmatpush.bf16.msrb.mxu1 %v5398_v48  ;;  %v5413_v26 = vld [vmem:[%s7757_s4 + $0x18] sm:$0xf0] }
0x22dc   :  { %v2799_v30 = vadd.f32 1.0, %v6067_v29  ;;  %v5416_v28 = vor.u32 %v5823_v24, %v5413_v26  ;;  %v5403_v29 = vld [vmem:[%s7757_s4] sm:$0xf] }
0x22de   :  { %6068 = vrcp.f32 %v2799_v30  ;;  %v2811_v35 = vand.u32 2147483648, %v2799_v30  ;;  %vm2805_vm2 = vweird.f32 %v2799_v30  ;;  %v2809_v36 = vand.u32 2147483647, %v2799_v30 }
0x22df   :  { %2923 = vmatpush.bf16.msrb.mxu1 %v5394_v63 }
0x22e0   :  { %v2812_v39 = vor.u32 1.1754944e-38, %v2811_v35  ;;  %vm2810_vm4 = vcmp.eq.f32.partialorder %v2809_v36, 8.507059e+37 }
0x22e4   :  { %v6069_v32 = vpop.eup %6068 }
0x22e5   :  { %v2801_v33 = vmul.f32 %v6069_v32, %v2799_v30  ;;  %vm2806_vm1 = vweird.f32 %v6069_v32  ;;  %v5822_v30 = vld [vmem:[%s7757_s4 + $0x4] sm:$0xf0] }
0x22e6   :  { %vm2807_vm3 = vmor %vm2805_vm2, %vm2806_vm1 }
0x22e7   :  { %v2802_v47 = vsub.f32 1.0, %v2801_v33  ;;  %v5404_v33 = vor.u32 %v5822_v30, %v5403_v29 }
0x22e9   :  { %v2803_v27 = vmul.f32 %v6069_v32, %v2802_v47 }
0x22eb   :  { %v2804_v34 = vadd.f32 %v6069_v32, %v2803_v27 }
0x22ed   :  { %v2808_v38 = vsel %vm2807_vm3, %v6069_v32, %v2804_v34  ;;  %v5405_v32 = vld [vmem:[%s7757_s4 + $0x8] sm:$0xf0] }
0x22ee   :  { %v2813_v43 = vsel %vm2810_vm4, %v2812_v39, %v2808_v38  ;;  %v5408_v47 = vor.u32 %v5821_v31, %v5405_v32  ;;  %v5425_v38 = vld [vmem:[%s7757_s4 + $0x14] sm:$0xf]  ;;  %v5826_v39 = vld [vmem:[%s7757_s4 + $0x18] sm:$0xf0] }
0x22ef   :  { %v5426_v40 = vor.u32 %v5826_v39, %v5425_v38 }
0x232f   :  { %v2822_v41 = vpop.permute.xlu2 %2821 }
0x2330   :  { %v2824_v45 = vmul.f32 %v2822_v41, %v2813_v43 }
0x2332   :  { %v2825_v55 = vadd.f32 %v2824_v45, %v2744_v18 }
0x2334   :  { %v2828_v56 = vadd.f32 %v2827_v54, %v2825_v55 }
0x2336   :  { %v2829_v57 = vmul.f32 0.25, %v2828_v56 }
0x2338   :  { %2830 = vst.msk [vmem:[%s7758_s5 + $0x40] sm:$0xff] %vm26_vm0, %v2829_v57  ;;  %2886 = vrot.lane.b32.xlu0 %v2829_v57, %s6210_s1  ;;  %v2831_v58 = vpack.c.bf16 %v2829_v57, %v2829_v57 }
0x233a   :  { %5389 = vmatmul.msk.bf16.vlgmr.msra.gmra.mxu0 %vm26_vm0, %v2831_v58 }
0x2340   :  { %2985 = vrot.lane.b32.xlu0 %v5412_v25, %s6212_s17 }
0x2348   :  { %2981 = vrot.lane.b32.xlu0 %v5404_v33, %s6212_s17 }
0x2350   :  { %3071 = vrot.lane.b32.xlu0 %v5426_v40, %s6212_s17 }
0x23aa   :  { %v2887_v4 = vpop.permute.xlu0 %2886 }
0x23b2   :  { %v2986_v41 = vpop.permute.xlu0 %2985 }
0x23b7   :  { %v2860_v0 = vpop.f32.mrf.mxu0 }
0x23b8   :  { %v2864_v1 = vadd.f32 %v2860_v0, %v6837_v42 }
0x23ba   :  { %6070 = vtanh.f32 %v2864_v1  ;;  %v5390_v7 = vmul.f32 -1.442695, %v2864_v1  ;;  %v2982_v54 = vpop.permute.xlu0 %2981 }
0x23bc   :  { %6072 = vpow2.f32 %v5390_v7 }
0x23bf   :  { %v2862_v2 = vpop.f32.mrf.mxu0 }
0x23c0   :  { %v6071_v3 = vpop.eup %6070 }
0x23c1   :  { %v2889_v5 = vsub.f32 %v6071_v3, %v2887_v4 }
0x23c2   :  { %v6073_v8 = vpop.eup %6072 }
0x23c3   :  { %2891 = vrot.lane.b32.xlu1 %v2889_v5, %s6211_s8  ;;  %v2868_v9 = vadd.f32 1.0, %v6073_v8 }
0x23c5   :  { %6074 = vrcp.f32 %v2868_v9  ;;  %v2880_v6 = vand.u32 2147483648, %v2868_v9  ;;  %vm2874_vm7 = vweird.f32 %v2868_v9  ;;  %v2878_v42 = vand.u32 2147483647, %v2868_v9 }
0x23c7   :  { %v2881_v16 = vor.u32 1.1754944e-38, %v2880_v6  ;;  %vm2879_vm9 = vcmp.eq.f32.partialorder %v2878_v42, 8.507059e+37 }
0x23cb   :  { %v6075_v10 = vpop.eup %6074  ;;  %2987 = vrot.lane.b32.xlu1 %v5416_v28, %s6212_s17 }
0x23cc   :  { %v2870_v11 = vmul.f32 %v6075_v10, %v2868_v9  ;;  %vm2875_vm6 = vweird.f32 %v6075_v10  ;;  %v3072_v9 = vpop.permute.xlu0 %3071 }
0x23cd   :  { %vm2876_vm8 = vmor %vm2874_vm7, %vm2875_vm6  ;;  %3084 = vmatpush.bf16.msrb.mxu3 %v3072_v9 }
0x23ce   :  { %v2871_v12 = vsub.f32 1.0, %v2870_v11  ;;  %v5825_v11 = vld [vmem:[%s7757_s4 + $0x8] sm:$0xf0] }
0x23d0   :  { %v2872_v13 = vmul.f32 %v6075_v10, %v2871_v12 }
0x23d2   :  { %v2873_v14 = vadd.f32 %v6075_v10, %v2872_v13 }
0x23d3   :  { %2983 = vrot.lane.b32.xlu1 %v5408_v47, %s6212_s17 }
0x23d4   :  { %v2877_v15 = vsel %vm2876_vm8, %v6075_v10, %v2873_v14  ;;  %v5421_v10 = vld [vmem:[%s7757_s4 + $0x4] sm:$0xf] }
0x23d5   :  { %v2882_v18 = vsel %vm2879_vm9, %v2881_v16, %v2877_v15  ;;  %v5422_v12 = vor.u32 %v5825_v11, %v5421_v10 }
0x2435   :  { %v2892_v17 = vpop.permute.xlu1 %2891 }
0x2436   :  { %v2894_v19 = vmul.f32 %v2892_v17, %v2882_v18 }
0x2438   :  { %v2895_v20 = vadd.f32 %v2894_v19, %v2829_v57 }
0x243a   :  { %v2900_v21 = vpack.c.bf16 %v2895_v20, %v2895_v20  ;;  %2950 = vrot.lane.b32.xlu2 %v2895_v20, %s6210_s1 }
0x243c   :  { %5399 = vmatmul.msk.bf16.vlgmr.msrb.gmra.mxu1 %vm26_vm0, %v2900_v21 }
0x243d   :  { %v2988_v43 = vpop.permute.xlu1 %2987 }
0x243e   :  { %v2990_v44 = vsel %vm333_vm5, %v2986_v41, %v2988_v43 }
0x243f   :  { %3002 = vmatpush.bf16.msrb.mxu2 %v2990_v44 }
0x2445   :  { %v2984_v55 = vpop.permute.xlu1 %2983 }
0x2446   :  { %v2989_v56 = vsel %vm333_vm5, %v2982_v54, %v2984_v55  ;;  %v5827_v54 = vld [vmem:[%s7754_s3] sm:$0xff] }
0x2447   :  { %3003 = vmatpush.bf16.msrb.mxu2 %v2989_v56 }
0x2494   :  { %v2951_v35 = vpop.permute.xlu2 %2950 }
0x24b9   :  { %v2925_v27 = vpop.f32.mrf.mxu1 }
0x24ba   :  { %6076 = vtanh.f32 %v2925_v27  ;;  %v5400_v45 = vmul.f32 -1.442695, %v2925_v27 }
0x24bc   :  { %6078 = vpow2.f32 %v5400_v45 }
0x24c0   :  { %v6077_v34 = vpop.eup %6076 }
0x24c1   :  { %v2927_v36 = vpop.f32.mrf.mxu1  ;;  %v2953_v37 = vsub.f32 %v6077_v34, %v2951_v35 }
0x24c2   :  { %v6079_v57 = vpop.eup %6078 }
0x24c3   :  { %2955 = vrot.lane.b32.xlu2 %v2953_v37, %s6211_s8  ;;  %v2932_v58 = vadd.f32 1.0, %v6079_v57  ;;  %v5828_v37 = vld [vmem:[%s7754_s3 + $0x8] sm:$0xff] }
0x24c4   :  { %3152 = vmatpush.bf16.msrb.mxu0 %v5828_v37  ;;  %v5461_v37 = vld [vmem:[%s7757_s4 + $0x18] sm:$0xf0] }
0x24c5   :  { %6080 = vrcp.f32 %v2932_v58  ;;  %v2944_v63 = vand.u32 2147483648, %v2932_v58  ;;  %vm2938_vm11 = vweird.f32 %v2932_v58  ;;  %v2942_v0 = vand.u32 2147483647, %v2932_v58 }
0x24c7   :  { %v2945_v2 = vor.u32 1.1754944e-38, %v2944_v63  ;;  %vm2943_vm13 = vcmp.eq.f32.partialorder %v2942_v0, 8.507059e+37 }
0x24c8   :  { %3153 = vmatpush.bf16.msrb.mxu0 %v5827_v54  ;;  %v5451_v54 = vld [vmem:[%s7757_s4] sm:$0xf] }
0x24cb   :  { %v6081_v59 = vpop.eup %6080 }
0x24cc   :  { %v2934_v46 = vmul.f32 %v6081_v59, %v2932_v58  ;;  %vm2939_vm10 = vweird.f32 %v6081_v59 }
0x24cd   :  { %vm2940_vm12 = vmor %vm2938_vm11, %vm2939_vm10 }
0x24ce   :  { %v2935_v61 = vsub.f32 1.0, %v2934_v46 }
0x24d0   :  { %v2936_v48 = vmul.f32 %v6081_v59, %v2935_v61 }
0x24d2   :  { %v2937_v62 = vadd.f32 %v6081_v59, %v2936_v48 }
0x24d4   :  { %v2941_v1 = vsel %vm2940_vm12, %v6081_v59, %v2937_v62 }
0x24d5   :  { %v2946_v4 = vsel %vm2943_vm13, %v2945_v2, %v2941_v1 }
0x251d   :  { %v2956_v3 = vpop.permute.xlu2 %2955 }
0x251e   :  { %v2958_v5 = vmul.f32 %v2956_v3, %v2946_v4 }
0x2520   :  { %v7177_v7 = vadd.f32 %v2958_v5, %v2895_v20 }
0x2522   :  { %3040 = vrot.lane.b32.xlu0 %v7177_v7, %s6211_s8  ;;  %3030 = vrot.lane.b32.xlu2 %v7177_v7, %s6210_s1  ;;  %v2964_v8 = vpack.c.bf16 %v7177_v7, %v7177_v7 }
0x2524   :  { %5417 = vmatmul.msk.bf16.vlgmr.msrb.gmra.mxu2 %vm26_vm0, %v2964_v8 }
0x252a   :  { %3069 = vrot.lane.b32.xlu2 %v5422_v12, %s6212_s17  ;;  %v5445_v12 = vld [vmem:[%s7757_s4 + $0x10] sm:$0xf] }
0x257c   :  { %v3031_v42 = vpop.permute.xlu2 %3030 }
0x2584   :  { %v3070_v32 = vpop.permute.xlu2 %3069 }
0x2585   :  { %3085 = vmatpush.bf16.msrb.mxu3 %v3070_v32 }
0x2594   :  { %v3041_v29 = vpop.permute.xlu0 %3040 }
0x25a7   :  { %v3005_v13 = vpop.f32.mrf.mxu2 }
0x25a8   :  { %v5418_v14 = vmul.f32 -1.442695, %v3005_v13  ;;  %v3028_v6 = vmax.f32 %v3005_v13, 0.0  ;;  %v5441_v13 = vld [vmem:[%s7757_s4] sm:$0xf] }
0x25aa   :  { %6082 = vpow2.f32 %v5418_v14  ;;  %v3033_v15 = vsub.f32 %v3028_v6, %v3031_v42  ;;  %v5829_v6 = vld [vmem:[%s7757_s4 + $0x4] sm:$0xf0] }
0x25ab   :  { %v5442_v42 = vor.u32 %v5829_v6, %v5441_v13 }
0x25ac   :  { %3035 = vrot.lane.b32.xlu1 %v3033_v15, %s6211_s8 }
0x25af   :  { %v3007_v16 = vpop.f32.mrf.mxu2 }
0x25b0   :  { %v6083_v17 = vpop.eup %6082 }
0x25b1   :  { %v3012_v18 = vadd.f32 1.0, %v6083_v17 }
0x25b3   :  { %6084 = vrcp.f32 %v3012_v18  ;;  %v3024_v22 = vand.u32 2147483648, %v3012_v18  ;;  %v3022_v24 = vand.u32 2147483647, %v3012_v18  ;;  %vm3018_vm15 = vweird.f32 %v3012_v18 }
0x25b5   :  { %v3025_v26 = vor.u32 1.1754944e-38, %v3024_v22  ;;  %vm3023_vm2 = vcmp.eq.f32.partialorder %v3022_v24, 8.507059e+37 }
0x25b9   :  { %v6085_v19 = vpop.eup %6084 }
0x25ba   :  { %v3014_v20 = vmul.f32 %v6085_v19, %v3012_v18  ;;  %vm3019_vm14 = vweird.f32 %v6085_v19 }
0x25bb   :  { %vm3020_vm1 = vmor %vm3018_vm15, %vm3019_vm14 }
0x25bc   :  { %v3015_v21 = vsub.f32 1.0, %v3014_v20 }
0x25be   :  { %v3016_v23 = vmul.f32 %v6085_v19, %v3015_v21 }
0x25c0   :  { %v3017_v25 = vadd.f32 %v6085_v19, %v3016_v23 }
0x25c2   :  { %v3021_v28 = vsel %vm3020_vm1, %v6085_v19, %v3017_v25 }
0x25c3   :  { %v3026_v30 = vsel %vm3023_vm2, %v3025_v26, %v3021_v28 }
0x25c4   :  { %v3043_v31 = vsub.f32 %v3026_v30, %v3041_v29 }
0x25c6   :  { %3045 = vrot.lane.b32.xlu1 %v3043_v31, %s6211_s8 }
0x261e   :  { %v3036_v33 = vpop.permute.xlu1 %3035 }
0x261f   :  { %v3038_v47 = vmul.f32 %v3036_v33, %v3026_v30 }
0x2621   :  { %v3039_v27 = vadd.f32 %v3038_v47, %v7177_v7 }
0x2623   :  { %v3058_v34 = vpack.c.bf16 %v3039_v27, %v3039_v27  ;;  %3111 = vrot.lane.b32.xlu2 %v3039_v27, %s6210_s1  ;;  %v3121_v3 = vadd.f32 %v3039_v27, %v7177_v7 }
0x2625   :  { %5427 = vmatmul.msk.bf16.vlgmr.msrb.gmra.mxu3 %vm26_vm0, %v3058_v34 }
0x2638   :  { %v3046_v35 = vpop.permute.xlu1 %3045 }
0x2639   :  { %v3048_v36 = vmul.f32 %v3046_v35, %v3026_v30 }
0x263b   :  { %3050 = vrot.lane.b32.xlu0 %v3048_v36, %s6212_s17  ;;  %v5833_v36 = vld [vmem:[%s7757_s4 + $0x14] sm:$0xf] }
0x267d   :  { %v3112_v38 = vpop.permute.xlu2 %3111 }
0x26a8   :  { %v3087_v39 = vpop.f32.mrf.mxu3 }
0x26a9   :  { %v3114_v40 = vsub.f32 %v3087_v39, %v3112_v38  ;;  %v5428_v43 = vmul.f32 -1.442695, %v3087_v39  ;;  %v5464_v38 = vor.u32 %v5833_v36, %v5461_v37  ;;  %v5831_v39 = vld [vmem:[%s7757_s4 + $0x4] sm:$0xf] }
0x26ab   :  { %3116 = vrot.lane.b32.xlu1 %v3114_v40, %s6211_s8  ;;  %6086 = vpow2.f32 %v5428_v43  ;;  %v5453_v40 = vld [vmem:[%s7757_s4 + $0x8] sm:$0xf0]  ;;  %v5459_v43 = vld [vmem:[%s7757_s4 + $0x10] sm:$0xf] }
0x26ad   :  { %v3051_v48 = vpop.permute.xlu0 %3050 }
0x26ae   :  { %v3053_v0 = vadd.f32 %v3051_v48, %v7177_v7  ;;  %v5830_v7 = vld [vmem:[%s7757_s4 + $0x14] sm:$0xf0]  ;;  %v5473_v48 = vld [vmem:[%s7757_s4 + $0x14] sm:$0xf] }
0x26af   :  { %v5446_v14 = vor.u32 %v5830_v7, %v5445_v12 }
0x26b0   :  { %v3089_v41 = vpop.f32.mrf.mxu3  ;;  %v3122_v5 = vadd.f32 %v3121_v3, %v3053_v0 }
0x26b1   :  { %v6087_v44 = vpop.eup %6086  ;;  %3217 = vmatpush.bf16.msra.mxu1 %v5446_v14  ;;  %v5456_v41 = vor.u32 %v5831_v39, %v5453_v40 }
0x26b2   :  { %v3094_v45 = vadd.f32 1.0, %v6087_v44  ;;  %v5834_v44 = vld [vmem:[%s7757_s4 + $0x14] sm:$0xf0] }
0x26b4   :  { %6088 = vrcp.f32 %v3094_v45  ;;  %v3106_v46 = vand.u32 2147483648, %v3094_v45  ;;  %vm3100_vm4 = vweird.f32 %v3094_v45  ;;  %v3104_v61 = vand.u32 2147483647, %v3094_v45 }
0x26b5   :  { %3218 = vmatpush.bf16.msra.mxu1 %v5442_v42 }
0x26b6   :  { %v3107_v63 = vor.u32 1.1754944e-38, %v3106_v46  ;;  %vm3105_vm7 = vcmp.eq.f32.partialorder %v3104_v61, 8.507059e+37 }
0x26ba   :  { %v6089_v55 = vpop.eup %6088 }
0x26bb   :  { %v3096_v56 = vmul.f32 %v6089_v55, %v3094_v45  ;;  %vm3101_vm3 = vweird.f32 %v6089_v55  ;;  %v5460_v45 = vor.u32 %v5834_v44, %v5459_v43 }
0x26bc   :  { %vm3102_vm6 = vmor %vm3100_vm4, %vm3101_vm3 }
0x26bd   :  { %v3097_v57 = vsub.f32 1.0, %v3096_v56 }
0x26bf   :  { %v3098_v58 = vmul.f32 %v6089_v55, %v3097_v57 }
0x26c1   :  { %v3099_v59 = vadd.f32 %v6089_v55, %v3098_v58 }
0x26c3   :  { %v3103_v62 = vsel %vm3102_vm6, %v6089_v55, %v3099_v59  ;;  %v5832_v55 = vld [vmem:[%s7757_s4 + $0x4] sm:$0xf0] }
0x26c4   :  { %v3108_v2 = vsel %vm3105_vm7, %v3107_v63, %v3103_v62  ;;  %v5452_v56 = vor.u32 %v5832_v55, %v5451_v54  ;;  %v5836_v62 = vld [vmem:[%s7757_s4 + $0x18] sm:$0xf0] }
0x26c5   :  { %v5474_v63 = vor.u32 %v5836_v62, %v5473_v48 }
0x271d   :  { %v3117_v1 = vpop.permute.xlu1 %3116 }
0x271e   :  { %v3119_v4 = vmul.f32 %v3117_v1, %v3108_v2 }
0x2720   :  { %v3120_v8 = vadd.f32 %v3119_v4, %v3039_v27 }
0x2722   :  { %v3123_v9 = vadd.f32 %v3122_v5, %v3120_v8 }
0x2724   :  { %v3124_v10 = vmul.f32 0.25, %v3123_v9 }
0x2726   :  { %3125 = vst.msk [vmem:[%s7758_s5 + $0x48] sm:$0xff] %vm26_vm0, %v3124_v10  ;;  %v3126_v11 = vpack.c.bf16 %v3124_v10, %v3124_v10  ;;  %3181 = vrot.lane.b32.xlu2 %v3124_v10, %s6210_s1 }
0x2728   :  { %5437 = vmatmul.msk.bf16.vlgmr.msrb.gmra.mxu0 %vm26_vm0, %v3126_v11 }
0x272e   :  { %3280 = vrot.lane.b32.xlu2 %v5460_v45, %s6212_s17 }
0x2736   :  { %3276 = vrot.lane.b32.xlu2 %v5452_v56, %s6212_s17 }
0x273e   :  { %3366 = vrot.lane.b32.xlu2 %v5474_v63, %s6212_s17 }
0x2780   :  { %v3182_v19 = vpop.permute.xlu2 %3181 }
0x2788   :  { %v3281_v1 = vpop.permute.xlu2 %3280 }
0x2790   :  { %v3277_v8 = vpop.permute.xlu2 %3276 }
0x27a5   :  { %v3155_v15 = vpop.f32.mrf.mxu0 }
0x27a6   :  { %v3159_v16 = vadd.f32 %v3155_v15, %v6839_v49 }
0x27a8   :  { %6090 = vtanh.f32 %v3159_v16  ;;  %v5438_v21 = vmul.f32 -1.442695, %v3159_v16 }
0x27aa   :  { %6092 = vpow2.f32 %v5438_v21 }
0x27ad   :  { %v3157_v17 = vpop.f32.mrf.mxu0 }
0x27ae   :  { %v6091_v18 = vpop.eup %6090 }
0x27af   :  { %v3184_v20 = vsub.f32 %v6091_v18, %v3182_v19 }
0x27b0   :  { %v6093_v22 = vpop.eup %6092 }
0x27b1   :  { %3186 = vrot.lane.b32.xlu0 %v3184_v20, %s6211_s8  ;;  %v3163_v23 = vadd.f32 1.0, %v6093_v22  ;;  %v3367_v22 = vpop.permute.xlu2 %3366 }
0x27b2   :  { %3379 = vmatpush.bf16.msra.mxu3 %v3367_v22 }
0x27b3   :  { %6094 = vrcp.f32 %v3163_v23  ;;  %v3175_v30 = vand.u32 2147483648, %v3163_v23  ;;  %vm3169_vm9 = vweird.f32 %v3163_v23  ;;  %v3173_v49 = vand.u32 2147483647, %v3163_v23 }
0x27b5   :  { %v3176_v32 = vor.u32 1.1754944e-38, %v3175_v30  ;;  %vm3174_vm11 = vcmp.eq.f32.partialorder %v3173_v49, 8.507059e+37 }
0x27b9   :  { %v6095_v24 = vpop.eup %6094  ;;  %3282 = vrot.lane.b32.xlu0 %v5464_v38, %s6212_s17 }
0x27ba   :  { %v3165_v25 = vmul.f32 %v6095_v24, %v3163_v23  ;;  %vm3170_vm8 = vweird.f32 %v6095_v24  ;;  %v5469_v23 = vld [vmem:[%s7757_s4 + $0x4] sm:$0xf] }
0x27bb   :  { %vm3171_vm10 = vmor %vm3169_vm9, %vm3170_vm8 }
0x27bc   :  { %v3166_v26 = vsub.f32 1.0, %v3165_v25 }
0x27be   :  { %v3167_v28 = vmul.f32 %v6095_v24, %v3166_v26 }
0x27c0   :  { %v3168_v29 = vadd.f32 %v6095_v24, %v3167_v28 }
0x27c1   :  { %3278 = vrot.lane.b32.xlu0 %v5456_v41, %s6212_s17 }
0x27c2   :  { %v3172_v31 = vsel %vm3171_vm10, %v6095_v24, %v3168_v29  ;;  %v5835_v24 = vld [vmem:[%s7757_s4 + $0x8] sm:$0xf0] }
0x27c3   :  { %v3177_v47 = vsel %vm3174_vm11, %v3176_v32, %v3172_v31  ;;  %v5470_v25 = vor.u32 %v5835_v24, %v5469_v23  ;;  %v5493_v24 = vld [vmem:[%s7757_s4 + $0x10] sm:$0xf] }
0x2823   :  { %v3187_v33 = vpop.permute.xlu0 %3186 }
0x2824   :  { %v3189_v27 = vmul.f32 %v3187_v33, %v3177_v47 }
0x2826   :  { %v3190_v34 = vadd.f32 %v3189_v27, %v3124_v10 }
0x2828   :  { %v3195_v35 = vpack.c.bf16 %v3190_v34, %v3190_v34  ;;  %3245 = vrot.lane.b32.xlu1 %v3190_v34, %s6210_s1 }
0x282a   :  { %5447 = vmatmul.msk.bf16.vlgmr.msra.gmra.mxu1 %vm26_vm0, %v3195_v35 }
0x282b   :  { %v3283_v0 = vpop.permute.xlu0 %3282 }
0x282c   :  { %v3285_v2 = vsel %vm333_vm5, %v3281_v1, %v3283_v0 }
0x282d   :  { %3297 = vmatpush.bf16.msra.mxu2 %v3285_v2 }
0x2833   :  { %v3279_v9 = vpop.permute.xlu0 %3278 }
0x2834   :  { %v3284_v10 = vsel %vm333_vm5, %v3277_v8, %v3279_v9 }
0x2835   :  { %3298 = vmatpush.bf16.msra.mxu2 %v3284_v10 }
0x289a   :  { %v3246_v59 = vpop.permute.xlu1 %3245 }
0x28a7   :  { %v3220_v57 = vpop.f32.mrf.mxu1 }
0x28a8   :  { %6096 = vtanh.f32 %v3220_v57  ;;  %v5448_v3 = vmul.f32 -1.442695, %v3220_v57 }
0x28aa   :  { %6098 = vpow2.f32 %v5448_v3  ;;  %v5837_v3 = vld [vmem:[%s7754_s3] sm:$0xff] }
0x28ae   :  { %v6097_v58 = vpop.eup %6096 }
0x28af   :  { %v3222_v46 = vpop.f32.mrf.mxu1  ;;  %v3248_v61 = vsub.f32 %v6097_v58, %v3246_v59 }
0x28b0   :  { %v6099_v4 = vpop.eup %6098  ;;  %v5838_v46 = vld [vmem:[%s7754_s3 + $0x8] sm:$0xff] }
0x28b1   :  { %3250 = vrot.lane.b32.xlu1 %v3248_v61, %s6211_s8  ;;  %v3227_v5 = vadd.f32 1.0, %v6099_v4  ;;  %3447 = vmatpush.bf16.msra.mxu0 %v5838_v46 }
0x28b3   :  { %6100 = vrcp.f32 %v3227_v5  ;;  %v3239_v6 = vand.u32 2147483648, %v3227_v5  ;;  %vm3233_vm13 = vweird.f32 %v3227_v5  ;;  %v3237_v42 = vand.u32 2147483647, %v3227_v5 }
0x28b5   :  { %v3240_v16 = vor.u32 1.1754944e-38, %v3239_v6  ;;  %vm3238_vm15 = vcmp.eq.f32.partialorder %v3237_v42, 8.507059e+37  ;;  %3448 = vmatpush.bf16.msra.mxu0 %v5837_v3  ;;  %v5501_v3 = vld [vmem:[%s7757_s4 + $0x8] sm:$0xf0] }
0x28b9   :  { %v6101_v11 = vpop.eup %6100 }
0x28ba   :  { %v3229_v12 = vmul.f32 %v6101_v11, %v3227_v5  ;;  %vm3234_vm12 = vweird.f32 %v6101_v11 }
0x28bb   :  { %vm3235_vm14 = vmor %vm3233_vm13, %vm3234_vm12 }
0x28bc   :  { %v3230_v7 = vsub.f32 1.0, %v3229_v12 }
0x28be   :  { %v3231_v13 = vmul.f32 %v6101_v11, %v3230_v7 }
0x28c0   :  { %v3232_v14 = vadd.f32 %v6101_v11, %v3231_v13 }
0x28c2   :  { %v3236_v15 = vsel %vm3235_vm14, %v6101_v11, %v3232_v14 }
0x28c3   :  { %v3241_v18 = vsel %vm3238_vm15, %v3240_v16, %v3236_v15 }
0x2923   :  { %v3251_v17 = vpop.permute.xlu1 %3250 }
0x2924   :  { %v3253_v19 = vmul.f32 %v3251_v17, %v3241_v18 }
0x2926   :  { %v7268_v20 = vadd.f32 %v3253_v19, %v3190_v34 }
0x2928   :  { %3335 = vrot.lane.b32.xlu2 %v7268_v20, %s6211_s8  ;;  %3325 = vrot.lane.b32.xlu1 %v7268_v20, %s6210_s1  ;;  %v3259_v21 = vpack.c.bf16 %v7268_v20, %v7268_v20 }
0x292a   :  { %5465 = vmatmul.msk.bf16.vlgmr.msra.gmra.mxu2 %vm26_vm0, %v3259_v21 }
0x2930   :  { %3364 = vrot.lane.b32.xlu1 %v5470_v25, %s6212_s17  ;;  %v5489_v25 = vld [vmem:[%s7757_s4] sm:$0xf] }
0x2982   :  { %v3336_v41 = vpop.permute.xlu2 %3335 }
0x299a   :  { %v3326_v30 = vpop.permute.xlu1 %3325 }
0x29a2   :  { %v3365_v45 = vpop.permute.xlu1 %3364 }
0x29a3   :  { %3380 = vmatpush.bf16.msra.mxu3 %v3365_v45 }
0x29ad   :  { %v3300_v26 = vpop.f32.mrf.mxu2 }
0x29ae   :  { %v5466_v28 = vmul.f32 -1.442695, %v3300_v26  ;;  %v3323_v29 = vmax.f32 %v3300_v26, 0.0 }
0x29b0   :  { %6102 = vpow2.f32 %v5466_v28  ;;  %v3328_v49 = vsub.f32 %v3323_v29, %v3326_v30  ;;  %v5839_v28 = vld [vmem:[%s7757_s4 + $0x4] sm:$0xf0] }
0x29b1   :  { %v5490_v29 = vor.u32 %v5839_v28, %v5489_v25 }
0x29b2   :  { %3330 = vrot.lane.b32.xlu0 %v3328_v49, %s6211_s8 }
0x29b5   :  { %v3302_v31 = vpop.f32.mrf.mxu2 }
0x29b6   :  { %v6103_v32 = vpop.eup %6102 }
0x29b7   :  { %v3307_v33 = vadd.f32 1.0, %v6103_v32 }
0x29b9   :  { %6104 = vrcp.f32 %v3307_v33  ;;  %v3319_v35 = vand.u32 2147483648, %v3307_v33  ;;  %v3317_v37 = vand.u32 2147483647, %v3307_v33  ;;  %vm3313_vm2 = vweird.f32 %v3307_v33 }
0x29bb   :  { %v3320_v39 = vor.u32 1.1754944e-38, %v3319_v35  ;;  %vm3318_vm4 = vcmp.eq.f32.partialorder %v3317_v37, 8.507059e+37 }
0x29bf   :  { %v6105_v47 = vpop.eup %6104 }
0x29c0   :  { %v3309_v27 = vmul.f32 %v6105_v47, %v3307_v33  ;;  %vm3314_vm1 = vweird.f32 %v6105_v47 }
0x29c1   :  { %vm3315_vm3 = vmor %vm3313_vm2, %vm3314_vm1 }
0x29c2   :  { %v3310_v34 = vsub.f32 1.0, %v3309_v27 }
0x29c4   :  { %v3311_v36 = vmul.f32 %v6105_v47, %v3310_v34 }
0x29c6   :  { %v3312_v38 = vadd.f32 %v6105_v47, %v3311_v36 }
0x29c8   :  { %v3316_v40 = vsel %vm3315_vm3, %v6105_v47, %v3312_v38 }
0x29c9   :  { %v3321_v43 = vsel %vm3318_vm4, %v3320_v39, %v3316_v40 }
0x29ca   :  { %v3338_v44 = vsub.f32 %v3321_v43, %v3336_v41 }
0x29cc   :  { %3340 = vrot.lane.b32.xlu0 %v3338_v44, %s6211_s8 }
0x2a24   :  { %v3331_v54 = vpop.permute.xlu0 %3330 }
0x2a25   :  { %v3333_v55 = vmul.f32 %v3331_v54, %v3321_v43 }
0x2a27   :  { %v3334_v56 = vadd.f32 %v3333_v55, %v7268_v20 }
0x2a29   :  { %v3353_v57 = vpack.c.bf16 %v3334_v56, %v3334_v56  ;;  %3406 = vrot.lane.b32.xlu1 %v3334_v56, %s6210_s1  ;;  %v3416_v16 = vadd.f32 %v3334_v56, %v7268_v20 }
0x2a2b   :  { %5475 = vmatmul.msk.bf16.vlgmr.msra.gmra.mxu3 %vm26_vm0, %v3353_v57 }
0x2a3e   :  { %v3341_v58 = vpop.permute.xlu0 %3340 }
0x2a3f   :  { %v3343_v59 = vmul.f32 %v3341_v58, %v3321_v43  ;;  %v5507_v58 = vld [vmem:[%s7757_s4 + $0x10] sm:$0xf] }
0x2a41   :  { %3345 = vrot.lane.b32.xlu2 %v3343_v59, %s6212_s17  ;;  %v5844_v59 = vld [vmem:[%s7757_s4 + $0x14] sm:$0xf0] }
0x2a42   :  { %v5508_v46 = vor.u32 %v5844_v59, %v5507_v58 }
0x2a9b   :  { %v3407_v61 = vpop.permute.xlu1 %3406  ;;  %v3346_v7 = vpop.permute.xlu2 %3345 }
0x2a9c   :  { %v3348_v6 = vadd.f32 %v3346_v7, %v7268_v20  ;;  %v5840_v20 = vld [vmem:[%s7757_s4 + $0x14] sm:$0xf0]  ;;  %v5846_v7 = vld [vmem:[%s7757_s4 + $0x18] sm:$0xf0] }
0x2a9d   :  { %v5494_v26 = vor.u32 %v5840_v20, %v5493_v24 }
0x2a9e   :  { %v3417_v18 = vadd.f32 %v3416_v16, %v3348_v6 }
0x2a9f   :  { %3512 = vmatpush.bf16.msrb.mxu1 %v5494_v26 }
0x2aa3   :  { %3513 = vmatpush.bf16.msrb.mxu1 %v5490_v29 }
0x2aae   :  { %v3382_v48 = vpop.f32.mrf.mxu3 }
0x2aaf   :  { %v3409_v62 = vsub.f32 %v3382_v48, %v3407_v61  ;;  %v5476_v0 = vmul.f32 -1.442695, %v3382_v48  ;;  %v5499_v61 = vld [vmem:[%s7757_s4] sm:$0xf]  ;;  %v5842_v48 = vld [vmem:[%s7757_s4 + $0x4] sm:$0xf0] }
0x2ab1   :  { %3411 = vrot.lane.b32.xlu0 %v3409_v62, %s6211_s8  ;;  %6106 = vpow2.f32 %v5476_v0  ;;  %v5500_v62 = vor.u32 %v5842_v48, %v5499_v61  ;;  %v5509_v0 = vld [vmem:[%s7757_s4 + $0x18] sm:$0xf0] }
0x2ab6   :  { %v3384_v63 = vpop.f32.mrf.mxu3 }
0x2ab7   :  { %v6107_v1 = vpop.eup %6106  ;;  %v5843_v63 = vld [vmem:[%s7757_s4 + $0x14] sm:$0xf] }
0x2ab8   :  { %v3389_v2 = vadd.f32 1.0, %v6107_v1  ;;  %v5512_v1 = vor.u32 %v5843_v63, %v5509_v0 }
0x2aba   :  { %6108 = vrcp.f32 %v3389_v2  ;;  %v3401_v11 = vand.u32 2147483648, %v3389_v2  ;;  %vm3395_vm7 = vweird.f32 %v3389_v2  ;;  %v3399_v12 = vand.u32 2147483647, %v3389_v2 }
0x2abc   :  { %v3402_v14 = vor.u32 1.1754944e-38, %v3401_v11  ;;  %vm3400_vm9 = vcmp.eq.f32.partialorder %v3399_v12, 8.507059e+37  ;;  %v5521_v12 = vld [vmem:[%s7757_s4 + $0x14] sm:$0xf] }
0x2ac0   :  { %v6109_v4 = vpop.eup %6108 }
0x2ac1   :  { %v3391_v5 = vmul.f32 %v6109_v4, %v3389_v2  ;;  %vm3396_vm6 = vweird.f32 %v6109_v4  ;;  %v5841_v2 = vld [vmem:[%s7757_s4 + $0x4] sm:$0xf] }
0x2ac2   :  { %vm3397_vm8 = vmor %vm3395_vm7, %vm3396_vm6 }
0x2ac3   :  { %v3392_v8 = vsub.f32 1.0, %v3391_v5 }
0x2ac5   :  { %v3393_v9 = vmul.f32 %v6109_v4, %v3392_v8 }
0x2ac7   :  { %v3394_v10 = vadd.f32 %v6109_v4, %v3393_v9 }
0x2ac9   :  { %v3398_v13 = vsel %vm3397_vm8, %v6109_v4, %v3394_v10  ;;  %v5504_v4 = vor.u32 %v5841_v2, %v5501_v3 }
0x2aca   :  { %v3403_v15 = vsel %vm3400_vm9, %v3402_v14, %v3398_v13  ;;  %v5522_v13 = vor.u32 %v5846_v7, %v5521_v12 }
0x2b23   :  { %v3412_v42 = vpop.permute.xlu0 %3411 }
0x2b24   :  { %v3414_v17 = vmul.f32 %v3412_v42, %v3403_v15 }
0x2b26   :  { %v3415_v19 = vadd.f32 %v3414_v17, %v3334_v56 }
0x2b28   :  { %v3418_v21 = vadd.f32 %v3417_v18, %v3415_v19 }
0x2b2a   :  { %v3419_v22 = vmul.f32 0.25, %v3418_v21 }
0x2b2c   :  { %3420 = vst.msk [vmem:[%s7758_s5 + $0x50] sm:$0xff] %vm26_vm0, %v3419_v22  ;;  %v3421_v23 = vpack.c.bf16 %v3419_v22, %v3419_v22  ;;  %3476 = vrot.lane.b32.xlu1 %v3419_v22, %s6210_s1 }
0x2b2e   :  { %5485 = vmatmul.msk.bf16.vlgmr.msra.gmra.mxu0 %vm26_vm0, %v3421_v23 }
0x2b34   :  { %3575 = vrot.lane.b32.xlu1 %v5508_v46, %s6212_s17 }
0x2b3c   :  { %3571 = vrot.lane.b32.xlu1 %v5500_v62, %s6212_s17 }
0x2b44   :  { %3661 = vrot.lane.b32.xlu1 %v5522_v13, %s6212_s17 }
0x2b9e   :  { %v3477_v33 = vpop.permute.xlu1 %3476 }
0x2ba6   :  { %v3576_v14 = vpop.permute.xlu1 %3575 }
0x2bab   :  { %v3450_v30 = vpop.f32.mrf.mxu0 }
0x2bac   :  { %v3454_v49 = vadd.f32 %v3450_v30, %v6841_v50 }
0x2bae   :  { %6110 = vtanh.f32 %v3454_v49  ;;  %v5486_v27 = vmul.f32 -1.442695, %v3454_v49  ;;  %v3572_v19 = vpop.permute.xlu1 %3571 }
0x2bb0   :  { %6112 = vpow2.f32 %v5486_v27  ;;  %v5517_v27 = vld [vmem:[%s7757_s4 + $0x4] sm:$0xf] }
0x2bb3   :  { %v3452_v31 = vpop.f32.mrf.mxu0 }
0x2bb4   :  { %v6111_v32 = vpop.eup %6110 }
0x2bb5   :  { %v3479_v47 = vsub.f32 %v6111_v32, %v3477_v33 }
0x2bb6   :  { %v6113_v34 = vpop.eup %6112 }
0x2bb7   :  { %3481 = vrot.lane.b32.xlu2 %v3479_v47, %s6211_s8  ;;  %v3458_v35 = vadd.f32 1.0, %v6113_v34  ;;  %v5845_v34 = vld [vmem:[%s7757_s4 + $0x8] sm:$0xf0] }
0x2bb9   :  { %6114 = vrcp.f32 %v3458_v35  ;;  %v3470_v41 = vand.u32 2147483648, %v3458_v35  ;;  %vm3464_vm11 = vweird.f32 %v3458_v35  ;;  %v3468_v50 = vand.u32 2147483647, %v3458_v35 }
0x2bbb   :  { %v3471_v44 = vor.u32 1.1754944e-38, %v3470_v41  ;;  %vm3469_vm13 = vcmp.eq.f32.partialorder %v3468_v50, 8.507059e+37 }
0x2bbf   :  { %v6115_v36 = vpop.eup %6114  ;;  %3577 = vrot.lane.b32.xlu2 %v5512_v1, %s6212_s17 }
0x2bc0   :  { %v3460_v37 = vmul.f32 %v6115_v36, %v3458_v35  ;;  %vm3465_vm10 = vweird.f32 %v6115_v36  ;;  %v5518_v35 = vor.u32 %v5845_v34, %v5517_v27  ;;  %v5541_v34 = vld [vmem:[%s7757_s4 + $0x10] sm:$0xf] }
0x2bc1   :  { %vm3466_vm12 = vmor %vm3464_vm11, %vm3465_vm10 }
0x2bc2   :  { %v3461_v38 = vsub.f32 1.0, %v3460_v37 }
0x2bc4   :  { %v3462_v39 = vmul.f32 %v6115_v36, %v3461_v38 }
0x2bc6   :  { %v3463_v40 = vadd.f32 %v6115_v36, %v3462_v39 }
0x2bc7   :  { %3573 = vrot.lane.b32.xlu2 %v5504_v4, %s6212_s17 }
0x2bc8   :  { %v3467_v43 = vsel %vm3466_vm12, %v6115_v36, %v3463_v40  ;;  %v3662_v36 = vpop.permute.xlu1 %3661 }
0x2bc9   :  { %v3472_v54 = vsel %vm3469_vm13, %v3471_v44, %v3467_v43  ;;  %3674 = vmatpush.bf16.msrb.mxu3 %v3662_v36 }
0x2c11   :  { %v3482_v45 = vpop.permute.xlu2 %3481 }
0x2c12   :  { %v3484_v55 = vmul.f32 %v3482_v45, %v3472_v54 }
0x2c14   :  { %v3485_v56 = vadd.f32 %v3484_v55, %v3419_v22 }
0x2c16   :  { %v3490_v57 = vpack.c.bf16 %v3485_v56, %v3485_v56  ;;  %3540 = vrot.lane.b32.xlu0 %v3485_v56, %s6210_s1 }
0x2c18   :  { %5495 = vmatmul.msk.bf16.vlgmr.msrb.gmra.mxu1 %vm26_vm0, %v3490_v57 }
0x2c19   :  { %v3578_v6 = vpop.permute.xlu2 %3577 }
0x2c1a   :  { %v3580_v42 = vsel %vm333_vm5, %v3576_v14, %v3578_v6 }
0x2c1b   :  { %3592 = vmatpush.bf16.msrb.mxu2 %v3580_v42  ;;  %v5847_v42 = vld [vmem:[%s7754_s3] sm:$0xff] }
0x2c21   :  { %v3574_v18 = vpop.permute.xlu2 %3573 }
0x2c22   :  { %v3579_v21 = vsel %vm333_vm5, %v3572_v19, %v3574_v18 }
0x2c23   :  { %3593 = vmatpush.bf16.msrb.mxu2 %v3579_v21 }
0x2c88   :  { %v3541_v9 = vpop.permute.xlu0 %3540 }
0x2c95   :  { %v3515_v5 = vpop.f32.mrf.mxu1 }
0x2c96   :  { %6116 = vtanh.f32 %v3515_v5  ;;  %v5496_v15 = vmul.f32 -1.442695, %v3515_v5 }
0x2c98   :  { %6118 = vpow2.f32 %v5496_v15 }
0x2c9c   :  { %v6117_v8 = vpop.eup %6116 }
0x2c9d   :  { %v3517_v10 = vpop.f32.mrf.mxu1  ;;  %v3543_v11 = vsub.f32 %v6117_v8, %v3541_v9  ;;  %v5848_v9 = vld [vmem:[%s7754_s3 + $0x8] sm:$0xff] }
0x2c9e   :  { %v6119_v16 = vpop.eup %6118  ;;  %3742 = vmatpush.bf16.msrb.mxu0 %v5848_v9 }
0x2c9f   :  { %3545 = vrot.lane.b32.xlu0 %v3543_v11, %s6211_s8  ;;  %v3522_v17 = vadd.f32 1.0, %v6119_v16 }
0x2ca1   :  { %6120 = vrcp.f32 %v3522_v17  ;;  %v3534_v26 = vand.u32 2147483648, %v3522_v17  ;;  %vm3528_vm15 = vweird.f32 %v3522_v17  ;;  %v3532_v28 = vand.u32 2147483647, %v3522_v17 }
0x2ca2   :  { %3743 = vmatpush.bf16.msrb.mxu0 %v5847_v42 }
0x2ca3   :  { %v3535_v30 = vor.u32 1.1754944e-38, %v3534_v26  ;;  %vm3533_vm2 = vcmp.eq.f32.partialorder %v3532_v28, 8.507059e+37 }
0x2ca7   :  { %v6121_v22 = vpop.eup %6120 }
0x2ca8   :  { %v3524_v23 = vmul.f32 %v6121_v22, %v3522_v17  ;;  %vm3529_vm14 = vweird.f32 %v6121_v22 }
0x2ca9   :  { %vm3530_vm1 = vmor %vm3528_vm15, %vm3529_vm14 }
0x2caa   :  { %v3525_v24 = vsub.f32 1.0, %v3524_v23 }
0x2cac   :  { %v3526_v20 = vmul.f32 %v6121_v22, %v3525_v24 }
0x2cae   :  { %v3527_v25 = vadd.f32 %v6121_v22, %v3526_v20 }
0x2cb0   :  { %v3531_v29 = vsel %vm3530_vm1, %v6121_v22, %v3527_v25 }
0x2cb1   :  { %v3536_v31 = vsel %vm3533_vm2, %v3535_v30, %v3531_v29 }
0x2d11   :  { %v3546_v49 = vpop.permute.xlu0 %3545 }
0x2d12   :  { %v3548_v32 = vmul.f32 %v3546_v49, %v3536_v31 }
0x2d14   :  { %v7359_v33 = vadd.f32 %v3548_v32, %v3485_v56 }
0x2d16   :  { %3630 = vrot.lane.b32.xlu1 %v7359_v33, %s6211_s8  ;;  %3620 = vrot.lane.b32.xlu0 %v7359_v33, %s6210_s1  ;;  %v3554_v47 = vpack.c.bf16 %v7359_v33, %v7359_v33 }
0x2d18   :  { %5513 = vmatmul.msk.bf16.vlgmr.msrb.gmra.mxu2 %vm26_vm0, %v3554_v47 }
0x2d1e   :  { %3659 = vrot.lane.b32.xlu0 %v5518_v35, %s6212_s17  ;;  %v5537_v35 = vld [vmem:[%s7757_s4] sm:$0xf] }
0x2d88   :  { %v3621_v37 = vpop.permute.xlu0 %3620  ;;  %v3631_v62 = vpop.permute.xlu1 %3630 }
0x2d90   :  { %v3660_v38 = vpop.permute.xlu0 %3659 }
0x2d91   :  { %3675 = vmatpush.bf16.msrb.mxu3 %v3660_v38 }
0x2d9b   :  { %v3595_v39 = vpop.f32.mrf.mxu2 }
0x2d9c   :  { %v5514_v40 = vmul.f32 -1.442695, %v3595_v39  ;;  %v3618_v41 = vmax.f32 %v3595_v39, 0.0 }
0x2d9e   :  { %6122 = vpow2.f32 %v5514_v40  ;;  %v3623_v50 = vsub.f32 %v3618_v41, %v3621_v37  ;;  %v5849_v37 = vld [vmem:[%s7757_s4 + $0x4] sm:$0xf0] }
0x2d9f   :  { %v5538_v38 = vor.u32 %v5849_v37, %v5537_v35 }
0x2da0   :  { %3625 = vrot.lane.b32.xlu2 %v3623_v50, %s6211_s8 }
0x2da3   :  { %v3597_v43 = vpop.f32.mrf.mxu2 }
0x2da4   :  { %v6123_v44 = vpop.eup %6122 }
0x2da5   :  { %v3602_v45 = vadd.f32 1.0, %v6123_v44 }
0x2da7   :  { %6124 = vrcp.f32 %v3602_v45  ;;  %v3614_v57 = vand.u32 2147483648, %v3602_v45  ;;  %v3612_v59 = vand.u32 2147483647, %v3602_v45  ;;  %vm3608_vm4 = vweird.f32 %v3602_v45 }
0x2da9   :  { %v3615_v61 = vor.u32 1.1754944e-38, %v3614_v57  ;;  %vm3613_vm7 = vcmp.eq.f32.partialorder %v3612_v59, 8.507059e+37 }
0x2dad   :  { %v6125_v54 = vpop.eup %6124 }
0x2dae   :  { %v3604_v55 = vmul.f32 %v6125_v54, %v3602_v45  ;;  %vm3609_vm3 = vweird.f32 %v6125_v54 }
0x2daf   :  { %vm3610_vm6 = vmor %vm3608_vm4, %vm3609_vm3 }
0x2db0   :  { %v3605_v56 = vsub.f32 1.0, %v3604_v55 }
0x2db2   :  { %v3606_v58 = vmul.f32 %v6125_v54, %v3605_v56 }
0x2db4   :  { %v3607_v46 = vadd.f32 %v6125_v54, %v3606_v58 }
0x2db6   :  { %v3611_v48 = vsel %vm3610_vm6, %v6125_v54, %v3607_v46 }
0x2db7   :  { %v3616_v63 = vsel %vm3613_vm7, %v3615_v61, %v3611_v48 }
0x2db8   :  { %v3633_v0 = vsub.f32 %v3616_v63, %v3631_v62 }
0x2dba   :  { %3635 = vrot.lane.b32.xlu2 %v3633_v0, %s6211_s8 }
0x2dfa   :  { %v3626_v1 = vpop.permute.xlu2 %3625 }
0x2dfb   :  { %v3628_v2 = vmul.f32 %v3626_v1, %v3616_v63 }
0x2dfd   :  { %v3629_v3 = vadd.f32 %v3628_v2, %v7359_v33 }
0x2dff   :  { %v3648_v4 = vpack.c.bf16 %v3629_v3, %v3629_v3  ;;  %3701 = vrot.lane.b32.xlu0 %v3629_v3, %s6210_s1  ;;  %v3711_v29 = vadd.f32 %v3629_v3, %v7359_v33 }
0x2e01   :  { %5523 = vmatmul.msk.bf16.vlgmr.msrb.gmra.mxu3 %vm26_vm0, %v3648_v4  ;;  %v5555_v4 = vld [vmem:[%s7757_s4 + $0x10] sm:$0xf] }
0x2e14   :  { %v3636_v5 = vpop.permute.xlu2 %3635 }
0x2e15   :  { %v3638_v8 = vmul.f32 %v3636_v5, %v3616_v63  ;;  %v5854_v5 = vld [vmem:[%s7757_s4 + $0x14] sm:$0xf0] }
0x2e16   :  { %v5556_v9 = vor.u32 %v5854_v5, %v5555_v4 }
0x2e17   :  { %3640 = vrot.lane.b32.xlu1 %v3638_v8, %s6212_s17  ;;  %v5853_v8 = vld [vmem:[%s7757_s4 + $0x14] sm:$0xf] }
0x2e71   :  { %v3702_v10 = vpop.permute.xlu0 %3701 }
0x2e84   :  { %v3677_v11 = vpop.f32.mrf.mxu3 }
0x2e85   :  { %v3704_v12 = vsub.f32 %v3677_v11, %v3702_v10  ;;  %v5524_v13 = vmul.f32 -1.442695, %v3677_v11  ;;  %v5557_v10 = vld [vmem:[%s7757_s4 + $0x18] sm:$0xf0] }
0x2e86   :  { %v5560_v11 = vor.u32 %v5853_v8, %v5557_v10 }
0x2e87   :  { %3706 = vrot.lane.b32.xlu2 %v3704_v12, %s6211_s8  ;;  %6126 = vpow2.f32 %v5524_v13  ;;  %v5547_v12 = vld [vmem:[%s7757_s4] sm:$0xf]  ;;  %v5851_v13 = vld [vmem:[%s7757_s4 + $0x4] sm:$0xf] }
0x2e89   :  { %v3641_v23 = vpop.permute.xlu1 %3640 }
0x2e8a   :  { %v3643_v25 = vadd.f32 %v3641_v23, %v7359_v33  ;;  %v5850_v33 = vld [vmem:[%s7757_s4 + $0x14] sm:$0xf0] }
0x2e8b   :  { %v5542_v36 = vor.u32 %v5850_v33, %v5541_v34 }
0x2e8c   :  { %v3679_v7 = vpop.f32.mrf.mxu3  ;;  %v3712_v49 = vadd.f32 %v3711_v29, %v3643_v25 }
0x2e8d   :  { %v6127_v14 = vpop.eup %6126  ;;  %3807 = vmatpush.bf16.msra.mxu1 %v5542_v36  ;;  %v5852_v7 = vld [vmem:[%s7757_s4 + $0x4] sm:$0xf0] }
0x2e8e   :  { %v3684_v6 = vadd.f32 1.0, %v6127_v14  ;;  %v5549_v14 = vld [vmem:[%s7757_s4 + $0x8] sm:$0xf0] }
0x2e8f   :  { %v5552_v42 = vor.u32 %v5851_v13, %v5549_v14 }
0x2e90   :  { %6128 = vrcp.f32 %v3684_v6  ;;  %v3696_v21 = vand.u32 2147483648, %v3684_v6  ;;  %vm3690_vm9 = vweird.f32 %v3684_v6  ;;  %v3694_v22 = vand.u32 2147483647, %v3684_v6 }
0x2e91   :  { %3808 = vmatpush.bf16.msra.mxu1 %v5538_v38 }
0x2e92   :  { %v3697_v20 = vor.u32 1.1754944e-38, %v3696_v21  ;;  %vm3695_vm11 = vcmp.eq.f32.partialorder %v3694_v22, 8.507059e+37  ;;  %v5569_v21 = vld [vmem:[%s7757_s4 + $0x14] sm:$0xf]  ;;  %v5856_v22 = vld [vmem:[%s7757_s4 + $0x18] sm:$0xf0] }
0x2e93   :  { %v5570_v23 = vor.u32 %v5856_v22, %v5569_v21 }
0x2e96   :  { %v6129_v15 = vpop.eup %6128 }
0x2e97   :  { %v3686_v16 = vmul.f32 %v6129_v15, %v3684_v6  ;;  %vm3691_vm8 = vweird.f32 %v6129_v15  ;;  %v5548_v6 = vor.u32 %v5852_v7, %v5547_v12 }
0x2e98   :  { %vm3692_vm10 = vmor %vm3690_vm9, %vm3691_vm8 }
0x2e99   :  { %v3687_v17 = vsub.f32 1.0, %v3686_v16 }
0x2e9b   :  { %v3688_v18 = vmul.f32 %v6129_v15, %v3687_v17 }
0x2e9d   :  { %v3689_v19 = vadd.f32 %v6129_v15, %v3688_v18 }
0x2e9f   :  { %v3693_v24 = vsel %vm3692_vm10, %v6129_v15, %v3689_v19 }
0x2ea0   :  { %v3698_v28 = vsel %vm3695_vm11, %v3697_v20, %v3693_v24 }
0x2ee1   :  { %v3707_v26 = vpop.permute.xlu2 %3706 }
0x2ee2   :  { %v3709_v30 = vmul.f32 %v3707_v26, %v3698_v28 }
0x2ee4   :  { %v3710_v31 = vadd.f32 %v3709_v30, %v3629_v3 }
0x2ee6   :  { %v3713_v32 = vadd.f32 %v3712_v49, %v3710_v31 }
0x2ee8   :  { %v3714_v47 = vmul.f32 0.25, %v3713_v32 }
0x2eea   :  { %3715 = vst.msk [vmem:[%s7758_s5 + $0x58] sm:$0xff] %vm26_vm0, %v3714_v47  ;;  %v3716_v27 = vpack.c.bf16 %v3714_v47, %v3714_v47  ;;  %3771 = vrot.lane.b32.xlu0 %v3714_v47, %s6210_s1 }
0x2eec   :  { %5533 = vmatmul.msk.bf16.vlgmr.msrb.gmra.mxu0 %vm26_vm0, %v3716_v27 }
0x2ef2   :  { %3870 = vrot.lane.b32.xlu0 %v5556_v9, %s6212_s17 }
0x2efa   :  { %3866 = vrot.lane.b32.xlu0 %v5548_v6, %s6212_s17 }
0x2f02   :  { %3956 = vrot.lane.b32.xlu0 %v5570_v23, %s6212_s17 }
0x2f5c   :  { %v3772_v43 = vpop.permute.xlu0 %3771 }
0x2f64   :  { %v3871_v24 = vpop.permute.xlu0 %3870 }
0x2f69   :  { %v3745_v39 = vpop.f32.mrf.mxu0 }
0x2f6a   :  { %v3749_v40 = vadd.f32 %v3745_v39, %v6843_v51 }
0x2f6c   :  { %6130 = vtanh.f32 %v3749_v40  ;;  %v5534_v45 = vmul.f32 -1.442695, %v3749_v40  ;;  %v3867_v28 = vpop.permute.xlu0 %3866 }
0x2f6e   :  { %6132 = vpow2.f32 %v5534_v45  ;;  %v5565_v45 = vld [vmem:[%s7757_s4 + $0x4] sm:$0xf] }
0x2f71   :  { %v3747_v41 = vpop.f32.mrf.mxu0 }
0x2f72   :  { %v6131_v50 = vpop.eup %6130 }
0x2f73   :  { %v3774_v44 = vsub.f32 %v6131_v50, %v3772_v43 }
0x2f74   :  { %v6133_v54 = vpop.eup %6132 }
0x2f75   :  { %3776 = vrot.lane.b32.xlu1 %v3774_v44, %s6211_s8  ;;  %v3753_v55 = vadd.f32 1.0, %v6133_v54  ;;  %v3957_v44 = vpop.permute.xlu0 %3956  ;;  %v5855_v54 = vld [vmem:[%s7757_s4 + $0x8] sm:$0xf0] }
0x2f76   :  { %3969 = vmatpush.bf16.msra.mxu3 %v3957_v44  ;;  %v5589_v44 = vld [vmem:[%s7757_s4 + $0x10] sm:$0xf] }
0x2f77   :  { %6134 = vrcp.f32 %v3753_v55  ;;  %v3765_v61 = vand.u32 2147483648, %v3753_v55  ;;  %vm3759_vm13 = vweird.f32 %v3753_v55  ;;  %v3763_v51 = vand.u32 2147483647, %v3753_v55 }
0x2f79   :  { %v3766_v62 = vor.u32 1.1754944e-38, %v3765_v61  ;;  %vm3764_vm15 = vcmp.eq.f32.partialorder %v3763_v51, 8.507059e+37 }
0x2f7d   :  { %v6135_v56 = vpop.eup %6134  ;;  %3872 = vrot.lane.b32.xlu1 %v5560_v11, %s6212_s17 }
0x2f7e   :  { %v3755_v57 = vmul.f32 %v6135_v56, %v3753_v55  ;;  %vm3760_vm12 = vweird.f32 %v6135_v56  ;;  %v5566_v55 = vor.u32 %v5855_v54, %v5565_v45  ;;  %v5585_v45 = vld [vmem:[%s7757_s4] sm:$0xf] }
0x2f7f   :  { %vm3761_vm14 = vmor %vm3759_vm13, %vm3760_vm12 }
0x2f80   :  { %v3756_v58 = vsub.f32 1.0, %v3755_v57 }
0x2f82   :  { %v3757_v59 = vmul.f32 %v6135_v56, %v3756_v58 }
0x2f84   :  { %v3758_v46 = vadd.f32 %v6135_v56, %v3757_v59 }
0x2f85   :  { %3868 = vrot.lane.b32.xlu1 %v5552_v42, %s6212_s17 }
0x2f86   :  { %v3762_v48 = vsel %vm3761_vm14, %v6135_v56, %v3758_v46 }
0x2f87   :  { %v3767_v0 = vsel %vm3764_vm15, %v3766_v62, %v3762_v48 }
0x2fe7   :  { %v3777_v63 = vpop.permute.xlu1 %3776 }
0x2fe8   :  { %v3779_v1 = vmul.f32 %v3777_v63, %v3767_v0 }
0x2fea   :  { %v3780_v2 = vadd.f32 %v3779_v1, %v3714_v47 }
0x2fec   :  { %v3785_v3 = vpack.c.bf16 %v3780_v2, %v3780_v2  ;;  %3835 = vrot.lane.b32.xlu2 %v3780_v2, %s6210_s1 }
0x2fee   :  { %5543 = vmatmul.msk.bf16.vlgmr.msra.gmra.mxu1 %vm26_vm0, %v3785_v3 }
0x2fef   :  { %v3873_v20 = vpop.permute.xlu1 %3872 }
0x2ff0   :  { %v3875_v25 = vsel %vm333_vm5, %v3871_v24, %v3873_v20  ;;  %v5857_v20 = vld [vmem:[%s7754_s3] sm:$0xff] }
0x2ff1   :  { %3887 = vmatpush.bf16.msra.mxu2 %v3875_v25 }
0x2ff7   :  { %v3869_v29 = vpop.permute.xlu1 %3868 }
0x2ff8   :  { %v3874_v30 = vsel %vm333_vm5, %v3867_v28, %v3869_v29 }
0x2ff9   :  { %3888 = vmatpush.bf16.msra.mxu2 %v3874_v30 }
0x3046   :  { %v3836_v17 = vpop.permute.xlu2 %3835 }
0x306b   :  { %v3810_v15 = vpop.f32.mrf.mxu1 }
0x306c   :  { %6136 = vtanh.f32 %v3810_v15  ;;  %v5544_v26 = vmul.f32 -1.442695, %v3810_v15 }
0x306e   :  { %6138 = vpow2.f32 %v5544_v26 }
0x3072   :  { %v6137_v16 = vpop.eup %6136 }
0x3073   :  { %v3812_v18 = vpop.f32.mrf.mxu1  ;;  %v3838_v19 = vsub.f32 %v6137_v16, %v3836_v17  ;;  %v5858_v16 = vld [vmem:[%s7754_s3 + $0x8] sm:$0xff] }
0x3074   :  { %v6139_v49 = vpop.eup %6138  ;;  %4037 = vmatpush.bf16.msra.mxu0 %v5858_v16  ;;  %v5597_v16 = vld [vmem:[%s7757_s4 + $0x8] sm:$0xf0] }
0x3075   :  { %3840 = vrot.lane.b32.xlu2 %v3838_v19, %s6211_s8  ;;  %v3817_v31 = vadd.f32 1.0, %v6139_v49 }
0x3077   :  { %6140 = vrcp.f32 %v3817_v31  ;;  %v3829_v35 = vand.u32 2147483648, %v3817_v31  ;;  %vm3823_vm2 = vweird.f32 %v3817_v31  ;;  %v3827_v36 = vand.u32 2147483647, %v3817_v31 }
0x3078   :  { %4038 = vmatpush.bf16.msra.mxu0 %v5857_v20 }
0x3079   :  { %v3830_v38 = vor.u32 1.1754944e-38, %v3829_v35  ;;  %vm3828_vm4 = vcmp.eq.f32.partialorder %v3827_v36, 8.507059e+37 }
0x307d   :  { %v6141_v32 = vpop.eup %6140 }
0x307e   :  { %v3819_v47 = vmul.f32 %v6141_v32, %v3817_v31  ;;  %vm3824_vm1 = vweird.f32 %v6141_v32 }
0x307f   :  { %vm3825_vm3 = vmor %vm3823_vm2, %vm3824_vm1 }
0x3080   :  { %v3820_v27 = vsub.f32 1.0, %v3819_v47 }
0x3082   :  { %v3821_v34 = vmul.f32 %v6141_v32, %v3820_v27 }
0x3084   :  { %v3822_v33 = vadd.f32 %v6141_v32, %v3821_v34 }
0x3086   :  { %v3826_v37 = vsel %vm3825_vm3, %v6141_v32, %v3822_v33 }
0x3087   :  { %v3831_v40 = vsel %vm3828_vm4, %v3830_v38, %v3826_v37 }
0x30cf   :  { %v3841_v39 = vpop.permute.xlu2 %3840 }
0x30d0   :  { %v3843_v41 = vmul.f32 %v3841_v39, %v3831_v40 }
0x30d2   :  { %v7450_v50 = vadd.f32 %v3843_v41, %v3780_v2 }
0x30d4   :  { %3925 = vrot.lane.b32.xlu0 %v7450_v50, %s6211_s8  ;;  %3915 = vrot.lane.b32.xlu2 %v7450_v50, %s6210_s1  ;;  %v3849_v43 = vpack.c.bf16 %v7450_v50, %v7450_v50 }
0x30d6   :  { %5561 = vmatmul.msk.bf16.vlgmr.msra.gmra.mxu2 %vm26_vm0, %v3849_v43 }
0x30dc   :  { %3954 = vrot.lane.b32.xlu2 %v5566_v55, %s6212_s17  ;;  %v5859_v55 = vld [vmem:[%s7757_s4 + $0x4] sm:$0xf0] }
0x312e   :  { %v3916_v59 = vpop.permute.xlu2 %3915 }
0x3136   :  { %v3955_v12 = vpop.permute.xlu2 %3954 }
0x3137   :  { %3970 = vmatpush.bf16.msra.mxu3 %v3955_v12 }
0x3146   :  { %v3926_v9 = vpop.permute.xlu0 %3925 }
0x3159   :  { %v3890_v56 = vpop.f32.mrf.mxu2 }
0x315a   :  { %v5562_v57 = vmul.f32 -1.442695, %v3890_v56  ;;  %v3913_v58 = vmax.f32 %v3890_v56, 0.0  ;;  %v5586_v56 = vor.u32 %v5859_v55, %v5585_v45 }
0x315c   :  { %6142 = vpow2.f32 %v5562_v57  ;;  %v3918_v46 = vsub.f32 %v3913_v58, %v3916_v59 }
0x315e   :  { %3920 = vrot.lane.b32.xlu1 %v3918_v46, %s6211_s8 }
0x3161   :  { %v3892_v61 = vpop.f32.mrf.mxu2 }
0x3162   :  { %v6143_v51 = vpop.eup %6142 }
0x3163   :  { %v3897_v48 = vadd.f32 1.0, %v6143_v51 }
0x3165   :  { %6144 = vrcp.f32 %v3897_v48  ;;  %v3909_v1 = vand.u32 2147483648, %v3897_v48  ;;  %v3907_v3 = vand.u32 2147483647, %v3897_v48  ;;  %vm3903_vm7 = vweird.f32 %v3897_v48 }
0x3167   :  { %v3910_v5 = vor.u32 1.1754944e-38, %v3909_v1  ;;  %vm3908_vm9 = vcmp.eq.f32.partialorder %v3907_v3, 8.507059e+37 }
0x316b   :  { %v6145_v62 = vpop.eup %6144 }
0x316c   :  { %v3899_v63 = vmul.f32 %v6145_v62, %v3897_v48  ;;  %vm3904_vm6 = vweird.f32 %v6145_v62 }
0x316d   :  { %vm3905_vm8 = vmor %vm3903_vm7, %vm3904_vm6 }
0x316e   :  { %v3900_v0 = vsub.f32 1.0, %v3899_v63 }
0x3170   :  { %v3901_v2 = vmul.f32 %v6145_v62, %v3900_v0 }
0x3172   :  { %v3902_v4 = vadd.f32 %v6145_v62, %v3901_v2 }
0x3174   :  { %v3906_v8 = vsel %vm3905_vm8, %v6145_v62, %v3902_v4 }
0x3175   :  { %v3911_v10 = vsel %vm3908_vm9, %v3910_v5, %v3906_v8 }
0x3176   :  { %v3928_v11 = vsub.f32 %v3911_v10, %v3926_v9 }
0x3178   :  { %3930 = vrot.lane.b32.xlu1 %v3928_v11, %s6211_s8 }
0x31d0   :  { %v3921_v7 = vpop.permute.xlu1 %3920 }
0x31d1   :  { %v3923_v13 = vmul.f32 %v3921_v7, %v3911_v10 }
0x31d3   :  { %v3924_v14 = vadd.f32 %v3923_v13, %v7450_v50 }
0x31d5   :  { %v3943_v6 = vpack.c.bf16 %v3924_v14, %v3924_v14  ;;  %3996 = vrot.lane.b32.xlu2 %v3924_v14, %s6210_s1  ;;  %v4006_v36 = vadd.f32 %v3924_v14, %v7450_v50 }
0x31d7   :  { %5571 = vmatmul.msk.bf16.vlgmr.msra.gmra.mxu3 %vm26_vm0, %v3943_v6  ;;  %v5605_v6 = vld [vmem:[%s7757_s4 + $0x18] sm:$0xf0] }
0x31ea   :  { %v3931_v42 = vpop.permute.xlu1 %3930 }
0x31eb   :  { %v3933_v15 = vmul.f32 %v3931_v42, %v3911_v10 }
0x31ed   :  { %3935 = vrot.lane.b32.xlu0 %v3933_v15, %s6212_s17  ;;  %v5861_v15 = vld [vmem:[%s7757_s4 + $0x4] sm:$0xf] }
0x322f   :  { %v3997_v17 = vpop.permute.xlu2 %3996 }
0x325a   :  { %v3972_v18 = vpop.f32.mrf.mxu3 }
0x325b   :  { %v3999_v19 = vsub.f32 %v3972_v18, %v3997_v17  ;;  %v5572_v22 = vmul.f32 -1.442695, %v3972_v18  ;;  %v5600_v17 = vor.u32 %v5861_v15, %v5597_v16  ;;  %v5603_v18 = vld [vmem:[%s7757_s4 + $0x10] sm:$0xf] }
0x325d   :  { %4001 = vrot.lane.b32.xlu1 %v3999_v19, %s6211_s8  ;;  %6146 = vpow2.f32 %v5572_v22  ;;  %v5864_v19 = vld [vmem:[%s7757_s4 + $0x14] sm:$0xf0]  ;;  %v5595_v22 = vld [vmem:[%s7757_s4] sm:$0xf] }
0x325f   :  { %v3936_v32 = vpop.permute.xlu0 %3935 }
0x3260   :  { %v3938_v34 = vadd.f32 %v3936_v32, %v7450_v50  ;;  %v5860_v50 = vld [vmem:[%s7757_s4 + $0x14] sm:$0xf0] }
0x3261   :  { %v5590_v54 = vor.u32 %v5860_v50, %v5589_v44 }
0x3262   :  { %v3974_v21 = vpop.f32.mrf.mxu3  ;;  %v4007_v38 = vadd.f32 %v4006_v36, %v3938_v34 }
0x3263   :  { %v6147_v23 = vpop.eup %6146  ;;  %4102 = vmatpush.bf16.msrb.mxu1 %v5590_v54  ;;  %v5604_v21 = vor.u32 %v5864_v19, %v5603_v18 }
0x3264   :  { %v3979_v24 = vadd.f32 1.0, %v6147_v23  ;;  %v5862_v23 = vld [vmem:[%s7757_s4 + $0x4] sm:$0xf0] }
0x3266   :  { %6148 = vrcp.f32 %v3979_v24  ;;  %v3991_v49 = vand.u32 2147483648, %v3979_v24  ;;  %vm3985_vm11 = vweird.f32 %v3979_v24  ;;  %v3989_v31 = vand.u32 2147483647, %v3979_v24 }
0x3267   :  { %4103 = vmatpush.bf16.msrb.mxu1 %v5586_v56 }
0x3268   :  { %v3992_v27 = vor.u32 1.1754944e-38, %v3991_v49  ;;  %vm3990_vm13 = vcmp.eq.f32.partialorder %v3989_v31, 8.507059e+37  ;;  %v5866_v49 = vld [vmem:[%s7757_s4 + $0x18] sm:$0xf0] }
0x326c   :  { %v6149_v25 = vpop.eup %6148 }
0x326d   :  { %v3981_v26 = vmul.f32 %v6149_v25, %v3979_v24  ;;  %vm3986_vm10 = vweird.f32 %v6149_v25  ;;  %v5596_v24 = vor.u32 %v5862_v23, %v5595_v22 }
0x326e   :  { %vm3987_vm12 = vmor %vm3985_vm11, %vm3986_vm10 }
0x326f   :  { %v3982_v28 = vsub.f32 1.0, %v3981_v26 }
0x3271   :  { %v3983_v29 = vmul.f32 %v6149_v25, %v3982_v28 }
0x3273   :  { %v3984_v30 = vadd.f32 %v6149_v25, %v3983_v29 }
0x3275   :  { %v3988_v47 = vsel %vm3987_vm12, %v6149_v25, %v3984_v30  ;;  %v5617_v30 = vld [vmem:[%s7757_s4 + $0x14] sm:$0xf] }
0x3276   :  { %v3993_v35 = vsel %vm3990_vm13, %v3992_v27, %v3988_v47  ;;  %v5618_v31 = vor.u32 %v5866_v49, %v5617_v30 }
0x32cf   :  { %v4002_v33 = vpop.permute.xlu1 %4001 }
0x32d0   :  { %v4004_v37 = vmul.f32 %v4002_v33, %v3993_v35 }
0x32d2   :  { %v4005_v39 = vadd.f32 %v4004_v37, %v3924_v14  ;;  %v5863_v14 = vld [vmem:[%s7757_s4 + $0x14] sm:$0xf] }
0x32d3   :  { %v5608_v42 = vor.u32 %v5863_v14, %v5605_v6 }
0x32d4   :  { %v4008_v40 = vadd.f32 %v4007_v38, %v4005_v39 }
0x32d6   :  { %v4009_v41 = vmul.f32 0.25, %v4008_v40 }
0x32d8   :  { %4010 = vst.msk [vmem:[%s7758_s5 + $0x60] sm:$0xff] %vm26_vm0, %v4009_v41  ;;  %v4011_v43 = vpack.c.bf16 %v4009_v41, %v4009_v41  ;;  %4066 = vrot.lane.b32.xlu2 %v4009_v41, %s6210_s1 }
0x32da   :  { %5581 = vmatmul.msk.bf16.vlgmr.msra.gmra.mxu0 %vm26_vm0, %v4011_v43 }
0x32e0   :  { %4165 = vrot.lane.b32.xlu2 %v5604_v21, %s6212_s17 }
0x32e8   :  { %4161 = vrot.lane.b32.xlu2 %v5596_v24, %s6212_s17 }
0x32f0   :  { %4251 = vrot.lane.b32.xlu2 %v5618_v31, %s6212_s17 }
0x3332   :  { %v4067_v61 = vpop.permute.xlu2 %4066 }
0x333a   :  { %v4166_v47 = vpop.permute.xlu2 %4165 }
0x3342   :  { %v4162_v36 = vpop.permute.xlu2 %4161 }
0x3357   :  { %v4040_v57 = vpop.f32.mrf.mxu0 }
0x3358   :  { %v4044_v58 = vadd.f32 %v4040_v57, %v6845_v52 }
0x335a   :  { %6150 = vtanh.f32 %v4044_v58  ;;  %v5582_v48 = vmul.f32 -1.442695, %v4044_v58 }
0x335c   :  { %6152 = vpow2.f32 %v5582_v48  ;;  %v5865_v48 = vld [vmem:[%s7757_s4 + $0x8] sm:$0xf0] }
0x335f   :  { %v4042_v59 = vpop.f32.mrf.mxu0 }
0x3360   :  { %v6151_v46 = vpop.eup %6150 }
0x3361   :  { %v4069_v51 = vsub.f32 %v6151_v46, %v4067_v61  ;;  %v4252_v61 = vpop.permute.xlu2 %4251 }
0x3362   :  { %v6153_v62 = vpop.eup %6152  ;;  %4264 = vmatpush.bf16.msrb.mxu3 %v4252_v61  ;;  %v5633_v61 = vld [vmem:[%s7757_s4] sm:$0xf] }
0x3363   :  { %4071 = vrot.lane.b32.xlu0 %v4069_v51, %s6211_s8  ;;  %v4048_v63 = vadd.f32 1.0, %v6153_v62  ;;  %v5613_v51 = vld [vmem:[%s7757_s4 + $0x4] sm:$0xf] }
0x3364   :  { %v5614_v62 = vor.u32 %v5865_v48, %v5613_v51  ;;  %v5869_v48 = vld [vmem:[%s7757_s4 + $0x4] sm:$0xf0] }
0x3365   :  { %6154 = vrcp.f32 %v4048_v63  ;;  %v4060_v5 = vand.u32 2147483648, %v4048_v63  ;;  %vm4054_vm15 = vweird.f32 %v4048_v63  ;;  %v4058_v52 = vand.u32 2147483647, %v4048_v63 }
0x3367   :  { %v4061_v9 = vor.u32 1.1754944e-38, %v4060_v5  ;;  %vm4059_vm2 = vcmp.eq.f32.partialorder %v4058_v52, 8.507059e+37 }
0x336b   :  { %v6155_v0 = vpop.eup %6154  ;;  %4167 = vrot.lane.b32.xlu0 %v5608_v42, %s6212_s17 }
0x336c   :  { %v4050_v1 = vmul.f32 %v6155_v0, %v4048_v63  ;;  %vm4055_vm14 = vweird.f32 %v6155_v0 }
0x336d   :  { %vm4056_vm1 = vmor %vm4054_vm15, %vm4055_vm14 }
0x336e   :  { %v4051_v2 = vsub.f32 1.0, %v4050_v1 }
0x3370   :  { %v4052_v3 = vmul.f32 %v6155_v0, %v4051_v2 }
0x3372   :  { %v4053_v4 = vadd.f32 %v6155_v0, %v4052_v3 }
0x3373   :  { %4163 = vrot.lane.b32.xlu0 %v5600_v17, %s6212_s17 }
0x3374   :  { %v4057_v8 = vsel %vm4056_vm1, %v6155_v0, %v4053_v4 }
0x3375   :  { %v4062_v11 = vsel %vm4059_vm2, %v4061_v9, %v4057_v8 }
0x33d5   :  { %v4072_v10 = vpop.permute.xlu0 %4071 }
0x33d6   :  { %v4074_v12 = vmul.f32 %v4072_v10, %v4062_v11 }
0x33d8   :  { %v4075_v7 = vadd.f32 %v4074_v12, %v4009_v41 }
0x33da   :  { %v4080_v13 = vpack.c.bf16 %v4075_v7, %v4075_v7  ;;  %4130 = vrot.lane.b32.xlu1 %v4075_v7, %s6210_s1 }
0x33dc   :  { %5591 = vmatmul.msk.bf16.vlgmr.msrb.gmra.mxu1 %vm26_vm0, %v4080_v13 }
0x33dd   :  { %v4168_v32 = vpop.permute.xlu0 %4167 }
0x33de   :  { %v4170_v27 = vsel %vm333_vm5, %v4166_v47, %v4168_v32  ;;  %v5867_v32 = vld [vmem:[%s7754_s3] sm:$0xff] }
0x33df   :  { %4182 = vmatpush.bf16.msrb.mxu2 %v4170_v27 }
0x33e5   :  { %v4164_v37 = vpop.permute.xlu0 %4163 }
0x33e6   :  { %v4169_v38 = vsel %vm333_vm5, %v4162_v36, %v4164_v37 }
0x33e7   :  { %4183 = vmatpush.bf16.msrb.mxu2 %v4169_v38 }
0x344c   :  { %v4131_v26 = vpop.permute.xlu1 %4130 }
0x3459   :  { %v4105_v20 = vpop.f32.mrf.mxu1 }
0x345a   :  { %6156 = vtanh.f32 %v4105_v20  ;;  %v5592_v34 = vmul.f32 -1.442695, %v4105_v20  ;;  %v5868_v20 = vld [vmem:[%s7754_s3 + $0x8] sm:$0xff] }
0x345b   :  { %4332 = vmatpush.bf16.msrb.mxu0 %v5868_v20 }
0x345c   :  { %6158 = vpow2.f32 %v5592_v34 }
0x345f   :  { %4333 = vmatpush.bf16.msrb.mxu0 %v5867_v32 }
0x3460   :  { %v6157_v25 = vpop.eup %6156 }
0x3461   :  { %v4107_v28 = vpop.f32.mrf.mxu1  ;;  %v4133_v29 = vsub.f32 %v6157_v25, %v4131_v26 }
0x3462   :  { %v6159_v33 = vpop.eup %6158 }
0x3463   :  { %4135 = vrot.lane.b32.xlu1 %v4133_v29, %s6211_s8  ;;  %v4112_v35 = vadd.f32 1.0, %v6159_v33 }
0x3465   :  { %6160 = vrcp.f32 %v4112_v35  ;;  %v4124_v50 = vand.u32 2147483648, %v4112_v35  ;;  %vm4118_vm4 = vweird.f32 %v4112_v35  ;;  %v4122_v45 = vand.u32 2147483647, %v4112_v35 }
0x3467   :  { %v4125_v55 = vor.u32 1.1754944e-38, %v4124_v50  ;;  %vm4123_vm7 = vcmp.eq.f32.partialorder %v4122_v45, 8.507059e+37 }
0x346b   :  { %v6161_v39 = vpop.eup %6160 }
0x346c   :  { %v4114_v40 = vmul.f32 %v6161_v39, %v4112_v35  ;;  %vm4119_vm3 = vweird.f32 %v6161_v39 }
0x346d   :  { %vm4120_vm6 = vmor %vm4118_vm4, %vm4119_vm3 }
0x346e   :  { %v4115_v41 = vsub.f32 1.0, %v4114_v40 }
0x3470   :  { %v4116_v43 = vmul.f32 %v6161_v39, %v4115_v41 }
0x3472   :  { %v4117_v44 = vadd.f32 %v6161_v39, %v4116_v43 }
0x3474   :  { %v4121_v54 = vsel %vm4120_vm6, %v6161_v39, %v4117_v44 }
0x3475   :  { %v4126_v57 = vsel %vm4123_vm7, %v4125_v55, %v4121_v54 }
0x34d5   :  { %v4136_v56 = vpop.permute.xlu1 %4135 }
0x34d6   :  { %v4138_v58 = vmul.f32 %v4136_v56, %v4126_v57 }
0x34d8   :  { %v7541_v59 = vadd.f32 %v4138_v58, %v4075_v7 }
0x34da   :  { %4220 = vrot.lane.b32.xlu2 %v7541_v59, %s6211_s8  ;;  %4210 = vrot.lane.b32.xlu1 %v7541_v59, %s6210_s1  ;;  %v4144_v46 = vpack.c.bf16 %v7541_v59, %v7541_v59 }
0x34dc   :  { %5609 = vmatmul.msk.bf16.vlgmr.msrb.gmra.mxu2 %vm26_vm0, %v4144_v46  ;;  %v5637_v46 = vld [vmem:[%s7757_s4 + $0x10] sm:$0xf] }
0x34e2   :  { %4249 = vrot.lane.b32.xlu1 %v5614_v62, %s6212_s17  ;;  %v5634_v62 = vor.u32 %v5869_v48, %v5633_v61 }
0x3534   :  { %v4221_v42 = vpop.permute.xlu2 %4220 }
0x354c   :  { %v4211_v2 = vpop.permute.xlu1 %4210 }
0x3554   :  { %v4250_v17 = vpop.permute.xlu1 %4249 }
0x3555   :  { %4265 = vmatpush.bf16.msrb.mxu3 %v4250_v17 }
0x355f   :  { %v4185_v63 = vpop.f32.mrf.mxu2 }
0x3560   :  { %v5610_v0 = vmul.f32 -1.442695, %v4185_v63  ;;  %v4208_v1 = vmax.f32 %v4185_v63, 0.0 }
0x3562   :  { %6162 = vpow2.f32 %v5610_v0  ;;  %v4213_v3 = vsub.f32 %v4208_v1, %v4211_v2 }
0x3564   :  { %4215 = vrot.lane.b32.xlu0 %v4213_v3, %s6211_s8 }
0x3567   :  { %v4187_v4 = vpop.f32.mrf.mxu2 }
0x3568   :  { %v6163_v5 = vpop.eup %6162 }
0x3569   :  { %v4192_v52 = vadd.f32 1.0, %v6163_v5 }
0x356b   :  { %6164 = vrcp.f32 %v4192_v52  ;;  %v4204_v11 = vand.u32 2147483648, %v4192_v52  ;;  %v4202_v7 = vand.u32 2147483647, %v4192_v52  ;;  %vm4198_vm9 = vweird.f32 %v4192_v52 }
0x356d   :  { %v4205_v14 = vor.u32 1.1754944e-38, %v4204_v11  ;;  %vm4203_vm11 = vcmp.eq.f32.partialorder %v4202_v7, 8.507059e+37 }
0x3571   :  { %v6165_v8 = vpop.eup %6164 }
0x3572   :  { %v4194_v9 = vmul.f32 %v6165_v8, %v4192_v52  ;;  %vm4199_vm8 = vweird.f32 %v6165_v8 }
0x3573   :  { %vm4200_vm10 = vmor %vm4198_vm9, %vm4199_vm8 }
0x3574   :  { %v4195_v10 = vsub.f32 1.0, %v4194_v9 }
0x3576   :  { %v4196_v12 = vmul.f32 %v6165_v8, %v4195_v10 }
0x3578   :  { %v4197_v13 = vadd.f32 %v6165_v8, %v4196_v12 }
0x357a   :  { %v4201_v6 = vsel %vm4200_vm10, %v6165_v8, %v4197_v13 }
0x357b   :  { %v4206_v15 = vsel %vm4203_vm11, %v4205_v14, %v4201_v6 }
0x357c   :  { %v4223_v16 = vsub.f32 %v4206_v15, %v4221_v42 }
0x357e   :  { %4225 = vrot.lane.b32.xlu0 %v4223_v16, %s6211_s8 }
0x35d6   :  { %v4216_v18 = vpop.permute.xlu0 %4215 }
0x35d7   :  { %v4218_v19 = vmul.f32 %v4216_v18, %v4206_v15 }
0x35d9   :  { %v4219_v21 = vadd.f32 %v4218_v19, %v7541_v59  ;;  %v5651_v19 = vld [vmem:[%s7757_s4 + $0x10] sm:$0xf] }
0x35db   :  { %v4238_v22 = vpack.c.bf16 %v4219_v21, %v4219_v21  ;;  %4291 = vrot.lane.b32.xlu1 %v4219_v21, %s6210_s1  ;;  %v4301_v50 = vadd.f32 %v4219_v21, %v7541_v59 }
0x35dd   :  { %5619 = vmatmul.msk.bf16.vlgmr.msrb.gmra.mxu3 %vm26_vm0, %v4238_v22 }
0x35f0   :  { %v4226_v23 = vpop.permute.xlu0 %4225 }
0x35f1   :  { %v4228_v24 = vmul.f32 %v4226_v23, %v4206_v15  ;;  %v5643_v23 = vld [vmem:[%s7757_s4] sm:$0xf] }
0x35f3   :  { %4230 = vrot.lane.b32.xlu2 %v4228_v24, %s6212_s17  ;;  %v5872_v24 = vld [vmem:[%s7757_s4 + $0x4] sm:$0xf0] }
0x35f4   :  { %v5644_v20 = vor.u32 %v5872_v24, %v5643_v23 }
0x364d   :  { %v4292_v25 = vpop.permute.xlu1 %4291  ;;  %v4231_v38 = vpop.permute.xlu2 %4230 }
0x364e   :  { %v4233_v41 = vadd.f32 %v4231_v38, %v7541_v59  ;;  %v5870_v59 = vld [vmem:[%s7757_s4 + $0x14] sm:$0xf0] }
0x364f   :  { %v5638_v51 = vor.u32 %v5870_v59, %v5637_v46 }
0x3650   :  { %v4302_v54 = vadd.f32 %v4301_v50, %v4233_v41 }
0x3651   :  { %4397 = vmatpush.bf16.msra.mxu1 %v5638_v51 }
0x3655   :  { %4398 = vmatpush.bf16.msra.mxu1 %v5634_v62 }
0x3660   :  { %v4267_v26 = vpop.f32.mrf.mxu3 }
0x3661   :  { %v4294_v28 = vsub.f32 %v4267_v26, %v4292_v25  ;;  %v5620_v30 = vmul.f32 -1.442695, %v4267_v26  ;;  %v5873_v25 = vld [vmem:[%s7757_s4 + $0x14] sm:$0xf]  ;;  %v5653_v26 = vld [vmem:[%s7757_s4 + $0x18] sm:$0xf0] }
0x3663   :  { %4296 = vrot.lane.b32.xlu0 %v4294_v28, %s6211_s8  ;;  %6166 = vpow2.f32 %v5620_v30  ;;  %v5656_v28 = vor.u32 %v5873_v25, %v5653_v26  ;;  %v5645_v30 = vld [vmem:[%s7757_s4 + $0x8] sm:$0xf0] }
0x3668   :  { %v4269_v29 = vpop.f32.mrf.mxu3 }
0x3669   :  { %v6167_v49 = vpop.eup %6166  ;;  %v5871_v29 = vld [vmem:[%s7757_s4 + $0x4] sm:$0xf] }
0x366a   :  { %v4274_v31 = vadd.f32 1.0, %v6167_v49  ;;  %v5648_v49 = vor.u32 %v5871_v29, %v5645_v30 }
0x366c   :  { %6168 = vrcp.f32 %v4274_v31  ;;  %v4286_v36 = vand.u32 2147483648, %v4274_v31  ;;  %vm4280_vm13 = vweird.f32 %v4274_v31  ;;  %v4284_v37 = vand.u32 2147483647, %v4274_v31 }
0x366e   :  { %v4287_v40 = vor.u32 1.1754944e-38, %v4286_v36  ;;  %vm4285_vm15 = vcmp.eq.f32.partialorder %v4284_v37, 8.507059e+37 }
0x3672   :  { %v6169_v47 = vpop.eup %6168 }
0x3673   :  { %v4276_v27 = vmul.f32 %v6169_v47, %v4274_v31  ;;  %vm4281_vm12 = vweird.f32 %v6169_v47 }
0x3674   :  { %vm4282_vm14 = vmor %vm4280_vm13, %vm4281_vm12 }
0x3675   :  { %v4277_v34 = vsub.f32 1.0, %v4276_v27 }
0x3677   :  { %v4278_v33 = vmul.f32 %v6169_v47, %v4277_v34 }
0x3679   :  { %v4279_v35 = vadd.f32 %v6169_v47, %v4278_v33  ;;  %v5665_v33 = vld [vmem:[%s7757_s4 + $0x14] sm:$0xf] }
0x367b   :  { %v4283_v39 = vsel %vm4282_vm14, %v6169_v47, %v4279_v35  ;;  %v5876_v35 = vld [vmem:[%s7757_s4 + $0x18] sm:$0xf0] }
0x367c   :  { %v4288_v44 = vsel %vm4285_vm15, %v4287_v40, %v4283_v39  ;;  %v5666_v36 = vor.u32 %v5876_v35, %v5665_v33 }
0x36d5   :  { %v4297_v43 = vpop.permute.xlu0 %4296 }
0x36d6   :  { %v4299_v45 = vmul.f32 %v4297_v43, %v4288_v44 }
0x36d8   :  { %v4300_v55 = vadd.f32 %v4299_v45, %v4219_v21  ;;  %v5874_v21 = vld [vmem:[%s7757_s4 + $0x14] sm:$0xf0] }
0x36d9   :  { %v5652_v22 = vor.u32 %v5874_v21, %v5651_v19 }
0x36da   :  { %v4303_v56 = vadd.f32 %v4302_v54, %v4300_v55 }
0x36dc   :  { %v4304_v57 = vmul.f32 0.25, %v4303_v56 }
0x36de   :  { %4305 = vst.msk [vmem:[%s7758_s5 + $0x68] sm:$0xff] %vm26_vm0, %v4304_v57  ;;  %v4306_v58 = vpack.c.bf16 %v4304_v57, %v4304_v57  ;;  %4361 = vrot.lane.b32.xlu1 %v4304_v57, %s6210_s1 }
0x36e0   :  { %5629 = vmatmul.msk.bf16.vlgmr.msrb.gmra.mxu0 %vm26_vm0, %v4306_v58 }
0x36e6   :  { %4460 = vrot.lane.b32.xlu1 %v5652_v22, %s6212_s17 }
0x36ee   :  { %4456 = vrot.lane.b32.xlu1 %v5644_v20, %s6212_s17 }
0x36f6   :  { %4546 = vrot.lane.b32.xlu1 %v5666_v36, %s6212_s17  ;;  %v5877_v36 = vld [vmem:[%s7754_s3] sm:$0xff] }
0x3750   :  { %v4362_v3 = vpop.permute.xlu1 %4361 }
0x3758   :  { %v4461_v37 = vpop.permute.xlu1 %4460 }
0x375d   :  { %v4335_v63 = vpop.f32.mrf.mxu0 }
0x375e   :  { %v4339_v0 = vadd.f32 %v4335_v63, %v6847_v53 }
0x3760   :  { %6170 = vtanh.f32 %v4339_v0  ;;  %v5630_v5 = vmul.f32 -1.442695, %v4339_v0  ;;  %v4457_v50 = vpop.permute.xlu1 %4456 }
0x3762   :  { %6172 = vpow2.f32 %v5630_v5 }
0x3765   :  { %v4337_v1 = vpop.f32.mrf.mxu0 }
0x3766   :  { %v6171_v2 = vpop.eup %6170 }
0x3767   :  { %v4364_v4 = vsub.f32 %v6171_v2, %v4362_v3  ;;  %v5661_v2 = vld [vmem:[%s7757_s4 + $0x4] sm:$0xf]  ;;  %v5875_v3 = vld [vmem:[%s7757_s4 + $0x8] sm:$0xf0] }
0x3768   :  { %v6173_v52 = vpop.eup %6172  ;;  %v4547_v5 = vpop.permute.xlu1 %4546 }
0x3769   :  { %4366 = vrot.lane.b32.xlu2 %v4364_v4, %s6211_s8  ;;  %v4343_v8 = vadd.f32 1.0, %v6173_v52  ;;  %v5662_v4 = vor.u32 %v5875_v3, %v5661_v2  ;;  %4559 = vmatpush.bf16.msra.mxu3 %v4547_v5  ;;  %v5879_v3 = vld [vmem:[%s7757_s4 + $0x4] sm:$0xf0] }
0x376b   :  { %6174 = vrcp.f32 %v4343_v8  ;;  %v4355_v13 = vand.u32 2147483648, %v4343_v8  ;;  %vm4349_vm2 = vweird.f32 %v4343_v8  ;;  %v4353_v53 = vand.u32 2147483647, %v4343_v8 }
0x376d   :  { %v4356_v6 = vor.u32 1.1754944e-38, %v4355_v13  ;;  %vm4354_vm4 = vcmp.eq.f32.partialorder %v4353_v53, 8.507059e+37 }
0x3771   :  { %v6175_v9 = vpop.eup %6174  ;;  %4462 = vrot.lane.b32.xlu2 %v5656_v28, %s6212_s17 }
0x3772   :  { %v4345_v10 = vmul.f32 %v6175_v9, %v4343_v8  ;;  %vm4350_vm1 = vweird.f32 %v6175_v9 }
0x3773   :  { %vm4351_vm3 = vmor %vm4349_vm2, %vm4350_vm1 }
0x3774   :  { %v4346_v11 = vsub.f32 1.0, %v4345_v10 }
0x3776   :  { %v4347_v12 = vmul.f32 %v6175_v9, %v4346_v11 }
0x3778   :  { %v4348_v7 = vadd.f32 %v6175_v9, %v4347_v12 }
0x3779   :  { %4458 = vrot.lane.b32.xlu2 %v5648_v49, %s6212_s17  ;;  %v5878_v49 = vld [vmem:[%s7754_s3 + $0x8] sm:$0xff] }
0x377a   :  { %v4352_v14 = vsel %vm4351_vm3, %v6175_v9, %v4348_v7  ;;  %4627 = vmatpush.bf16.msra.mxu0 %v5878_v49  ;;  %v5691_v49 = vld [vmem:[%s7757_s4] sm:$0xf] }
0x377b   :  { %v4357_v15 = vsel %vm4354_vm4, %v4356_v6, %v4352_v14 }
0x377e   :  { %4628 = vmatpush.bf16.msra.mxu0 %v5877_v36 }
0x37c3   :  { %v4367_v42 = vpop.permute.xlu2 %4366 }
0x37c4   :  { %v4369_v16 = vmul.f32 %v4367_v42, %v4357_v15 }
0x37c6   :  { %v4370_v17 = vadd.f32 %v4369_v16, %v4304_v57 }
0x37c8   :  { %v4375_v18 = vpack.c.bf16 %v4370_v17, %v4370_v17  ;;  %4425 = vrot.lane.b32.xlu0 %v4370_v17, %s6210_s1 }
0x37ca   :  { %5639 = vmatmul.msk.bf16.vlgmr.msra.gmra.mxu1 %vm26_vm0, %v4375_v18 }
0x37cb   :  { %v4463_v38 = vpop.permute.xlu2 %4462 }
0x37cc   :  { %v4465_v39 = vsel %vm333_vm5, %v4461_v37, %v4463_v38 }
0x37cd   :  { %4477 = vmatpush.bf16.msra.mxu2 %v4465_v39 }
0x37d3   :  { %v4459_v44 = vpop.permute.xlu2 %4458 }
0x37d4   :  { %v4464_v45 = vsel %vm333_vm5, %v4457_v50, %v4459_v44 }
0x37d5   :  { %4478 = vmatpush.bf16.msra.mxu2 %v4464_v45 }
0x383a   :  { %v4426_v47 = vpop.permute.xlu0 %4425 }
0x3847   :  { %v4400_v31 = vpop.f32.mrf.mxu1 }
0x3848   :  { %6176 = vtanh.f32 %v4400_v31  ;;  %v5640_v40 = vmul.f32 -1.442695, %v4400_v31 }
0x384a   :  { %6178 = vpow2.f32 %v5640_v40 }
0x384e   :  { %v6177_v32 = vpop.eup %6176 }
0x384f   :  { %v4402_v27 = vpop.f32.mrf.mxu1  ;;  %v4428_v34 = vsub.f32 %v6177_v32, %v4426_v47 }
0x3850   :  { %v6179_v41 = vpop.eup %6178 }
0x3851   :  { %4430 = vrot.lane.b32.xlu0 %v4428_v34, %s6211_s8  ;;  %v4407_v43 = vadd.f32 1.0, %v6179_v41 }
0x3853   :  { %6180 = vrcp.f32 %v4407_v43  ;;  %v4419_v46 = vand.u32 2147483648, %v4407_v43  ;;  %vm4413_vm7 = vweird.f32 %v4407_v43  ;;  %v4417_v59 = vand.u32 2147483647, %v4407_v43 }
0x3855   :  { %v4420_v51 = vor.u32 1.1754944e-38, %v4419_v46  ;;  %vm4418_vm9 = vcmp.eq.f32.partialorder %v4417_v59, 8.507059e+37 }
0x3859   :  { %v6181_v54 = vpop.eup %6180 }
0x385a   :  { %v4409_v55 = vmul.f32 %v6181_v54, %v4407_v43  ;;  %vm4414_vm6 = vweird.f32 %v6181_v54 }
0x385b   :  { %vm4415_vm8 = vmor %vm4413_vm7, %vm4414_vm6 }
0x385c   :  { %v4410_v56 = vsub.f32 1.0, %v4409_v55 }
0x385e   :  { %v4411_v57 = vmul.f32 %v6181_v54, %v4410_v56 }
0x3860   :  { %v4412_v58 = vadd.f32 %v6181_v54, %v4411_v57 }
0x3862   :  { %v4416_v61 = vsel %vm4415_vm8, %v6181_v54, %v4412_v58 }
0x3863   :  { %v4421_v62 = vsel %vm4418_vm9, %v4420_v51, %v4416_v61 }
0x38c3   :  { %v4431_v48 = vpop.permute.xlu0 %4430 }
0x38c4   :  { %v4433_v63 = vmul.f32 %v4431_v48, %v4421_v62 }
0x38c6   :  { %v7632_v0 = vadd.f32 %v4433_v63, %v4370_v17  ;;  %v5685_v63 = vld [vmem:[%s7757_s4 + $0x10] sm:$0xf] }
0x38c8   :  { %4515 = vrot.lane.b32.xlu1 %v7632_v0, %s6211_s8  ;;  %4505 = vrot.lane.b32.xlu0 %v7632_v0, %s6210_s1  ;;  %v4439_v1 = vpack.c.bf16 %v7632_v0, %v7632_v0 }
0x38ca   :  { %5657 = vmatmul.msk.bf16.vlgmr.msra.gmra.mxu2 %vm26_vm0, %v4439_v1  ;;  %v5681_v1 = vld [vmem:[%s7757_s4] sm:$0xf] }
0x38d0   :  { %4544 = vrot.lane.b32.xlu0 %v5662_v4, %s6212_s17  ;;  %v5682_v4 = vor.u32 %v5879_v3, %v5681_v1 }
0x393a   :  { %v4506_v52 = vpop.permute.xlu0 %4505  ;;  %v4516_v22 = vpop.permute.xlu1 %4515 }
0x3942   :  { %v4545_v8 = vpop.permute.xlu0 %4544 }
0x3943   :  { %4560 = vmatpush.bf16.msra.mxu3 %v4545_v8 }
0x394d   :  { %v4480_v9 = vpop.f32.mrf.mxu2 }
0x394e   :  { %v5658_v10 = vmul.f32 -1.442695, %v4480_v9  ;;  %v4503_v11 = vmax.f32 %v4480_v9, 0.0 }
0x3950   :  { %6182 = vpow2.f32 %v5658_v10  ;;  %v4508_v12 = vsub.f32 %v4503_v11, %v4506_v52 }
0x3952   :  { %4510 = vrot.lane.b32.xlu2 %v4508_v12, %s6211_s8 }
0x3955   :  { %v4482_v7 = vpop.f32.mrf.mxu2 }
0x3956   :  { %v6183_v13 = vpop.eup %6182 }
0x3957   :  { %v4487_v53 = vadd.f32 1.0, %v6183_v13 }
0x3959   :  { %6184 = vrcp.f32 %v4487_v53  ;;  %v4499_v15 = vand.u32 2147483648, %v4487_v53  ;;  %v4497_v17 = vand.u32 2147483647, %v4487_v53  ;;  %vm4493_vm11 = vweird.f32 %v4487_v53 }
0x395b   :  { %v4500_v19 = vor.u32 1.1754944e-38, %v4499_v15  ;;  %vm4498_vm13 = vcmp.eq.f32.partialorder %v4497_v17, 8.507059e+37 }
0x395f   :  { %v6185_v14 = vpop.eup %6184 }
0x3960   :  { %v4489_v6 = vmul.f32 %v6185_v14, %v4487_v53  ;;  %vm4494_vm10 = vweird.f32 %v6185_v14 }
0x3961   :  { %vm4495_vm12 = vmor %vm4493_vm11, %vm4494_vm10 }
0x3962   :  { %v4490_v42 = vsub.f32 1.0, %v4489_v6 }
0x3964   :  { %v4491_v16 = vmul.f32 %v6185_v14, %v4490_v42 }
0x3966   :  { %v4492_v18 = vadd.f32 %v6185_v14, %v4491_v16 }
0x3968   :  { %v4496_v21 = vsel %vm4495_vm12, %v6185_v14, %v4492_v18 }
0x3969   :  { %v4501_v23 = vsel %vm4498_vm13, %v4500_v19, %v4496_v21 }
0x396a   :  { %v4518_v24 = vsub.f32 %v4501_v23, %v4516_v22 }
0x396c   :  { %4520 = vrot.lane.b32.xlu2 %v4518_v24, %s6211_s8 }
0x39ac   :  { %v4511_v20 = vpop.permute.xlu2 %4510 }
0x39ad   :  { %v4513_v25 = vmul.f32 %v4511_v20, %v4501_v23  ;;  %v5699_v20 = vld [vmem:[%s7757_s4 + $0x10] sm:$0xf] }
0x39af   :  { %v4514_v26 = vadd.f32 %v4513_v25, %v7632_v0  ;;  %v5884_v25 = vld [vmem:[%s7757_s4 + $0x14] sm:$0xf0] }
0x39b1   :  { %v4533_v28 = vpack.c.bf16 %v4514_v26, %v4514_v26  ;;  %4586 = vrot.lane.b32.xlu0 %v4514_v26, %s6210_s1  ;;  %v4596_v58 = vadd.f32 %v4514_v26, %v7632_v0 }
0x39b3   :  { %5667 = vmatmul.msk.bf16.vlgmr.msra.gmra.mxu3 %vm26_vm0, %v4533_v28  ;;  %v5700_v28 = vor.u32 %v5884_v25, %v5699_v20 }
0x39c6   :  { %v4521_v29 = vpop.permute.xlu2 %4520 }
0x39c7   :  { %v4523_v30 = vmul.f32 %v4521_v29, %v4501_v23  ;;  %v5701_v29 = vld [vmem:[%s7757_s4 + $0x18] sm:$0xf0] }
0x39c9   :  { %4525 = vrot.lane.b32.xlu1 %v4523_v30, %s6212_s17 }
0x3a23   :  { %v4587_v31 = vpop.permute.xlu0 %4586 }
0x3a36   :  { %v4562_v32 = vpop.f32.mrf.mxu3 }
0x3a37   :  { %v4589_v47 = vsub.f32 %v4562_v32, %v4587_v31  ;;  %v5668_v34 = vmul.f32 -1.442695, %v4562_v32  ;;  %v5882_v31 = vld [vmem:[%s7757_s4 + $0x4] sm:$0xf0]  ;;  %v5881_v32 = vld [vmem:[%s7757_s4 + $0x4] sm:$0xf] }
0x3a39   :  { %4591 = vrot.lane.b32.xlu2 %v4589_v47, %s6211_s8  ;;  %6186 = vpow2.f32 %v5668_v34  ;;  %v5693_v47 = vld [vmem:[%s7757_s4 + $0x8] sm:$0xf0] }
0x3a3a   :  { %v5696_v34 = vor.u32 %v5881_v32, %v5693_v47 }
0x3a3b   :  { %v4526_v50 = vpop.permute.xlu1 %4525 }
0x3a3c   :  { %v4528_v55 = vadd.f32 %v4526_v50, %v7632_v0  ;;  %v5880_v0 = vld [vmem:[%s7757_s4 + $0x14] sm:$0xf0] }
0x3a3d   :  { %v5686_v2 = vor.u32 %v5880_v0, %v5685_v63 }
0x3a3e   :  { %v4564_v27 = vpop.f32.mrf.mxu3  ;;  %v4597_v59 = vadd.f32 %v4596_v58, %v4528_v55 }
0x3a3f   :  { %v6187_v33 = vpop.eup %6186  ;;  %4692 = vmatpush.bf16.msrb.mxu1 %v5686_v2  ;;  %v5692_v27 = vor.u32 %v5882_v31, %v5691_v49 }
0x3a40   :  { %v4569_v35 = vadd.f32 1.0, %v6187_v33 }
0x3a42   :  { %6188 = vrcp.f32 %v4569_v35  ;;  %v4581_v43 = vand.u32 2147483648, %v4569_v35  ;;  %vm4575_vm15 = vweird.f32 %v4569_v35  ;;  %v4579_v44 = vand.u32 2147483647, %v4569_v35 }
0x3a43   :  { %4693 = vmatpush.bf16.msrb.mxu1 %v5682_v4 }
0x3a44   :  { %v4582_v54 = vor.u32 1.1754944e-38, %v4581_v43  ;;  %vm4580_vm2 = vcmp.eq.f32.partialorder %v4579_v44, 8.507059e+37 }
0x3a48   :  { %v6189_v37 = vpop.eup %6188 }
0x3a49   :  { %v4571_v38 = vmul.f32 %v6189_v37, %v4569_v35  ;;  %vm4576_vm14 = vweird.f32 %v6189_v37 }
0x3a4a   :  { %vm4577_vm1 = vmor %vm4575_vm15, %vm4576_vm14 }
0x3a4b   :  { %v4572_v39 = vsub.f32 1.0, %v4571_v38 }
0x3a4d   :  { %v4573_v40 = vmul.f32 %v6189_v37, %v4572_v39  ;;  %v5713_v39 = vld [vmem:[%s7757_s4 + $0x14] sm:$0xf] }
0x3a4f   :  { %v4574_v41 = vadd.f32 %v6189_v37, %v4573_v40  ;;  %v5886_v40 = vld [vmem:[%s7757_s4 + $0x18] sm:$0xf0] }
0x3a51   :  { %v4578_v45 = vsel %vm4577_vm1, %v6189_v37, %v4574_v41  ;;  %v5714_v41 = vor.u32 %v5886_v40, %v5713_v39 }
0x3a52   :  { %v4583_v57 = vsel %vm4580_vm2, %v4582_v54, %v4578_v45 }
0x3a93   :  { %v4592_v56 = vpop.permute.xlu2 %4591 }
0x3a94   :  { %v4594_v46 = vmul.f32 %v4592_v56, %v4583_v57 }
0x3a96   :  { %v4595_v61 = vadd.f32 %v4594_v46, %v4514_v26  ;;  %v5883_v26 = vld [vmem:[%s7757_s4 + $0x14] sm:$0xf] }
0x3a97   :  { %v5704_v30 = vor.u32 %v5883_v26, %v5701_v29 }
0x3a98   :  { %v4598_v51 = vadd.f32 %v4597_v59, %v4595_v61 }
0x3a9a   :  { %v4599_v48 = vmul.f32 0.25, %v4598_v51 }
0x3a9c   :  { %4600 = vst.msk [vmem:[%s7758_s5 + $0x70] sm:$0xff] %vm26_vm0, %v4599_v48  ;;  %v4601_v62 = vpack.c.bf16 %v4599_v48, %v4599_v48  ;;  %4656 = vrot.lane.b32.xlu0 %v4599_v48, %s6210_s1 }
0x3a9e   :  { %5677 = vmatmul.msk.bf16.vlgmr.msra.gmra.mxu0 %vm26_vm0, %v4601_v62 }
0x3aa4   :  { %4755 = vrot.lane.b32.xlu0 %v5700_v28, %s6212_s17 }
0x3aac   :  { %4751 = vrot.lane.b32.xlu0 %v5692_v27, %s6212_s17 }
0x3ab4   :  { %4841 = vrot.lane.b32.xlu0 %v5714_v41, %s6212_s17 }
0x3b0e   :  { %v4657_v10 = vpop.permute.xlu0 %4656 }
0x3b16   :  { %v4756_v43 = vpop.permute.xlu0 %4755 }
0x3b1b   :  { %v4630_v5 = vpop.f32.mrf.mxu0 }
0x3b1c   :  { %v4634_v52 = vadd.f32 %v4630_v5, %v6861_v60 }
0x3b1e   :  { %6190 = vtanh.f32 %v4634_v52  ;;  %v5678_v12 = vmul.f32 -1.442695, %v4634_v52  ;;  %v4752_v54 = vpop.permute.xlu0 %4751 }
0x3b20   :  { %6192 = vpow2.f32 %v5678_v12 }
0x3b23   :  { %v4632_v8 = vpop.f32.mrf.mxu0 }
0x3b24   :  { %v6191_v9 = vpop.eup %6190 }
0x3b25   :  { %v4659_v11 = vsub.f32 %v6191_v9, %v4657_v10  ;;  %v5709_v9 = vld [vmem:[%s7757_s4 + $0x4] sm:$0xf]  ;;  %v5885_v10 = vld [vmem:[%s7757_s4 + $0x8] sm:$0xf0] }
0x3b26   :  { %v6193_v7 = vpop.eup %6192  ;;  %v4842_v8 = vpop.permute.xlu0 %4841 }
0x3b27   :  { %4661 = vrot.lane.b32.xlu1 %v4659_v11, %s6211_s8  ;;  %v4638_v13 = vadd.f32 1.0, %v6193_v7  ;;  %4854 = vmatpush.bf16.msrb.mxu3 %v4842_v8  ;;  %v5710_v11 = vor.u32 %v5885_v10, %v5709_v9 }
0x3b29   :  { %6194 = vrcp.f32 %v4638_v13  ;;  %v4650_v16 = vand.u32 2147483648, %v4638_v13  ;;  %vm4644_vm4 = vweird.f32 %v4638_v13  ;;  %v4648_v60 = vand.u32 2147483647, %v4638_v13 }
0x3b2b   :  { %v4651_v18 = vor.u32 1.1754944e-38, %v4650_v16  ;;  %vm4649_vm7 = vcmp.eq.f32.partialorder %v4648_v60, 8.507059e+37 }
0x3b2f   :  { %v6195_v53 = vpop.eup %6194  ;;  %4757 = vrot.lane.b32.xlu1 %v5704_v30, %s6212_s17 }
0x3b30   :  { %v4640_v14 = vmul.f32 %v6195_v53, %v4638_v13  ;;  %vm4645_vm3 = vweird.f32 %v6195_v53 }
0x3b31   :  { %vm4646_vm6 = vmor %vm4644_vm4, %vm4645_vm3 }
0x3b32   :  { %v4641_v6 = vsub.f32 1.0, %v4640_v14 }
0x3b34   :  { %v4642_v42 = vmul.f32 %v6195_v53, %v4641_v6 }
0x3b36   :  { %v4643_v15 = vadd.f32 %v6195_v53, %v4642_v42 }
0x3b37   :  { %4753 = vrot.lane.b32.xlu1 %v5696_v34, %s6212_s17 }
0x3b38   :  { %v4647_v17 = vsel %vm4646_vm6, %v6195_v53, %v4643_v15 }
0x3b39   :  { %v4652_v21 = vsel %vm4649_vm7, %v4651_v18, %v4647_v17 }
0x3b99   :  { %v4662_v19 = vpop.permute.xlu1 %4661 }
0x3b9a   :  { %v4664_v22 = vmul.f32 %v4662_v19, %v4652_v21 }
0x3b9c   :  { %v4665_v23 = vadd.f32 %v4664_v22, %v4599_v48 }
0x3b9e   :  { %v4670_v24 = vpack.c.bf16 %v4665_v23, %v4665_v23  ;;  %4720 = vrot.lane.b32.xlu2 %v4665_v23, %s6210_s1 }
0x3ba0   :  { %5687 = vmatmul.msk.bf16.vlgmr.msrb.gmra.mxu1 %vm26_vm0, %v4670_v24 }
0x3ba1   :  { %v4758_v44 = vpop.permute.xlu1 %4757 }
0x3ba2   :  { %v4760_v50 = vsel %vm333_vm5, %v4756_v43, %v4758_v44 }
0x3ba3   :  { %4772 = vmatpush.bf16.msrb.mxu2 %v4760_v50 }
0x3ba9   :  { %v4754_v55 = vpop.permute.xlu1 %4753 }
0x3baa   :  { %v4759_v56 = vsel %vm333_vm5, %v4752_v54, %v4754_v55 }
0x3bab   :  { %4773 = vmatpush.bf16.msrb.mxu2 %v4759_v56 }
0x3bf8   :  { %v4721_v36 = vpop.permute.xlu2 %4720 }
0x3c1d   :  { %v4695_v33 = vpop.f32.mrf.mxu1 }
0x3c1e   :  { %6196 = vtanh.f32 %v4695_v33  ;;  %v5688_v45 = vmul.f32 -1.442695, %v4695_v33 }
0x3c20   :  { %6198 = vpow2.f32 %v5688_v45 }
0x3c24   :  { %v6197_v35 = vpop.eup %6196 }
0x3c25   :  { %v4697_v37 = vpop.f32.mrf.mxu1  ;;  %v4723_v38 = vsub.f32 %v6197_v35, %v4721_v36 }
0x3c26   :  { %v6199_v57 = vpop.eup %6198 }
0x3c27   :  { %4725 = vrot.lane.b32.xlu2 %v4723_v38, %s6211_s8  ;;  %v4702_v58 = vadd.f32 1.0, %v6199_v57 }
0x3c29   :  { %6200 = vrcp.f32 %v4702_v58  ;;  %v4714_v62 = vand.u32 2147483648, %v4702_v58  ;;  %vm4708_vm9 = vweird.f32 %v4702_v58  ;;  %v4712_v63 = vand.u32 2147483647, %v4702_v58 }
0x3c2b   :  { %v4715_v1 = vor.u32 1.1754944e-38, %v4714_v62  ;;  %vm4713_vm11 = vcmp.eq.f32.partialorder %v4712_v63, 8.507059e+37 }
0x3c2f   :  { %v6201_v46 = vpop.eup %6200 }
0x3c30   :  { %v4704_v59 = vmul.f32 %v6201_v46, %v4702_v58  ;;  %vm4709_vm8 = vweird.f32 %v6201_v46 }
0x3c31   :  { %vm4710_vm10 = vmor %vm4708_vm9, %vm4709_vm8 }
0x3c32   :  { %v4705_v61 = vsub.f32 1.0, %v4704_v59 }
0x3c34   :  { %v4706_v51 = vmul.f32 %v6201_v46, %v4705_v61 }
0x3c36   :  { %v4707_v48 = vadd.f32 %v6201_v46, %v4706_v51 }
0x3c38   :  { %v4711_v0 = vsel %vm4710_vm10, %v6201_v46, %v4707_v48 }
0x3c39   :  { %v4716_v3 = vsel %vm4713_vm11, %v4715_v1, %v4711_v0 }
0x3c81   :  { %v4726_v2 = vpop.permute.xlu2 %4725 }
0x3c82   :  { %v4728_v4 = vmul.f32 %v4726_v2, %v4716_v3 }
0x3c84   :  { %v7723_v5 = vadd.f32 %v4728_v4, %v4665_v23 }
0x3c86   :  { %4810 = vrot.lane.b32.xlu0 %v7723_v5, %s6211_s8  ;;  %4800 = vrot.lane.b32.xlu2 %v7723_v5, %s6210_s1  ;;  %v4734_v52 = vpack.c.bf16 %v7723_v5, %v7723_v5 }
0x3c88   :  { %5705 = vmatmul.msk.bf16.vlgmr.msrb.gmra.mxu2 %vm26_vm0, %v4734_v52 }
0x3c8e   :  { %4839 = vrot.lane.b32.xlu2 %v5710_v11, %s6212_s17 }
0x3ce0   :  { %v4801_v53 = vpop.permute.xlu2 %4800 }
0x3ce8   :  { %v4840_v28 = vpop.permute.xlu2 %4839 }
0x3ce9   :  { %4855 = vmatpush.bf16.msrb.mxu3 %v4840_v28 }
0x3cf8   :  { %v4811_v20 = vpop.permute.xlu0 %4810 }
0x3d0b   :  { %v4775_v12 = vpop.f32.mrf.mxu2 }
0x3d0c   :  { %v5706_v7 = vmul.f32 -1.442695, %v4775_v12  ;;  %v4798_v13 = vmax.f32 %v4775_v12, 0.0 }
0x3d0e   :  { %6202 = vpow2.f32 %v5706_v7  ;;  %v4803_v14 = vsub.f32 %v4798_v13, %v4801_v53 }
0x3d10   :  { %4805 = vrot.lane.b32.xlu1 %v4803_v14, %s6211_s8 }
0x3d13   :  { %v4777_v6 = vpop.f32.mrf.mxu2 }
0x3d14   :  { %v6203_v42 = vpop.eup %6202 }
0x3d15   :  { %v4782_v15 = vadd.f32 1.0, %v6203_v42 }
0x3d17   :  { %6204 = vrcp.f32 %v4782_v15  ;;  %v4794_v18 = vand.u32 2147483648, %v4782_v15  ;;  %v4792_v21 = vand.u32 2147483647, %v4782_v15  ;;  %vm4788_vm12 = vweird.f32 %v4782_v15 }
0x3d19   :  { %v4795_v23 = vor.u32 1.1754944e-38, %v4794_v18  ;;  %vm4793_vm14 = vcmp.eq.f32.partialorder %v4792_v21, 8.507059e+37 }
0x3d1d   :  { %v6205_v16 = vpop.eup %6204 }
0x3d1e   :  { %v4784_v60 = vmul.f32 %v6205_v16, %v4782_v15  ;;  %vm4789_vm5 = vweird.f32 %v6205_v16 }
0x3d1f   :  { %vm4790_vm13 = vmor %vm4788_vm12, %vm4789_vm5 }
0x3d20   :  { %v4785_v17 = vsub.f32 1.0, %v4784_v60 }
0x3d22   :  { %v4786_v19 = vmul.f32 %v6205_v16, %v4785_v17 }
0x3d24   :  { %v4787_v22 = vadd.f32 %v6205_v16, %v4786_v19 }
0x3d26   :  { %v4791_v24 = vsel %vm4790_vm13, %v6205_v16, %v4787_v22 }
0x3d27   :  { %v4796_v25 = vsel %vm4793_vm14, %v4795_v23, %v4791_v24 }
0x3d28   :  { %v4813_v26 = vsub.f32 %v4796_v25, %v4811_v20 }
0x3d2a   :  { %4815 = vrot.lane.b32.xlu1 %v4813_v26, %s6211_s8 }
0x3d82   :  { %v4806_v29 = vpop.permute.xlu1 %4805 }
0x3d83   :  { %v4808_v30 = vmul.f32 %v4806_v29, %v4796_v25 }
0x3d85   :  { %v4809_v49 = vadd.f32 %v4808_v30, %v7723_v5 }
0x3d87   :  { %v4828_v31 = vpack.c.bf16 %v4809_v49, %v4809_v49  ;;  %4881 = vrot.lane.b32.xlu2 %v4809_v49, %s6210_s1  ;;  %v4891_v59 = vadd.f32 %v4809_v49, %v7723_v5 }
0x3d89   :  { %5715 = vmatmul.msk.bf16.vlgmr.msrb.gmra.mxu3 %vm26_vm0, %v4828_v31 }
0x3d9c   :  { %v4816_v32 = vpop.permute.xlu1 %4815 }
0x3d9d   :  { %v4818_v47 = vmul.f32 %v4816_v32, %v4796_v25 }
0x3d9f   :  { %4820 = vrot.lane.b32.xlu0 %v4818_v47, %s6212_s17 }
0x3de1   :  { %v4882_v27 = vpop.permute.xlu2 %4881 }
0x3e0c   :  { %v4857_v34 = vpop.f32.mrf.mxu3 }
0x3e0d   :  { %v4884_v33 = vsub.f32 %v4857_v34, %v4882_v27  ;;  %v5716_v36 = vmul.f32 -1.442695, %v4857_v34 }
0x3e0f   :  { %4886 = vrot.lane.b32.xlu1 %v4884_v33, %s6211_s8  ;;  %6206 = vpow2.f32 %v5716_v36 }
0x3e11   :  { %v4821_v54 = vpop.permute.xlu0 %4820 }
0x3e12   :  { %v4823_v57 = vadd.f32 %v4821_v54, %v7723_v5 }
0x3e14   :  { %v4859_v35 = vpop.f32.mrf.mxu3  ;;  %v4892_v51 = vadd.f32 %v4891_v59, %v4823_v57 }
0x3e15   :  { %v6207_v37 = vpop.eup %6206 }
0x3e16   :  { %v4864_v38 = vadd.f32 1.0, %v6207_v37 }
0x3e18   :  { %6208 = vrcp.f32 %v4864_v38  ;;  %v4876_v50 = vand.u32 2147483648, %v4864_v38  ;;  %vm4870_vm1 = vweird.f32 %v4864_v38  ;;  %v4874_v45 = vand.u32 2147483647, %v4864_v38 }
0x3e1a   :  { %v4877_v56 = vor.u32 1.1754944e-38, %v4876_v50  ;;  %vm4875_vm3 = vcmp.eq.f32.partialorder %v4874_v45, 8.507059e+37 }
0x3e1e   :  { %v6209_v39 = vpop.eup %6208 }
0x3e1f   :  { %v4866_v40 = vmul.f32 %v6209_v39, %v4864_v38  ;;  %vm4871_vm15 = vweird.f32 %v6209_v39 }
0x3e20   :  { %vm4872_vm2 = vmor %vm4870_vm1, %vm4871_vm15 }
0x3e21   :  { %v4867_v41 = vsub.f32 1.0, %v4866_v40 }
0x3e23   :  { %v4868_v43 = vmul.f32 %v6209_v39, %v4867_v41 }
0x3e25   :  { %v4869_v44 = vadd.f32 %v6209_v39, %v4868_v43 }
0x3e27   :  { %v4873_v55 = vsel %vm4872_vm2, %v6209_v39, %v4869_v44 }
0x3e28   :  { %v4878_v46 = vsel %vm4875_vm3, %v4877_v56, %v4873_v55 }
0x3e81   :  { %v4887_v58 = vpop.permute.xlu1 %4886 }
0x3e82   :  { %v4889_v61 = vmul.f32 %v4887_v58, %v4878_v46 }
0x3e84   :  { %v4890_v48 = vadd.f32 %v4889_v61, %v4809_v49 }
0x3e86   :  { %v4893_v62 = vadd.f32 %v4892_v51, %v4890_v48 }
0x3e88   :  { %v4894_v63 = vmul.f32 0.25, %v4893_v62 }
0x3e8a   :  { %4895 = vst.msk [vmem:[%s7758_s5 + $0x78] sm:$0xff] %vm26_vm0, %v4894_v63 }
0x3e8b   :  { %4896 = vst.msk [vmem:[#allocation2] sm:$0xff] %vm26_vm0, %v4894_v63 }

</bundles_post_ra>
